<compile_context>
chip_gen: v5e
topology: v5e:2x2
jax: 0.10.0
libtpu: 0.0.40
codegen_flags: <defaults>
</compile_context>

<pallas_src>
import functools

import jax
import jax.numpy as jnp
import numpy as np
from jax.experimental import pallas as pl
from jax.experimental.pallas import tpu as pltpu

EPS = 1e-5       # nn.LayerNorm default
LANE = 128       # TPU lane width; decoder output padded to this for lane-dense stores


# ----------------------------------------------------------------------------- kernel
def _layernorm(t, gamma, beta):
    mu = jnp.mean(t, axis=-1, keepdims=True)
    var = jnp.mean(jnp.square(t - mu), axis=-1, keepdims=True)
    return (t - mu) * jax.lax.rsqrt(var + EPS) * gamma + beta


def fused_transformer_kernel(
    seq_ref,                     # (S, Cin)  f32   stacked [x batches ; y batches]
    wenc_ref,                    # (Cin, D)  bf16
    encb_ref,                    # (N, D)    f32   pos + encoder bias
    ln1g_ref, ln1b_ref,          # (depth, 1, D)        f32
    wq_ref, wk_ref, wv_ref,      # (depth, heads, D, hd) bf16  (1/sqrt(hd) folded into wq)
    wp_ref,                      # (depth, heads, hd, D) bf16  per-head rows of Wproj
    bp_ref,                      # (depth, 1, D)        f32
    ln2g_ref, ln2b_ref,          # (depth, 1, D)        f32
    w1_ref,                      # (depth, D, MLP)      bf16
    b1_ref,                      # (depth, 1, MLP)      f32
    w2_ref,                      # (depth, MLP, D)      bf16
    b2_ref,                      # (depth, 1, D)        f32
    wdec_ref,                    # (D, LANE)            bf16  zero-padded past M_channel
    bdec_ref,                    # (1, LANE)            f32
    out_ref,                     # (3, B*N, LANE)       f32   [dec(x), dec(y), dec(x)+dec(y)]
    *, depth, heads, batch, seq_len,
):
    f32, bf16 = jnp.float32, jnp.bfloat16
    N = seq_len
    G = 2 * batch                # stream-batch groups (x batches then y batches)
    S = G * N
    BN = batch * N
    HB = heads * G
    D = wenc_ref.shape[1]
    hd = D // heads

    # ------------- encode: linear_encoding + learned positional encoding -------------
    h = jnp.dot(seq_ref[...].astype(bf16), wenc_ref[...],
                preferred_element_type=f32)                                 # (S, D) f32
    h = (h.reshape(G, N, D) + encb_ref[...][None]).reshape(S, D)

    for l in range(depth):       # small static depth -> unrolled at trace time
        # ---------- Residual(PreNormDrop(SelfAttention)) ----------
        xn = _layernorm(h, ln1g_ref[l], ln1b_ref[l])                        # (S, D) f32
        # cross-stream value source: x-stream attends over y's values and vice versa
        sw = jnp.concatenate([xn[BN:], xn[:BN]], axis=0)                    # (S, D)

        xb = jnp.broadcast_to(xn.astype(bf16)[None], (heads, S, D))
        vb = jnp.broadcast_to(sw.astype(bf16)[None], (heads, S, D))

        q = jnp.einsum('hsc,hcd->hsd', xb, wq_ref[l], preferred_element_type=f32)
        k = jnp.einsum('hsc,hcd->hsd', xb, wk_ref[l], preferred_element_type=f32)
        v = jnp.einsum('hsc,hcd->hsd', vb, wv_ref[l], preferred_element_type=f32)

        # (heads, S, hd) -> (heads*G, N, hd): sublane-aligned split, no data movement
        qh = q.astype(bf16).reshape(HB, N, hd)
        kh = k.astype(bf16).reshape(HB, N, hd)
        vh = v.astype(bf16).reshape(HB, N, hd)

        # scores contract over the last dim of both operands (no .T / transpose needed)
        s = jnp.einsum('bnd,bmd->bnm', qh, kh, preferred_element_type=f32)  # (HB, N, N)
        s = s - jnp.max(s, axis=-1, keepdims=True)
        e = jnp.exp(s)
        p = e * pl.reciprocal(jnp.sum(e, axis=-1, keepdims=True), approx=True)

        o = jnp.einsum('bnm,bmd->bnd', p.astype(bf16), vh,
                       preferred_element_type=f32)                          # (HB, N, hd)
        # per-head projection slice, summed over heads == proj(concat_h(o_h))
        oh = o.astype(bf16).reshape(heads, S, hd)
        pc = jnp.einsum('hsd,hdc->hsc', oh, wp_ref[l],
                        preferred_element_type=f32)                         # (heads, S, D)
        attn = jnp.sum(pc, axis=0)                                          # (S, D)
        h = attn + bp_ref[l] + xn     # residual vs. the *normalized* input (as in PyTorch)

        # ---------- Residual(PreNorm(FeedForward)) : no skip connection ----------
        yn = _layernorm(h, ln2g_ref[l], ln2b_ref[l])
        f = jnp.dot(yn.astype(bf16), w1_ref[l], preferred_element_type=f32) + b1_ref[l]
        f = jnp.maximum(f, 0.0)                                             # ReLU
        h = jnp.dot(f.astype(bf16), w2_ref[l], preferred_element_type=f32) + b2_ref[l]

    # ------------- decode (lane-dense, zero-padded to LANE output columns) -------------
    d = jnp.dot(h.astype(bf16), wdec_ref[...], preferred_element_type=f32) + bdec_ref[...]
    dx = d[:BN]
    dy = d[BN:]
    out_ref[0] = dx
    out_ref[1] = dy
    out_ref[2] = dx + dy


# ----------------------------------------------------------------------------- wrapper
def _spec(shape):
    nd = len(shape)
    return pl.BlockSpec(shape, lambda i, _nd=nd: (0,) * _nd)


def transformer_forward(x_img, y_img, params, heads, map_size):
    B, Cm, H, W = x_img.shape
    N = H * W
    D = params["w_enc"].shape[1]
    depth = len(params["layers"])
    hd = D // heads
    S = 2 * B * N
    bf16 = jnp.bfloat16

    # NCHW -> (B, N, C) sequences, stacked [x ; y] on the row axis (KB-scale layout ops;
    # all heavy lifting happens inside the single fused kernel below).
    x_seq = jnp.transpose(x_img, (0, 2, 3, 1)).reshape(B, N, Cm)
    y_seq = jnp.transpose(y_img, (0, 2, 3, 1)).reshape(B, N, Cm)
    seq = jnp.concatenate([x_seq, y_seq], axis=0).reshape(S, Cm)

    # ---------------- pack / pre-layout parameters (tiny, trace-time) ----------------
    wenc = params["w_enc"].astype(bf16)
    encb = params["pos"] + params["b_enc"]                                  # (N, D) f32

    def per_layer(L):
        wqkv = L["wqkv"]                                                    # (D, 3D)
        wq = wqkv[:, 0:D].reshape(D, heads, hd).transpose(1, 0, 2) * (hd ** -0.5)
        wk = wqkv[:, D:2 * D].reshape(D, heads, hd).transpose(1, 0, 2)
        wv = wqkv[:, 2 * D:3 * D].reshape(D, heads, hd).transpose(1, 0, 2)
        wp = L["wproj"].reshape(heads, hd, D)
        return dict(
            ln1g=L["ln1_g"], ln1b=L["ln1_b"],
            wq=wq.astype(bf16), wk=wk.astype(bf16), wv=wv.astype(bf16),
            wp=wp.astype(bf16), bp=L["bproj"],
            ln2g=L["ln2_g"], ln2b=L["ln2_b"],
            w1=L["w1"].astype(bf16), b1=L["b1"], w2=L["w2"].astype(bf16), b2=L["b2"],
        )

    packed = [per_layer(L) for L in params["layers"]]
    stack = lambda k: jnp.stack([p[k] for p in packed], axis=0)

    wdec = jnp.zeros((D, LANE), jnp.float32).at[:, :Cm].set(params["w_dec"]).astype(bf16)
    bdec = jnp.zeros((1, LANE), jnp.float32).at[:, :Cm].set(params["b_dec"])

    kernel = functools.partial(fused_transformer_kernel,
                               depth=depth, heads=heads, batch=B, seq_len=N)

    args = (seq, wenc, encb,
            stack("ln1g"), stack("ln1b"),
            stack("wq"), stack("wk"), stack("wv"), stack("wp"), stack("bp"),
            stack("ln2g"), stack("ln2b"),
            stack("w1"), stack("b1"), stack("w2"), stack("b2"),
            wdec, bdec)

    out = pl.pallas_call(
        kernel,
        out_shape=jax.ShapeDtypeStruct((3, B * N, LANE), jnp.float32),
        grid=(1,),
        in_specs=[_spec(a.shape) for a in args],
        out_specs=_spec((3, B * N, LANE)),
        compiler_params=pltpu.CompilerParams(dimension_semantics=("arbitrary",)),
    )(*args)

    dec = out[:, :, :Cm].reshape(3, B, N, Cm)                 # strip lane padding
    imgs = jnp.transpose(dec, (0, 1, 3, 2)).reshape(3, B, Cm, map_size, map_size)
    return {"x": imgs[0], "y": imgs[1], "z": imgs[2]}


# ----------------------------------------------------------------------------- params
def init_params(key, M_channel, dim, mlp_dim, depth, N):
    def lin(k, fan_in, fan_out, scale=0.05):
        kw, kb = jax.random.split(k)
        w = scale * jax.random.normal(kw, (fan_in, fan_out), jnp.float32)
        b = scale * jax.random.normal(kb, (1, fan_out), jnp.float32)
        return w, b

    keys = jax.random.split(key, 3 + depth)
    w_enc, b_enc = lin(keys[0], M_channel, dim)
    w_dec, b_dec = lin(keys[1], dim, M_channel)
    pos = 0.05 * jax.random.normal(keys[2], (N, dim), jnp.float32)

    layers = []
    for l in range(depth):
        lk = jax.random.split(keys[3 + l], 4)
        wqkv = 0.05 * jax.random.normal(lk[0], (dim, 3 * dim), jnp.float32)  # qkv_bias=False
        wproj, bproj = lin(lk[1], dim, dim)
        w1, b1 = lin(lk[2], dim, mlp_dim)
        w2, b2 = lin(lk[3], mlp_dim, dim)
        layers.append(dict(
            ln1_g=jnp.ones((1, dim), jnp.float32), ln1_b=jnp.zeros((1, dim), jnp.float32),
            wqkv=wqkv, wproj=wproj, bproj=bproj,
            ln2_g=jnp.ones((1, dim), jnp.float32), ln2_b=jnp.zeros((1, dim), jnp.float32),
            w1=w1, b1=b1, w2=w2, b2=b2,
        ))
    return dict(w_enc=w_enc, b_enc=b_enc, w_dec=w_dec, b_dec=b_dec, pos=pos, layers=layers)


# ----------------------------------------------------------------------------- pure-JAX reference
def reference_forward(x_img, y_img, params, heads, map_size):
    B, Cm, Hs, Ws = x_img.shape
    x = jnp.transpose(x_img, (0, 2, 3, 1)).reshape(B, Hs * Ws, Cm)
    y = jnp.transpose(y_img, (0, 2, 3, 1)).reshape(B, Hs * Ws, Cm)
    x = x @ params["w_enc"] + params["b_enc"] + params["pos"]
    y = y @ params["w_enc"] + params["b_enc"] + params["pos"]
    _, N, C = x.shape
    hd = C // heads
    scale = hd ** (-0.5)

    def ln(t, g, b):
        mu = t.mean(-1, keepdims=True)
        var = ((t - mu) ** 2).mean(-1, keepdims=True)
        return (t - mu) / jnp.sqrt(var + EPS) * g + b

    for L in params["layers"]:
        xn = ln(x, L["ln1_g"], L["ln1_b"])
        yn = ln(y, L["ln1_g"], L["ln1_b"])

        def qkv(t):
            q, k, v = jnp.split(t @ L["wqkv"], 3, axis=-1)
            sh = lambda u: u.reshape(B, N, heads, hd).transpose(0, 2, 1, 3)
            return sh(q), sh(k), sh(v)

        q, k, v = qkv(xn)
        q1, k1, v1 = qkv(yn)
        a = jax.nn.softmax(jnp.einsum("bhnd,bhmd->bhnm", q, k) * scale, axis=-1)
        a1 = jax.nn.softmax(jnp.einsum("bhnd,bhmd->bhnm", q1, k1) * scale, axis=-1)
        xo = jnp.einsum("bhnm,bhmd->bhnd", a, v1).transpose(0, 2, 1, 3).reshape(B, N, C)
        yo = jnp.einsum("bhnm,bhmd->bhnd", a1, v).transpose(0, 2, 1, 3).reshape(B, N, C)
        x = xo @ L["wproj"] + L["bproj"] + xn
        y = yo @ L["wproj"] + L["bproj"] + yn

        xn = ln(x, L["ln2_g"], L["ln2_b"])
        yn = ln(y, L["ln2_g"], L["ln2_b"])
        x = jnp.maximum(xn @ L["w1"] + L["b1"], 0.0) @ L["w2"] + L["b2"]
        y = jnp.maximum(yn @ L["w1"] + L["b1"], 0.0) @ L["w2"] + L["b2"]

    dx = x @ params["w_dec"] + params["b_dec"]
    dy = y @ params["w_dec"] + params["b_dec"]
    to_img = lambda t: jnp.transpose(t, (0, 2, 1)).reshape(B, Cm, map_size, map_size)
    return {"x": to_img(dx), "y": to_img(dy), "z": to_img(dx + dy)}


# ----------------------------------------------------------------------------- main
if __name__ == "__main__":
    B, M_channel, map_size = 2, 8, 4
    dim, heads, mlp_dim, depth = 32, 4, 64, 2
    N = map_size * map_size

    key = jax.random.PRNGKey(0)
    kx, ky, kp = jax.random.split(key, 3)
    x_img = jax.random.normal(kx, (B, M_channel, map_size, map_size), jnp.float32)
    y_img = jax.random.normal(ky, (B, M_channel, map_size, map_size), jnp.float32)
    params = init_params(kp, M_channel, dim, mlp_dim, depth, N)

    fwd = jax.jit(lambda a, b, p: transformer_forward(a, b, p, heads, map_size))
    out = fwd(x_img, y_img, params)
    out = jax.tree_util.tree_map(jax.block_until_ready, out)

    ref = reference_forward(x_img, y_img, params, heads, map_size)
    for name in ("x", "y", "z"):
        assert out[name].shape == (B, M_channel, map_size, map_size)
        # bf16 MXU inputs + approx reciprocal -> slightly looser tolerance than pure f32
        np.testing.assert_allclose(np.asarray(out[name]), np.asarray(ref[name]),
                                   rtol=2e-2, atol=1e-2)

    print("KERNEL_OK")
</pallas_src>

<mosaic_0001>
module attributes {stable_mosaic.version = 11 : i64} {
  func.func @fused_transformer_kernel(%arg0: i32, %arg1: memref<64x8xf32, #tpu.memory_space<vmem>>, %arg2: memref<8x32xbf16, #tpu.memory_space<vmem>>, %arg3: memref<16x32xf32, #tpu.memory_space<vmem>>, %arg4: memref<2x1x32xf32, #tpu.memory_space<vmem>>, %arg5: memref<2x1x32xf32, #tpu.memory_space<vmem>>, %arg6: memref<2x4x32x8xbf16, #tpu.memory_space<vmem>>, %arg7: memref<2x4x32x8xbf16, #tpu.memory_space<vmem>>, %arg8: memref<2x4x32x8xbf16, #tpu.memory_space<vmem>>, %arg9: memref<2x4x8x32xbf16, #tpu.memory_space<vmem>>, %arg10: memref<2x1x32xf32, #tpu.memory_space<vmem>>, %arg11: memref<2x1x32xf32, #tpu.memory_space<vmem>>, %arg12: memref<2x1x32xf32, #tpu.memory_space<vmem>>, %arg13: memref<2x32x64xbf16, #tpu.memory_space<vmem>>, %arg14: memref<2x1x64xf32, #tpu.memory_space<vmem>>, %arg15: memref<2x64x32xbf16, #tpu.memory_space<vmem>>, %arg16: memref<2x1x32xf32, #tpu.memory_space<vmem>>, %arg17: memref<32x128xbf16, #tpu.memory_space<vmem>>, %arg18: memref<1x128xf32, #tpu.memory_space<vmem>>, %arg19: memref<3x32x128xf32, #tpu.memory_space<vmem>>) attributes {dimension_semantics = [#tpu.dimension_semantics<arbitrary>], iteration_bounds = array<i64: 1>, scalar_prefetch = 0 : i64, scratch_operands = 0 : i64, tpu.core_type = #tpu.core_type<tc>, window_params = [{pipeline_mode = #tpu.pipeline_mode<synchronous>, transform_indices = @transform_0, window_bounds = array<i64: 64, 8>}, {pipeline_mode = #tpu.pipeline_mode<synchronous>, transform_indices = @transform_1, window_bounds = array<i64: 8, 32>}, {pipeline_mode = #tpu.pipeline_mode<synchronous>, transform_indices = @transform_2, window_bounds = array<i64: 16, 32>}, {pipeline_mode = #tpu.pipeline_mode<synchronous>, transform_indices = @transform_3, window_bounds = array<i64: 2, 1, 32>}, {pipeline_mode = #tpu.pipeline_mode<synchronous>, transform_indices = @transform_4, window_bounds = array<i64: 2, 1, 32>}, {pipeline_mode = #tpu.pipeline_mode<synchronous>, transform_indices = @transform_5, window_bounds = array<i64: 2, 4, 32, 8>}, {pipeline_mode = #tpu.pipeline_mode<synchronous>, transform_indices = @transform_6, window_bounds = array<i64: 2, 4, 32, 8>}, {pipeline_mode = #tpu.pipeline_mode<synchronous>, transform_indices = @transform_7, window_bounds = array<i64: 2, 4, 32, 8>}, {pipeline_mode = #tpu.pipeline_mode<synchronous>, transform_indices = @transform_8, window_bounds = array<i64: 2, 4, 8, 32>}, {pipeline_mode = #tpu.pipeline_mode<synchronous>, transform_indices = @transform_9, window_bounds = array<i64: 2, 1, 32>}, {pipeline_mode = #tpu.pipeline_mode<synchronous>, transform_indices = @transform_10, window_bounds = array<i64: 2, 1, 32>}, {pipeline_mode = #tpu.pipeline_mode<synchronous>, transform_indices = @transform_11, window_bounds = array<i64: 2, 1, 32>}, {pipeline_mode = #tpu.pipeline_mode<synchronous>, transform_indices = @transform_12, window_bounds = array<i64: 2, 32, 64>}, {pipeline_mode = #tpu.pipeline_mode<synchronous>, transform_indices = @transform_13, window_bounds = array<i64: 2, 1, 64>}, {pipeline_mode = #tpu.pipeline_mode<synchronous>, transform_indices = @transform_14, window_bounds = array<i64: 2, 64, 32>}, {pipeline_mode = #tpu.pipeline_mode<synchronous>, transform_indices = @transform_15, window_bounds = array<i64: 2, 1, 32>}, {pipeline_mode = #tpu.pipeline_mode<synchronous>, transform_indices = @transform_16, window_bounds = array<i64: 32, 128>}, {pipeline_mode = #tpu.pipeline_mode<synchronous>, transform_indices = @transform_17, window_bounds = array<i64: 1, 128>}, {pipeline_mode = #tpu.pipeline_mode<synchronous>, transform_indices = @transform_18, window_bounds = array<i64: 3, 32, 128>}]} {
    %c0 = arith.constant 0 : index
    %c0_0 = arith.constant 0 : index
    %0 = vector.load %arg1[%c0, %c0_0] : memref<64x8xf32, #tpu.memory_space<vmem>>, vector<64x8xf32>
    %1 = arith.truncf %0 : vector<64x8xf32> to vector<64x8xbf16>
    %c0_1 = arith.constant 0 : index
    %c0_2 = arith.constant 0 : index
    %2 = vector.load %arg2[%c0_1, %c0_2] : memref<8x32xbf16, #tpu.memory_space<vmem>>, vector<8x32xbf16>
    %cst = arith.constant dense<0.000000e+00> : vector<64x32xf32>
    %3 = tpu.matmul %1, %2, %cst {dimension_numbers = #tpu.dot_dimension_numbers<[1], [0], [0], [1], [0, 0, 1, 1], [], []>} : vector<64x8xbf16>, vector<8x32xbf16>, vector<64x32xf32> -> vector<64x32xf32>
    %4 = vector.shape_cast %3 : vector<64x32xf32> to vector<4x16x32xf32>
    %c0_3 = arith.constant 0 : index
    %c0_4 = arith.constant 0 : index
    %5 = vector.load %arg3[%c0_3, %c0_4] : memref<16x32xf32, #tpu.memory_space<vmem>>, vector<16x32xf32>
    %6 = vector.shape_cast %5 : vector<16x32xf32> to vector<1x16x32xf32>
    %7 = vector.broadcast %6 : vector<1x16x32xf32> to vector<4x16x32xf32>
    %8 = arith.addf %4, %7 : vector<4x16x32xf32>
    %9 = vector.shape_cast %8 : vector<4x16x32xf32> to vector<64x32xf32>
    %c0_5 = arith.constant 0 : index
    %c0_6 = arith.constant 0 : index
    %c0_7 = arith.constant 0 : index
    %10 = vector.load %arg4[%c0_5, %c0_6, %c0_7] : memref<2x1x32xf32, #tpu.memory_space<vmem>>, vector<1x1x32xf32>
    %11 = vector.shape_cast %10 : vector<1x1x32xf32> to vector<1x32xf32>
    %c0_8 = arith.constant 0 : index
    %c0_9 = arith.constant 0 : index
    %c0_10 = arith.constant 0 : index
    %12 = vector.load %arg5[%c0_8, %c0_9, %c0_10] : memref<2x1x32xf32, #tpu.memory_space<vmem>>, vector<1x1x32xf32>
    %13 = vector.shape_cast %12 : vector<1x1x32xf32> to vector<1x32xf32>
    %cst_11 = arith.constant dense<0.000000e+00> : vector<64xf32>
    %14 = vector.multi_reduction <add>, %9, %cst_11 [1] : vector<64x32xf32> to vector<64xf32>
    %15 = vector.shape_cast %14 : vector<64xf32> to vector<64x1xf32>
    %cst_12 = arith.constant 3.200000e+01 : f32
    %16 = vector.broadcast %cst_12 : f32 to vector<64x1xf32>
    %17 = arith.divf %15, %16 : vector<64x1xf32>
    %18 = vector.broadcast %17 : vector<64x1xf32> to vector<64x32xf32>
    %19 = arith.subf %9, %18 : vector<64x32xf32>
    %20 = arith.mulf %19, %19 : vector<64x32xf32>
    %cst_13 = arith.constant dense<0.000000e+00> : vector<64xf32>
    %21 = vector.multi_reduction <add>, %20, %cst_13 [1] : vector<64x32xf32> to vector<64xf32>
    %22 = vector.shape_cast %21 : vector<64xf32> to vector<64x1xf32>
    %cst_14 = arith.constant 3.200000e+01 : f32
    %23 = vector.broadcast %cst_14 : f32 to vector<64x1xf32>
    %24 = arith.divf %22, %23 : vector<64x1xf32>
    %25 = vector.broadcast %17 : vector<64x1xf32> to vector<64x32xf32>
    %26 = arith.subf %9, %25 : vector<64x32xf32>
    %cst_15 = arith.constant 9.99999974E-6 : f32
    %27 = vector.broadcast %cst_15 : f32 to vector<64x1xf32>
    %28 = arith.addf %24, %27 : vector<64x1xf32>
    %29 = math.rsqrt %28 : vector<64x1xf32>
    %30 = vector.broadcast %29 : vector<64x1xf32> to vector<64x32xf32>
    %31 = arith.mulf %26, %30 : vector<64x32xf32>
    %32 = vector.broadcast %11 : vector<1x32xf32> to vector<64x32xf32>
    %33 = arith.mulf %31, %32 : vector<64x32xf32>
    %34 = vector.broadcast %13 : vector<1x32xf32> to vector<64x32xf32>
    %35 = arith.addf %33, %34 : vector<64x32xf32>
    %36 = vector.extract_strided_slice %35 {offsets = [32, 0], sizes = [32, 32], strides = [1, 1]} : vector<64x32xf32> to vector<32x32xf32>
    %37 = vector.extract_strided_slice %35 {offsets = [0, 0], sizes = [32, 32], strides = [1, 1]} : vector<64x32xf32> to vector<32x32xf32>
    %38 = tpu.concatenate %36, %37 in 0 : vector<32x32xf32>, vector<32x32xf32> -> vector<64x32xf32>
    %39 = arith.truncf %35 : vector<64x32xf32> to vector<64x32xbf16>
    %40 = vector.shape_cast %39 : vector<64x32xbf16> to vector<1x64x32xbf16>
    %41 = vector.shape_cast %40 : vector<1x64x32xbf16> to vector<1x64x32xbf16>
    %42 = vector.broadcast %41 : vector<1x64x32xbf16> to vector<4x64x32xbf16>
    %43 = arith.truncf %38 : vector<64x32xf32> to vector<64x32xbf16>
    %44 = vector.shape_cast %43 : vector<64x32xbf16> to vector<1x64x32xbf16>
    %45 = vector.shape_cast %44 : vector<1x64x32xbf16> to vector<1x64x32xbf16>
    %46 = vector.broadcast %45 : vector<1x64x32xbf16> to vector<4x64x32xbf16>
    %c0_16 = arith.constant 0 : index
    %c0_17 = arith.constant 0 : index
    %c0_18 = arith.constant 0 : index
    %c0_19 = arith.constant 0 : index
    %47 = vector.load %arg6[%c0_16, %c0_17, %c0_18, %c0_19] : memref<2x4x32x8xbf16, #tpu.memory_space<vmem>>, vector<1x4x32x8xbf16>
    %48 = vector.shape_cast %47 : vector<1x4x32x8xbf16> to vector<4x32x8xbf16>
    "tpu.trace_start"() <{level = 10 : i32, message = "hsc,hcd->hsd"}> : () -> ()
    %cst_20 = arith.constant dense<0.000000e+00> : vector<4x64x8xf32>
    %49 = tpu.matmul %42, %48, %cst_20 {dimension_numbers = #tpu.dot_dimension_numbers<[2], [1], [1], [2], [0, 0, 0, 1, 1, 2], [0], [0]>} : vector<4x64x32xbf16>, vector<4x32x8xbf16>, vector<4x64x8xf32> -> vector<4x64x8xf32>
    "tpu.trace_stop"() : () -> ()
    %c0_21 = arith.constant 0 : index
    %c0_22 = arith.constant 0 : index
    %c0_23 = arith.constant 0 : index
    %c0_24 = arith.constant 0 : index
    %50 = vector.load %arg7[%c0_21, %c0_22, %c0_23, %c0_24] : memref<2x4x32x8xbf16, #tpu.memory_space<vmem>>, vector<1x4x32x8xbf16>
    %51 = vector.shape_cast %50 : vector<1x4x32x8xbf16> to vector<4x32x8xbf16>
    "tpu.trace_start"() <{level = 10 : i32, message = "hsc,hcd->hsd"}> : () -> ()
    %cst_25 = arith.constant dense<0.000000e+00> : vector<4x64x8xf32>
    %52 = tpu.matmul %42, %51, %cst_25 {dimension_numbers = #tpu.dot_dimension_numbers<[2], [1], [1], [2], [0, 0, 0, 1, 1, 2], [0], [0]>} : vector<4x64x32xbf16>, vector<4x32x8xbf16>, vector<4x64x8xf32> -> vector<4x64x8xf32>
    "tpu.trace_stop"() : () -> ()
    %c0_26 = arith.constant 0 : index
    %c0_27 = arith.constant 0 : index
    %c0_28 = arith.constant 0 : index
    %c0_29 = arith.constant 0 : index
    %53 = vector.load %arg8[%c0_26, %c0_27, %c0_28, %c0_29] : memref<2x4x32x8xbf16, #tpu.memory_space<vmem>>, vector<1x4x32x8xbf16>
    %54 = vector.shape_cast %53 : vector<1x4x32x8xbf16> to vector<4x32x8xbf16>
    "tpu.trace_start"() <{level = 10 : i32, message = "hsc,hcd->hsd"}> : () -> ()
    %cst_30 = arith.constant dense<0.000000e+00> : vector<4x64x8xf32>
    %55 = tpu.matmul %46, %54, %cst_30 {dimension_numbers = #tpu.dot_dimension_numbers<[2], [1], [1], [2], [0, 0, 0, 1, 1, 2], [0], [0]>} : vector<4x64x32xbf16>, vector<4x32x8xbf16>, vector<4x64x8xf32> -> vector<4x64x8xf32>
    "tpu.trace_stop"() : () -> ()
    %56 = arith.truncf %49 : vector<4x64x8xf32> to vector<4x64x8xbf16>
    %57 = vector.shape_cast %56 : vector<4x64x8xbf16> to vector<16x16x8xbf16>
    %58 = arith.truncf %52 : vector<4x64x8xf32> to vector<4x64x8xbf16>
    %59 = vector.shape_cast %58 : vector<4x64x8xbf16> to vector<16x16x8xbf16>
    %60 = arith.truncf %55 : vector<4x64x8xf32> to vector<4x64x8xbf16>
    %61 = vector.shape_cast %60 : vector<4x64x8xbf16> to vector<16x16x8xbf16>
    "tpu.trace_start"() <{level = 10 : i32, message = "bnd,bmd->bnm"}> : () -> ()
    %cst_31 = arith.constant dense<0.000000e+00> : vector<16x16x16xf32>
    %62 = tpu.matmul %57, %59, %cst_31 {dimension_numbers = #tpu.dot_dimension_numbers<[2], [2], [1], [1], [0, 0, 0, 1, 1, 1], [0], [0]>} : vector<16x16x8xbf16>, vector<16x16x8xbf16>, vector<16x16x16xf32> -> vector<16x16x16xf32>
    "tpu.trace_stop"() : () -> ()
    %cst_32 = arith.constant dense<0xFF800000> : vector<16x16xf32>
    %63 = vector.multi_reduction <maximumf>, %62, %cst_32 [2] : vector<16x16x16xf32> to vector<16x16xf32>
    %64 = vector.shape_cast %63 : vector<16x16xf32> to vector<16x16x1xf32>
    %65 = vector.broadcast %64 : vector<16x16x1xf32> to vector<16x16x16xf32>
    %66 = arith.subf %62, %65 : vector<16x16x16xf32>
    %67 = math.exp %66 : vector<16x16x16xf32>
    %cst_33 = arith.constant dense<0.000000e+00> : vector<16x16xf32>
    %68 = vector.multi_reduction <add>, %67, %cst_33 [2] : vector<16x16x16xf32> to vector<16x16xf32>
    %69 = vector.shape_cast %68 : vector<16x16xf32> to vector<16x16x1xf32>
    %70 = tpu.reciprocal %69 {approx = true} : vector<16x16x1xf32> -> vector<16x16x1xf32>
    %71 = vector.broadcast %70 : vector<16x16x1xf32> to vector<16x16x16xf32>
    %72 = arith.mulf %67, %71 : vector<16x16x16xf32>
    %73 = arith.truncf %72 : vector<16x16x16xf32> to vector<16x16x16xbf16>
    "tpu.trace_start"() <{level = 10 : i32, message = "bnm,bmd->bnd"}> : () -> ()
    %cst_34 = arith.constant dense<0.000000e+00> : vector<16x16x8xf32>
    %74 = tpu.matmul %73, %61, %cst_34 {dimension_numbers = #tpu.dot_dimension_numbers<[2], [1], [1], [2], [0, 0, 0, 1, 1, 2], [0], [0]>} : vector<16x16x16xbf16>, vector<16x16x8xbf16>, vector<16x16x8xf32> -> vector<16x16x8xf32>
    "tpu.trace_stop"() : () -> ()
    %75 = arith.truncf %74 : vector<16x16x8xf32> to vector<16x16x8xbf16>
    %76 = vector.shape_cast %75 : vector<16x16x8xbf16> to vector<4x64x8xbf16>
    %c0_35 = arith.constant 0 : index
    %c0_36 = arith.constant 0 : index
    %c0_37 = arith.constant 0 : index
    %c0_38 = arith.constant 0 : index
    %77 = vector.load %arg9[%c0_35, %c0_36, %c0_37, %c0_38] : memref<2x4x8x32xbf16, #tpu.memory_space<vmem>>, vector<1x4x8x32xbf16>
    %78 = vector.shape_cast %77 : vector<1x4x8x32xbf16> to vector<4x8x32xbf16>
    "tpu.trace_start"() <{level = 10 : i32, message = "hsd,hdc->hsc"}> : () -> ()
    %cst_39 = arith.constant dense<0.000000e+00> : vector<4x64x32xf32>
    %79 = tpu.matmul %76, %78, %cst_39 {dimension_numbers = #tpu.dot_dimension_numbers<[2], [1], [1], [2], [0, 0, 0, 1, 1, 2], [0], [0]>} : vector<4x64x8xbf16>, vector<4x8x32xbf16>, vector<4x64x32xf32> -> vector<4x64x32xf32>
    "tpu.trace_stop"() : () -> ()
    %cst_40 = arith.constant dense<0.000000e+00> : vector<64x32xf32>
    %80 = vector.multi_reduction <add>, %79, %cst_40 [0] : vector<4x64x32xf32> to vector<64x32xf32>
    %c0_41 = arith.constant 0 : index
    %c0_42 = arith.constant 0 : index
    %c0_43 = arith.constant 0 : index
    %81 = vector.load %arg10[%c0_41, %c0_42, %c0_43] : memref<2x1x32xf32, #tpu.memory_space<vmem>>, vector<1x1x32xf32>
    %82 = vector.shape_cast %81 : vector<1x1x32xf32> to vector<1x32xf32>
    %83 = vector.broadcast %82 : vector<1x32xf32> to vector<64x32xf32>
    %84 = arith.addf %80, %83 : vector<64x32xf32>
    %85 = arith.addf %84, %35 : vector<64x32xf32>
    %c0_44 = arith.constant 0 : index
    %c0_45 = arith.constant 0 : index
    %c0_46 = arith.constant 0 : index
    %86 = vector.load %arg11[%c0_44, %c0_45, %c0_46] : memref<2x1x32xf32, #tpu.memory_space<vmem>>, vector<1x1x32xf32>
    %87 = vector.shape_cast %86 : vector<1x1x32xf32> to vector<1x32xf32>
    %c0_47 = arith.constant 0 : index
    %c0_48 = arith.constant 0 : index
    %c0_49 = arith.constant 0 : index
    %88 = vector.load %arg12[%c0_47, %c0_48, %c0_49] : memref<2x1x32xf32, #tpu.memory_space<vmem>>, vector<1x1x32xf32>
    %89 = vector.shape_cast %88 : vector<1x1x32xf32> to vector<1x32xf32>
    %cst_50 = arith.constant dense<0.000000e+00> : vector<64xf32>
    %90 = vector.multi_reduction <add>, %85, %cst_50 [1] : vector<64x32xf32> to vector<64xf32>
    %91 = vector.shape_cast %90 : vector<64xf32> to vector<64x1xf32>
    %cst_51 = arith.constant 3.200000e+01 : f32
    %92 = vector.broadcast %cst_51 : f32 to vector<64x1xf32>
    %93 = arith.divf %91, %92 : vector<64x1xf32>
    %94 = vector.broadcast %93 : vector<64x1xf32> to vector<64x32xf32>
    %95 = arith.subf %85, %94 : vector<64x32xf32>
    %96 = arith.mulf %95, %95 : vector<64x32xf32>
    %cst_52 = arith.constant dense<0.000000e+00> : vector<64xf32>
    %97 = vector.multi_reduction <add>, %96, %cst_52 [1] : vector<64x32xf32> to vector<64xf32>
    %98 = vector.shape_cast %97 : vector<64xf32> to vector<64x1xf32>
    %cst_53 = arith.constant 3.200000e+01 : f32
    %99 = vector.broadcast %cst_53 : f32 to vector<64x1xf32>
    %100 = arith.divf %98, %99 : vector<64x1xf32>
    %101 = vector.broadcast %93 : vector<64x1xf32> to vector<64x32xf32>
    %102 = arith.subf %85, %101 : vector<64x32xf32>
    %cst_54 = arith.constant 9.99999974E-6 : f32
    %103 = vector.broadcast %cst_54 : f32 to vector<64x1xf32>
    %104 = arith.addf %100, %103 : vector<64x1xf32>
    %105 = math.rsqrt %104 : vector<64x1xf32>
    %106 = vector.broadcast %105 : vector<64x1xf32> to vector<64x32xf32>
    %107 = arith.mulf %102, %106 : vector<64x32xf32>
    %108 = vector.broadcast %87 : vector<1x32xf32> to vector<64x32xf32>
    %109 = arith.mulf %107, %108 : vector<64x32xf32>
    %110 = vector.broadcast %89 : vector<1x32xf32> to vector<64x32xf32>
    %111 = arith.addf %109, %110 : vector<64x32xf32>
    %112 = arith.truncf %111 : vector<64x32xf32> to vector<64x32xbf16>
    %c0_55 = arith.constant 0 : index
    %c0_56 = arith.constant 0 : index
    %c0_57 = arith.constant 0 : index
    %113 = vector.load %arg13[%c0_55, %c0_56, %c0_57] : memref<2x32x64xbf16, #tpu.memory_space<vmem>>, vector<1x32x64xbf16>
    %114 = vector.shape_cast %113 : vector<1x32x64xbf16> to vector<32x64xbf16>
    %cst_58 = arith.constant dense<0.000000e+00> : vector<64x64xf32>
    %115 = tpu.matmul %112, %114, %cst_58 {dimension_numbers = #tpu.dot_dimension_numbers<[1], [0], [0], [1], [0, 0, 1, 1], [], []>} : vector<64x32xbf16>, vector<32x64xbf16>, vector<64x64xf32> -> vector<64x64xf32>
    %c0_59 = arith.constant 0 : index
    %c0_60 = arith.constant 0 : index
    %c0_61 = arith.constant 0 : index
    %116 = vector.load %arg14[%c0_59, %c0_60, %c0_61] : memref<2x1x64xf32, #tpu.memory_space<vmem>>, vector<1x1x64xf32>
    %117 = vector.shape_cast %116 : vector<1x1x64xf32> to vector<1x64xf32>
    %118 = vector.broadcast %117 : vector<1x64xf32> to vector<64x64xf32>
    %119 = arith.addf %115, %118 : vector<64x64xf32>
    %cst_62 = arith.constant 0.000000e+00 : f32
    %120 = vector.broadcast %cst_62 : f32 to vector<64x64xf32>
    %121 = arith.maximumf %119, %120 : vector<64x64xf32>
    %122 = arith.truncf %121 : vector<64x64xf32> to vector<64x64xbf16>
    %c0_63 = arith.constant 0 : index
    %c0_64 = arith.constant 0 : index
    %c0_65 = arith.constant 0 : index
    %123 = vector.load %arg15[%c0_63, %c0_64, %c0_65] : memref<2x64x32xbf16, #tpu.memory_space<vmem>>, vector<1x64x32xbf16>
    %124 = vector.shape_cast %123 : vector<1x64x32xbf16> to vector<64x32xbf16>
    %cst_66 = arith.constant dense<0.000000e+00> : vector<64x32xf32>
    %125 = tpu.matmul %122, %124, %cst_66 {dimension_numbers = #tpu.dot_dimension_numbers<[1], [0], [0], [1], [0, 0, 1, 1], [], []>} : vector<64x64xbf16>, vector<64x32xbf16>, vector<64x32xf32> -> vector<64x32xf32>
    %c0_67 = arith.constant 0 : index
    %c0_68 = arith.constant 0 : index
    %c0_69 = arith.constant 0 : index
    %126 = vector.load %arg16[%c0_67, %c0_68, %c0_69] : memref<2x1x32xf32, #tpu.memory_space<vmem>>, vector<1x1x32xf32>
    %127 = vector.shape_cast %126 : vector<1x1x32xf32> to vector<1x32xf32>
    %128 = vector.broadcast %127 : vector<1x32xf32> to vector<64x32xf32>
    %129 = arith.addf %125, %128 : vector<64x32xf32>
    %c1 = arith.constant 1 : index
    %c0_70 = arith.constant 0 : index
    %c0_71 = arith.constant 0 : index
    %130 = vector.load %arg4[%c1, %c0_70, %c0_71] : memref<2x1x32xf32, #tpu.memory_space<vmem>>, vector<1x1x32xf32>
    %131 = vector.shape_cast %130 : vector<1x1x32xf32> to vector<1x32xf32>
    %c1_72 = arith.constant 1 : index
    %c0_73 = arith.constant 0 : index
    %c0_74 = arith.constant 0 : index
    %132 = vector.load %arg5[%c1_72, %c0_73, %c0_74] : memref<2x1x32xf32, #tpu.memory_space<vmem>>, vector<1x1x32xf32>
    %133 = vector.shape_cast %132 : vector<1x1x32xf32> to vector<1x32xf32>
    %cst_75 = arith.constant dense<0.000000e+00> : vector<64xf32>
    %134 = vector.multi_reduction <add>, %129, %cst_75 [1] : vector<64x32xf32> to vector<64xf32>
    %135 = vector.shape_cast %134 : vector<64xf32> to vector<64x1xf32>
    %cst_76 = arith.constant 3.200000e+01 : f32
    %136 = vector.broadcast %cst_76 : f32 to vector<64x1xf32>
    %137 = arith.divf %135, %136 : vector<64x1xf32>
    %138 = vector.broadcast %137 : vector<64x1xf32> to vector<64x32xf32>
    %139 = arith.subf %129, %138 : vector<64x32xf32>
    %140 = arith.mulf %139, %139 : vector<64x32xf32>
    %cst_77 = arith.constant dense<0.000000e+00> : vector<64xf32>
    %141 = vector.multi_reduction <add>, %140, %cst_77 [1] : vector<64x32xf32> to vector<64xf32>
    %142 = vector.shape_cast %141 : vector<64xf32> to vector<64x1xf32>
    %cst_78 = arith.constant 3.200000e+01 : f32
    %143 = vector.broadcast %cst_78 : f32 to vector<64x1xf32>
    %144 = arith.divf %142, %143 : vector<64x1xf32>
    %145 = vector.broadcast %137 : vector<64x1xf32> to vector<64x32xf32>
    %146 = arith.subf %129, %145 : vector<64x32xf32>
    %cst_79 = arith.constant 9.99999974E-6 : f32
    %147 = vector.broadcast %cst_79 : f32 to vector<64x1xf32>
    %148 = arith.addf %144, %147 : vector<64x1xf32>
    %149 = math.rsqrt %148 : vector<64x1xf32>
    %150 = vector.broadcast %149 : vector<64x1xf32> to vector<64x32xf32>
    %151 = arith.mulf %146, %150 : vector<64x32xf32>
    %152 = vector.broadcast %131 : vector<1x32xf32> to vector<64x32xf32>
    %153 = arith.mulf %151, %152 : vector<64x32xf32>
    %154 = vector.broadcast %133 : vector<1x32xf32> to vector<64x32xf32>
    %155 = arith.addf %153, %154 : vector<64x32xf32>
    %156 = vector.extract_strided_slice %155 {offsets = [32, 0], sizes = [32, 32], strides = [1, 1]} : vector<64x32xf32> to vector<32x32xf32>
    %157 = vector.extract_strided_slice %155 {offsets = [0, 0], sizes = [32, 32], strides = [1, 1]} : vector<64x32xf32> to vector<32x32xf32>
    %158 = tpu.concatenate %156, %157 in 0 : vector<32x32xf32>, vector<32x32xf32> -> vector<64x32xf32>
    %159 = arith.truncf %155 : vector<64x32xf32> to vector<64x32xbf16>
    %160 = vector.shape_cast %159 : vector<64x32xbf16> to vector<1x64x32xbf16>
    %161 = vector.shape_cast %160 : vector<1x64x32xbf16> to vector<1x64x32xbf16>
    %162 = vector.broadcast %161 : vector<1x64x32xbf16> to vector<4x64x32xbf16>
    %163 = arith.truncf %158 : vector<64x32xf32> to vector<64x32xbf16>
    %164 = vector.shape_cast %163 : vector<64x32xbf16> to vector<1x64x32xbf16>
    %165 = vector.shape_cast %164 : vector<1x64x32xbf16> to vector<1x64x32xbf16>
    %166 = vector.broadcast %165 : vector<1x64x32xbf16> to vector<4x64x32xbf16>
    %c1_80 = arith.constant 1 : index
    %c0_81 = arith.constant 0 : index
    %c0_82 = arith.constant 0 : index
    %c0_83 = arith.constant 0 : index
    %167 = vector.load %arg6[%c1_80, %c0_81, %c0_82, %c0_83] : memref<2x4x32x8xbf16, #tpu.memory_space<vmem>>, vector<1x4x32x8xbf16>
    %168 = vector.shape_cast %167 : vector<1x4x32x8xbf16> to vector<4x32x8xbf16>
    "tpu.trace_start"() <{level = 10 : i32, message = "hsc,hcd->hsd"}> : () -> ()
    %cst_84 = arith.constant dense<0.000000e+00> : vector<4x64x8xf32>
    %169 = tpu.matmul %162, %168, %cst_84 {dimension_numbers = #tpu.dot_dimension_numbers<[2], [1], [1], [2], [0, 0, 0, 1, 1, 2], [0], [0]>} : vector<4x64x32xbf16>, vector<4x32x8xbf16>, vector<4x64x8xf32> -> vector<4x64x8xf32>
    "tpu.trace_stop"() : () -> ()
    %c1_85 = arith.constant 1 : index
    %c0_86 = arith.constant 0 : index
    %c0_87 = arith.constant 0 : index
    %c0_88 = arith.constant 0 : index
    %170 = vector.load %arg7[%c1_85, %c0_86, %c0_87, %c0_88] : memref<2x4x32x8xbf16, #tpu.memory_space<vmem>>, vector<1x4x32x8xbf16>
    %171 = vector.shape_cast %170 : vector<1x4x32x8xbf16> to vector<4x32x8xbf16>
    "tpu.trace_start"() <{level = 10 : i32, message = "hsc,hcd->hsd"}> : () -> ()
    %cst_89 = arith.constant dense<0.000000e+00> : vector<4x64x8xf32>
    %172 = tpu.matmul %162, %171, %cst_89 {dimension_numbers = #tpu.dot_dimension_numbers<[2], [1], [1], [2], [0, 0, 0, 1, 1, 2], [0], [0]>} : vector<4x64x32xbf16>, vector<4x32x8xbf16>, vector<4x64x8xf32> -> vector<4x64x8xf32>
    "tpu.trace_stop"() : () -> ()
    %c1_90 = arith.constant 1 : index
    %c0_91 = arith.constant 0 : index
    %c0_92 = arith.constant 0 : index
    %c0_93 = arith.constant 0 : index
    %173 = vector.load %arg8[%c1_90, %c0_91, %c0_92, %c0_93] : memref<2x4x32x8xbf16, #tpu.memory_space<vmem>>, vector<1x4x32x8xbf16>
    %174 = vector.shape_cast %173 : vector<1x4x32x8xbf16> to vector<4x32x8xbf16>
    "tpu.trace_start"() <{level = 10 : i32, message = "hsc,hcd->hsd"}> : () -> ()
    %cst_94 = arith.constant dense<0.000000e+00> : vector<4x64x8xf32>
    %175 = tpu.matmul %166, %174, %cst_94 {dimension_numbers = #tpu.dot_dimension_numbers<[2], [1], [1], [2], [0, 0, 0, 1, 1, 2], [0], [0]>} : vector<4x64x32xbf16>, vector<4x32x8xbf16>, vector<4x64x8xf32> -> vector<4x64x8xf32>
    "tpu.trace_stop"() : () -> ()
    %176 = arith.truncf %169 : vector<4x64x8xf32> to vector<4x64x8xbf16>
    %177 = vector.shape_cast %176 : vector<4x64x8xbf16> to vector<16x16x8xbf16>
    %178 = arith.truncf %172 : vector<4x64x8xf32> to vector<4x64x8xbf16>
    %179 = vector.shape_cast %178 : vector<4x64x8xbf16> to vector<16x16x8xbf16>
    %180 = arith.truncf %175 : vector<4x64x8xf32> to vector<4x64x8xbf16>
    %181 = vector.shape_cast %180 : vector<4x64x8xbf16> to vector<16x16x8xbf16>
    "tpu.trace_start"() <{level = 10 : i32, message = "bnd,bmd->bnm"}> : () -> ()
    %cst_95 = arith.constant dense<0.000000e+00> : vector<16x16x16xf32>
    %182 = tpu.matmul %177, %179, %cst_95 {dimension_numbers = #tpu.dot_dimension_numbers<[2], [2], [1], [1], [0, 0, 0, 1, 1, 1], [0], [0]>} : vector<16x16x8xbf16>, vector<16x16x8xbf16>, vector<16x16x16xf32> -> vector<16x16x16xf32>
    "tpu.trace_stop"() : () -> ()
    %cst_96 = arith.constant dense<0xFF800000> : vector<16x16xf32>
    %183 = vector.multi_reduction <maximumf>, %182, %cst_96 [2] : vector<16x16x16xf32> to vector<16x16xf32>
    %184 = vector.shape_cast %183 : vector<16x16xf32> to vector<16x16x1xf32>
    %185 = vector.broadcast %184 : vector<16x16x1xf32> to vector<16x16x16xf32>
    %186 = arith.subf %182, %185 : vector<16x16x16xf32>
    %187 = math.exp %186 : vector<16x16x16xf32>
    %cst_97 = arith.constant dense<0.000000e+00> : vector<16x16xf32>
    %188 = vector.multi_reduction <add>, %187, %cst_97 [2] : vector<16x16x16xf32> to vector<16x16xf32>
    %189 = vector.shape_cast %188 : vector<16x16xf32> to vector<16x16x1xf32>
    %190 = tpu.reciprocal %189 {approx = true} : vector<16x16x1xf32> -> vector<16x16x1xf32>
    %191 = vector.broadcast %190 : vector<16x16x1xf32> to vector<16x16x16xf32>
    %192 = arith.mulf %187, %191 : vector<16x16x16xf32>
    %193 = arith.truncf %192 : vector<16x16x16xf32> to vector<16x16x16xbf16>
    "tpu.trace_start"() <{level = 10 : i32, message = "bnm,bmd->bnd"}> : () -> ()
    %cst_98 = arith.constant dense<0.000000e+00> : vector<16x16x8xf32>
    %194 = tpu.matmul %193, %181, %cst_98 {dimension_numbers = #tpu.dot_dimension_numbers<[2], [1], [1], [2], [0, 0, 0, 1, 1, 2], [0], [0]>} : vector<16x16x16xbf16>, vector<16x16x8xbf16>, vector<16x16x8xf32> -> vector<16x16x8xf32>
    "tpu.trace_stop"() : () -> ()
    %195 = arith.truncf %194 : vector<16x16x8xf32> to vector<16x16x8xbf16>
    %196 = vector.shape_cast %195 : vector<16x16x8xbf16> to vector<4x64x8xbf16>
    %c1_99 = arith.constant 1 : index
    %c0_100 = arith.constant 0 : index
    %c0_101 = arith.constant 0 : index
    %c0_102 = arith.constant 0 : index
    %197 = vector.load %arg9[%c1_99, %c0_100, %c0_101, %c0_102] : memref<2x4x8x32xbf16, #tpu.memory_space<vmem>>, vector<1x4x8x32xbf16>
    %198 = vector.shape_cast %197 : vector<1x4x8x32xbf16> to vector<4x8x32xbf16>
    "tpu.trace_start"() <{level = 10 : i32, message = "hsd,hdc->hsc"}> : () -> ()
    %cst_103 = arith.constant dense<0.000000e+00> : vector<4x64x32xf32>
    %199 = tpu.matmul %196, %198, %cst_103 {dimension_numbers = #tpu.dot_dimension_numbers<[2], [1], [1], [2], [0, 0, 0, 1, 1, 2], [0], [0]>} : vector<4x64x8xbf16>, vector<4x8x32xbf16>, vector<4x64x32xf32> -> vector<4x64x32xf32>
    "tpu.trace_stop"() : () -> ()
    %cst_104 = arith.constant dense<0.000000e+00> : vector<64x32xf32>
    %200 = vector.multi_reduction <add>, %199, %cst_104 [0] : vector<4x64x32xf32> to vector<64x32xf32>
    %c1_105 = arith.constant 1 : index
    %c0_106 = arith.constant 0 : index
    %c0_107 = arith.constant 0 : index
    %201 = vector.load %arg10[%c1_105, %c0_106, %c0_107] : memref<2x1x32xf32, #tpu.memory_space<vmem>>, vector<1x1x32xf32>
    %202 = vector.shape_cast %201 : vector<1x1x32xf32> to vector<1x32xf32>
    %203 = vector.broadcast %202 : vector<1x32xf32> to vector<64x32xf32>
    %204 = arith.addf %200, %203 : vector<64x32xf32>
    %205 = arith.addf %204, %155 : vector<64x32xf32>
    %c1_108 = arith.constant 1 : index
    %c0_109 = arith.constant 0 : index
    %c0_110 = arith.constant 0 : index
    %206 = vector.load %arg11[%c1_108, %c0_109, %c0_110] : memref<2x1x32xf32, #tpu.memory_space<vmem>>, vector<1x1x32xf32>
    %207 = vector.shape_cast %206 : vector<1x1x32xf32> to vector<1x32xf32>
    %c1_111 = arith.constant 1 : index
    %c0_112 = arith.constant 0 : index
    %c0_113 = arith.constant 0 : index
    %208 = vector.load %arg12[%c1_111, %c0_112, %c0_113] : memref<2x1x32xf32, #tpu.memory_space<vmem>>, vector<1x1x32xf32>
    %209 = vector.shape_cast %208 : vector<1x1x32xf32> to vector<1x32xf32>
    %cst_114 = arith.constant dense<0.000000e+00> : vector<64xf32>
    %210 = vector.multi_reduction <add>, %205, %cst_114 [1] : vector<64x32xf32> to vector<64xf32>
    %211 = vector.shape_cast %210 : vector<64xf32> to vector<64x1xf32>
    %cst_115 = arith.constant 3.200000e+01 : f32
    %212 = vector.broadcast %cst_115 : f32 to vector<64x1xf32>
    %213 = arith.divf %211, %212 : vector<64x1xf32>
    %214 = vector.broadcast %213 : vector<64x1xf32> to vector<64x32xf32>
    %215 = arith.subf %205, %214 : vector<64x32xf32>
    %216 = arith.mulf %215, %215 : vector<64x32xf32>
    %cst_116 = arith.constant dense<0.000000e+00> : vector<64xf32>
    %217 = vector.multi_reduction <add>, %216, %cst_116 [1] : vector<64x32xf32> to vector<64xf32>
    %218 = vector.shape_cast %217 : vector<64xf32> to vector<64x1xf32>
    %cst_117 = arith.constant 3.200000e+01 : f32
    %219 = vector.broadcast %cst_117 : f32 to vector<64x1xf32>
    %220 = arith.divf %218, %219 : vector<64x1xf32>
    %221 = vector.broadcast %213 : vector<64x1xf32> to vector<64x32xf32>
    %222 = arith.subf %205, %221 : vector<64x32xf32>
    %cst_118 = arith.constant 9.99999974E-6 : f32
    %223 = vector.broadcast %cst_118 : f32 to vector<64x1xf32>
    %224 = arith.addf %220, %223 : vector<64x1xf32>
    %225 = math.rsqrt %224 : vector<64x1xf32>
    %226 = vector.broadcast %225 : vector<64x1xf32> to vector<64x32xf32>
    %227 = arith.mulf %222, %226 : vector<64x32xf32>
    %228 = vector.broadcast %207 : vector<1x32xf32> to vector<64x32xf32>
    %229 = arith.mulf %227, %228 : vector<64x32xf32>
    %230 = vector.broadcast %209 : vector<1x32xf32> to vector<64x32xf32>
    %231 = arith.addf %229, %230 : vector<64x32xf32>
    %232 = arith.truncf %231 : vector<64x32xf32> to vector<64x32xbf16>
    %c1_119 = arith.constant 1 : index
    %c0_120 = arith.constant 0 : index
    %c0_121 = arith.constant 0 : index
    %233 = vector.load %arg13[%c1_119, %c0_120, %c0_121] : memref<2x32x64xbf16, #tpu.memory_space<vmem>>, vector<1x32x64xbf16>
    %234 = vector.shape_cast %233 : vector<1x32x64xbf16> to vector<32x64xbf16>
    %cst_122 = arith.constant dense<0.000000e+00> : vector<64x64xf32>
    %235 = tpu.matmul %232, %234, %cst_122 {dimension_numbers = #tpu.dot_dimension_numbers<[1], [0], [0], [1], [0, 0, 1, 1], [], []>} : vector<64x32xbf16>, vector<32x64xbf16>, vector<64x64xf32> -> vector<64x64xf32>
    %c1_123 = arith.constant 1 : index
    %c0_124 = arith.constant 0 : index
    %c0_125 = arith.constant 0 : index
    %236 = vector.load %arg14[%c1_123, %c0_124, %c0_125] : memref<2x1x64xf32, #tpu.memory_space<vmem>>, vector<1x1x64xf32>
    %237 = vector.shape_cast %236 : vector<1x1x64xf32> to vector<1x64xf32>
    %238 = vector.broadcast %237 : vector<1x64xf32> to vector<64x64xf32>
    %239 = arith.addf %235, %238 : vector<64x64xf32>
    %cst_126 = arith.constant 0.000000e+00 : f32
    %240 = vector.broadcast %cst_126 : f32 to vector<64x64xf32>
    %241 = arith.maximumf %239, %240 : vector<64x64xf32>
    %242 = arith.truncf %241 : vector<64x64xf32> to vector<64x64xbf16>
    %c1_127 = arith.constant 1 : index
    %c0_128 = arith.constant 0 : index
    %c0_129 = arith.constant 0 : index
    %243 = vector.load %arg15[%c1_127, %c0_128, %c0_129] : memref<2x64x32xbf16, #tpu.memory_space<vmem>>, vector<1x64x32xbf16>
    %244 = vector.shape_cast %243 : vector<1x64x32xbf16> to vector<64x32xbf16>
    %cst_130 = arith.constant dense<0.000000e+00> : vector<64x32xf32>
    %245 = tpu.matmul %242, %244, %cst_130 {dimension_numbers = #tpu.dot_dimension_numbers<[1], [0], [0], [1], [0, 0, 1, 1], [], []>} : vector<64x64xbf16>, vector<64x32xbf16>, vector<64x32xf32> -> vector<64x32xf32>
    %c1_131 = arith.constant 1 : index
    %c0_132 = arith.constant 0 : index
    %c0_133 = arith.constant 0 : index
    %246 = vector.load %arg16[%c1_131, %c0_132, %c0_133] : memref<2x1x32xf32, #tpu.memory_space<vmem>>, vector<1x1x32xf32>
    %247 = vector.shape_cast %246 : vector<1x1x32xf32> to vector<1x32xf32>
    %248 = vector.broadcast %247 : vector<1x32xf32> to vector<64x32xf32>
    %249 = arith.addf %245, %248 : vector<64x32xf32>
    %250 = arith.truncf %249 : vector<64x32xf32> to vector<64x32xbf16>
    %c0_134 = arith.constant 0 : index
    %c0_135 = arith.constant 0 : index
    %251 = vector.load %arg17[%c0_134, %c0_135] : memref<32x128xbf16, #tpu.memory_space<vmem>>, vector<32x128xbf16>
    %cst_136 = arith.constant dense<0.000000e+00> : vector<64x128xf32>
    %252 = tpu.matmul %250, %251, %cst_136 {dimension_numbers = #tpu.dot_dimension_numbers<[1], [0], [0], [1], [0, 0, 1, 1], [], []>} : vector<64x32xbf16>, vector<32x128xbf16>, vector<64x128xf32> -> vector<64x128xf32>
    %c0_137 = arith.constant 0 : index
    %c0_138 = arith.constant 0 : index
    %253 = vector.load %arg18[%c0_137, %c0_138] : memref<1x128xf32, #tpu.memory_space<vmem>>, vector<1x128xf32>
    %254 = vector.broadcast %253 : vector<1x128xf32> to vector<64x128xf32>
    %255 = arith.addf %252, %254 : vector<64x128xf32>
    %256 = vector.extract_strided_slice %255 {offsets = [0, 0], sizes = [32, 128], strides = [1, 1]} : vector<64x128xf32> to vector<32x128xf32>
    %257 = vector.extract_strided_slice %255 {offsets = [32, 0], sizes = [32, 128], strides = [1, 1]} : vector<64x128xf32> to vector<32x128xf32>
    %c0_139 = arith.constant 0 : index
    %c0_140 = arith.constant 0 : index
    %c0_141 = arith.constant 0 : index
    %258 = vector.load %arg19[%c0_139, %c0_140, %c0_141] : memref<3x32x128xf32, #tpu.memory_space<vmem>>, vector<1x32x128xf32>
    %259 = vector.shape_cast %258 : vector<1x32x128xf32> to vector<32x128xf32>
    %260 = vector.shape_cast %256 : vector<32x128xf32> to vector<1x32x128xf32>
    tpu.vector_store %arg19[%c0_139, %c0_140, %c0_141], %260 {strides = array<i32>} : memref<3x32x128xf32, #tpu.memory_space<vmem>>, vector<1x32x128xf32>,
    %c1_142 = arith.constant 1 : index
    %c0_143 = arith.constant 0 : index
    %c0_144 = arith.constant 0 : index
    %261 = vector.load %arg19[%c1_142, %c0_143, %c0_144] : memref<3x32x128xf32, #tpu.memory_space<vmem>>, vector<1x32x128xf32>
    %262 = vector.shape_cast %261 : vector<1x32x128xf32> to vector<32x128xf32>
    %263 = vector.shape_cast %257 : vector<32x128xf32> to vector<1x32x128xf32>
    tpu.vector_store %arg19[%c1_142, %c0_143, %c0_144], %263 {strides = array<i32>} : memref<3x32x128xf32, #tpu.memory_space<vmem>>, vector<1x32x128xf32>,
    %264 = arith.addf %256, %257 : vector<32x128xf32>
    %c2 = arith.constant 2 : index
    %c0_145 = arith.constant 0 : index
    %c0_146 = arith.constant 0 : index
    %265 = vector.load %arg19[%c2, %c0_145, %c0_146] : memref<3x32x128xf32, #tpu.memory_space<vmem>>, vector<1x32x128xf32>
    %266 = vector.shape_cast %265 : vector<1x32x128xf32> to vector<32x128xf32>
    %267 = vector.shape_cast %264 : vector<32x128xf32> to vector<1x32x128xf32>
    tpu.vector_store %arg19[%c2, %c0_145, %c0_146], %267 {strides = array<i32>} : memref<3x32x128xf32, #tpu.memory_space<vmem>>, vector<1x32x128xf32>,
    return
  }
  func.func @transform_0(%arg0: i32) -> (i32, i32) {
    %c0_i32 = arith.constant 0 : i32
    %c0_i32_0 = arith.constant 0 : i32
    %c0_i32_1 = arith.constant 0 : i32
    return %c0_i32, %c0_i32_0 : i32, i32
  }
  func.func @transform_1(%arg0: i32) -> (i32, i32) {
    %c0_i32 = arith.constant 0 : i32
    %c0_i32_0 = arith.constant 0 : i32
    %c0_i32_1 = arith.constant 0 : i32
    return %c0_i32, %c0_i32_0 : i32, i32
  }
  func.func @transform_2(%arg0: i32) -> (i32, i32) {
    %c0_i32 = arith.constant 0 : i32
    %c0_i32_0 = arith.constant 0 : i32
    %c0_i32_1 = arith.constant 0 : i32
    return %c0_i32, %c0_i32_0 : i32, i32
  }
  func.func @transform_3(%arg0: i32) -> (i32, i32, i32) {
    %c0_i32 = arith.constant 0 : i32
    %c0_i32_0 = arith.constant 0 : i32
    %c0_i32_1 = arith.constant 0 : i32
    %c0_i32_2 = arith.constant 0 : i32
    return %c0_i32, %c0_i32_0, %c0_i32_1 : i32, i32, i32
  }
  func.func @transform_4(%arg0: i32) -> (i32, i32, i32) {
    %c0_i32 = arith.constant 0 : i32
    %c0_i32_0 = arith.constant 0 : i32
    %c0_i32_1 = arith.constant 0 : i32
    %c0_i32_2 = arith.constant 0 : i32
    return %c0_i32, %c0_i32_0, %c0_i32_1 : i32, i32, i32
  }
  func.func @transform_5(%arg0: i32) -> (i32, i32, i32, i32) {
    %c0_i32 = arith.constant 0 : i32
    %c0_i32_0 = arith.constant 0 : i32
    %c0_i32_1 = arith.constant 0 : i32
    %c0_i32_2 = arith.constant 0 : i32
    %c0_i32_3 = arith.constant 0 : i32
    return %c0_i32, %c0_i32_0, %c0_i32_1, %c0_i32_2 : i32, i32, i32, i32
  }
  func.func @transform_6(%arg0: i32) -> (i32, i32, i32, i32) {
    %c0_i32 = arith.constant 0 : i32
    %c0_i32_0 = arith.constant 0 : i32
    %c0_i32_1 = arith.constant 0 : i32
    %c0_i32_2 = arith.constant 0 : i32
    %c0_i32_3 = arith.constant 0 : i32
    return %c0_i32, %c0_i32_0, %c0_i32_1, %c0_i32_2 : i32, i32, i32, i32
  }
  func.func @transform_7(%arg0: i32) -> (i32, i32, i32, i32) {
    %c0_i32 = arith.constant 0 : i32
    %c0_i32_0 = arith.constant 0 : i32
    %c0_i32_1 = arith.constant 0 : i32
    %c0_i32_2 = arith.constant 0 : i32
    %c0_i32_3 = arith.constant 0 : i32
    return %c0_i32, %c0_i32_0, %c0_i32_1, %c0_i32_2 : i32, i32, i32, i32
  }
  func.func @transform_8(%arg0: i32) -> (i32, i32, i32, i32) {
    %c0_i32 = arith.constant 0 : i32
    %c0_i32_0 = arith.constant 0 : i32
    %c0_i32_1 = arith.constant 0 : i32
    %c0_i32_2 = arith.constant 0 : i32
    %c0_i32_3 = arith.constant 0 : i32
    return %c0_i32, %c0_i32_0, %c0_i32_1, %c0_i32_2 : i32, i32, i32, i32
  }
  func.func @transform_9(%arg0: i32) -> (i32, i32, i32) {
    %c0_i32 = arith.constant 0 : i32
    %c0_i32_0 = arith.constant 0 : i32
    %c0_i32_1 = arith.constant 0 : i32
    %c0_i32_2 = arith.constant 0 : i32
    return %c0_i32, %c0_i32_0, %c0_i32_1 : i32, i32, i32
  }
  func.func @transform_10(%arg0: i32) -> (i32, i32, i32) {
    %c0_i32 = arith.constant 0 : i32
    %c0_i32_0 = arith.constant 0 : i32
    %c0_i32_1 = arith.constant 0 : i32
    %c0_i32_2 = arith.constant 0 : i32
    return %c0_i32, %c0_i32_0, %c0_i32_1 : i32, i32, i32
  }
  func.func @transform_11(%arg0: i32) -> (i32, i32, i32) {
    %c0_i32 = arith.constant 0 : i32
    %c0_i32_0 = arith.constant 0 : i32
    %c0_i32_1 = arith.constant 0 : i32
    %c0_i32_2 = arith.constant 0 : i32
    return %c0_i32, %c0_i32_0, %c0_i32_1 : i32, i32, i32
  }
  func.func @transform_12(%arg0: i32) -> (i32, i32, i32) {
    %c0_i32 = arith.constant 0 : i32
    %c0_i32_0 = arith.constant 0 : i32
    %c0_i32_1 = arith.constant 0 : i32
    %c0_i32_2 = arith.constant 0 : i32
    return %c0_i32, %c0_i32_0, %c0_i32_1 : i32, i32, i32
  }
  func.func @transform_13(%arg0: i32) -> (i32, i32, i32) {
    %c0_i32 = arith.constant 0 : i32
    %c0_i32_0 = arith.constant 0 : i32
    %c0_i32_1 = arith.constant 0 : i32
    %c0_i32_2 = arith.constant 0 : i32
    return %c0_i32, %c0_i32_0, %c0_i32_1 : i32, i32, i32
  }
  func.func @transform_14(%arg0: i32) -> (i32, i32, i32) {
    %c0_i32 = arith.constant 0 : i32
    %c0_i32_0 = arith.constant 0 : i32
    %c0_i32_1 = arith.constant 0 : i32
    %c0_i32_2 = arith.constant 0 : i32
    return %c0_i32, %c0_i32_0, %c0_i32_1 : i32, i32, i32
  }
  func.func @transform_15(%arg0: i32) -> (i32, i32, i32) {
    %c0_i32 = arith.constant 0 : i32
    %c0_i32_0 = arith.constant 0 : i32
    %c0_i32_1 = arith.constant 0 : i32
    %c0_i32_2 = arith.constant 0 : i32
    return %c0_i32, %c0_i32_0, %c0_i32_1 : i32, i32, i32
  }
  func.func @transform_16(%arg0: i32) -> (i32, i32) {
    %c0_i32 = arith.constant 0 : i32
    %c0_i32_0 = arith.constant 0 : i32
    %c0_i32_1 = arith.constant 0 : i32
    return %c0_i32, %c0_i32_0 : i32, i32
  }
  func.func @transform_17(%arg0: i32) -> (i32, i32) {
    %c0_i32 = arith.constant 0 : i32
    %c0_i32_0 = arith.constant 0 : i32
    %c0_i32_1 = arith.constant 0 : i32
    return %c0_i32, %c0_i32_0 : i32, i32
  }
  func.func @transform_18(%arg0: i32) -> (i32, i32, i32) {
    %c0_i32 = arith.constant 0 : i32
    %c0_i32_0 = arith.constant 0 : i32
    %c0_i32_1 = arith.constant 0 : i32
    %c0_i32_2 = arith.constant 0 : i32
    return %c0_i32, %c0_i32_0, %c0_i32_1 : i32, i32, i32
  }
}

</mosaic_0001>

<bundles_post_ra>
// kernel: _lambda_.1
= control target key start
LH: loop header
LB: loop body
LE: loop exit
PB: predicated region body
PF: predicated region fallthrough
CT: control target
= control target key end

     0   :  { %vm86_vm0 = vcmask 1043456   ;;  %vm73_vm1 = vcmask 64512   ;;  %vm131_vm2 = vcmask 261120   ;;  %v7006_v40 = vmov 32.0   ;;  %s9483_s1 = inlined_call_operand.vmem [shape: bf16[8,32], index: 1, kind: input, shape index: {}]   ;;  %s9484_s0 = inlined_call_operand.vmem [shape: f32[64,8], index: 0, kind: input, shape index: {}]   ;;  %s9485_s2 = inlined_call_operand.vmem [shape: f32[16,32], index: 2, kind: input, shape index: {}]   ;;  %s9486_s3 = inlined_call_operand.vmem [shape: f32[2,1,32], index: 3, kind: input, shape index: {}]   ;;  %s9487_s4 = inlined_call_operand.vmem [shape: f32[2,1,32], index: 4, kind: input, shape index: {}]   ;;  %s9488_s5 = inlined_call_operand.vmem [shape: bf16[2,4,32,8], index: 5, kind: input, shape index: {}]   ;;  %s9489_s6 = inlined_call_operand.vmem [shape: bf16[2,4,32,8], index: 6, kind: input, shape index: {}]   ;;  %s9490_s7 = inlined_call_operand.vmem [shape: bf16[2,4,32,8], index: 7, kind: input, shape index: {}]   ;;  %s9491_s8 = inlined_call_operand.vmem [shape: bf16[2,4,8,32], index: 8, kind: input, shape index: {}]   ;;  %s9492_s9 = inlined_call_operand.vmem [shape: f32[2,1,32], index: 9, kind: input, shape index: {}]   ;;  %s9493_s10 = inlined_call_operand.vmem [shape: f32[2,1,32], index: 10, kind: input, shape index: {}]   ;;  %s9494_s11 = inlined_call_operand.vmem [shape: f32[2,1,32], index: 11, kind: input, shape index: {}]   ;;  %s9495_s12 = inlined_call_operand.vmem [shape: bf16[2,32,64], index: 12, kind: input, shape index: {}]   ;;  %s9496_s13 = inlined_call_operand.vmem [shape: f32[2,1,64], index: 13, kind: input, shape index: {}]   ;;  %s9497_s14 = inlined_call_operand.vmem [shape: bf16[2,64,32], index: 14, kind: input, shape index: {}]   ;;  %s9498_s15 = inlined_call_operand.vmem [shape: f32[2,1,32], index: 15, kind: input, shape index: {}]   ;;  %s9499_s16 = inlined_call_operand.vmem [shape: bf16[32,128], index: 16, kind: input, shape index: {}]   ;;  %s9500_s17 = inlined_call_operand.vmem [shape: f32[1,128], index: 17, kind: input, shape index: {}]   ;;  %s9501_s18 = inlined_call_operand.vmem [shape: f32[3,32,128], index: 18, kind: output, shape index: {}]  }
   0x1   :  { %9514 = sst [smem:[#allocation12_spill]] %s9483_s1  ;;  %6684 = vrcp.f32 %v7006_v40 }
   0x2   :  { %9515 = sst [smem:[#allocation13_spill]] %s9484_s0 }
   0x3   :  { %9516 = sst [smem:[#allocation14_spill]] %s9485_s2 }
   0x4   :  { %s9517_s29 = sld [smem:[#allocation12_spill]] }
   0x5   :  { %s9518_s19 = sld [smem:[#allocation13_spill]] }
   0x6   :  { %s9519_s21 = sld [smem:[#allocation14_spill]] }
   0x7   :  { %v6685_v41 = vpop.eup %6684 }
   0x8   :  { %v157_v42 = vmul.f32 32.0, %v6685_v41  ;;  %vm161_vm3 = vweird.f32 %v6685_v41 }
   0xa   :  { %v72_v0 = vld [vmem:[%s9517_s29] sm:$0xf]  ;;  %v158_v43 = vsub.f32 1.0, %v157_v42 }
   0xb   :  { %v60_v1 = vld [vmem:[%s9518_s19] sm:$0xff]  ;;  %v61_v2 = vld [vmem:[%s9518_s19 + $0x8] sm:$0xff]  ;;  %v88_v3 = vsel %vm86_vm0, %v72_v0, 0  ;;  %v62_v5 = vld [vmem:[%s9518_s19 + $0x10] sm:$0xff] }
   0xc   :  { %v68_v4 = vpack.c.bf16 %v61_v2, %v60_v1  ;;  %97 = vmatpush.bf16.msra.mxu0 %v88_v3  ;;  %v63_v6 = vld [vmem:[%s9518_s19 + $0x18] sm:$0xff]  ;;  %v64_v8 = vld [vmem:[%s9518_s19 + $0x20] sm:$0xff]  ;;  %v65_v9 = vld [vmem:[%s9518_s19 + $0x28] sm:$0xff]  ;;  %v159_v44 = vmul.f32 %v6685_v41, %v158_v43 }
   0xd   :  { %v69_v7 = vpack.c.bf16 %v63_v6, %v62_v5  ;;  %v70_v10 = vpack.c.bf16 %v65_v9, %v64_v8  ;;  %v66_v11 = vld [vmem:[%s9518_s19 + $0x30] sm:$0xff]  ;;  %v67_v12 = vld [vmem:[%s9518_s19 + $0x38] sm:$0xff]  ;;  %v119_v14 = vld [vmem:[%s9519_s21] sm:$0xff] }
   0xe   :  { %v71_v13 = vpack.c.bf16 %v67_v12, %v66_v11  ;;  %v120_v18 = vld [vmem:[%s9519_s21 + $0x8] sm:$0xff]  ;;  %v160_v45 = vadd.f32 %v6685_v41, %v159_v44 }
   0xf   :  { %6059 = vmatmul.msk.bf16.vlgmr.msra.gmra.mxu0 %vm73_vm1, %v68_v4 }
  0x10   :  { %v7148_v46 = vsel %vm161_vm3, %v6685_v41, %v160_v45 }
  0x11   :  { %9520 = vst [vmem:[#allocation2_spill] sm:$0xff] %v7148_v46 }
  0x1f   :  { %6060 = vmatmul.msk.bf16.gmra.mxu0 %vm73_vm1, %v69_v7 }
  0x2f   :  { %6061 = vmatmul.msk.bf16.gmra.mxu0 %vm73_vm1, %v70_v10 }
  0x3f   :  { %6062 = vmatmul.msk.bf16.gmra.mxu0 %vm73_vm1, %v71_v13 }
  0x8c   :  { %v99_v15 = vpop.f32.mrf.mxu0 }
  0x8d   :  { %v121_v16 = vadd.f32 %v119_v14, %v99_v15 }
  0x8f   :  { %v132_v17 = vsel %vm131_vm2, %v121_v16, 0.0 }
  0x90   :  { %133 = vadd.xlane.f32.xlu2 %v132_v17 }
  0x94   :  { %v101_v19 = vpop.f32.mrf.mxu0 }
  0x95   :  { %v122_v20 = vadd.f32 %v120_v18, %v101_v19 }
  0x97   :  { %v135_v21 = vsel %vm131_vm2, %v122_v20, 0.0 }
  0x98   :  { %136 = vadd.xlane.f32.xlu2 %v135_v21 }
  0x9c   :  { %v104_v22 = vpop.f32.mrf.mxu0 }
  0x9d   :  { %v123_v23 = vadd.f32 %v119_v14, %v104_v22 }
  0x9f   :  { %v138_v24 = vsel %vm131_vm2, %v123_v23, 0.0 }
  0xa0   :  { %139 = vadd.xlane.f32.xlu0 %v138_v24 }
  0xa4   :  { %v106_v25 = vpop.f32.mrf.mxu0 }
  0xa5   :  { %v124_v26 = vadd.f32 %v120_v18, %v106_v25 }
  0xa7   :  { %v141_v27 = vsel %vm131_vm2, %v124_v26, 0.0 }
  0xa8   :  { %142 = vadd.xlane.f32.xlu0 %v141_v27  ;;  %v6605_v27 = vld [vmem:[%s9488_s5 + $0x18] sm:$0xff] }
  0xa9   :  { %6666 = vmatpush.bf16.msra.mxu2 %v6605_v27 }
  0xac   :  { %v109_v28 = vpop.f32.mrf.mxu0 }
  0xad   :  { %v125_v29 = vadd.f32 %v119_v14, %v109_v28 }
  0xaf   :  { %v144_v30 = vsel %vm131_vm2, %v125_v29, 0.0 }
  0xb0   :  { %145 = vadd.xlane.f32.xlu1 %v144_v30  ;;  %v6604_v30 = vld [vmem:[%s9488_s5 + $0x10] sm:$0xff] }
  0xb1   :  { %6667 = vmatpush.bf16.msra.mxu2 %v6604_v30 }
  0xb4   :  { %v111_v31 = vpop.f32.mrf.mxu0 }
  0xb5   :  { %v126_v32 = vadd.f32 %v120_v18, %v111_v31 }
  0xb7   :  { %v147_v33 = vsel %vm131_vm2, %v126_v32, 0.0 }
  0xb8   :  { %148 = vadd.xlane.f32.xlu1 %v147_v33 }
  0xbc   :  { %v114_v34 = vpop.f32.mrf.mxu0 }
  0xbd   :  { %v127_v35 = vadd.f32 %v119_v14, %v114_v34 }
  0xbf   :  { %v150_v36 = vsel %vm131_vm2, %v127_v35, 0.0 }
  0xc0   :  { %151 = vadd.xlane.f32.xlu0 %v150_v36 }
  0xc4   :  { %v116_v37 = vpop.f32.mrf.mxu0 }
  0xc5   :  { %v128_v38 = vadd.f32 %v120_v18, %v116_v37 }
  0xc7   :  { %v153_v39 = vsel %vm131_vm2, %v128_v38, 0.0 }
  0xc8   :  { %154 = vadd.xlane.f32.xlu1 %v153_v39 }
 0x103   :  { %v134_v51 = vpop.xlane.xlu2 %133 }
 0x104   :  { %v163_v55 = vmul.f32 %v7148_v46, %v134_v51 }
 0x106   :  { %v7162_v58 = vsub.f32 %v121_v16, %v163_v55 }
 0x108   :  { %v179_v1 = vmul.f32 %v7162_v58, %v7162_v58 }
 0x10a   :  { %v187_v4 = vsel %vm131_vm2, %v179_v1, 0.0 }
 0x10b   :  { %v137_v60 = vpop.xlane.xlu2 %136 }
 0x10c   :  { %v164_v63 = vmul.f32 %v7148_v46, %v137_v60 }
 0x10e   :  { %v7173_v3 = vsub.f32 %v122_v20, %v164_v63 }
 0x110   :  { %v180_v9 = vmul.f32 %v7173_v3, %v7173_v3 }
 0x112   :  { %v190_v12 = vsel %vm131_vm2, %v180_v9, 0.0 }
 0x113   :  { %v140_v47 = vpop.xlane.xlu0 %139 }
 0x114   :  { %v165_v48 = vmul.f32 %v7148_v46, %v140_v47 }
 0x116   :  { %v7151_v49 = vsub.f32 %v123_v23, %v165_v48  ;;  %v6609_v48 = vld [vmem:[%s9488_s5 + $0x38] sm:$0xff] }
 0x117   :  { %534 = vmatpush.bf16.msrb.mxu0 %v6609_v48 }
 0x118   :  { %v181_v50 = vmul.f32 %v7151_v49, %v7151_v49 }
 0x11a   :  { %v193_v52 = vsel %vm131_vm2, %v181_v50, 0.0  ;;  %v7222_v50 = vld [vmem:[%s9486_s3] ss:$0 sm:$0xff] }
 0x11b   :  { %194 = vadd.xlane.f32.xlu2 %v193_v52  ;;  %v143_v53 = vpop.xlane.xlu0 %142 }
 0x11c   :  { %v166_v54 = vmul.f32 %v7148_v46, %v143_v53 }
 0x11e   :  { %v7158_v56 = vsub.f32 %v124_v26, %v166_v54  ;;  %v6603_v26 = vld [vmem:[%s9488_s5 + $0x8] sm:$0xff] }
 0x11f   :  { %6664 = vmatpush.bf16.msra.mxu3 %v6603_v26  ;;  %411 = vmatpush.bf16.msra.mxu1 %v6603_v26 }
 0x120   :  { %v182_v57 = vmul.f32 %v7158_v56, %v7158_v56 }
 0x122   :  { %v196_v59 = vsel %vm131_vm2, %v182_v57, 0.0 }
 0x123   :  { %v146_v61 = vpop.xlane.xlu1 %145  ;;  %197 = vadd.xlane.f32.xlu0 %v196_v59  ;;  %v6608_v59 = vld [vmem:[%s9488_s5 + $0x30] sm:$0xff] }
 0x124   :  { %v167_v62 = vmul.f32 %v7148_v46, %v146_v61  ;;  %535 = vmatpush.bf16.msrb.mxu0 %v6608_v59  ;;  %v6613_v59 = vld [vmem:[%s9489_s6 + $0x18] sm:$0xff] }
 0x125   :  { %632 = vmatpush.bf16.msrb.mxu2 %v6613_v59  ;;  %v6623_v59 = vld [vmem:[%s9490_s7 + $0x28] sm:$0xff] }
 0x126   :  { %v7167_v0 = vsub.f32 %v125_v29, %v167_v62  ;;  %v6602_v29 = vld [vmem:[%s9488_s5] sm:$0xff] }
 0x127   :  { %6665 = vmatpush.bf16.msra.mxu3 %v6602_v29  ;;  %412 = vmatpush.bf16.msra.mxu1 %v6602_v29  ;;  %v7234_v62 = vld [vmem:[%s9487_s4] ss:$0 sm:$0xff] }
 0x128   :  { %v183_v2 = vmul.f32 %v7167_v0, %v7167_v0 }
 0x12a   :  { %v199_v5 = vsel %vm131_vm2, %v183_v2, 0.0 }
 0x12b   :  { %v149_v6 = vpop.xlane.xlu1 %148  ;;  %188 = vadd.xlane.f32.xlu0 %v187_v4  ;;  %200 = vadd.xlane.f32.xlu1 %v199_v5 }
 0x12c   :  { %v168_v7 = vmul.f32 %v7148_v46, %v149_v6  ;;  %452 = vmatpush.bf16.msrb.mxu1 %v6605_v27 }
 0x12e   :  { %v7178_v8 = vsub.f32 %v126_v32, %v168_v7 }
 0x130   :  { %v184_v10 = vmul.f32 %v7178_v8, %v7178_v8  ;;  %453 = vmatpush.bf16.msrb.mxu1 %v6604_v30 }
 0x132   :  { %v202_v11 = vsel %vm131_vm2, %v184_v10, 0.0 }
 0x133   :  { %203 = vadd.xlane.f32.xlu2 %v202_v11  ;;  %v152_v13 = vpop.xlane.xlu0 %151  ;;  %191 = vadd.xlane.f32.xlu1 %v190_v12 }
 0x134   :  { %v169_v14 = vmul.f32 %v7148_v46, %v152_v13 }
 0x136   :  { %v7187_v15 = vsub.f32 %v127_v35, %v169_v14 }
 0x138   :  { %v185_v16 = vmul.f32 %v7187_v15, %v7187_v15 }
 0x13a   :  { %v205_v17 = vsel %vm131_vm2, %v185_v16, 0.0 }
 0x13b   :  { %206 = vadd.xlane.f32.xlu2 %v205_v17  ;;  %v155_v18 = vpop.xlane.xlu1 %154 }
 0x13c   :  { %v170_v19 = vmul.f32 %v7148_v46, %v155_v18 }
 0x13e   :  { %v7193_v20 = vsub.f32 %v128_v38, %v170_v19 }
 0x140   :  { %v186_v21 = vmul.f32 %v7193_v20, %v7193_v20 }
 0x142   :  { %v208_v22 = vsel %vm131_vm2, %v186_v21, 0.0 }
 0x143   :  { %209 = vadd.xlane.f32.xlu0 %v208_v22 }
 0x18e   :  { %v195_v23 = vpop.xlane.xlu2 %194 }
 0x18f   :  { %v213_v24 = vmul.f32 %v195_v23, %v7148_v46 }
 0x191   :  { %v221_v25 = vadd.f32 1e-05, %v213_v24 }
 0x193   :  { %6686 = vrsqrt.f32 %v221_v25  ;;  %vm253_vm5 = vweird.f32 %v221_v25 }
 0x196   :  { %v198_v28 = vpop.xlane.xlu0 %197 }
 0x197   :  { %v214_v31 = vmul.f32 %v198_v28, %v7148_v46 }
 0x199   :  { %v6687_v32 = vpop.eup %6686  ;;  %v222_v33 = vadd.f32 1e-05, %v214_v31 }
 0x19a   :  { %v248_v34 = vmul.f32 %v6687_v32, %v221_v25  ;;  %vm254_vm4 = vweird.f32 %v6687_v32 }
 0x19b   :  { %6688 = vrsqrt.f32 %v222_v33  ;;  %vm255_vm6 = vmor %vm253_vm5, %vm254_vm4  ;;  %vm263_vm8 = vweird.f32 %v222_v33 }
 0x19c   :  { %v249_v35 = vmul.f32 %v6687_v32, %v248_v34 }
 0x19e   :  { %v250_v36 = vmul.f32 0.5, %v249_v35  ;;  %v189_v37 = vpop.xlane.xlu0 %188  ;;  %v201_v38 = vpop.xlane.xlu1 %200 }
 0x19f   :  { %v211_v39 = vmul.f32 %v189_v37, %v7148_v46  ;;  %v215_v40 = vmul.f32 %v201_v38, %v7148_v46 }
 0x1a0   :  { %v251_v41 = vsub.f32 1.5, %v250_v36 }
 0x1a1   :  { %v6689_v42 = vpop.eup %6688  ;;  %v219_v43 = vadd.f32 1e-05, %v211_v39  ;;  %v7214_v44 = vadd.f32 1e-05, %v215_v40 }
 0x1a2   :  { %v252_v45 = vmul.f32 %v6687_v32, %v251_v41  ;;  %v258_v47 = vmul.f32 %v6689_v42, %v222_v33  ;;  %vm264_vm7 = vweird.f32 %v6689_v42 }
 0x1a3   :  { %6690 = vrsqrt.f32 %v219_v43  ;;  %vm265_vm9 = vmor %vm263_vm8, %vm264_vm7  ;;  %vm233_vm12 = vweird.f32 %v219_v43  ;;  %vm273_vm14 = vweird.f32 %v7214_v44 }
 0x1a4   :  { %v256_v51 = vsel %vm255_vm6, %v6687_v32, %v252_v45  ;;  %v259_v52 = vmul.f32 %v6689_v42, %v258_v47  ;;  %6692 = vrsqrt.f32 %v7214_v44 }
 0x1a5   :  { %v309_v53 = vmul.f32 %v256_v51, %v7151_v49 }
 0x1a6   :  { %v260_v54 = vmul.f32 0.5, %v259_v52  ;;  %v204_v55 = vpop.xlane.xlu2 %203  ;;  %v192_v57 = vpop.xlane.xlu1 %191 }
 0x1a7   :  { %v216_v60 = vmul.f32 %v204_v55, %v7148_v46  ;;  %v212_v61 = vmul.f32 %v192_v57, %v7148_v46  ;;  %v320_v63 = vmul.f32 %v7222_v50, %v309_v53  ;;  %v6607_v57 = vld [vmem:[%s9488_s5 + $0x28] sm:$0xff] }
 0x1a8   :  { %v261_v1 = vsub.f32 1.5, %v260_v54  ;;  %493 = vmatpush.bf16.msrb.mxu3 %v6607_v57 }
 0x1a9   :  { %v6691_v49 = vpop.eup %6690  ;;  %v7237_v2 = vadd.f32 1e-05, %v216_v60  ;;  %v7239_v4 = vadd.f32 1e-05, %v212_v61  ;;  %v7244_v10 = vadd.f32 %v7234_v62, %v320_v63 }
 0x1aa   :  { %v6693_v5 = vpop.eup %6692  ;;  %v262_v6 = vmul.f32 %v6689_v42, %v261_v1  ;;  %v228_v7 = vmul.f32 %v6691_v49, %v219_v43  ;;  %vm234_vm10 = vweird.f32 %v6691_v49 }
 0x1ab   :  { %v268_v9 = vmul.f32 %v6693_v5, %v7214_v44  ;;  %6694 = vrsqrt.f32 %v7237_v2  ;;  %v339_v22 = vpack.c.bf16 %v7244_v10, %v7244_v10  ;;  %vm274_vm11 = vweird.f32 %v6693_v5  ;;  %vm235_vm13 = vmor %vm233_vm12, %vm234_vm10 }
 0x1ac   :  { %v266_v11 = vsel %vm265_vm9, %v6689_v42, %v262_v6  ;;  %v229_v12 = vmul.f32 %v6691_v49, %v228_v7  ;;  %6696 = vrsqrt.f32 %v7239_v4  ;;  %vm275_vm15 = vmor %vm273_vm14, %vm274_vm11  ;;  %vm283_vm5 = vweird.f32 %v7237_v2 }
 0x1ad   :  { %v310_v13 = vmul.f32 %v266_v11, %v7158_v56  ;;  %v269_v14 = vmul.f32 %v6693_v5, %v268_v9  ;;  %v371_v35 = vunpack.c.l.b16 %v339_v22  ;;  %vm243_vm7 = vweird.f32 %v7239_v4 }
 0x1ae   :  { %v230_v16 = vmul.f32 0.5, %v229_v12  ;;  %v207_v17 = vpop.xlane.xlu2 %206 }
 0x1af   :  { %v321_v18 = vmul.f32 %v7222_v50, %v310_v13  ;;  %v270_v19 = vmul.f32 0.5, %v269_v14  ;;  %v217_v21 = vmul.f32 %v207_v17, %v7148_v46 }
 0x1b0   :  { %v231_v23 = vsub.f32 1.5, %v230_v16 }
 0x1b1   :  { %v6695_v24 = vpop.eup %6694  ;;  %v7253_v25 = vadd.f32 %v7234_v62, %v321_v18  ;;  %v271_v26 = vsub.f32 1.5, %v270_v19  ;;  %v7255_v56 = vadd.f32 1e-05, %v217_v21 }
 0x1b2   :  { %v6697_v27 = vpop.eup %6696  ;;  %v232_v28 = vmul.f32 %v6691_v49, %v231_v23  ;;  %v278_v29 = vmul.f32 %v6695_v24, %v7237_v2  ;;  %vm284_vm3 = vweird.f32 %v6695_v24  ;;  %v6606_v2 = vld [vmem:[%s9488_s5 + $0x20] sm:$0xff] }
 0x1b3   :  { %v340_v30 = vpack.c.bf16 %v7253_v25, %v7253_v25  ;;  %v272_v31 = vmul.f32 %v6693_v5, %v271_v26  ;;  %v238_v32 = vmul.f32 %v6697_v27, %v7239_v4  ;;  %6698 = vrsqrt.f32 %v7255_v56  ;;  %vm285_vm6 = vmor %vm283_vm5, %vm284_vm3  ;;  %v6612_v4 = vld [vmem:[%s9489_s6 + $0x10] sm:$0xff]  ;;  %494 = vmatpush.bf16.msrb.mxu3 %v6606_v2  ;;  %v6622_v2 = vld [vmem:[%s9490_s7 + $0x20] sm:$0xff] }
 0x1b4   :  { %v236_v33 = vsel %vm235_vm13, %v6691_v49, %v232_v28  ;;  %v279_v34 = vmul.f32 %v6695_v24, %v278_v29  ;;  %vm244_vm4 = vweird.f32 %v6697_v27  ;;  %633 = vmatpush.bf16.msrb.mxu2 %v6612_v4  ;;  %vm293_vm10 = vweird.f32 %v7255_v56 }
 0x1b5   :  { %v372_v36 = vunpack.c.l.b16 %v340_v30  ;;  %v276_v37 = vsel %vm275_vm15, %v6693_v5, %v272_v31  ;;  %v239_v38 = vmul.f32 %v6697_v27, %v238_v32  ;;  %v307_v39 = vmul.f32 %v236_v33, %v7162_v58  ;;  %vm245_vm8 = vmor %vm243_vm7, %vm244_vm4 }
 0x1b6   :  { %v311_v40 = vmul.f32 %v276_v37, %v7167_v0  ;;  %v280_v41 = vmul.f32 0.5, %v279_v34  ;;  %v210_v42 = vpop.xlane.xlu0 %209  ;;  %vm1493_vm15 = vcmask 130048  }
 0x1b7   :  { %v7265_v43 = vpack.c.b16 %v372_v36, %v371_v35  ;;  %v240_v44 = vmul.f32 0.5, %v239_v38  ;;  %v218_v45 = vmul.f32 %v210_v42, %v7148_v46  ;;  %v318_v0 = vmul.f32 %v7222_v50, %v307_v39  ;;  %v6610_v35 = vld [vmem:[%s9489_s6] sm:$0xff] }
 0x1b8   :  { %v322_v47 = vmul.f32 %v7222_v50, %v311_v40  ;;  %v281_v48 = vsub.f32 1.5, %v280_v41 }
 0x1b9   :  { %v241_v51 = vsub.f32 1.5, %v240_v44  ;;  %v7269_v52 = vadd.f32 1e-05, %v218_v45  ;;  %6072 = vmatmul.msk.bf16.vlgmr.msra.gmra.mxu3 %vm131_vm2, %v7265_v43  ;;  %6084 = vmatmul.msk.bf16.vlgmr.msra.gmra.mxu2 %vm131_vm2, %v7265_v43  ;;  %v6699_v58 = vpop.eup %6698  ;;  %v7298_v5 = vadd.f32 %v7234_v62, %v318_v0  ;;  %v6620_v0 = vld [vmem:[%s9490_s7 + $0x10] sm:$0xff] }
 0x1ba   :  { %v282_v53 = vmul.f32 %v6695_v24, %v281_v48  ;;  %v288_v55 = vmul.f32 %v6699_v58, %v7255_v56  ;;  %v7286_v60 = vadd.f32 %v7234_v62, %v322_v47  ;;  %vm294_vm9 = vweird.f32 %v6699_v58  ;;  %v6611_v56 = vld [vmem:[%s9489_s6 + $0x8] sm:$0xff] }
 0x1bb   :  { %v242_v54 = vmul.f32 %v6697_v27, %v241_v51  ;;  %6700 = vrsqrt.f32 %v7269_v52  ;;  %v337_v16 = vpack.c.bf16 %v7298_v5, %v7298_v5  ;;  %vm295_vm11 = vmor %vm293_vm10, %vm294_vm9  ;;  %vm303_vm13 = vweird.f32 %v7269_v52  ;;  %v6619_v48 = vld [vmem:[%s9490_s7 + $0x8] sm:$0xff]  ;;  %v6621_v51 = vld [vmem:[%s9490_s7 + $0x18] sm:$0xff] }
 0x1bc   :  { %v286_v61 = vsel %vm285_vm6, %v6695_v24, %v282_v53  ;;  %v289_v49 = vmul.f32 %v6699_v58, %v288_v55  ;;  %v341_v11 = vpack.c.bf16 %v7286_v60, %v7286_v60  ;;  %812 = vmatpush.bf16.msra.mxu2 %v6621_v51  ;;  %v6625_v53 = vld [vmem:[%s9490_s7 + $0x38] sm:$0xff] }
 0x1bd   :  { %v312_v63 = vmul.f32 %v286_v61, %v7178_v8  ;;  %v246_v1 = vsel %vm245_vm8, %v6697_v27, %v242_v54  ;;  %v369_v27 = vunpack.c.l.b16 %v337_v16  ;;  %v6624_v54 = vld [vmem:[%s9490_s7 + $0x30] sm:$0xff] }
 0x1be   :  { %v308_v6 = vmul.f32 %v246_v1, %v7173_v3  ;;  %v290_v8 = vmul.f32 0.5, %v289_v49  ;;  %v373_v22 = vunpack.c.l.b16 %v341_v11 }
 0x1bf   :  { %v323_v7 = vmul.f32 %v7222_v50, %v312_v63 }
 0x1c0   :  { %v319_v9 = vmul.f32 %v7222_v50, %v308_v6  ;;  %v291_v13 = vsub.f32 1.5, %v290_v8  ;;  %813 = vmatpush.bf16.msra.mxu2 %v6620_v0 }
 0x1c1   :  { %v7306_v12 = vadd.f32 %v7234_v62, %v323_v7  ;;  %v6701_v14 = vpop.eup %6700 }
 0x1c2   :  { %v7311_v3 = vadd.f32 %v7234_v62, %v319_v9  ;;  %v292_v18 = vmul.f32 %v6699_v58, %v291_v13  ;;  %v298_v19 = vmul.f32 %v6701_v14, %v7269_v52  ;;  %vm304_vm12 = vweird.f32 %v6701_v14  ;;  %v6614_v52 = vld [vmem:[%s9489_s6 + $0x20] sm:$0xff] }
 0x1c3   :  { %v342_v17 = vpack.c.bf16 %v7306_v12, %v7306_v12  ;;  %vm305_vm14 = vmor %vm303_vm13, %vm304_vm12 }
 0x1c4   :  { %v338_v21 = vpack.c.bf16 %v7311_v3, %v7311_v3  ;;  %v296_v24 = vsel %vm295_vm11, %v6699_v58, %v292_v18  ;;  %v299_v26 = vmul.f32 %v6701_v14, %v298_v19  ;;  %v6618_v58 = vld [vmem:[%s9490_s7] sm:$0xff] }
 0x1c5   :  { %v374_v23 = vunpack.c.l.b16 %v342_v17  ;;  %v313_v29 = vmul.f32 %v296_v24, %v7187_v15 }
 0x1c6   :  { %v370_v28 = vunpack.c.l.b16 %v338_v21  ;;  %v300_v31 = vmul.f32 0.5, %v299_v26 }
 0x1c7   :  { %v7320_v30 = vpack.c.b16 %v374_v23, %v373_v22  ;;  %v324_v34 = vmul.f32 %v7222_v50, %v313_v29 }
 0x1c8   :  { %v7325_v32 = vpack.c.b16 %v370_v28, %v369_v27  ;;  %v301_v33 = vsub.f32 1.5, %v300_v31 }
 0x1c9   :  { %6073 = vmatmul.msk.bf16.gmra.mxu3 %vm131_vm2, %v7320_v30  ;;  %6085 = vmatmul.msk.bf16.gmra.mxu2 %vm131_vm2, %v7320_v30  ;;  %v7341_v37 = vadd.f32 %v7234_v62, %v324_v34 }
 0x1ca   :  { %6071 = vmatmul.msk.bf16.vlgmr.msra.gmra.mxu1 %vm131_vm2, %v7325_v32  ;;  %6107 = vmatmul.msk.bf16.vlgmr.msrb.gmra.mxu0 %vm131_vm2, %v7325_v32  ;;  %v302_v15 = vmul.f32 %v6701_v14, %v301_v33 }
 0x1cb   :  { %591 = vmatpush.bf16.msra.mxu1 %v6611_v56  ;;  %v343_v40 = vpack.c.bf16 %v7341_v37, %v7341_v37 }
 0x1cc   :  { %v306_v36 = vsel %vm305_vm14, %v6701_v14, %v302_v15 }
 0x1cd   :  { %v314_v38 = vmul.f32 %v306_v36, %v7193_v20  ;;  %v375_v44 = vunpack.c.l.b16 %v343_v40  ;;  %v6617_v20 = vld [vmem:[%s9489_s6 + $0x38] sm:$0xff] }
 0x1ce   :  { %714 = vmatpush.bf16.msra.mxu0 %v6617_v20 }
 0x1cf   :  { %592 = vmatpush.bf16.msra.mxu1 %v6610_v35  ;;  %v325_v39 = vmul.f32 %v7222_v50, %v314_v38  ;;  %v6616_v50 = vld [vmem:[%s9489_s6 + $0x30] sm:$0xff] }
 0x1d1   :  { %v7348_v41 = vadd.f32 %v7234_v62, %v325_v39  ;;  %v6615_v62 = vld [vmem:[%s9489_s6 + $0x28] sm:$0xff] }
 0x1d2   :  { %715 = vmatpush.bf16.msra.mxu0 %v6616_v50  ;;  %673 = vmatpush.bf16.msra.mxu3 %v6615_v62 }
 0x1d3   :  { %v344_v42 = vpack.c.bf16 %v7348_v41, %v7348_v41 }
 0x1d5   :  { %v376_v45 = vunpack.c.l.b16 %v344_v42 }
 0x1d6   :  { %674 = vmatpush.bf16.msra.mxu3 %v6614_v52  ;;  %894 = vmatpush.bf16.msrb.mxu0 %v6625_v53 }
 0x1d7   :  { %v7352_v47 = vpack.c.b16 %v376_v45, %v375_v44 }
 0x1d9   :  { %6074 = vmatmul.msk.bf16.gmra.mxu3 %vm131_vm2, %v7352_v47  ;;  %6086 = vmatmul.msk.bf16.gmra.mxu2 %vm131_vm2, %v7352_v47 }
 0x1da   :  { %6083 = vmatmul.msk.bf16.vlgmr.msrb.gmra.mxu1 %vm131_vm2, %v7325_v32  ;;  %6108 = vmatmul.msk.bf16.gmra.mxu0 %vm131_vm2, %v7265_v43 }
 0x1db   :  { %771 = vmatpush.bf16.msrb.mxu1 %v6619_v48  ;;  %895 = vmatpush.bf16.msrb.mxu0 %v6624_v54 }
 0x1df   :  { %772 = vmatpush.bf16.msrb.mxu1 %v6618_v58 }
 0x1e9   :  { %6095 = vmatmul.msk.bf16.vlgmr.msrb.gmra.mxu3 %vm131_vm2, %v7325_v32  ;;  %6131 = vmatmul.msk.bf16.vlgmr.msrb.gmra.mxu2 %vm131_vm2, %v7325_v32 }
 0x1ea   :  { %6119 = vmatmul.msk.bf16.vlgmr.msra.gmra.mxu1 %vm131_vm2, %v7325_v32  ;;  %6109 = vmatmul.msk.bf16.gmra.mxu0 %vm131_vm2, %v7320_v30 }
 0x1eb   :  { %853 = vmatpush.bf16.msrb.mxu3 %v6623_v59 }
 0x1ef   :  { %854 = vmatpush.bf16.msrb.mxu3 %v6622_v2 }
 0x1f9   :  { %6096 = vmatmul.msk.bf16.gmra.mxu3 %vm131_vm2, %v7265_v43  ;;  %6132 = vmatmul.msk.bf16.gmra.mxu2 %vm131_vm2, %v7265_v43 }
 0x1fa   :  { %6120 = vmatmul.msk.bf16.gmra.mxu1 %vm131_vm2, %v7265_v43  ;;  %6110 = vmatmul.msk.bf16.gmra.mxu0 %vm131_vm2, %v7352_v47 }
 0x209   :  { %6097 = vmatmul.msk.bf16.gmra.mxu3 %vm131_vm2, %v7320_v30  ;;  %6133 = vmatmul.msk.bf16.gmra.mxu2 %vm131_vm2, %v7320_v30 }
 0x20a   :  { %6121 = vmatmul.msk.bf16.gmra.mxu1 %vm131_vm2, %v7320_v30  ;;  %6155 = vmatmul.msk.bf16.vlgmr.msra.gmra.mxu0 %vm131_vm2, %v7325_v32 }
 0x219   :  { %6098 = vmatmul.msk.bf16.gmra.mxu3 %vm131_vm2, %v7352_v47  ;;  %6134 = vmatmul.msk.bf16.gmra.mxu2 %vm131_vm2, %v7352_v47 }
 0x21a   :  { %6122 = vmatmul.msk.bf16.gmra.mxu1 %vm131_vm2, %v7352_v47  ;;  %6156 = vmatmul.msk.bf16.gmra.mxu0 %vm131_vm2, %v7265_v43 }
 0x229   :  { %6143 = vmatmul.msk.bf16.vlgmr.msra.gmra.mxu3 %vm131_vm2, %v7325_v32  ;;  %6179 = vmatmul.msk.bf16.vlgmr.msra.gmra.mxu2 %vm131_vm2, %v7320_v30 }
 0x22a   :  { %6167 = vmatmul.msk.bf16.vlgmr.msrb.gmra.mxu1 %vm131_vm2, %v7320_v30  ;;  %6157 = vmatmul.msk.bf16.gmra.mxu0 %vm131_vm2, %v7320_v30 }
 0x239   :  { %6144 = vmatmul.msk.bf16.gmra.mxu3 %vm131_vm2, %v7265_v43  ;;  %6180 = vmatmul.msk.bf16.gmra.mxu2 %vm131_vm2, %v7352_v47 }
 0x23a   :  { %6168 = vmatmul.msk.bf16.gmra.mxu1 %vm131_vm2, %v7352_v47  ;;  %6158 = vmatmul.msk.bf16.gmra.mxu0 %vm131_vm2, %v7352_v47 }
 0x23c   :  { %v419_v55 = vpop.f32.mrf.mxu3  ;;  %v7440_v57 = vpop.f32.mrf.mxu2 }
 0x23d   :  { %v919_v61 = vpack.c.bf16 %v419_v55, %v419_v55 }
 0x23f   :  { %v7450_v4 = vunpack.c.l.b16 %v919_v61 }
 0x244   :  { %v421_v63 = vpop.f32.mrf.mxu3  ;;  %v7445_v1 = vpop.f32.mrf.mxu2 }
 0x245   :  { %v920_v49 = vpack.c.bf16 %v421_v63, %v421_v63 }
 0x247   :  { %v7452_v6 = vunpack.c.l.b16 %v920_v49  ;;  %v414_v7 = vpop.f32.mrf.mxu1  ;;  %v7454_v8 = vpop.f32.mrf.mxu0 }
 0x248   :  { %v917_v54 = vpack.c.bf16 %v414_v7, %v414_v7 }
 0x249   :  { %v1047_v9 = vpack.c.b16 %v7452_v6, %v7450_v4  ;;  %6145 = vmatmul.msk.bf16.gmra.mxu3 %vm131_vm2, %v7320_v30  ;;  %6181 = vmatmul.msk.bf16.gmra.mxu2 %vm131_vm2, %v7325_v32 }
 0x24a   :  { %6169 = vmatmul.msk.bf16.gmra.mxu1 %vm131_vm2, %v7325_v32  ;;  %6203 = vmatmul.msk.bf16.vlgmr.msrb.gmra.mxu0 %vm131_vm2, %v7320_v30 }
 0x24c   :  { %v424_v11 = vpop.f32.mrf.mxu3  ;;  %v7466_v13 = vpop.f32.mrf.mxu2 }
 0x24d   :  { %v921_v17 = vpack.c.bf16 %v424_v11, %v424_v11  ;;  %v1015_v11 = vunpack.c.l.b16 %v917_v54 }
 0x24f   :  { %v416_v14 = vpop.f32.mrf.mxu1  ;;  %v7468_v16 = vpop.f32.mrf.mxu0  ;;  %v7472_v22 = vunpack.c.l.b16 %v921_v17 }
 0x250   :  { %v918_v52 = vpack.c.bf16 %v416_v14, %v416_v14 }
 0x252   :  { %v1016_v63 = vunpack.c.l.b16 %v918_v52 }
 0x254   :  { %v426_v18 = vpop.f32.mrf.mxu3  ;;  %v7470_v19 = vpop.f32.mrf.mxu2 }
 0x255   :  { %v922_v21 = vpack.c.bf16 %v426_v18, %v426_v18  ;;  %v1017_v18 = vpack.c.b16 %v1016_v63, %v1015_v11 }
 0x257   :  { %v7474_v23 = vunpack.c.l.b16 %v922_v21  ;;  %v7476_v24 = vpop.f32.mrf.mxu1  ;;  %v7488_v27 = vpop.f32.mrf.mxu0 }
 0x259   :  { %v1077_v26 = vpack.c.b16 %v7474_v23, %v7472_v22  ;;  %6146 = vmatmul.msk.bf16.gmra.mxu3 %vm131_vm2, %v7352_v47  ;;  %6182 = vmatmul.msk.bf16.gmra.mxu2 %vm131_vm2, %v7265_v43 }
 0x25a   :  { %6170 = vmatmul.msk.bf16.gmra.mxu1 %vm131_vm2, %v7265_v43  ;;  %6204 = vmatmul.msk.bf16.gmra.mxu0 %vm131_vm2, %v7352_v47 }
 0x25c   :  { %v429_v28 = vpop.f32.mrf.mxu3  ;;  %v7490_v29 = vpop.f32.mrf.mxu2 }
 0x25d   :  { %v923_v56 = vpack.c.bf16 %v429_v28, %v429_v28 }
 0x25f   :  { %v7492_v31 = vpop.f32.mrf.mxu1  ;;  %v7494_v34 = vpop.f32.mrf.mxu0  ;;  %v7498_v38 = vunpack.c.l.b16 %v923_v56 }
 0x264   :  { %v431_v33 = vpop.f32.mrf.mxu3  ;;  %v7496_v35 = vpop.f32.mrf.mxu2 }
 0x265   :  { %v924_v15 = vpack.c.bf16 %v431_v33, %v431_v33 }
 0x267   :  { %v594_v36 = vpop.f32.mrf.mxu1  ;;  %v7500_v39 = vunpack.c.l.b16 %v924_v15  ;;  %v7508_v50 = vpop.f32.mrf.mxu0 }
 0x268   :  { %v949_v44 = vpack.c.bf16 %v594_v36, %v594_v36 }
 0x269   :  { %v1107_v40 = vpack.c.b16 %v7500_v39, %v7498_v38  ;;  %6191 = vmatmul.msk.bf16.vlgmr.msrb.gmra.mxu3 %vm131_vm2, %v7320_v30 }
 0x26a   :  { %6205 = vmatmul.msk.bf16.gmra.mxu0 %vm131_vm2, %v7325_v32  ;;  %v1020_v48 = vunpack.c.l.b16 %v949_v44 }
 0x26c   :  { %v496_v42 = vpop.f32.mrf.mxu3  ;;  %v635_v45 = vpop.f32.mrf.mxu2 }
 0x26d   :  { %v933_v58 = vpack.c.bf16 %v496_v42, %v496_v42  ;;  %v957_v21 = vpack.c.bf16 %v635_v45, %v635_v45 }
 0x26f   :  { %v596_v20 = vpop.f32.mrf.mxu1  ;;  %v7511_v49 = vunpack.c.l.b16 %v933_v58  ;;  %v7515_v17 = vpop.f32.mrf.mxu0  ;;  %v1140_v44 = vunpack.c.l.b16 %v957_v21 }
 0x270   :  { %v950_v62 = vpack.c.bf16 %v596_v20, %v596_v20 }
 0x272   :  { %v1021_v51 = vunpack.c.l.b16 %v950_v62 }
 0x274   :  { %v1022_v0 = vpack.c.b16 %v1021_v51, %v1020_v48  ;;  %v498_v53 = vpop.f32.mrf.mxu3  ;;  %v637_v59 = vpop.f32.mrf.mxu2 }
 0x275   :  { %v934_v55 = vpack.c.bf16 %v498_v53, %v498_v53  ;;  %v958_v7 = vpack.c.bf16 %v637_v59, %v637_v59 }
 0x276   :  { %v1027_v30 = vsel %vm73_vm1, %v1022_v0, 0 }
 0x277   :  { %v599_v61 = vpop.f32.mrf.mxu1  ;;  %1036 = vmatpush.bf16.xpose.msra.mxu1 %v1027_v30  ;;  %v7513_v2 = vunpack.c.l.b16 %v934_v55  ;;  %v1141_v15 = vunpack.c.l.b16 %v958_v7  ;;  %v7524_v51 = vpop.f32.mrf.mxu0 }
 0x278   :  { %v951_v56 = vpack.c.bf16 %v599_v61, %v599_v61 }
 0x279   :  { %v1257_v14 = vpack.c.b16 %v7513_v2, %v7511_v49  ;;  %6192 = vmatmul.msk.bf16.gmra.mxu3 %vm131_vm2, %v7352_v47  ;;  %v1142_v48 = vpack.c.b16 %v1141_v15, %v1140_v44 }
 0x27a   :  { %6206 = vmatmul.msk.bf16.gmra.mxu0 %vm131_vm2, %v7265_v43  ;;  %v1050_v20 = vunpack.c.l.b16 %v951_v56 }
 0x27b   :  { %v1147_v55 = vsel %vm73_vm1, %v1142_v48, 0 }
 0x27c   :  { %v501_v28 = vpop.f32.mrf.mxu3  ;;  %v640_v33 = vpop.f32.mrf.mxu2 }
 0x27d   :  { %v935_v47 = vpack.c.bf16 %v501_v28, %v501_v28  ;;  %v959_v11 = vpack.c.bf16 %v640_v33, %v640_v33 }
 0x27e   :  { %6207 = vmatmul.msk.bf16.vlgmr.msra.gmra.mxu1 %vm73_vm1, %v1017_v18 }
 0x27f   :  { %v601_v36 = vpop.f32.mrf.mxu1  ;;  %v7528_v59 = vunpack.c.l.b16 %v935_v47  ;;  %v7536_v18 = vpop.f32.mrf.mxu0 }
 0x280   :  { %v952_v42 = vpack.c.bf16 %v601_v36, %v601_v36 }
 0x282   :  { %v1051_v62 = vunpack.c.l.b16 %v952_v42  ;;  %v1170_v42 = vunpack.c.l.b16 %v959_v11 }
 0x284   :  { %v1052_v52 = vpack.c.b16 %v1051_v62, %v1050_v20  ;;  %v503_v58 = vpop.f32.mrf.mxu3  ;;  %v642_v53 = vpop.f32.mrf.mxu2 }
 0x285   :  { %v936_v0 = vpack.c.bf16 %v503_v58, %v503_v58  ;;  %v960_v63 = vpack.c.bf16 %v642_v53, %v642_v53 }
 0x286   :  { %v1057_v45 = vsel %vm73_vm1, %v1052_v52, 0  ;;  %v925_v52 = vpack.c.bf16 %v7476_v24, %v7476_v24 }
 0x287   :  { %v604_v54 = vpop.f32.mrf.mxu1  ;;  %1066 = vmatpush.bf16.xpose.msrb.mxu2 %v1057_v45  ;;  %v7530_v30 = vunpack.c.l.b16 %v936_v0  ;;  %v1171_v56 = vunpack.c.l.b16 %v960_v63  ;;  %v7548_v45 = vpop.f32.mrf.mxu0 }
 0x288   :  { %v953_v21 = vpack.c.bf16 %v604_v54, %v604_v54 }
 0x289   :  { %v1287_v61 = vpack.c.b16 %v7530_v30, %v7528_v59  ;;  %6193 = vmatmul.msk.bf16.gmra.mxu3 %vm131_vm2, %v7325_v32  ;;  %v1172_v62 = vpack.c.b16 %v1171_v56, %v1170_v42  ;;  %v926_v32 = vpack.c.bf16 %v7492_v31, %v7492_v31 }
 0x28a   :  { %v1080_v44 = vunpack.c.l.b16 %v953_v21 }
 0x28b   :  { %v1177_v0 = vsel %vm73_vm1, %v1172_v62, 0  ;;  %v1136_v53 = vunpack.c.l.b16 %v926_v32 }
 0x28c   :  { %v506_v7 = vpop.f32.mrf.mxu3  ;;  %v645_v28 = vpop.f32.mrf.mxu2 }
 0x28d   :  { %v937_v33 = vpack.c.bf16 %v506_v7, %v506_v7  ;;  %v961_v7 = vpack.c.bf16 %v645_v28, %v645_v28 }
 0x28e   :  { %6208 = vmatmul.msk.bf16.vlgmr.msrb.gmra.mxu2 %vm73_vm1, %v1047_v9 }
 0x28f   :  { %1156 = vmatpush.bf16.xpose.msra.mxu2 %v1147_v55  ;;  %v606_v15 = vpop.f32.mrf.mxu1  ;;  %v7550_v54 = vunpack.c.l.b16 %v937_v33  ;;  %v1135_v55 = vunpack.c.l.b16 %v925_v52  ;;  %v7561_v62 = vpop.f32.mrf.mxu0 }
 0x290   :  { %v954_v36 = vpack.c.bf16 %v606_v15, %v606_v15 }
 0x291   :  { %v1137_v11 = vpack.c.b16 %v1136_v53, %v1135_v55  ;;  %v932_v55 = vpack.c.bf16 %v7496_v35, %v7496_v35 }
 0x292   :  { %v1081_v20 = vunpack.c.l.b16 %v954_v36 }
 0x293   :  { %v1226_v22 = vunpack.c.l.b16 %v932_v55 }
 0x294   :  { %v1082_v48 = vpack.c.b16 %v1081_v20, %v1080_v44  ;;  %v508_v47 = vpop.f32.mrf.mxu3  ;;  %v647_v4 = vpop.f32.mrf.mxu2  ;;  %v1200_v20 = vunpack.c.l.b16 %v961_v7  ;;  %v931_v7 = vpack.c.bf16 %v7490_v29, %v7490_v29  ;;  %v927_v29 = vpack.c.bf16 %v7440_v57, %v7440_v57 }
 0x295   :  { %v938_v58 = vpack.c.bf16 %v508_v47, %v508_v47  ;;  %v962_v63 = vpack.c.bf16 %v647_v4, %v647_v4 }
 0x296   :  { %v1087_v6 = vsel %vm73_vm1, %v1082_v48, 0 }
 0x297   :  { %v609_v9 = vpop.f32.mrf.mxu1  ;;  %1096 = vmatpush.bf16.xpose.msra.mxu3 %v1087_v6  ;;  %v7552_v31 = vunpack.c.l.b16 %v938_v58  ;;  %v1201_v36 = vunpack.c.l.b16 %v962_v63 }
 0x298   :  { %v955_v56 = vpack.c.bf16 %v609_v9, %v609_v9 }
 0x299   :  { %v1317_v24 = vpack.c.b16 %v7552_v31, %v7550_v54  ;;  %6194 = vmatmul.msk.bf16.gmra.mxu3 %vm131_vm2, %v7265_v43  ;;  %v1202_v48 = vpack.c.b16 %v1201_v36, %v1200_v20 }
 0x29a   :  { %v1110_v32 = vunpack.c.l.b16 %v955_v56 }
 0x29b   :  { %v1207_v9 = vsel %vm73_vm1, %v1202_v48, 0 }
 0x29c   :  { %v7558_v21 = vpop.f32.mrf.mxu3  ;;  %v650_v15 = vpop.f32.mrf.mxu2 }
 0x29d   :  { %v963_v43 = vpack.c.bf16 %v650_v15, %v650_v15 }
 0x29e   :  { %6211 = vmatmul.msk.bf16.vlgmr.msra.gmra.mxu2 %vm73_vm1, %v1137_v11  ;;  %v7573_v11 = vpop.f32.mrf.mxu0 }
 0x29f   :  { %1186 = vmatpush.bf16.xpose.msrb.mxu3 %v1177_v0  ;;  %v611_v42 = vpop.f32.mrf.mxu1  ;;  %v1230_v0 = vunpack.c.l.b16 %v963_v43 }
 0x2a0   :  { %v956_v44 = vpack.c.bf16 %v611_v42, %v611_v42 }
 0x2a2   :  { %v1111_v33 = vunpack.c.l.b16 %v956_v44  ;;  %v1225_v44 = vunpack.c.l.b16 %v931_v7 }
 0x2a4   :  { %v1112_v47 = vpack.c.b16 %v1111_v33, %v1110_v32  ;;  %v7563_v52 = vpop.f32.mrf.mxu3  ;;  %v652_v28 = vpop.f32.mrf.mxu2  ;;  %v1227_v33 = vpack.c.b16 %v1226_v22, %v1225_v44  ;;  %v973_v44 = vpack.c.bf16 %v7548_v45, %v7548_v45 }
 0x2a5   :  { %v964_v4 = vpack.c.bf16 %v652_v28, %v652_v28  ;;  %v1165_v28 = vunpack.c.l.b16 %v927_v29  ;;  %v940_v54 = vpack.c.bf16 %v7563_v52, %v7563_v52  ;;  %v945_v52 = vpack.c.bf16 %v7508_v50, %v7508_v50 }
 0x2a6   :  { %v1117_v58 = vsel %vm73_vm1, %v1112_v47, 0  ;;  %v930_v47 = vpack.c.bf16 %v7470_v19, %v7470_v19 }
 0x2a7   :  { %v774_v6 = vpop.f32.mrf.mxu1  ;;  %1126 = vmatpush.bf16.xpose.msrb.mxu1 %v1117_v58  ;;  %v1231_v53 = vunpack.c.l.b16 %v964_v4  ;;  %v724_v58 = vpop.f32.mrf.mxu0 }
 0x2a8   :  { %v981_v36 = vpack.c.bf16 %v774_v6, %v774_v6 }
 0x2a9   :  { %6209 = vmatmul.msk.bf16.vlgmr.msra.gmra.mxu3 %vm73_vm1, %v1077_v26  ;;  %v1232_v63 = vpack.c.b16 %v1231_v53, %v1230_v0  ;;  %v928_v26 = vpack.c.bf16 %v7445_v1, %v7445_v1  ;;  %v929_v1 = vpack.c.bf16 %v7466_v13, %v7466_v13  ;;  %v1196_v53 = vunpack.c.l.b16 %v930_v47 }
 0x2aa   :  { %v1885_v20 = vunpack.c.l.b16 %v981_v36  ;;  %v1380_v47 = vunpack.c.l.b16 %v973_v44 }
 0x2ab   :  { %v1237_v15 = vsel %vm73_vm1, %v1232_v63, 0  ;;  %v1166_v48 = vunpack.c.l.b16 %v928_v26  ;;  %v974_v26 = vpack.c.bf16 %v7561_v62, %v7561_v62 }
 0x2ac   :  { %v676_v56 = vpop.f32.mrf.mxu3  ;;  %v815_v42 = vpop.f32.mrf.mxu2  ;;  %1246 = vmatpush.bf16.xpose.msrb.mxu2 %v1237_v15 }
 0x2ad   :  { %v965_v38 = vpack.c.bf16 %v676_v56, %v676_v56  ;;  %v1167_v0 = vpack.c.b16 %v1166_v48, %v1165_v28  ;;  %v1195_v56 = vunpack.c.l.b16 %v929_v1  ;;  %v975_v28 = vpack.c.bf16 %v7573_v11, %v7573_v11 }
 0x2ae   :  { %6210 = vmatmul.msk.bf16.vlgmr.msrb.gmra.mxu1 %vm73_vm1, %v1107_v40  ;;  %v989_v40 = vpack.c.bf16 %v815_v42, %v815_v42 }
 0x2af   :  { %1216 = vmatpush.bf16.xpose.msra.mxu1 %v1207_v9  ;;  %v776_v23 = vpop.f32.mrf.mxu1  ;;  %v1260_v19 = vunpack.c.l.b16 %v965_v38  ;;  %v1197_v42 = vpack.c.b16 %v1196_v53, %v1195_v56  ;;  %v976_v38 = vpack.c.bf16 %v724_v58, %v724_v58 }
 0x2b0   :  { %v982_v35 = vpack.c.bf16 %v776_v23, %v776_v23  ;;  %v1997_v63 = vunpack.c.l.b16 %v989_v40  ;;  %v727_v23 = vpop.f32.mrf.mxu0 }
 0x2b2   :  { %v1886_v32 = vunpack.c.l.b16 %v982_v35 }
 0x2b3   :  { %6214 = vmatmul.msk.bf16.vlgmr.msrb.gmra.mxu2 %vm73_vm1, %v1227_v33 }
 0x2b4   :  { %v1887_v39 = vpack.c.b16 %v1886_v32, %v1885_v20  ;;  %v678_v43 = vpop.f32.mrf.mxu3  ;;  %v817_v57 = vpop.f32.mrf.mxu2  ;;  %v1381_v20 = vunpack.c.l.b16 %v974_v26 }
 0x2b5   :  { %v966_v4 = vpack.c.bf16 %v678_v43, %v678_v43  ;;  %v990_v6 = vpack.c.bf16 %v817_v57, %v817_v57 }
 0x2b6   :  { %1899 = vmatpush.bf16.msra.mxu0 %v1887_v39  ;;  %v1382_v43 = vpack.c.b16 %v1381_v20, %v1380_v47 }
 0x2b7   :  { %v7591_v9 = vpop.f32.mrf.mxu1  ;;  %v1261_v55 = vunpack.c.l.b16 %v966_v4  ;;  %v1998_v7 = vunpack.c.l.b16 %v990_v6  ;;  %v1411_v4 = vunpack.c.l.b16 %v976_v38 }
 0x2b8   :  { %v729_v1 = vpop.f32.mrf.mxu0  ;;  %v1387_v58 = vsel %vm73_vm1, %v1382_v43, 0  ;;  %v983_v20 = vpack.c.bf16 %v7591_v9, %v7591_v9 }
 0x2b9   :  { %v1262_v15 = vpack.c.b16 %v1261_v55, %v1260_v19  ;;  %6212 = vmatmul.msk.bf16.vlgmr.msrb.gmra.mxu3 %vm73_vm1, %v1167_v0  ;;  %v1999_v36 = vpack.c.b16 %v1998_v7, %v1997_v63  ;;  %v1410_v0 = vunpack.c.l.b16 %v975_v28  ;;  %v978_v11 = vpack.c.bf16 %v729_v1, %v729_v1 }
 0x2ba   :  { %v977_v55 = vpack.c.bf16 %v727_v23, %v727_v23  ;;  %v942_v23 = vpack.c.bf16 %v7468_v16, %v7468_v16  ;;  %v1913_v28 = vunpack.c.l.b16 %v983_v20 }
 0x2bb   :  { %v1267_v13 = vsel %vm73_vm1, %v1262_v15, 0  ;;  %2011 = vmatpush.bf16.msrb.mxu0 %v1999_v36  ;;  %v1412_v53 = vpack.c.b16 %v1411_v4, %v1410_v0  ;;  %v1441_v2 = vunpack.c.l.b16 %v978_v11 }
 0x2bc   :  { %v681_v22 = vpop.f32.mrf.mxu3  ;;  %1276 = vmatpush.bf16.xpose.msra.mxu3 %v1267_v13  ;;  %v7600_v33 = vpop.f32.mrf.mxu2  ;;  %v1440_v36 = vunpack.c.l.b16 %v977_v55  ;;  %v1376_v38 = vunpack.c.l.b16 %v942_v23 }
 0x2bd   :  { %v967_v29 = vpack.c.bf16 %v681_v22, %v681_v22  ;;  %v1417_v49 = vsel %vm73_vm1, %v1412_v53, 0 }
 0x2be   :  { %6213 = vmatmul.msk.bf16.vlgmr.msra.gmra.mxu1 %vm73_vm1, %v1197_v42  ;;  %v1442_v22 = vpack.c.b16 %v1441_v2, %v1440_v36  ;;  %v944_v2 = vpack.c.bf16 %v7494_v34, %v7494_v34 }
 0x2bf   :  { %v781_v35 = vpop.f32.mrf.mxu1  ;;  %v1290_v39 = vunpack.c.l.b16 %v967_v29 }
 0x2c0   :  { %v732_v63 = vpop.f32.mrf.mxu0  ;;  %v984_v59 = vpack.c.bf16 %v781_v35, %v781_v35  ;;  %v1447_v47 = vsel %vm73_vm1, %v1442_v22, 0  ;;  %v1406_v22 = vunpack.c.l.b16 %v944_v2 }
 0x2c1   :  { %v979_v4 = vpack.c.bf16 %v732_v63, %v732_v63 }
 0x2c3   :  { %v1470_v11 = vunpack.c.l.b16 %v979_v4  ;;  %v947_v4 = vpack.c.bf16 %v7524_v51, %v7524_v51 }
 0x2c4   :  { %v683_v32 = vpop.f32.mrf.mxu3  ;;  %v7610_v19 = vpop.f32.mrf.mxu2 }
 0x2c5   :  { %v968_v48 = vpack.c.bf16 %v683_v32, %v683_v32 }
 0x2c7   :  { %v1291_v40 = vunpack.c.l.b16 %v968_v48  ;;  %v784_v45 = vpop.f32.mrf.mxu1 }
 0x2c8   :  { %v985_v32 = vpack.c.bf16 %v784_v45, %v784_v45  ;;  %v734_v16 = vpop.f32.mrf.mxu0 }
 0x2c9   :  { %v1292_v62 = vpack.c.b16 %v1291_v40, %v1290_v39  ;;  %6215 = vmatmul.msk.bf16.vlgmr.msra.gmra.mxu3 %vm73_vm1, %v1257_v14  ;;  %v1914_v39 = vunpack.c.l.b16 %v984_v59  ;;  %v980_v1 = vpack.c.bf16 %v734_v16, %v734_v16 }
 0x2cb   :  { %v1297_v57 = vsel %vm73_vm1, %v1292_v62, 0 }
 0x2cc   :  { %v686_v6 = vpop.f32.mrf.mxu3  ;;  %1306 = vmatpush.bf16.xpose.msrb.mxu1 %v1297_v57  ;;  %v7619_v26 = vpop.f32.mrf.mxu2  ;;  %v1915_v57 = vpack.c.b16 %v1914_v39, %v1913_v28 }
 0x2cd   :  { %v969_v7 = vpack.c.bf16 %v686_v6, %v686_v6 }
 0x2cf   :  { %v786_v14 = vpop.f32.mrf.mxu1  ;;  %v1320_v42 = vunpack.c.l.b16 %v969_v7 }
 0x2d0   :  { %v986_v30 = vpack.c.bf16 %v786_v14, %v786_v14  ;;  %v946_v14 = vpack.c.bf16 %v7515_v17, %v7515_v17 }
 0x2d2   :  { %v1942_v40 = vunpack.c.l.b16 %v986_v30  ;;  %v1436_v59 = vunpack.c.l.b16 %v946_v14 }
 0x2d3   :  { %6216 = vmatmul.msk.bf16.vlgmr.msrb.gmra.mxu1 %vm73_vm1, %v1287_v61  ;;  %v941_v61 = vpack.c.bf16 %v7454_v8, %v7454_v8  ;;  %v1941_v8 = vunpack.c.l.b16 %v985_v32 }
 0x2d4   :  { %1396 = vmatpush.bf16.xpose.msra.mxu1 %v1387_v58  ;;  %v688_v56 = vpop.f32.mrf.mxu3  ;;  %v827_v9 = vpop.f32.mrf.mxu2  ;;  %v1471_v58 = vunpack.c.l.b16 %v980_v1  ;;  %v948_v1 = vpack.c.bf16 %v7536_v18, %v7536_v18 }
 0x2d5   :  { %v970_v15 = vpack.c.bf16 %v688_v56, %v688_v56  ;;  %v1375_v43 = vunpack.c.l.b16 %v941_v61  ;;  %v1943_v6 = vpack.c.b16 %v1942_v40, %v1941_v8  ;;  %v992_v56 = vpack.c.bf16 %v7610_v19, %v7610_v19 }
 0x2d6   :  { %v1472_v63 = vpack.c.b16 %v1471_v58, %v1470_v11  ;;  %v994_v36 = vpack.c.bf16 %v827_v9, %v827_v9  ;;  %v1346_v19 = vunpack.c.l.b16 %v940_v54 }
 0x2d7   :  { %v1321_v13 = vunpack.c.l.b16 %v970_v15  ;;  %v789_v35 = vpop.f32.mrf.mxu1  ;;  %v1377_v62 = vpack.c.b16 %v1376_v38, %v1375_v43  ;;  %v939_v15 = vpack.c.bf16 %v7558_v21, %v7558_v21  ;;  %v993_v21 = vpack.c.bf16 %v7619_v26, %v7619_v26 }
 0x2d8   :  { %v1477_v17 = vsel %vm73_vm1, %v1472_v63, 0  ;;  %v987_v23 = vpack.c.bf16 %v789_v35, %v789_v35  ;;  %v2026_v30 = vunpack.c.l.b16 %v992_v56 }
 0x2d9   :  { %v1322_v44 = vpack.c.b16 %v1321_v13, %v1320_v42  ;;  %v991_v13 = vpack.c.bf16 %v7600_v33, %v7600_v33  ;;  %v1345_v50 = vunpack.c.l.b16 %v939_v15  ;;  %v1435_v33 = vunpack.c.l.b16 %v945_v52 }
 0x2da   :  { %v2053_v38 = vunpack.c.l.b16 %v993_v21  ;;  %v1969_v16 = vunpack.c.l.b16 %v987_v23 }
 0x2db   :  { %v1327_v29 = vsel %vm73_vm1, %v1322_v44, 0  ;;  %v2025_v32 = vunpack.c.l.b16 %v991_v13  ;;  %v1437_v39 = vpack.c.b16 %v1436_v59, %v1435_v33 }
 0x2dc   :  { %1426 = vmatpush.bf16.xpose.msrb.mxu1 %v1417_v49  ;;  %v691_v48 = vpop.f32.mrf.mxu3  ;;  %1336 = vmatpush.bf16.xpose.msra.mxu2 %v1327_v29  ;;  %v830_v44 = vpop.f32.mrf.mxu2  ;;  %v2054_v29 = vunpack.c.l.b16 %v994_v36 }
 0x2dd   :  { %v971_v45 = vpack.c.bf16 %v691_v48, %v691_v48  ;;  %v2027_v40 = vpack.c.b16 %v2026_v30, %v2025_v32 }
 0x2de   :  { %v2055_v43 = vpack.c.b16 %v2054_v29, %v2053_v38 }
 0x2df   :  { %v1350_v55 = vunpack.c.l.b16 %v971_v45  ;;  %v791_v49 = vpop.f32.mrf.mxu1  ;;  %v1466_v45 = vunpack.c.l.b16 %v948_v1 }
 0x2e0   :  { %v988_v42 = vpack.c.bf16 %v791_v49, %v791_v49 }
 0x2e2   :  { %v1970_v20 = vunpack.c.l.b16 %v988_v42 }
 0x2e3   :  { %6217 = vmatmul.msk.bf16.vlgmr.msra.gmra.mxu2 %vm73_vm1, %v1317_v24  ;;  %6219 = vmatmul.msk.bf16.vlgmr.msra.gmra.mxu1 %vm73_vm1, %v1377_v62  ;;  %v943_v24 = vpack.c.bf16 %v7488_v27, %v7488_v27 }
 0x2e4   :  { %1456 = vmatpush.bf16.xpose.msrb.mxu2 %v1447_v47  ;;  %1927 = vmatpush.bf16.msra.mxu1 %v1915_v57  ;;  %v693_v0 = vpop.f32.mrf.mxu3  ;;  %v1347_v47 = vpack.c.b16 %v1346_v19, %v1345_v50  ;;  %v1971_v28 = vpack.c.b16 %v1970_v20, %v1969_v16  ;;  %v832_v35 = vpop.f32.mrf.mxu2 }
 0x2e5   :  { %v972_v53 = vpack.c.bf16 %v693_v0, %v693_v0  ;;  %v1405_v61 = vunpack.c.l.b16 %v943_v24  ;;  %v996_v8 = vpack.c.bf16 %v832_v35, %v832_v35  ;;  %v1465_v0 = vunpack.c.l.b16 %v947_v4 }
 0x2e7   :  { %v1351_v7 = vunpack.c.l.b16 %v972_v53  ;;  %v1407_v48 = vpack.c.b16 %v1406_v22, %v1405_v61  ;;  %v2082_v58 = vunpack.c.l.b16 %v996_v8  ;;  %v1467_v11 = vpack.c.b16 %v1466_v45, %v1465_v0 }
 0x2e9   :  { %v1352_v31 = vpack.c.b16 %v1351_v7, %v1350_v55 }
 0x2eb   :  { %v1357_v34 = vsel %vm73_vm1, %v1352_v31, 0 }
 0x2ec   :  { %1955 = vmatpush.bf16.msra.mxu2 %v1943_v6  ;;  %v7649_v27 = vpop.f32.mrf.mxu3  ;;  %1366 = vmatpush.bf16.xpose.msrb.mxu3 %v1357_v34  ;;  %v995_v6 = vpack.c.bf16 %v830_v44, %v830_v44 }
 0x2ee   :  { %v2081_v53 = vunpack.c.l.b16 %v995_v6 }
 0x2f0   :  { %v2083_v55 = vpack.c.b16 %v2082_v58, %v2081_v53 }
 0x2f3   :  { %6218 = vmatmul.msk.bf16.vlgmr.msrb.gmra.mxu3 %vm73_vm1, %v1347_v47  ;;  %6220 = vmatmul.msk.bf16.vlgmr.msrb.gmra.mxu1 %vm73_vm1, %v1407_v48 }
 0x2f4   :  { %1486 = vmatpush.bf16.xpose.msra.mxu3 %v1477_v17  ;;  %6221 = vmatmul.msk.bf16.vlgmr.msrb.gmra.mxu2 %vm73_vm1, %v1437_v39  ;;  %v7657_v26 = vpop.f32.mrf.mxu3 }
 0x2f5   :  { %2039 = vmatpush.bf16.msrb.mxu1 %v2027_v40  ;;  %2067 = vmatpush.bf16.msrb.mxu2 %v2055_v43 }
 0x2fb   :  { %v7661_v62 = vpop.f32.mrf.mxu1 }
 0x2fc   :  { %1983 = vmatpush.bf16.msrb.mxu3 %v1971_v28  ;;  %v1494_v57 = vsel %vm1493_vm15, %v7661_v62, -inf  ;;  %v7667_v9 = vpop.f32.mrf.mxu3 }
 0x2fd   :  { %1495 = vmax.xlane.f32.xlu1 %v1494_v57 }
 0x303   :  { %v7669_v18 = vpop.f32.mrf.mxu1  ;;  %6222 = vmatmul.msk.bf16.vlgmr.msra.gmra.mxu3 %vm73_vm1, %v1467_v11 }
 0x304   :  { %v1497_v51 = vsel %vm1493_vm15, %v7669_v18, -inf  ;;  %2095 = vmatpush.bf16.msra.mxu3 %v2083_v55  ;;  %v7674_v7 = vpop.f32.mrf.mxu3 }
 0x305   :  { %1498 = vmax.xlane.f32.xlu2 %v1497_v51 }
 0x30c   :  { %v7676_v63 = vpop.f32.mrf.mxu3 }
 0x311   :  { %v7678_v49 = vpop.f32.mrf.mxu2 }
 0x312   :  { %v1500_v2 = vsel %vm1493_vm15, %v7678_v49, -inf }
 0x313   :  { %1501 = vmax.xlane.f32.xlu0 %v1500_v2 }
 0x314   :  { %v7682_v54 = vpop.f32.mrf.mxu3 }
 0x319   :  { %v7684_v31 = vpop.f32.mrf.mxu2 }
 0x31a   :  { %v1503_v24 = vsel %vm1493_vm15, %v7684_v31, -inf }
 0x31b   :  { %1504 = vmax.xlane.f32.xlu1 %v1503_v24 }
 0x31c   :  { %v7688_v14 = vpop.f32.mrf.mxu3 }
 0x321   :  { %v7690_v56 = vpop.f32.mrf.mxu2 }
 0x322   :  { %v1518_v15 = vsel %vm1493_vm15, %v7690_v56, -inf }
 0x323   :  { %1519 = vmax.xlane.f32.xlu2 %v1518_v15 }
 0x324   :  { %v7694_v36 = vpop.f32.mrf.mxu3 }
 0x329   :  { %v7696_v42 = vpop.f32.mrf.mxu2 }
 0x32a   :  { %v1521_v34 = vsel %vm1493_vm15, %v7696_v42, -inf }
 0x32b   :  { %1522 = vmax.xlane.f32.xlu0 %v1521_v34  ;;  %v7700_v52 = vpop.f32.mrf.mxu1 }
 0x32c   :  { %v1512_v13 = vsel %vm1493_vm15, %v7700_v52, -inf  ;;  %v7704_v17 = vpop.f32.mrf.mxu3 }
 0x32d   :  { %1513 = vmax.xlane.f32.xlu1 %v1512_v13  ;;  %v1506_v16 = vsel %vm1493_vm15, %v7704_v17, -inf }
 0x333   :  { %v7706_v22 = vpop.f32.mrf.mxu1 }
 0x334   :  { %v1515_v19 = vsel %vm1493_vm15, %v7706_v22, -inf  ;;  %v7710_v21 = vpop.f32.mrf.mxu3 }
 0x335   :  { %1516 = vmax.xlane.f32.xlu2 %v1515_v19  ;;  %v1509_v44 = vsel %vm1493_vm15, %v7710_v21, -inf }
 0x336   :  { %v7720_v61 = vpop.f32.mrf.mxu2 }
 0x337   :  { %v1536_v29 = vsel %vm1493_vm15, %v7720_v61, -inf }
 0x33b   :  { %v7712_v23 = vpop.f32.mrf.mxu1 }
 0x33c   :  { %v1530_v59 = vsel %vm1493_vm15, %v7712_v23, -inf  ;;  %v7718_v30 = vpop.f32.mrf.mxu3 }
 0x33d   :  { %1510 = vmax.xlane.f32.xlu2 %v1509_v44  ;;  %1531 = vmax.xlane.f32.xlu0 %v1530_v59  ;;  %v1524_v20 = vsel %vm1493_vm15, %v7718_v30, -inf }
 0x33e   :  { %v7732_v48 = vpop.f32.mrf.mxu2 }
 0x33f   :  { %v1539_v47 = vsel %vm1493_vm15, %v7732_v48, -inf }
 0x343   :  { %v7722_v50 = vpop.f32.mrf.mxu1 }
 0x344   :  { %v1533_v33 = vsel %vm1493_vm15, %v7722_v50, -inf  ;;  %v7730_v32 = vpop.f32.mrf.mxu3 }
 0x345   :  { %1537 = vmax.xlane.f32.xlu2 %v1536_v29  ;;  %1525 = vmax.xlane.f32.xlu0 %v1524_v20  ;;  %v1527_v28 = vsel %vm1493_vm15, %v7730_v32, -inf }
 0x346   :  { %1534 = vmax.xlane.f32.xlu1 %v1533_v33 }
 0x34c   :  { %v7736_v38 = vpop.f32.mrf.mxu3 }
 0x34d   :  { %1540 = vmax.xlane.f32.xlu0 %v1539_v47  ;;  %v1542_v39 = vsel %vm1493_vm15, %v7736_v38, -inf }
 0x34e   :  { %1507 = vmax.xlane.f32.xlu1 %v1506_v16  ;;  %1543 = vmax.xlane.f32.xlu2 %v1542_v39 }
 0x350   :  { %v7742_v40 = vpop.f32.mrf.mxu1 }
 0x351   :  { %v1548_v1 = vsel %vm1493_vm15, %v7742_v40, -inf }
 0x354   :  { %v7744_v43 = vpop.f32.mrf.mxu3 }
 0x355   :  { %v1545_v35 = vsel %vm1493_vm15, %v7744_v43, -inf }
 0x356   :  { %1528 = vmax.xlane.f32.xlu1 %v1527_v28  ;;  %1546 = vmax.xlane.f32.xlu0 %v1545_v35 }
 0x357   :  { %1549 = vmax.xlane.f32.xlu2 %v1548_v1 }
 0x358   :  { %v7752_v8 = vpop.f32.mrf.mxu1 }
 0x359   :  { %v1551_v4 = vsel %vm1493_vm15, %v7752_v8, -inf }
 0x35e   :  { %1552 = vmax.xlane.f32.xlu0 %v1551_v4 }
 0x360   :  { %v7756_v57 = vpop.f32.mrf.mxu1 }
 0x361   :  { %v1566_v6 = vsel %vm1493_vm15, %v7756_v57, -inf }
 0x362   :  { %1567 = vmax.xlane.f32.xlu1 %v1566_v6 }
 0x366   :  { %v7760_v45 = vpop.f32.mrf.mxu2 }
 0x367   :  { %v1554_v16 = vsel %vm1493_vm15, %v7760_v45, -inf }
 0x368   :  { %v7762_v58 = vpop.f32.mrf.mxu1 }
 0x369   :  { %v1569_v0 = vsel %vm1493_vm15, %v7762_v58, -inf }
 0x36a   :  { %1570 = vmax.xlane.f32.xlu2 %v1569_v0 }
 0x36e   :  { %v7766_v53 = vpop.f32.mrf.mxu2 }
 0x36f   :  { %v1557_v51 = vsel %vm1493_vm15, %v7766_v53, -inf }
 0x370   :  { %v1496_v11 = vpop.xlane.xlu1 %1495  ;;  %v7776_v44 = vpop.f32.mrf.mxu1 }
 0x371   :  { %v1590_v55 = vsub.f32 %v7661_v62, %v1496_v11  ;;  %v1572_v29 = vsel %vm1493_vm15, %v7776_v44, -inf }
 0x372   :  { %1558 = vmax.xlane.f32.xlu2 %v1557_v51 }
 0x373   :  { %v1622_v2 = vmul.f32 1.442695, %v1590_v55 }
 0x375   :  { %6702 = vpow2.f32 %v1622_v2 }
 0x376   :  { %v7785_v33 = vpop.f32.mrf.mxu3 }
 0x377   :  { %v1560_v39 = vsel %vm1493_vm15, %v7785_v33, -inf  ;;  %v7800_v11 = vpop.f32.mrf.mxu2 }
 0x378   :  { %v1499_v24 = vpop.xlane.xlu2 %1498  ;;  %v7794_v4 = vpop.f32.mrf.mxu1 }
 0x379   :  { %v1591_v15 = vsub.f32 %v7669_v18, %v1499_v24  ;;  %v1575_v0 = vsel %vm1493_vm15, %v7794_v4, -inf }
 0x37b   :  { %v7772_v34 = vpop.eup %6702  ;;  %v1624_v13 = vmul.f32 1.442695, %v1591_v15  ;;  %v1578_v15 = vsel %vm1493_vm15, %v7800_v11, -inf }
 0x37c   :  { %v1686_v19 = vsel %vm1493_vm15, %v7772_v34, 0.0 }
 0x37d   :  { %6704 = vpow2.f32 %v1624_v13  ;;  %1687 = vadd.xlane.f32.xlu0 %v1686_v19 }
 0x37e   :  { %v7805_v2 = vpop.f32.mrf.mxu3 }
 0x37f   :  { %v1563_v19 = vsel %vm1493_vm15, %v7805_v2, -inf }
 0x383   :  { %v7778_v62 = vpop.eup %6704 }
 0x384   :  { %v1689_v59 = vsel %vm1493_vm15, %v7778_v62, 0.0 }
 0x385   :  { %1690 = vadd.xlane.f32.xlu1 %v1689_v59  ;;  %1573 = vmax.xlane.f32.xlu0 %v1572_v29 }
 0x386   :  { %v1502_v18 = vpop.xlane.xlu0 %1501 }
 0x387   :  { %v1592_v20 = vsub.f32 %v7678_v49, %v1502_v18 }
 0x389   :  { %v1626_v47 = vmul.f32 1.442695, %v1592_v20 }
 0x38b   :  { %6706 = vpow2.f32 %v1626_v47 }
 0x38d   :  { %1555 = vmax.xlane.f32.xlu1 %v1554_v16  ;;  %1561 = vmax.xlane.f32.xlu0 %v1560_v39 }
 0x38e   :  { %v1505_v28 = vpop.xlane.xlu1 %1504 }
 0x38f   :  { %v1593_v35 = vsub.f32 %v7684_v31, %v1505_v28 }
 0x391   :  { %v7792_v1 = vpop.eup %6706  ;;  %v1628_v49 = vmul.f32 1.442695, %v1593_v35 }
 0x392   :  { %v1692_v6 = vsel %vm1493_vm15, %v7792_v1, 0.0 }
 0x393   :  { %6708 = vpow2.f32 %v1628_v49  ;;  %1693 = vadd.xlane.f32.xlu2 %v1692_v6  ;;  %v7823_v49 = vpop.f32.mrf.mxu3 }
 0x395   :  { %1576 = vmax.xlane.f32.xlu1 %v1575_v0 }
 0x396   :  { %v1520_v55 = vpop.xlane.xlu2 %1519 }
 0x397   :  { %v1598_v51 = vsub.f32 %v7690_v56, %v1520_v55  ;;  %v7813_v56 = vpop.f32.mrf.mxu2 }
 0x398   :  { %v1581_v39 = vsel %vm1493_vm15, %v7813_v56, -inf }
 0x399   :  { %v7803_v31 = vpop.eup %6708  ;;  %v1638_v24 = vmul.f32 1.442695, %v1598_v51 }
 0x39a   :  { %v1695_v13 = vsel %vm1493_vm15, %v7803_v31, 0.0 }
 0x39b   :  { %6710 = vpow2.f32 %v1638_v24  ;;  %1579 = vmax.xlane.f32.xlu2 %v1578_v15  ;;  %1696 = vadd.xlane.f32.xlu0 %v1695_v13  ;;  %v1584_v15 = vsel %vm1493_vm15, %v7823_v49, -inf  ;;  %v7836_v13 = vpop.f32.mrf.mxu3 }
 0x39d   :  { %1564 = vmax.xlane.f32.xlu1 %v1563_v19 }
 0x39e   :  { %v1523_v59 = vpop.xlane.xlu0 %1522 }
 0x39f   :  { %v1599_v29 = vsub.f32 %v7696_v42, %v1523_v59 }
 0x3a0   :  { %v1514_v18 = vpop.xlane.xlu1 %1513 }
 0x3a1   :  { %v7816_v20 = vpop.eup %6710  ;;  %v1640_v47 = vmul.f32 1.442695, %v1599_v29  ;;  %v1596_v16 = vsub.f32 %v7700_v52, %v1514_v18  ;;  %v1587_v29 = vsel %vm1493_vm15, %v7836_v13, -inf }
 0x3a2   :  { %v1710_v35 = vsel %vm1493_vm15, %v7816_v20, 0.0 }
 0x3a3   :  { %6712 = vpow2.f32 %v1640_v47  ;;  %v1634_v28 = vmul.f32 1.442695, %v1596_v16  ;;  %1582 = vmax.xlane.f32.xlu0 %v1581_v39 }
 0x3a5   :  { %6714 = vpow2.f32 %v1634_v28  ;;  %1711 = vadd.xlane.f32.xlu1 %v1710_v35 }
 0x3a8   :  { %v1517_v42 = vpop.xlane.xlu2 %1516 }
 0x3a9   :  { %v7825_v6 = vpop.eup %6712  ;;  %v1597_v0 = vsub.f32 %v7706_v22, %v1517_v42 }
 0x3aa   :  { %v1713_v52 = vsel %vm1493_vm15, %v7825_v6, 0.0 }
 0x3ab   :  { %v7830_v55 = vpop.eup %6714  ;;  %v1636_v51 = vmul.f32 1.442695, %v1597_v0  ;;  %1714 = vadd.xlane.f32.xlu2 %v1713_v52 }
 0x3ac   :  { %v1704_v24 = vsel %vm1493_vm15, %v7830_v55, 0.0 }
 0x3ad   :  { %6716 = vpow2.f32 %v1636_v51  ;;  %1705 = vadd.xlane.f32.xlu0 %v1704_v24  ;;  %1585 = vmax.xlane.f32.xlu1 %v1584_v15 }
 0x3b0   :  { %v1511_v19 = vpop.xlane.xlu2 %1510  ;;  %v1532_v22 = vpop.xlane.xlu0 %1531 }
 0x3b1   :  { %v1595_v59 = vsub.f32 %v7710_v21, %v1511_v19 }
 0x3b3   :  { %v7841_v18 = vpop.eup %6716  ;;  %v1632_v47 = vmul.f32 1.442695, %v1595_v59  ;;  %1588 = vmax.xlane.f32.xlu2 %v1587_v29 }
 0x3b4   :  { %v1707_v16 = vsel %vm1493_vm15, %v7841_v18, 0.0 }
 0x3b5   :  { %6718 = vpow2.f32 %v1632_v47  ;;  %1708 = vadd.xlane.f32.xlu1 %v1707_v16  ;;  %v1602_v47 = vsub.f32 %v7712_v23, %v1532_v22 }
 0x3b8   :  { %v1526_v39 = vpop.xlane.xlu0 %1525  ;;  %v1538_v42 = vpop.xlane.xlu2 %1537 }
 0x3b9   :  { %v1600_v28 = vsub.f32 %v7718_v30, %v1526_v39  ;;  %v1535_v35 = vpop.xlane.xlu1 %1534 }
 0x3bb   :  { %v7846_v0 = vpop.eup %6718  ;;  %v1642_v21 = vmul.f32 1.442695, %v1600_v28  ;;  %v1646_v28 = vmul.f32 1.442695, %v1602_v47 }
 0x3bc   :  { %v1701_v52 = vsel %vm1493_vm15, %v7846_v0, 0.0 }
 0x3bd   :  { %1702 = vadd.xlane.f32.xlu2 %v1701_v52  ;;  %6720 = vpow2.f32 %v1642_v21 }
 0x3c0   :  { %v7850_v24 = vpop.xlane.xlu0 %1540 }
 0x3c1   :  { %v1508_v51 = vpop.xlane.xlu1 %1507  ;;  %v1544_v19 = vpop.xlane.xlu2 %1543 }
 0x3c2   :  { %v1594_v15 = vsub.f32 %v7704_v17, %v1508_v51  ;;  %v1606_v59 = vsub.f32 %v7736_v38, %v1544_v19 }
 0x3c3   :  { %v7854_v29 = vpop.eup %6720 }
 0x3c4   :  { %v1630_v30 = vmul.f32 1.442695, %v1594_v15  ;;  %v1654_v16 = vmul.f32 1.442695, %v1606_v59  ;;  %v1716_v39 = vsel %vm1493_vm15, %v7854_v29, 0.0  ;;  %v1603_v59 = vsub.f32 %v7722_v50, %v1535_v35 }
 0x3c5   :  { %1717 = vadd.xlane.f32.xlu0 %v1716_v39  ;;  %v1604_v50 = vsub.f32 %v7720_v61, %v1538_v42 }
 0x3c6   :  { %6722 = vpow2.f32 %v1630_v30 }
 0x3c7   :  { %6724 = vpow2.f32 %v1654_v16  ;;  %v1648_v16 = vmul.f32 1.442695, %v1603_v59  ;;  %v1650_v61 = vmul.f32 1.442695, %v1604_v50 }
 0x3c8   :  { %6726 = vpow2.f32 %v1646_v28 }
 0x3c9   :  { %v1529_v21 = vpop.xlane.xlu1 %1528  ;;  %v1547_v17 = vpop.xlane.xlu0 %1546 }
 0x3ca   :  { %v1601_v52 = vsub.f32 %v7730_v32, %v1529_v21  ;;  %v1550_v51 = vpop.xlane.xlu2 %1549  ;;  %v1607_v38 = vsub.f32 %v7744_v43, %v1547_v17 }
 0x3cb   :  { %v1608_v23 = vsub.f32 %v7742_v40, %v1550_v51 }
 0x3cc   :  { %v7861_v19 = vpop.eup %6722  ;;  %v1644_v15 = vmul.f32 1.442695, %v1601_v52  ;;  %v1656_v30 = vmul.f32 1.442695, %v1607_v38 }
 0x3cd   :  { %v7864_v22 = vpop.eup %6724  ;;  %v1698_v47 = vsel %vm1493_vm15, %v7861_v19, 0.0  ;;  %v1658_v43 = vmul.f32 1.442695, %v1608_v23 }
 0x3ce   :  { %6728 = vpow2.f32 %v1644_v15  ;;  %1699 = vadd.xlane.f32.xlu1 %v1698_v47  ;;  %v1734_v32 = vsel %vm1493_vm15, %v7864_v22, 0.0  ;;  %v7871_v40 = vpop.eup %6726  ;;  %v1605_v47 = vsub.f32 %v7732_v48, %v7850_v24 }
 0x3cf   :  { %6730 = vpow2.f32 %v1656_v30  ;;  %1735 = vadd.xlane.f32.xlu2 %v1734_v32  ;;  %v1722_v38 = vsel %vm1493_vm15, %v7871_v40, 0.0 }
 0x3d0   :  { %6732 = vpow2.f32 %v1658_v43 }
 0x3d1   :  { %v1553_v39 = vpop.xlane.xlu0 %1552  ;;  %6734 = vpow2.f32 %v1648_v16 }
 0x3d2   :  { %v1609_v28 = vsub.f32 %v7752_v8, %v1553_v39 }
 0x3d4   :  { %v7874_v21 = vpop.eup %6728  ;;  %v1660_v52 = vmul.f32 1.442695, %v1609_v28  ;;  %v1652_v28 = vmul.f32 1.442695, %v1605_v47 }
 0x3d5   :  { %v7877_v35 = vpop.eup %6730  ;;  %v1719_v17 = vsel %vm1493_vm15, %v7874_v21, 0.0  ;;  %v1568_v51 = vpop.xlane.xlu1 %1567 }
 0x3d6   :  { %1720 = vadd.xlane.f32.xlu1 %v1719_v17  ;;  %v1737_v8 = vsel %vm1493_vm15, %v7877_v35, 0.0  ;;  %6736 = vpow2.f32 %v1660_v52  ;;  %v1614_v15 = vsub.f32 %v7756_v57, %v1568_v51  ;;  %v7886_v23 = vpop.eup %6732 }
 0x3d7   :  { %1723 = vadd.xlane.f32.xlu2 %v1722_v38  ;;  %1738 = vadd.xlane.f32.xlu0 %v1737_v8  ;;  %v7888_v59 = vpop.eup %6734  ;;  %6738 = vpow2.f32 %v1650_v61  ;;  %v1740_v32 = vsel %vm1493_vm15, %v7886_v23, 0.0 }
 0x3d8   :  { %v1670_v42 = vmul.f32 1.442695, %v1614_v15  ;;  %v1725_v16 = vsel %vm1493_vm15, %v7888_v59, 0.0 }
 0x3da   :  { %6740 = vpow2.f32 %v1670_v42 }
 0x3dc   :  { %v7890_v30 = vpop.eup %6736 }
 0x3dd   :  { %v1571_v57 = vpop.xlane.xlu2 %1570  ;;  %v1743_v43 = vsel %vm1493_vm15, %v7890_v30, 0.0  ;;  %v7901_v52 = vpop.eup %6738 }
 0x3de   :  { %1741 = vadd.xlane.f32.xlu1 %v1740_v32  ;;  %v1615_v39 = vsub.f32 %v7762_v58, %v1571_v57  ;;  %v1728_v17 = vsel %vm1493_vm15, %v7901_v52, 0.0 }
 0x3df   :  { %1744 = vadd.xlane.f32.xlu2 %v1743_v43  ;;  %1726 = vadd.xlane.f32.xlu0 %v1725_v16 }
 0x3e0   :  { %v1672_v50 = vmul.f32 1.442695, %v1615_v39  ;;  %v7903_v48 = vpop.eup %6740 }
 0x3e1   :  { %v1758_v51 = vsel %vm1493_vm15, %v7903_v48, 0.0 }
 0x3e2   :  { %6742 = vpow2.f32 %v1672_v50 }
 0x3e3   :  { %6744 = vpow2.f32 %v1652_v28 }
 0x3e5   :  { %v1559_v24 = vpop.xlane.xlu2 %1558 }
 0x3e6   :  { %v1611_v38 = vsub.f32 %v7766_v53, %v1559_v24 }
 0x3e7   :  { %1729 = vadd.xlane.f32.xlu2 %v1728_v17  ;;  %1759 = vadd.xlane.f32.xlu0 %v1758_v51  ;;  %v998_v17 = vpack.c.bf16 %v7657_v26, %v7657_v26 }
 0x3e8   :  { %v7910_v58 = vpop.eup %6742  ;;  %v1664_v8 = vmul.f32 1.442695, %v1611_v38 }
 0x3e9   :  { %v1761_v15 = vsel %vm1493_vm15, %v7910_v58, 0.0  ;;  %v7914_v61 = vpop.eup %6744 }
 0x3ea   :  { %6746 = vpow2.f32 %v1664_v8  ;;  %1762 = vadd.xlane.f32.xlu1 %v1761_v15  ;;  %v1731_v42 = vsel %vm1493_vm15, %v7914_v61, 0.0 }
 0x3ef   :  { %1732 = vadd.xlane.f32.xlu0 %v1731_v42  ;;  %v997_v42 = vpack.c.bf16 %v7649_v27, %v7649_v27 }
 0x3f0   :  { %v1688_v47 = vpop.xlane.xlu0 %1687  ;;  %v7918_v32 = vpop.eup %6746 }
 0x3f1   :  { %v1749_v53 = vsel %vm1493_vm15, %v7918_v32, 0.0  ;;  %6748 = vrcp.f32 %v1688_v47 }
 0x3f2   :  { %1750 = vadd.xlane.f32.xlu2 %v1749_v53 }
 0x3f7   :  { %v6749_v16 = vpop.eup %6748 }
 0x3f8   :  { %v1691_v57 = vpop.xlane.xlu1 %1690  ;;  %v1574_v43 = vpop.xlane.xlu0 %1573  ;;  %v1814_v50 = vmul.f32 %v6749_v16, %v7772_v34  ;;  %v2110_v34 = vunpack.c.l.b16 %v998_v17 }
 0x3f9   :  { %6750 = vrcp.f32 %v1691_v57  ;;  %v1616_v39 = vsub.f32 %v7776_v44, %v1574_v43 }
 0x3fa   :  { %v1846_v51 = vpack.c.bf16 %v1814_v50, %v1814_v50 }
 0x3fb   :  { %v1674_v28 = vmul.f32 1.442695, %v1616_v39 }
 0x3fc   :  { %v1880_v39 = vunpack.c.l.b16 %v1846_v51 }
 0x3fd   :  { %6752 = vpow2.f32 %v1674_v28  ;;  %v2109_v28 = vunpack.c.l.b16 %v997_v42 }
 0x3ff   :  { %v6751_v24 = vpop.eup %6750 }
 0x400   :  { %v1815_v38 = vmul.f32 %v6751_v24, %v7778_v62  ;;  %v1556_v8 = vpop.xlane.xlu1 %1555  ;;  %v1562_v15 = vpop.xlane.xlu0 %1561 }
 0x401   :  { %v1610_v47 = vsub.f32 %v7760_v45, %v1556_v8  ;;  %v1612_v44 = vsub.f32 %v7785_v33, %v1562_v15  ;;  %v2111_v45 = vpack.c.b16 %v2110_v34, %v2109_v28 }
 0x402   :  { %v1847_v53 = vpack.c.bf16 %v1815_v38, %v1815_v38 }
 0x403   :  { %v7931_v57 = vpop.eup %6752  ;;  %v1662_v43 = vmul.f32 1.442695, %v1610_v47  ;;  %v1666_v16 = vmul.f32 1.442695, %v1612_v44 }
 0x404   :  { %v1881_v26 = vunpack.c.l.b16 %v1847_v53  ;;  %v1764_v62 = vsel %vm1493_vm15, %v7931_v57, 0.0 }
 0x405   :  { %6754 = vpow2.f32 %v1662_v43  ;;  %1765 = vadd.xlane.f32.xlu0 %v1764_v62 }
 0x406   :  { %v1882_v50 = vpack.c.b16 %v1881_v26, %v1880_v39  ;;  %6756 = vpow2.f32 %v1666_v16  ;;  %v1694_v27 = vpop.xlane.xlu2 %1693 }
 0x407   :  { %6758 = vrcp.f32 %v1694_v27 }
 0x408   :  { %6223 = vmatmul.msk.bf16.vlgmr.msra.gmra.mxu0 %vm1493_vm15, %v1882_v50  ;;  %v1577_v33 = vpop.xlane.xlu1 %1576  ;;  %v1000_v50 = vpack.c.bf16 %v7674_v7, %v7674_v7 }
 0x409   :  { %2123 = vmatpush.bf16.msra.mxu0 %v2111_v45  ;;  %v1617_v24 = vsub.f32 %v7794_v4, %v1577_v33  ;;  %v897_v33 = vpop.f32.mrf.mxu0 }
 0x40b   :  { %v7937_v17 = vpop.eup %6754  ;;  %v1676_v51 = vmul.f32 1.442695, %v1617_v24 }
 0x40c   :  { %v7939_v38 = vpop.eup %6756  ;;  %v1746_v8 = vsel %vm1493_vm15, %v7937_v17, 0.0 }
 0x40d   :  { %6760 = vpow2.f32 %v1676_v51  ;;  %v1752_v15 = vsel %vm1493_vm15, %v7939_v38, 0.0  ;;  %1747 = vadd.xlane.f32.xlu1 %v1746_v8  ;;  %v6759_v44 = vpop.eup %6758 }
 0x40e   :  { %1753 = vadd.xlane.f32.xlu2 %v1752_v15  ;;  %v1580_v42 = vpop.xlane.xlu2 %1579  ;;  %v1697_v47 = vpop.xlane.xlu0 %1696  ;;  %v1816_v16 = vmul.f32 %v6759_v44, %v7792_v1  ;;  %v999_v1 = vpack.c.bf16 %v7667_v9, %v7667_v9  ;;  %v2138_v15 = vunpack.c.l.b16 %v1000_v50 }
 0x40f   :  { %v1618_v53 = vsub.f32 %v7800_v11, %v1580_v42  ;;  %6762 = vrcp.f32 %v1697_v47 }
 0x410   :  { %v1565_v4 = vpop.xlane.xlu1 %1564  ;;  %v1848_v11 = vpack.c.bf16 %v1816_v16, %v1816_v16 }
 0x411   :  { %v1678_v34 = vmul.f32 1.442695, %v1618_v53  ;;  %v1613_v43 = vsub.f32 %v7805_v2, %v1565_v4  ;;  %v2137_v53 = vunpack.c.l.b16 %v999_v1  ;;  %v899_v50 = vpop.f32.mrf.mxu0 }
 0x412   :  { %v1908_v7 = vunpack.c.l.b16 %v1848_v11 }
 0x413   :  { %v7948_v39 = vpop.eup %6760  ;;  %6764 = vpow2.f32 %v1678_v34  ;;  %v1668_v26 = vmul.f32 1.442695, %v1613_v43  ;;  %v2139_v4 = vpack.c.b16 %v2138_v15, %v2137_v53 }
 0x414   :  { %v1767_v62 = vsel %vm1493_vm15, %v7948_v39, 0.0 }
 0x415   :  { %v6763_v28 = vpop.eup %6762  ;;  %6766 = vpow2.f32 %v1668_v26  ;;  %1768 = vadd.xlane.f32.xlu1 %v1767_v62 }
 0x416   :  { %v1817_v27 = vmul.f32 %v6763_v28, %v7803_v31  ;;  %v1583_v45 = vpop.xlane.xlu0 %1582 }
 0x417   :  { %v1619_v2 = vsub.f32 %v7813_v56, %v1583_v45 }
 0x418   :  { %v1849_v24 = vpack.c.bf16 %v1817_v27, %v1817_v27  ;;  %v1712_v51 = vpop.xlane.xlu1 %1711 }
 0x419   :  { %v7958_v8 = vpop.eup %6764  ;;  %v1680_v42 = vmul.f32 1.442695, %v1619_v2  ;;  %6768 = vrcp.f32 %v1712_v51  ;;  %v1006_v2 = vpack.c.bf16 %v899_v50, %v899_v50 }
 0x41a   :  { %v1909_v47 = vunpack.c.l.b16 %v1849_v24  ;;  %v1770_v9 = vsel %vm1493_vm15, %v7958_v8, 0.0 }
 0x41b   :  { %v7960_v44 = vpop.eup %6766  ;;  %6770 = vpow2.f32 %v1680_v42  ;;  %v1005_v42 = vpack.c.bf16 %v897_v33, %v897_v33 }
 0x41c   :  { %v1910_v31 = vpack.c.b16 %v1909_v47, %v1908_v7  ;;  %v1755_v56 = vsel %vm1493_vm15, %v7960_v44, 0.0 }
 0x41d   :  { %1771 = vadd.xlane.f32.xlu1 %v1770_v9  ;;  %1756 = vadd.xlane.f32.xlu0 %v1755_v56 }
 0x41e   :  { %v1715_v34 = vpop.xlane.xlu2 %1714  ;;  %6224 = vmatmul.msk.bf16.vlgmr.msra.gmra.mxu1 %vm1493_vm15, %v1910_v31 }
 0x41f   :  { %v6769_v43 = vpop.eup %6768  ;;  %6772 = vrcp.f32 %v1715_v34  ;;  %2151 = vmatpush.bf16.msra.mxu1 %v2139_v4  ;;  %v2221_v34 = vunpack.c.l.b16 %v1005_v42 }
 0x420   :  { %v1706_v16 = vpop.xlane.xlu0 %1705  ;;  %v1586_v26 = vpop.xlane.xlu1 %1585  ;;  %v1822_v11 = vmul.f32 %v6769_v43, %v7816_v20  ;;  %v2222_v20 = vunpack.c.l.b16 %v1006_v2 }
 0x421   :  { %v7967_v62 = vpop.eup %6770  ;;  %v1620_v28 = vsub.f32 %v7823_v49, %v1586_v26  ;;  %6774 = vrcp.f32 %v1706_v16  ;;  %v1004_v26 = vpack.c.bf16 %v7694_v36, %v7694_v36 }
 0x422   :  { %v1773_v27 = vsel %vm1493_vm15, %v7967_v62, 0.0  ;;  %v1854_v24 = vpack.c.bf16 %v1822_v11, %v1822_v11  ;;  %v2223_v33 = vpack.c.b16 %v2222_v20, %v2221_v34 }
 0x423   :  { %v1682_v45 = vmul.f32 1.442695, %v1620_v28  ;;  %1774 = vadd.xlane.f32.xlu2 %v1773_v27  ;;  %v2194_v2 = vunpack.c.l.b16 %v1004_v26 }
 0x424   :  { %v1992_v9 = vunpack.c.l.b16 %v1854_v24 }
 0x425   :  { %v6773_v1 = vpop.eup %6772  ;;  %6776 = vpow2.f32 %v1682_v45 }
 0x426   :  { %v1823_v51 = vmul.f32 %v6773_v1, %v7825_v6  ;;  %v1589_v15 = vpop.xlane.xlu2 %1588  ;;  %v7990_v1 = vpop.f32.mrf.mxu0 }
 0x427   :  { %v1621_v7 = vsub.f32 %v7836_v13, %v1589_v15  ;;  %v6775_v53 = vpop.eup %6774 }
 0x428   :  { %v1855_v49 = vpack.c.bf16 %v1823_v51, %v1823_v51  ;;  %v1709_v47 = vpop.xlane.xlu1 %1708  ;;  %v1820_v16 = vmul.f32 %v6775_v53, %v7830_v55  ;;  %v1003_v55 = vpack.c.bf16 %v7688_v14, %v7688_v14 }
 0x429   :  { %v1684_v31 = vmul.f32 1.442695, %v1621_v7  ;;  %6778 = vrcp.f32 %v1709_v47 }
 0x42a   :  { %v1993_v56 = vunpack.c.l.b16 %v1855_v49  ;;  %v1852_v28 = vpack.c.bf16 %v1820_v16, %v1820_v16  ;;  %v2193_v36 = vunpack.c.l.b16 %v1003_v55 }
 0x42b   :  { %v7975_v4 = vpop.eup %6776  ;;  %6780 = vpow2.f32 %v1684_v31 }
 0x42c   :  { %v1994_v43 = vpack.c.b16 %v1993_v56, %v1992_v9  ;;  %v1776_v6 = vsel %vm1493_vm15, %v7975_v4, 0.0  ;;  %v1964_v24 = vunpack.c.l.b16 %v1852_v28  ;;  %v2195_v42 = vpack.c.b16 %v2194_v2, %v2193_v36 }
 0x42d   :  { %1777 = vadd.xlane.f32.xlu0 %v1776_v6  ;;  %v1002_v56 = vpack.c.bf16 %v7682_v54, %v7682_v54 }
 0x42e   :  { %6227 = vmatmul.msk.bf16.vlgmr.msrb.gmra.mxu0 %vm1493_vm15, %v1994_v43  ;;  %v904_v7 = vpop.f32.mrf.mxu0 }
 0x42f   :  { %v6779_v13 = vpop.eup %6778  ;;  %2235 = vmatpush.bf16.msrb.mxu0 %v2223_v33  ;;  %v1001_v33 = vpack.c.bf16 %v7676_v63, %v7676_v63 }
 0x430   :  { %v1821_v50 = vmul.f32 %v6779_v13, %v7841_v18  ;;  %v1703_v18 = vpop.xlane.xlu2 %1702 }
 0x431   :  { %v7984_v11 = vpop.eup %6780  ;;  %6782 = vrcp.f32 %v1703_v18  ;;  %v2165_v54 = vunpack.c.l.b16 %v1001_v33 }
 0x432   :  { %v1853_v27 = vpack.c.bf16 %v1821_v50, %v1821_v50  ;;  %v1779_v45 = vsel %vm1493_vm15, %v7984_v11, 0.0  ;;  %v2166_v50 = vunpack.c.l.b16 %v1002_v56 }
 0x433   :  { %1780 = vadd.xlane.f32.xlu1 %v1779_v45 }
 0x434   :  { %v1965_v51 = vunpack.c.l.b16 %v1853_v27  ;;  %v2167_v36 = vpack.c.b16 %v2166_v50, %v2165_v54 }
 0x436   :  { %v1966_v15 = vpack.c.b16 %v1965_v51, %v1964_v24  ;;  %v7994_v31 = vpop.f32.mrf.mxu0  ;;  %v1008_v51 = vpack.c.bf16 %v904_v7, %v904_v7 }
 0x437   :  { %v6783_v47 = vpop.eup %6782 }
 0x438   :  { %6226 = vmatmul.msk.bf16.vlgmr.msrb.gmra.mxu3 %vm1493_vm15, %v1966_v15  ;;  %v1718_v14 = vpop.xlane.xlu0 %1717  ;;  %v1819_v20 = vmul.f32 %v6783_v47, %v7846_v0 }
 0x439   :  { %2207 = vmatpush.bf16.msrb.mxu3 %v2195_v42 }
 0x43a   :  { %v1851_v34 = vpack.c.bf16 %v1819_v20, %v1819_v20 }
 0x43c   :  { %v1937_v55 = vunpack.c.l.b16 %v1851_v34 }
 0x43e   :  { %v909_v63 = vpop.f32.mrf.mxu0 }
 0x43f   :  { %v1010_v50 = vpack.c.bf16 %v909_v63, %v909_v63 }
 0x441   :  { %v1700_v49 = vpop.xlane.xlu1 %1699 }
 0x442   :  { %6784 = vrcp.f32 %v1700_v49  ;;  %v1736_v53 = vpop.xlane.xlu2 %1735 }
 0x443   :  { %6786 = vrcp.f32 %v1718_v14 }
 0x444   :  { %6788 = vrcp.f32 %v1736_v53 }
 0x448   :  { %v6785_v9 = vpop.eup %6784 }
 0x449   :  { %v1818_v43 = vmul.f32 %v6785_v9, %v7861_v19  ;;  %v1721_v16 = vpop.xlane.xlu1 %1720  ;;  %v6787_v6 = vpop.eup %6786  ;;  %v2250_v9 = vunpack.c.l.b16 %v1008_v51 }
 0x44a   :  { %6790 = vrcp.f32 %v1721_v16  ;;  %v1724_v13 = vpop.xlane.xlu2 %1723  ;;  %v1739_v26 = vpop.xlane.xlu0 %1738  ;;  %v1824_v27 = vmul.f32 %v6787_v6, %v7854_v29  ;;  %v1007_v29 = vpack.c.bf16 %v7990_v1, %v7990_v1 }
 0x44b   :  { %v1850_v28 = vpack.c.bf16 %v1818_v43, %v1818_v43  ;;  %v6789_v0 = vpop.eup %6788  ;;  %6792 = vrcp.f32 %v1739_v26 }
 0x44c   :  { %6794 = vrcp.f32 %v1724_v13  ;;  %v1830_v19 = vmul.f32 %v6789_v0, %v7864_v22  ;;  %v1856_v15 = vpack.c.bf16 %v1824_v27, %v1824_v27  ;;  %v2249_v43 = vunpack.c.l.b16 %v1007_v29 }
 0x44d   :  { %v1936_v45 = vunpack.c.l.b16 %v1850_v28 }
 0x44e   :  { %v1862_v53 = vpack.c.bf16 %v1830_v19, %v1830_v19  ;;  %v2251_v26 = vpack.c.b16 %v2250_v9, %v2249_v43  ;;  %v912_v19 = vpop.f32.mrf.mxu0 }
 0x44f   :  { %v1938_v2 = vpack.c.b16 %v1937_v55, %v1936_v45 }
 0x450   :  { %v6791_v24 = vpop.eup %6790  ;;  %v2104_v16 = vunpack.c.l.b16 %v1862_v53 }
 0x451   :  { %v1825_v42 = vmul.f32 %v6791_v24, %v7874_v21  ;;  %6225 = vmatmul.msk.bf16.vlgmr.msra.gmra.mxu2 %vm1493_vm15, %v1938_v2  ;;  %v1742_v18 = vpop.xlane.xlu1 %1741  ;;  %v6793_v14 = vpop.eup %6792  ;;  %v2020_v21 = vunpack.c.l.b16 %v1856_v15 }
 0x452   :  { %2179 = vmatpush.bf16.msra.mxu2 %v2167_v36  ;;  %6796 = vrcp.f32 %v1742_v18  ;;  %v1745_v49 = vpop.xlane.xlu2 %1744  ;;  %v1727_v47 = vpop.xlane.xlu0 %1726  ;;  %v1831_v7 = vmul.f32 %v6793_v14, %v7877_v35  ;;  %v2278_v36 = vunpack.c.l.b16 %v1010_v50 }
 0x453   :  { %v1857_v22 = vpack.c.bf16 %v1825_v42, %v1825_v42  ;;  %6798 = vrcp.f32 %v1745_v49  ;;  %v6795_v20 = vpop.eup %6794 }
 0x454   :  { %6800 = vrcp.f32 %v1727_v47  ;;  %v1863_v34 = vpack.c.bf16 %v1831_v7, %v1831_v7  ;;  %v1826_v1 = vmul.f32 %v6795_v20, %v7871_v40  ;;  %v1009_v40 = vpack.c.bf16 %v7994_v31, %v7994_v31 }
 0x455   :  { %v2021_v56 = vunpack.c.l.b16 %v1857_v22 }
 0x456   :  { %v2105_v33 = vunpack.c.l.b16 %v1863_v34  ;;  %v1858_v45 = vpack.c.bf16 %v1826_v1, %v1826_v1  ;;  %v914_v20 = vpop.f32.mrf.mxu0 }
 0x457   :  { %v2022_v6 = vpack.c.b16 %v2021_v56, %v2020_v21 }
 0x458   :  { %v6797_v13 = vpop.eup %6796  ;;  %v2106_v0 = vpack.c.b16 %v2105_v33, %v2104_v16  ;;  %v2048_v15 = vunpack.c.l.b16 %v1858_v45  ;;  %v2358_v45 = vld [vmem:[%s9491_s8] sm:$0xf] }
 0x459   :  { %v6799_v28 = vpop.eup %6798  ;;  %6228 = vmatmul.msk.bf16.vlgmr.msrb.gmra.mxu1 %vm1493_vm15, %v2022_v6  ;;  %v1832_v24 = vmul.f32 %v6797_v13, %v7886_v23  ;;  %v1012_v6 = vpack.c.bf16 %v914_v20, %v914_v20 }
 0x45a   :  { %v6801_v35 = vpop.eup %6800  ;;  %2263 = vmatpush.bf16.msrb.mxu1 %v2251_v26  ;;  %v1730_v55 = vpop.xlane.xlu2 %1729  ;;  %v1833_v54 = vmul.f32 %v6799_v28, %v7890_v30  ;;  %6231 = vmatmul.msk.bf16.vlgmr.msra.gmra.mxu0 %vm1493_vm15, %v2106_v0  ;;  %v2277_v30 = vunpack.c.l.b16 %v1009_v40  ;;  %v1011_v26 = vpack.c.bf16 %v912_v19, %v912_v19 }
 0x45b   :  { %v1760_v27 = vpop.xlane.xlu0 %1759  ;;  %v1827_v2 = vmul.f32 %v6801_v35, %v7888_v59  ;;  %v1864_v14 = vpack.c.bf16 %v1832_v24, %v1832_v24  ;;  %v2306_v35 = vunpack.c.l.b16 %v1012_v6 }
 0x45c   :  { %6802 = vrcp.f32 %v1760_v27  ;;  %v1865_v42 = vpack.c.bf16 %v1833_v54, %v1833_v54  ;;  %v2279_v49 = vpack.c.b16 %v2278_v36, %v2277_v30  ;;  %v2395_v54 = vsel %vm86_vm0, %v2358_v45, 0 }
 0x45d   :  { %v1859_v51 = vpack.c.bf16 %v1827_v2, %v1827_v2  ;;  %6804 = vrcp.f32 %v1730_v55  ;;  %v1763_v63 = vpop.xlane.xlu1 %1762  ;;  %v2132_v7 = vunpack.c.l.b16 %v1864_v14  ;;  %2404 = vmatpush.bf16.msra.mxu0 %v2395_v54 }
 0x45e   :  { %6806 = vrcp.f32 %v1763_v63  ;;  %v2133_v31 = vunpack.c.l.b16 %v1865_v42 }
 0x45f   :  { %v2049_v18 = vunpack.c.l.b16 %v1859_v51 }
 0x460   :  { %v2134_v34 = vpack.c.b16 %v2133_v31, %v2132_v7 }
 0x461   :  { %v2050_v59 = vpack.c.b16 %v2049_v18, %v2048_v15 }
 0x462   :  { %v6803_v29 = vpop.eup %6802 }
 0x463   :  { %v1733_v47 = vpop.xlane.xlu0 %1732  ;;  %v6805_v53 = vpop.eup %6804  ;;  %v1838_v22 = vmul.f32 %v6803_v29, %v7903_v48  ;;  %6229 = vmatmul.msk.bf16.vlgmr.msrb.gmra.mxu2 %vm1493_vm15, %v2050_v59 }
 0x464   :  { %6808 = vrcp.f32 %v1733_v47  ;;  %2291 = vmatpush.bf16.msrb.mxu2 %v2279_v49  ;;  %v6807_v23 = vpop.eup %6806  ;;  %v1828_v9 = vmul.f32 %v6805_v53, %v7901_v52 }
 0x465   :  { %v1870_v21 = vpack.c.bf16 %v1838_v22, %v1838_v22  ;;  %v1839_v56 = vmul.f32 %v6807_v23, %v7910_v58  ;;  %v2305_v58 = vunpack.c.l.b16 %v1011_v26 }
 0x466   :  { %v1860_v1 = vpack.c.bf16 %v1828_v9, %v1828_v9 }
 0x467   :  { %v1871_v43 = vpack.c.bf16 %v1839_v56, %v1839_v56  ;;  %v2216_v48 = vunpack.c.l.b16 %v1870_v21  ;;  %v2307_v27 = vpack.c.b16 %v2306_v35, %v2305_v58 }
 0x468   :  { %v2076_v50 = vunpack.c.l.b16 %v1860_v1 }
 0x469   :  { %6232 = vmatmul.msk.bf16.vlgmr.msra.gmra.mxu1 %vm1493_vm15, %v2134_v34  ;;  %v2217_v33 = vunpack.c.l.b16 %v1871_v43 }
 0x46a   :  { %v6809_v16 = vpop.eup %6808 }
 0x46b   :  { %v1829_v13 = vmul.f32 %v6809_v16, %v7914_v61  ;;  %v2218_v28 = vpack.c.b16 %v2217_v33, %v2216_v48  ;;  %v1751_v61 = vpop.xlane.xlu2 %1750 }
 0x46c   :  { %6810 = vrcp.f32 %v1751_v61 }
 0x46d   :  { %v1861_v0 = vpack.c.bf16 %v1829_v13, %v1829_v13  ;;  %6235 = vmatmul.msk.bf16.vlgmr.msrb.gmra.mxu0 %vm1493_vm15, %v2218_v28 }
 0x46f   :  { %v2077_v52 = vunpack.c.l.b16 %v1861_v0 }
 0x471   :  { %v2078_v55 = vpack.c.b16 %v2077_v52, %v2076_v50 }
 0x472   :  { %v6811_v19 = vpop.eup %6810 }
 0x473   :  { %6230 = vmatmul.msk.bf16.vlgmr.msra.gmra.mxu3 %vm1493_vm15, %v2078_v55  ;;  %v1835_v24 = vmul.f32 %v6811_v19, %v7918_v32 }
 0x474   :  { %2319 = vmatpush.bf16.msra.mxu3 %v2307_v27 }
 0x475   :  { %v1867_v63 = vpack.c.bf16 %v1835_v24, %v1835_v24 }
 0x477   :  { %v2161_v59 = vunpack.c.l.b16 %v1867_v63 }
 0x478   :  { %v1766_v2 = vpop.xlane.xlu0 %1765 }
 0x480   :  { %v1748_v40 = vpop.xlane.xlu1 %1747 }
 0x481   :  { %6812 = vrcp.f32 %v1748_v40  ;;  %v1754_v15 = vpop.xlane.xlu2 %1753 }
 0x482   :  { %6814 = vrcp.f32 %v1766_v2 }
 0x485   :  { %v1901_v51 = vpop.f32.mrf.mxu0 }
 0x486   :  { %v2326_v47 = vpack.c.bf16 %v1901_v51, %v1901_v51 }
 0x487   :  { %v6813_v36 = vpop.eup %6812 }
 0x488   :  { %v1834_v42 = vmul.f32 %v6813_v36, %v7937_v17  ;;  %v1769_v18 = vpop.xlane.xlu1 %1768  ;;  %v6815_v30 = vpop.eup %6814  ;;  %v2370_v7 = vunpack.c.l.b16 %v2326_v47 }
 0x489   :  { %6816 = vrcp.f32 %v1769_v18  ;;  %v1840_v29 = vmul.f32 %v6815_v30, %v7931_v57 }
 0x48a   :  { %v1866_v14 = vpack.c.bf16 %v1834_v42, %v1834_v42  ;;  %6818 = vrcp.f32 %v1754_v15 }
 0x48b   :  { %v1872_v23 = vpack.c.bf16 %v1840_v29, %v1840_v29 }
 0x48c   :  { %v2160_v49 = vunpack.c.l.b16 %v1866_v14 }
 0x48d   :  { %v1903_v53 = vpop.f32.mrf.mxu0  ;;  %v2244_v57 = vunpack.c.l.b16 %v1872_v23 }
 0x48e   :  { %v2162_v31 = vpack.c.b16 %v2161_v59, %v2160_v49  ;;  %v2327_v22 = vpack.c.bf16 %v1903_v53, %v1903_v53 }
 0x48f   :  { %v6817_v32 = vpop.eup %6816 }
 0x490   :  { %v1841_v20 = vmul.f32 %v6817_v32, %v7948_v39  ;;  %v2371_v9 = vunpack.c.l.b16 %v2327_v22  ;;  %v1757_v17 = vpop.xlane.xlu0 %1756  ;;  %6233 = vmatmul.msk.bf16.vlgmr.msra.gmra.mxu2 %vm1493_vm15, %v2162_v31  ;;  %v1772_v21 = vpop.xlane.xlu1 %1771  ;;  %v2359_v39 = vld [vmem:[%s9491_s8 + $0x4] sm:$0xf] }
 0x491   :  { %v6819_v56 = vpop.eup %6818  ;;  %6820 = vrcp.f32 %v1757_v17  ;;  %v2459_v0 = vsel %vm86_vm0, %v2359_v39, 0 }
 0x492   :  { %v1873_v34 = vpack.c.bf16 %v1841_v20, %v1841_v20  ;;  %v2378_v43 = vpack.c.b16 %v2371_v9, %v2370_v7  ;;  %6822 = vrcp.f32 %v1772_v21  ;;  %v1836_v16 = vmul.f32 %v6819_v56, %v7939_v38  ;;  %2468 = vmatpush.bf16.msra.mxu1 %v2459_v0  ;;  %v2361_v56 = vld [vmem:[%s9491_s8 + $0xc] sm:$0xf] }
 0x494   :  { %v2245_v6 = vunpack.c.l.b16 %v1873_v34  ;;  %6239 = vmatmul.msk.bf16.vlgmr.msra.gmra.mxu0 %vm73_vm1, %v2378_v43  ;;  %v1868_v26 = vpack.c.bf16 %v1836_v16, %v1836_v16  ;;  %v2587_v43 = vsel %vm86_vm0, %v2361_v56, 0 }
 0x496   :  { %v2246_v1 = vpack.c.b16 %v2245_v6, %v2244_v57  ;;  %v1775_v48 = vpop.xlane.xlu2 %1774  ;;  %v2188_v52 = vunpack.c.l.b16 %v1868_v26 }
 0x497   :  { %v6821_v33 = vpop.eup %6820  ;;  %6824 = vrcp.f32 %v1775_v48 }
 0x498   :  { %v6823_v13 = vpop.eup %6822  ;;  %v1837_v28 = vmul.f32 %v6821_v33, %v7960_v44  ;;  %6236 = vmatmul.msk.bf16.vlgmr.msrb.gmra.mxu1 %vm1493_vm15, %v2246_v1 }
 0x499   :  { %v1842_v35 = vmul.f32 %v6823_v13, %v7958_v8 }
 0x49a   :  { %v1869_v38 = vpack.c.bf16 %v1837_v28, %v1837_v28 }
 0x49b   :  { %v1929_v50 = vpop.f32.mrf.mxu1  ;;  %v1874_v45 = vpack.c.bf16 %v1842_v35, %v1842_v35 }
 0x49c   :  { %v2189_v58 = vunpack.c.l.b16 %v1869_v38  ;;  %v2328_v19 = vpack.c.bf16 %v1929_v50, %v1929_v50 }
 0x49d   :  { %v6825_v55 = vpop.eup %6824  ;;  %v2272_v44 = vunpack.c.l.b16 %v1874_v45 }
 0x49e   :  { %v2190_v27 = vpack.c.b16 %v2189_v58, %v2188_v52  ;;  %v1843_v54 = vmul.f32 %v6825_v55, %v7967_v62  ;;  %v2372_v8 = vunpack.c.l.b16 %v2328_v19 }
 0x4a0   :  { %v1875_v61 = vpack.c.bf16 %v1843_v54, %v1843_v54  ;;  %v1778_v2 = vpop.xlane.xlu0 %1777  ;;  %6234 = vmatmul.msk.bf16.vlgmr.msrb.gmra.mxu3 %vm1493_vm15, %v2190_v27 }
 0x4a1   :  { %6826 = vrcp.f32 %v1778_v2  ;;  %2596 = vmatpush.bf16.msrb.mxu3 %v2587_v43 }
 0x4a2   :  { %v2273_v40 = vunpack.c.l.b16 %v1875_v61 }
 0x4a3   :  { %v1931_v24 = vpop.f32.mrf.mxu1 }
 0x4a4   :  { %v2274_v51 = vpack.c.b16 %v2273_v40, %v2272_v44  ;;  %v2329_v36 = vpack.c.bf16 %v1931_v24, %v1931_v24 }
 0x4a6   :  { %v2373_v63 = vunpack.c.l.b16 %v2329_v36  ;;  %6237 = vmatmul.msk.bf16.vlgmr.msrb.gmra.mxu2 %vm1493_vm15, %v2274_v51  ;;  %v1781_v15 = vpop.xlane.xlu1 %1780 }
 0x4a7   :  { %v6827_v42 = vpop.eup %6826  ;;  %6828 = vrcp.f32 %v1781_v15 }
 0x4a8   :  { %v2379_v18 = vpack.c.b16 %v2373_v63, %v2372_v8  ;;  %v1844_v62 = vmul.f32 %v6827_v42, %v7975_v4  ;;  %v2360_v4 = vld [vmem:[%s9491_s8 + $0x8] sm:$0xf] }
 0x4aa   :  { %6240 = vmatmul.msk.bf16.gmra.mxu0 %vm73_vm1, %v2379_v18  ;;  %v1876_v59 = vpack.c.bf16 %v1844_v62, %v1844_v62 }
 0x4ab   :  { %v2013_v30 = vpop.f32.mrf.mxu0 }
 0x4ac   :  { %v2300_v47 = vunpack.c.l.b16 %v1876_v59  ;;  %v2334_v31 = vpack.c.bf16 %v2013_v30, %v2013_v30 }
 0x4ad   :  { %v6829_v14 = vpop.eup %6828 }
 0x4ae   :  { %v1845_v29 = vmul.f32 %v6829_v14, %v7984_v11  ;;  %v2434_v7 = vunpack.c.l.b16 %v2334_v31  ;;  %v2523_v11 = vsel %vm86_vm0, %v2360_v4, 0 }
 0x4af   :  { %2532 = vmatpush.bf16.msra.mxu2 %v2523_v11 }
 0x4b0   :  { %v1877_v49 = vpack.c.bf16 %v1845_v29, %v1845_v29 }
 0x4b2   :  { %v2301_v53 = vunpack.c.l.b16 %v1877_v49 }
 0x4b3   :  { %v2015_v22 = vpop.f32.mrf.mxu0 }
 0x4b4   :  { %v2302_v32 = vpack.c.b16 %v2301_v53, %v2300_v47  ;;  %v2335_v23 = vpack.c.bf16 %v2015_v22, %v2015_v22 }
 0x4b6   :  { %v2435_v20 = vunpack.c.l.b16 %v2335_v23  ;;  %6238 = vmatmul.msk.bf16.vlgmr.msra.gmra.mxu3 %vm1493_vm15, %v2302_v32 }
 0x4b8   :  { %v2442_v9 = vpack.c.b16 %v2435_v20, %v2434_v7 }
 0x4ba   :  { %6243 = vmatmul.msk.bf16.vlgmr.msra.gmra.mxu1 %vm73_vm1, %v2442_v9 }
 0x4bb   :  { %v1985_v57 = vpop.f32.mrf.mxu3 }
 0x4bc   :  { %v2332_v40 = vpack.c.bf16 %v1985_v57, %v1985_v57 }
 0x4be   :  { %v2376_v63 = vunpack.c.l.b16 %v2332_v40 }
 0x4c3   :  { %v1987_v45 = vpop.f32.mrf.mxu3 }
 0x4c4   :  { %v2333_v44 = vpack.c.bf16 %v1987_v45, %v1987_v45 }
 0x4c6   :  { %v2377_v24 = vunpack.c.l.b16 %v2333_v44 }
 0x4c8   :  { %v2381_v62 = vpack.c.b16 %v2377_v24, %v2376_v63 }
 0x4d4   :  { %v1957_v17 = vpop.f32.mrf.mxu2 }
 0x4d5   :  { %v2330_v16 = vpack.c.bf16 %v1957_v17, %v1957_v17 }
 0x4d6   :  { %v2041_v21 = vpop.f32.mrf.mxu1 }
 0x4d7   :  { %v2125_v34 = vpop.f32.mrf.mxu0  ;;  %v2336_v1 = vpack.c.bf16 %v2041_v21, %v2041_v21  ;;  %v2374_v39 = vunpack.c.l.b16 %v2330_v16 }
 0x4d8   :  { %v2342_v13 = vpack.c.bf16 %v2125_v34, %v2125_v34 }
 0x4d9   :  { %v2436_v38 = vunpack.c.l.b16 %v2336_v1 }
 0x4da   :  { %v2498_v58 = vunpack.c.l.b16 %v2342_v13 }
 0x4dc   :  { %v1959_v6 = vpop.f32.mrf.mxu2 }
 0x4dd   :  { %v2331_v48 = vpack.c.bf16 %v1959_v6, %v1959_v6 }
 0x4de   :  { %v2043_v33 = vpop.f32.mrf.mxu1 }
 0x4df   :  { %v2375_v26 = vunpack.c.l.b16 %v2331_v48  ;;  %v2337_v28 = vpack.c.bf16 %v2043_v33, %v2043_v33  ;;  %v2127_v0 = vpop.f32.mrf.mxu0 }
 0x4e0   :  { %v2343_v52 = vpack.c.bf16 %v2127_v0, %v2127_v0 }
 0x4e1   :  { %v2380_v35 = vpack.c.b16 %v2375_v26, %v2374_v39  ;;  %v2437_v50 = vunpack.c.l.b16 %v2337_v28 }
 0x4e2   :  { %v2499_v27 = vunpack.c.l.b16 %v2343_v52 }
 0x4e3   :  { %v2443_v55 = vpack.c.b16 %v2437_v50, %v2436_v38  ;;  %6241 = vmatmul.msk.bf16.gmra.mxu0 %vm73_vm1, %v2380_v35 }
 0x4e4   :  { %v2506_v54 = vpack.c.b16 %v2499_v27, %v2498_v58 }
 0x4e5   :  { %6244 = vmatmul.msk.bf16.gmra.mxu1 %vm73_vm1, %v2443_v55 }
 0x4e6   :  { %v2069_v61 = vpop.f32.mrf.mxu2  ;;  %v2153_v2 = vpop.f32.mrf.mxu1  ;;  %6247 = vmatmul.msk.bf16.vlgmr.msra.gmra.mxu2 %vm73_vm1, %v2506_v54 }
 0x4e7   :  { %v2338_v51 = vpack.c.bf16 %v2069_v61, %v2069_v61  ;;  %v2344_v15 = vpack.c.bf16 %v2153_v2, %v2153_v2 }
 0x4e9   :  { %v2438_v30 = vunpack.c.l.b16 %v2338_v51  ;;  %v2500_v49 = vunpack.c.l.b16 %v2344_v15 }
 0x4ea   :  { %v2237_v19 = vpop.f32.mrf.mxu0 }
 0x4eb   :  { %v2350_v29 = vpack.c.bf16 %v2237_v19, %v2237_v19 }
 0x4ed   :  { %v2562_v23 = vunpack.c.l.b16 %v2350_v29 }
 0x4ee   :  { %v2071_v36 = vpop.f32.mrf.mxu2  ;;  %v2155_v8 = vpop.f32.mrf.mxu1 }
 0x4ef   :  { %v2339_v42 = vpack.c.bf16 %v2071_v36, %v2071_v36  ;;  %v2345_v18 = vpack.c.bf16 %v2155_v8, %v2155_v8 }
 0x4f1   :  { %v2439_v14 = vunpack.c.l.b16 %v2339_v42  ;;  %v2501_v59 = vunpack.c.l.b16 %v2345_v18 }
 0x4f2   :  { %v2239_v53 = vpop.f32.mrf.mxu0 }
 0x4f3   :  { %v2444_v47 = vpack.c.b16 %v2439_v14, %v2438_v30  ;;  %6242 = vmatmul.msk.bf16.gmra.mxu0 %vm73_vm1, %v2381_v62  ;;  %v2351_v31 = vpack.c.bf16 %v2239_v53, %v2239_v53  ;;  %v2507_v22 = vpack.c.b16 %v2501_v59, %v2500_v49 }
 0x4f5   :  { %6245 = vmatmul.msk.bf16.gmra.mxu1 %vm73_vm1, %v2444_v47  ;;  %v2563_v7 = vunpack.c.l.b16 %v2351_v31 }
 0x4f6   :  { %v2097_v32 = vpop.f32.mrf.mxu3  ;;  %6248 = vmatmul.msk.bf16.gmra.mxu2 %vm73_vm1, %v2507_v22 }
 0x4f7   :  { %v2570_v20 = vpack.c.b16 %v2563_v7, %v2562_v23  ;;  %v2340_v9 = vpack.c.bf16 %v2097_v32, %v2097_v32  ;;  %v8077_v32 = vld [vmem:[%s9492_s9] ss:$0 sm:$0xff] }
 0x4f9   :  { %6251 = vmatmul.msk.bf16.vlgmr.msrb.gmra.mxu3 %vm73_vm1, %v2570_v20  ;;  %v2440_v17 = vunpack.c.l.b16 %v2340_v9 }
 0x4fe   :  { %v2099_v4 = vpop.f32.mrf.mxu3 }
 0x4ff   :  { %v2341_v11 = vpack.c.bf16 %v2099_v4, %v2099_v4 }
 0x501   :  { %v2441_v21 = vunpack.c.l.b16 %v2341_v11 }
 0x503   :  { %v2445_v56 = vpack.c.b16 %v2441_v21, %v2440_v17 }
 0x505   :  { %6246 = vmatmul.msk.bf16.gmra.mxu1 %vm73_vm1, %v2445_v56 }
 0x511   :  { %v2406_v30 = vpop.f32.mrf.mxu0 }
 0x512   :  { %v2618_v29 = vsel %vm131_vm2, %v2406_v30, 0.0 }
 0x513   :  { %v2181_v34 = vpop.f32.mrf.mxu2 }
 0x514   :  { %v2346_v57 = vpack.c.bf16 %v2181_v34, %v2181_v34 }
 0x515   :  { %v2265_v43 = vpop.f32.mrf.mxu1 }
 0x516   :  { %v2352_v6 = vpack.c.bf16 %v2265_v43, %v2265_v43  ;;  %v2502_v33 = vunpack.c.l.b16 %v2346_v57 }
 0x518   :  { %v2564_v26 = vunpack.c.l.b16 %v2352_v6 }
 0x519   :  { %v2408_v7 = vpop.f32.mrf.mxu0 }
 0x51a   :  { %v2625_v17 = vsel %vm131_vm2, %v2408_v7, 0.0 }
 0x51b   :  { %v2183_v16 = vpop.f32.mrf.mxu2 }
 0x51c   :  { %v2347_v1 = vpack.c.bf16 %v2183_v16, %v2183_v16 }
 0x51d   :  { %v2267_v48 = vpop.f32.mrf.mxu1 }
 0x51e   :  { %v2503_v39 = vunpack.c.l.b16 %v2347_v1  ;;  %v2353_v13 = vpack.c.bf16 %v2267_v48, %v2267_v48 }
 0x520   :  { %v2508_v28 = vpack.c.b16 %v2503_v39, %v2502_v33  ;;  %v2565_v0 = vunpack.c.l.b16 %v2353_v13 }
 0x522   :  { %v2571_v38 = vpack.c.b16 %v2565_v0, %v2564_v26  ;;  %6249 = vmatmul.msk.bf16.gmra.mxu2 %vm73_vm1, %v2508_v28 }
 0x523   :  { %v2209_v35 = vpop.f32.mrf.mxu3 }
 0x524   :  { %6252 = vmatmul.msk.bf16.gmra.mxu3 %vm73_vm1, %v2571_v38  ;;  %v2348_v52 = vpack.c.bf16 %v2209_v35, %v2209_v35 }
 0x526   :  { %v2504_v27 = vunpack.c.l.b16 %v2348_v52 }
 0x527   :  { %v2411_v13 = vpop.f32.mrf.mxu0 }
 0x528   :  { %v2632_v0 = vsel %vm131_vm2, %v2411_v13, 0.0 }
 0x529   :  { %v2293_v50 = vpop.f32.mrf.mxu2 }
 0x52a   :  { %v2354_v54 = vpack.c.bf16 %v2293_v50, %v2293_v50 }
 0x52b   :  { %v2211_v58 = vpop.f32.mrf.mxu3 }
 0x52c   :  { %v2349_v55 = vpack.c.bf16 %v2211_v58, %v2211_v58  ;;  %v2566_v40 = vunpack.c.l.b16 %v2354_v54 }
 0x52e   :  { %v2505_v45 = vunpack.c.l.b16 %v2349_v55 }
 0x52f   :  { %v2413_v55 = vpop.f32.mrf.mxu0 }
 0x530   :  { %v2509_v61 = vpack.c.b16 %v2505_v45, %v2504_v27 }
 0x531   :  { %v2295_v2 = vpop.f32.mrf.mxu2 }
 0x532   :  { %v2355_v44 = vpack.c.bf16 %v2295_v2, %v2295_v2  ;;  %6250 = vmatmul.msk.bf16.gmra.mxu2 %vm73_vm1, %v2509_v61  ;;  %v2639_v2 = vsel %vm131_vm2, %v2413_v55, 0.0 }
 0x534   :  { %v2567_v19 = vunpack.c.l.b16 %v2355_v44 }
 0x536   :  { %v2572_v24 = vpack.c.b16 %v2567_v19, %v2566_v40 }
 0x537   :  { %v2470_v62 = vpop.f32.mrf.mxu1 }
 0x538   :  { %6253 = vmatmul.msk.bf16.gmra.mxu3 %vm73_vm1, %v2572_v24  ;;  %v2619_v59 = vsel %vm131_vm2, %v2470_v62, 0.0 }
 0x539   :  { %v2321_v51 = vpop.f32.mrf.mxu3  ;;  %v2620_v47 = vadd.f32 %v2619_v59, %v2618_v29 }
 0x53a   :  { %v2356_v36 = vpack.c.bf16 %v2321_v51, %v2321_v51 }
 0x53c   :  { %v2568_v15 = vunpack.c.l.b16 %v2356_v36 }
 0x53f   :  { %v2472_v53 = vpop.f32.mrf.mxu1 }
 0x540   :  { %v2626_v4 = vsel %vm131_vm2, %v2472_v53, 0.0 }
 0x541   :  { %v2323_v8 = vpop.f32.mrf.mxu3  ;;  %v2627_v56 = vadd.f32 %v2626_v4, %v2625_v17 }
 0x542   :  { %v2357_v63 = vpack.c.bf16 %v2323_v8, %v2323_v8 }
 0x544   :  { %v2569_v42 = vunpack.c.l.b16 %v2357_v63 }
 0x546   :  { %v2573_v18 = vpack.c.b16 %v2569_v42, %v2568_v15 }
 0x548   :  { %6254 = vmatmul.msk.bf16.gmra.mxu3 %vm73_vm1, %v2573_v18 }
 0x560   :  { %v2416_v63 = vpop.f32.mrf.mxu0 }
 0x561   :  { %v2646_v59 = vsel %vm131_vm2, %v2416_v63, 0.0 }
 0x568   :  { %v2418_v53 = vpop.f32.mrf.mxu0 }
 0x569   :  { %v2534_v14 = vpop.f32.mrf.mxu2  ;;  %v2653_v4 = vsel %vm131_vm2, %v2418_v53, 0.0 }
 0x56a   :  { %v2621_v49 = vsel %vm131_vm2, %v2534_v14, 0.0 }
 0x56b   :  { %v2622_v31 = vadd.f32 %v2621_v49, %v2620_v47 }
 0x571   :  { %v2536_v20 = vpop.f32.mrf.mxu2 }
 0x572   :  { %v2628_v21 = vsel %vm131_vm2, %v2536_v20, 0.0 }
 0x573   :  { %v2629_v43 = vadd.f32 %v2628_v21, %v2627_v56 }
 0x579   :  { %v2539_v26 = vpop.f32.mrf.mxu2 }
 0x57a   :  { %v2635_v38 = vsel %vm131_vm2, %v2539_v26, 0.0 }
 0x57c   :  { %v2598_v22 = vpop.f32.mrf.mxu3 }
 0x57d   :  { %v2623_v23 = vsel %vm131_vm2, %v2598_v22, 0.0 }
 0x57e   :  { %v2624_v9 = vadd.f32 %v2623_v23, %v2622_v31 }
 0x580   :  { %v2678_v11 = vadd.f32 %v8077_v32, %v2624_v9 }
 0x581   :  { %v2541_v27 = vpop.f32.mrf.mxu2 }
 0x582   :  { %v8085_v34 = vadd.f32 %v2678_v11, %v7298_v5  ;;  %v2475_v5 = vpop.f32.mrf.mxu1  ;;  %v2642_v44 = vsel %vm131_vm2, %v2541_v27, 0.0 }
 0x583   :  { %v2633_v28 = vsel %vm131_vm2, %v2475_v5, 0.0 }
 0x584   :  { %v2600_v57 = vpop.f32.mrf.mxu3  ;;  %v2696_v16 = vsel %vm131_vm2, %v8085_v34, 0.0  ;;  %v2634_v35 = vadd.f32 %v2633_v28, %v2632_v0 }
 0x585   :  { %v2630_v6 = vsel %vm131_vm2, %v2600_v57, 0.0  ;;  %2697 = vadd.xlane.f32.xlu2 %v2696_v16 }
 0x586   :  { %v2631_v1 = vadd.f32 %v2630_v6, %v2629_v43  ;;  %v2636_v52 = vadd.f32 %v2635_v38, %v2634_v35 }
 0x588   :  { %v2679_v48 = vadd.f32 %v8077_v32, %v2631_v1  ;;  %v2421_v1 = vpop.f32.mrf.mxu0 }
 0x589   :  { %v2660_v26 = vsel %vm131_vm2, %v2421_v1, 0.0 }
 0x58a   :  { %v8092_v33 = vadd.f32 %v2679_v48, %v7311_v3  ;;  %v2477_v50 = vpop.f32.mrf.mxu1 }
 0x58b   :  { %v2640_v54 = vsel %vm131_vm2, %v2477_v50, 0.0 }
 0x58c   :  { %v2699_v39 = vsel %vm131_vm2, %v8092_v33, 0.0  ;;  %v2641_v40 = vadd.f32 %v2640_v54, %v2639_v2 }
 0x58d   :  { %2700 = vadd.xlane.f32.xlu0 %v2699_v39 }
 0x58e   :  { %v2643_v51 = vadd.f32 %v2642_v44, %v2641_v40 }
 0x590   :  { %v2423_v54 = vpop.f32.mrf.mxu0 }
 0x591   :  { %v2667_v44 = vsel %vm131_vm2, %v2423_v54, 0.0 }
 0x592   :  { %v2480_v24 = vpop.f32.mrf.mxu1 }
 0x59a   :  { %v2482_v47 = vpop.f32.mrf.mxu1 }
 0x59b   :  { %v2654_v20 = vsel %vm131_vm2, %v2482_v47, 0.0 }
 0x59c   :  { %v2655_v17 = vadd.f32 %v2654_v20, %v2653_v4 }
 0x5a2   :  { %v2485_v56 = vpop.f32.mrf.mxu1 }
 0x5a3   :  { %v2661_v5 = vsel %vm131_vm2, %v2485_v56, 0.0 }
 0x5a4   :  { %v2662_v28 = vadd.f32 %v2661_v5, %v2660_v26 }
 0x5a5   :  { %v2544_v42 = vpop.f32.mrf.mxu2 }
 0x5a6   :  { %v2649_v29 = vsel %vm131_vm2, %v2544_v42, 0.0 }
 0x5a7   :  { %v2603_v58 = vpop.f32.mrf.mxu3 }
 0x5a8   :  { %v2637_v3 = vsel %vm131_vm2, %v2603_v58, 0.0 }
 0x5a9   :  { %v2638_v45 = vadd.f32 %v2637_v3, %v2636_v52 }
 0x5ab   :  { %v2680_v61 = vadd.f32 %v8077_v32, %v2638_v45  ;;  %v2487_v45 = vpop.f32.mrf.mxu1 }
 0x5ad   :  { %v8105_v19 = vadd.f32 %v2680_v61, %v7244_v10  ;;  %v2647_v10 = vsel %vm131_vm2, %v2480_v24, 0.0  ;;  %v2546_v22 = vpop.f32.mrf.mxu2 }
 0x5ae   :  { %v2648_v49 = vadd.f32 %v2647_v10, %v2646_v59  ;;  %v2656_v11 = vsel %vm131_vm2, %v2546_v22, 0.0 }
 0x5af   :  { %v2605_v36 = vpop.f32.mrf.mxu3  ;;  %v2702_v8 = vsel %vm131_vm2, %v8105_v19, 0.0  ;;  %v2657_v43 = vadd.f32 %v2656_v11, %v2655_v17 }
 0x5b0   :  { %v2644_v15 = vsel %vm131_vm2, %v2605_v36, 0.0  ;;  %2703 = vadd.xlane.f32.xlu1 %v2702_v8  ;;  %v2650_v31 = vadd.f32 %v2649_v29, %v2648_v49 }
 0x5b1   :  { %v2645_v18 = vadd.f32 %v2644_v15, %v2643_v51 }
 0x5b3   :  { %v2681_v62 = vadd.f32 %v8077_v32, %v2645_v18 }
 0x5b5   :  { %v8112_v30 = vadd.f32 %v2681_v62, %v7253_v25  ;;  %v2549_v48 = vpop.f32.mrf.mxu2 }
 0x5b7   :  { %v2705_v14 = vsel %vm131_vm2, %v8112_v30, 0.0 }
 0x5b8   :  { %2706 = vadd.xlane.f32.xlu2 %v2705_v14 }
 0x5bb   :  { %v2608_v23 = vpop.f32.mrf.mxu3 }
 0x5bc   :  { %v2651_v7 = vsel %vm131_vm2, %v2608_v23, 0.0 }
 0x5bd   :  { %v2652_v25 = vadd.f32 %v2651_v7, %v2650_v31  ;;  %v2551_v61 = vpop.f32.mrf.mxu2 }
 0x5be   :  { %v2670_v40 = vsel %vm131_vm2, %v2551_v61, 0.0 }
 0x5bf   :  { %v2682_v9 = vadd.f32 %v8077_v32, %v2652_v25 }
 0x5c1   :  { %v8125_v21 = vadd.f32 %v2682_v9, %v7286_v60  ;;  %v2663_v60 = vsel %vm131_vm2, %v2549_v48, 0.0 }
 0x5c2   :  { %v2664_v38 = vadd.f32 %v2663_v60, %v2662_v28  ;;  %v6626_v28 = vld [vmem:[%s9495_s12] sm:$0xff] }
 0x5c3   :  { %v2610_v57 = vpop.f32.mrf.mxu3  ;;  %v2708_v16 = vsel %vm131_vm2, %v8125_v21, 0.0 }
 0x5c4   :  { %v2658_v6 = vsel %vm131_vm2, %v2610_v57, 0.0  ;;  %2709 = vadd.xlane.f32.xlu0 %v2708_v16 }
 0x5c5   :  { %v2659_v39 = vadd.f32 %v2658_v6, %v2657_v43 }
 0x5c7   :  { %v2683_v13 = vadd.f32 %v8077_v32, %v2659_v39 }
 0x5c9   :  { %v2691_v0 = vadd.f32 %v2683_v13, %v7306_v12  ;;  %v2668_v12 = vsel %vm131_vm2, %v2487_v45, 0.0  ;;  %v6627_v13 = vld [vmem:[%s9495_s12 + $0x8] sm:$0xff] }
 0x5ca   :  { %v2669_v24 = vadd.f32 %v2668_v12, %v2667_v44  ;;  %2936 = vmatpush.bf16.msrb.mxu0 %v6627_v13 }
 0x5cb   :  { %v2613_v35 = vpop.f32.mrf.mxu3  ;;  %v2711_v50 = vsel %vm131_vm2, %v2691_v0, 0.0 }
 0x5cc   :  { %v2665_v52 = vsel %vm131_vm2, %v2613_v35, 0.0  ;;  %2712 = vadd.xlane.f32.xlu1 %v2711_v50  ;;  %v2671_v8 = vadd.f32 %v2670_v40, %v2669_v24 }
 0x5cd   :  { %v2666_v58 = vadd.f32 %v2665_v52, %v2664_v38 }
 0x5ce   :  { %2937 = vmatpush.bf16.msrb.mxu0 %v6626_v28 }
 0x5cf   :  { %v2684_v55 = vadd.f32 %v8077_v32, %v2666_v58 }
 0x5d1   :  { %v2692_v3 = vadd.f32 %v2684_v55, %v7341_v37 }
 0x5d3   :  { %v2714_v27 = vsel %vm131_vm2, %v2692_v3, 0.0  ;;  %v2615_v2 = vpop.f32.mrf.mxu3 }
 0x5d4   :  { %2715 = vadd.xlane.f32.xlu1 %v2714_v27  ;;  %v2672_v51 = vsel %vm131_vm2, %v2615_v2, 0.0 }
 0x5d5   :  { %v2673_v63 = vadd.f32 %v2672_v51, %v2671_v8 }
 0x5d7   :  { %v2685_v62 = vadd.f32 %v8077_v32, %v2673_v63 }
 0x5d9   :  { %v2693_v29 = vadd.f32 %v2685_v62, %v7348_v41  ;;  %v8217_v62 = vld [vmem:[%s9494_s11] ss:$0 sm:$0xff] }
 0x5db   :  { %v2717_v47 = vsel %vm131_vm2, %v2693_v29, 0.0 }
 0x5f8   :  { %v2698_v36 = vpop.xlane.xlu2 %2697 }
 0x5f9   :  { %v2720_v37 = vmul.f32 %v2698_v36, %v7148_v46 }
 0x5fb   :  { %v8146_v15 = vsub.f32 %v8085_v34, %v2720_v37  ;;  %v8211_v37 = vld [vmem:[%s9493_s10] ss:$0 sm:$0xff] }
 0x5fd   :  { %v2736_v42 = vmul.f32 %v8146_v15, %v8146_v15 }
 0x5ff   :  { %v2744_v18 = vsel %vm131_vm2, %v2736_v42, 0.0 }
 0x600   :  { %v2701_v10 = vpop.xlane.xlu0 %2700  ;;  %2745 = vadd.xlane.f32.xlu2 %v2744_v18 }
 0x601   :  { %v2721_v14 = vmul.f32 %v2701_v10, %v7148_v46 }
 0x603   :  { %v8154_v59 = vsub.f32 %v8092_v33, %v2721_v14 }
 0x605   :  { %v2737_v34 = vmul.f32 %v8154_v59, %v8154_v59 }
 0x607   :  { %v2747_v49 = vsel %vm131_vm2, %v2737_v34, 0.0 }
 0x608   :  { %2748 = vadd.xlane.f32.xlu0 %v2747_v49  ;;  %2718 = vadd.xlane.f32.xlu2 %v2717_v47 }
 0x623   :  { %v2704_v53 = vpop.xlane.xlu1 %2703 }
 0x624   :  { %v2722_v32 = vmul.f32 %v2704_v53, %v7148_v46 }
 0x626   :  { %v8163_v31 = vsub.f32 %v8105_v19, %v2722_v32 }
 0x628   :  { %v2738_v33 = vmul.f32 %v8163_v31, %v8163_v31 }
 0x62a   :  { %v2750_v41 = vsel %vm131_vm2, %v2738_v33, 0.0 }
 0x62b   :  { %v2707_v22 = vpop.xlane.xlu2 %2706  ;;  %2751 = vadd.xlane.f32.xlu0 %v2750_v41 }
 0x62c   :  { %v2723_v23 = vmul.f32 %v2707_v22, %v7148_v46 }
 0x62e   :  { %v8170_v7 = vsub.f32 %v8112_v30, %v2723_v23 }
 0x630   :  { %v2739_v25 = vmul.f32 %v8170_v7, %v8170_v7 }
 0x632   :  { %v2753_v20 = vsel %vm131_vm2, %v2739_v25, 0.0 }
 0x633   :  { %2754 = vadd.xlane.f32.xlu1 %v2753_v20 }
 0x637   :  { %v2710_v19 = vpop.xlane.xlu0 %2709 }
 0x638   :  { %v2724_v9 = vmul.f32 %v2710_v19, %v7148_v46 }
 0x63a   :  { %v8177_v4 = vsub.f32 %v8125_v21, %v2724_v9 }
 0x63c   :  { %v2740_v11 = vmul.f32 %v8177_v4, %v8177_v4 }
 0x63e   :  { %v2756_v17 = vsel %vm131_vm2, %v2740_v11, 0.0 }
 0x63f   :  { %v2713_v56 = vpop.xlane.xlu1 %2712  ;;  %2757 = vadd.xlane.f32.xlu2 %v2756_v17 }
 0x640   :  { %v2725_v30 = vmul.f32 %v2713_v56, %v7148_v46 }
 0x642   :  { %v8183_v43 = vsub.f32 %v2691_v0, %v2725_v30 }
 0x644   :  { %v2741_v57 = vmul.f32 %v8183_v43, %v8183_v43 }
 0x646   :  { %v2759_v16 = vsel %vm131_vm2, %v2741_v57, 0.0 }
 0x647   :  { %2760 = vadd.xlane.f32.xlu0 %v2759_v16  ;;  %v2716_v6 = vpop.xlane.xlu1 %2715 }
 0x648   :  { %v2726_v21 = vmul.f32 %v2716_v6, %v7148_v46 }
 0x64a   :  { %v8189_v1 = vsub.f32 %v2692_v3, %v2726_v21 }
 0x64c   :  { %v2742_v48 = vmul.f32 %v8189_v1, %v8189_v1 }
 0x64e   :  { %v2762_v39 = vsel %vm131_vm2, %v2742_v48, 0.0 }
 0x64f   :  { %2763 = vadd.xlane.f32.xlu1 %v2762_v39 }
 0x673   :  { %v2746_v5 = vpop.xlane.xlu2 %2745 }
 0x674   :  { %v2768_v26 = vmul.f32 %v2746_v5, %v7148_v46 }
 0x676   :  { %v2776_v60 = vadd.f32 1e-05, %v2768_v26 }
 0x678   :  { %6830 = vrsqrt.f32 %v2776_v60  ;;  %vm2790_vm4 = vweird.f32 %v2776_v60 }
 0x67b   :  { %v2749_v0 = vpop.xlane.xlu0 %2748  ;;  %v2719_v38 = vpop.xlane.xlu2 %2718 }
 0x67c   :  { %v2769_v35 = vmul.f32 %v2749_v0, %v7148_v46  ;;  %v2727_v50 = vmul.f32 %v2719_v38, %v7148_v46 }
 0x67e   :  { %v6831_v52 = vpop.eup %6830  ;;  %v2777_v58 = vadd.f32 1e-05, %v2769_v35  ;;  %v8203_v55 = vsub.f32 %v2693_v29, %v2727_v50 }
 0x67f   :  { %v2785_v3 = vmul.f32 %v6831_v52, %v2776_v60  ;;  %vm2791_vm3 = vweird.f32 %v6831_v52 }
 0x680   :  { %6832 = vrsqrt.f32 %v2777_v58  ;;  %v2743_v27 = vmul.f32 %v8203_v55, %v8203_v55  ;;  %vm2792_vm5 = vmor %vm2790_vm4, %vm2791_vm3  ;;  %vm2800_vm7 = vweird.f32 %v2777_v58 }
 0x681   :  { %v2786_v45 = vmul.f32 %v6831_v52, %v2785_v3 }
 0x682   :  { %v2765_v54 = vsel %vm131_vm2, %v2743_v27, 0.0 }
 0x683   :  { %v2787_v61 = vmul.f32 0.5, %v2786_v45  ;;  %2766 = vadd.xlane.f32.xlu2 %v2765_v54 }
 0x685   :  { %v2788_v12 = vsub.f32 1.5, %v2787_v61 }
 0x686   :  { %v6833_v2 = vpop.eup %6832 }
 0x687   :  { %v2789_v44 = vmul.f32 %v6831_v52, %v2788_v12  ;;  %v2795_v40 = vmul.f32 %v6833_v2, %v2777_v58  ;;  %vm2801_vm6 = vweird.f32 %v6833_v2 }
 0x688   :  { %vm2802_vm8 = vmor %vm2800_vm7, %vm2801_vm6 }
 0x689   :  { %v2796_v24 = vmul.f32 %v6833_v2, %v2795_v40  ;;  %v2793_v51 = vsel %vm2792_vm5, %v6831_v52, %v2789_v44 }
 0x68a   :  { %v2864_v63 = vmul.f32 %v2793_v51, %v8146_v15 }
 0x68b   :  { %v2797_v36 = vmul.f32 0.5, %v2796_v24 }
 0x68c   :  { %v2875_v10 = vmul.f32 %v8211_v37, %v2864_v63 }
 0x68d   :  { %v2798_v8 = vsub.f32 1.5, %v2797_v36 }
 0x68e   :  { %v2886_v34 = vadd.f32 %v8217_v62, %v2875_v10 }
 0x68f   :  { %v2799_v42 = vmul.f32 %v6833_v2, %v2798_v8 }
 0x691   :  { %v2803_v18 = vsel %vm2802_vm8, %v6833_v2, %v2799_v42 }
 0x692   :  { %v2865_v14 = vmul.f32 %v2803_v18, %v8154_v59 }
 0x694   :  { %v2876_v29 = vmul.f32 %v8211_v37, %v2865_v14 }
 0x696   :  { %v2887_v49 = vadd.f32 %v8217_v62, %v2876_v29 }
 0x698   :  { %v2894_v15 = vpack.c.bf16 %v2887_v49, %v2886_v34 }
 0x69a   :  { %6263 = vmatmul.msk.bf16.vlgmr.msrb.gmra.mxu0 %vm131_vm2, %v2894_v15 }
 0x69e   :  { %v2752_v47 = vpop.xlane.xlu0 %2751 }
 0x69f   :  { %v2770_v53 = vmul.f32 %v2752_v47, %v7148_v46 }
 0x6a1   :  { %v2778_v32 = vadd.f32 1e-05, %v2770_v53 }
 0x6a3   :  { %6834 = vrsqrt.f32 %v2778_v32  ;;  %vm2810_vm10 = vweird.f32 %v2778_v32 }
 0x6a6   :  { %v2755_v33 = vpop.xlane.xlu1 %2754 }
 0x6a7   :  { %v2771_v41 = vmul.f32 %v2755_v33, %v7148_v46  ;;  %v6631_v33 = vld [vmem:[%s9497_s14 + $0x18] sm:$0xff] }
 0x6a8   :  { %3024 = vmatpush.bf16.msrb.mxu1 %v6631_v33 }
 0x6a9   :  { %v6835_v22 = vpop.eup %6834  ;;  %v2779_v23 = vadd.f32 1e-05, %v2771_v41 }
 0x6aa   :  { %v2805_v59 = vmul.f32 %v6835_v22, %v2778_v32  ;;  %vm2811_vm9 = vweird.f32 %v6835_v22 }
 0x6ab   :  { %6836 = vrsqrt.f32 %v2779_v23  ;;  %vm2812_vm11 = vmor %vm2810_vm10, %vm2811_vm9  ;;  %vm2820_vm13 = vweird.f32 %v2779_v23 }
 0x6ac   :  { %v2806_v25 = vmul.f32 %v6835_v22, %v2805_v59 }
 0x6ae   :  { %v2807_v20 = vmul.f32 0.5, %v2806_v25  ;;  %v6629_v25 = vld [vmem:[%s9497_s14 + $0x8] sm:$0xff] }
 0x6b0   :  { %v2808_v19 = vsub.f32 1.5, %v2807_v20 }
 0x6b1   :  { %v6837_v9 = vpop.eup %6836 }
 0x6b2   :  { %v2809_v11 = vmul.f32 %v6835_v22, %v2808_v19  ;;  %v2815_v17 = vmul.f32 %v6837_v9, %v2779_v23  ;;  %v2758_v56 = vpop.xlane.xlu2 %2757  ;;  %vm2821_vm12 = vweird.f32 %v6837_v9  ;;  %v6630_v23 = vld [vmem:[%s9497_s14 + $0x10] sm:$0xff] }
 0x6b3   :  { %v2772_v30 = vmul.f32 %v2758_v56, %v7148_v46  ;;  %vm2822_vm14 = vmor %vm2820_vm13, %vm2821_vm12  ;;  %3025 = vmatpush.bf16.msrb.mxu1 %v6630_v23 }
 0x6b4   :  { %v2816_v57 = vmul.f32 %v6837_v9, %v2815_v17  ;;  %v2813_v6 = vsel %vm2812_vm11, %v6835_v22, %v2809_v11  ;;  %v6628_v11 = vld [vmem:[%s9497_s14] sm:$0xff] }
 0x6b5   :  { %v2780_v16 = vadd.f32 1e-05, %v2772_v30  ;;  %v2866_v39 = vmul.f32 %v2813_v6, %v8163_v31 }
 0x6b6   :  { %v2817_v21 = vmul.f32 0.5, %v2816_v57 }
 0x6b7   :  { %6838 = vrsqrt.f32 %v2780_v16  ;;  %v2877_v35 = vmul.f32 %v8211_v37, %v2866_v39  ;;  %vm2830_vm4 = vweird.f32 %v2780_v16  ;;  %3026 = vmatpush.bf16.msrb.mxu1 %v6629_v25 }
 0x6b8   :  { %v2818_v48 = vsub.f32 1.5, %v2817_v21 }
 0x6b9   :  { %v2888_v31 = vadd.f32 %v8217_v62, %v2877_v35 }
 0x6ba   :  { %v2819_v5 = vmul.f32 %v6837_v9, %v2818_v48  ;;  %v2761_v13 = vpop.xlane.xlu0 %2760 }
 0x6bb   :  { %v2773_v26 = vmul.f32 %v2761_v13, %v7148_v46  ;;  %3027 = vmatpush.bf16.msrb.mxu1 %v6628_v11 }
 0x6bc   :  { %v2823_v60 = vsel %vm2822_vm14, %v6837_v9, %v2819_v5 }
 0x6bd   :  { %v6839_v28 = vpop.eup %6838  ;;  %v2867_v0 = vmul.f32 %v2823_v60, %v8170_v7  ;;  %v2781_v38 = vadd.f32 1e-05, %v2773_v26 }
 0x6be   :  { %v2825_v50 = vmul.f32 %v6839_v28, %v2780_v16  ;;  %vm2831_vm3 = vweird.f32 %v6839_v28 }
 0x6bf   :  { %6840 = vrsqrt.f32 %v2781_v38  ;;  %v2878_v52 = vmul.f32 %v8211_v37, %v2867_v0  ;;  %vm2832_vm5 = vmor %vm2830_vm4, %vm2831_vm3  ;;  %vm2840_vm7 = vweird.f32 %v2781_v38  ;;  %vm3007_vm3 = vcmask 523264  }
 0x6c0   :  { %v2826_v58 = vmul.f32 %v6839_v28, %v2825_v50 }
 0x6c1   :  { %v2889_v3 = vadd.f32 %v8217_v62, %v2878_v52 }
 0x6c2   :  { %v2827_v27 = vmul.f32 0.5, %v2826_v58  ;;  %v2764_v34 = vpop.xlane.xlu1 %2763 }
 0x6c3   :  { %v2895_v45 = vpack.c.bf16 %v2889_v3, %v2888_v31 }
 0x6c4   :  { %v2828_v54 = vsub.f32 1.5, %v2827_v27 }
 0x6c5   :  { %v6841_v61 = vpop.eup %6840  ;;  %6264 = vmatmul.msk.bf16.gmra.mxu0 %vm131_vm2, %v2895_v45 }
 0x6c6   :  { %v2829_v12 = vmul.f32 %v6839_v28, %v2828_v54  ;;  %v2835_v7 = vmul.f32 %v6841_v61, %v2781_v38  ;;  %vm2841_vm6 = vweird.f32 %v6841_v61 }
 0x6c7   :  { %vm2842_vm8 = vmor %vm2840_vm7, %vm2841_vm6 }
 0x6c8   :  { %v2836_v2 = vmul.f32 %v6841_v61, %v2835_v7  ;;  %v2833_v44 = vsel %vm2832_vm5, %v6839_v28, %v2829_v12 }
 0x6c9   :  { %v2868_v51 = vmul.f32 %v2833_v44, %v8177_v4  ;;  %v2774_v4 = vmul.f32 %v2764_v34, %v7148_v46 }
 0x6ca   :  { %v2837_v40 = vmul.f32 0.5, %v2836_v2 }
 0x6cb   :  { %v2879_v42 = vmul.f32 %v8211_v37, %v2868_v51  ;;  %v2782_v49 = vadd.f32 1e-05, %v2774_v4 }
 0x6cc   :  { %v2838_v24 = vsub.f32 1.5, %v2837_v40 }
 0x6cd   :  { %v2890_v10 = vadd.f32 %v8217_v62, %v2879_v42  ;;  %6842 = vrsqrt.f32 %v2782_v49  ;;  %vm2850_vm10 = vweird.f32 %v2782_v49 }
 0x6ce   :  { %v2839_v36 = vmul.f32 %v6841_v61, %v2838_v24 }
 0x6d0   :  { %v2843_v8 = vsel %vm2842_vm8, %v6841_v61, %v2839_v36 }
 0x6d1   :  { %v2869_v63 = vmul.f32 %v2843_v8, %v8183_v43 }
 0x6d3   :  { %v2880_v18 = vmul.f32 %v8211_v37, %v2869_v63  ;;  %v6843_v15 = vpop.eup %6842 }
 0x6d4   :  { %v2845_v47 = vmul.f32 %v6843_v15, %v2782_v49  ;;  %vm2851_vm9 = vweird.f32 %v6843_v15 }
 0x6d5   :  { %v2891_v14 = vadd.f32 %v8217_v62, %v2880_v18  ;;  %vm2852_vm11 = vmor %vm2850_vm10, %vm2851_vm9 }
 0x6d6   :  { %v2846_v53 = vmul.f32 %v6843_v15, %v2845_v47 }
 0x6d7   :  { %v2896_v29 = vpack.c.bf16 %v2891_v14, %v2890_v10  ;;  %v6675_v10 = vld [vmem:[%s9498_s15] ss:$0 sm:$0xff] }
 0x6d8   :  { %v2847_v22 = vmul.f32 0.5, %v2846_v53 }
 0x6d9   :  { %6265 = vmatmul.msk.bf16.gmra.mxu0 %vm131_vm2, %v2896_v29 }
 0x6da   :  { %v2848_v59 = vsub.f32 1.5, %v2847_v22 }
 0x6dc   :  { %v2849_v19 = vmul.f32 %v6843_v15, %v2848_v59 }
 0x6de   :  { %v2853_v56 = vsel %vm2852_vm11, %v6843_v15, %v2849_v19 }
 0x6df   :  { %v2870_v16 = vmul.f32 %v2853_v56, %v8189_v1  ;;  %v6674_v1 = vld [vmem:[%s9496_s13] ss:$0 sm:$0xff] }
 0x6e1   :  { %v2881_v39 = vmul.f32 %v8211_v37, %v2870_v16 }
 0x6e3   :  { %v2892_v13 = vadd.f32 %v8217_v62, %v2881_v39 }
 0x6f6   :  { %v2767_v43 = vpop.xlane.xlu2 %2766 }
 0x6f7   :  { %v2775_v32 = vmul.f32 %v2767_v43, %v7148_v46 }
 0x6f9   :  { %v2783_v41 = vadd.f32 1e-05, %v2775_v32 }
 0x6fb   :  { %6844 = vrsqrt.f32 %v2783_v41  ;;  %vm2860_vm13 = vweird.f32 %v2783_v41 }
 0x701   :  { %v6845_v20 = vpop.eup %6844 }
 0x702   :  { %v2855_v9 = vmul.f32 %v6845_v20, %v2783_v41  ;;  %vm2861_vm12 = vweird.f32 %v6845_v20 }
 0x703   :  { %vm2862_vm14 = vmor %vm2860_vm13, %vm2861_vm12 }
 0x704   :  { %v2856_v17 = vmul.f32 %v6845_v20, %v2855_v9 }
 0x706   :  { %v2857_v30 = vmul.f32 0.5, %v2856_v17 }
 0x708   :  { %v2858_v57 = vsub.f32 1.5, %v2857_v30 }
 0x70a   :  { %v2859_v6 = vmul.f32 %v6845_v20, %v2858_v57 }
 0x70c   :  { %v2863_v21 = vsel %vm2862_vm14, %v6845_v20, %v2859_v6 }
 0x70d   :  { %v2871_v48 = vmul.f32 %v2863_v21, %v8203_v55 }
 0x70f   :  { %v2882_v5 = vmul.f32 %v8211_v37, %v2871_v48 }
 0x711   :  { %v2893_v26 = vadd.f32 %v8217_v62, %v2882_v5 }
 0x713   :  { %v2897_v60 = vpack.c.bf16 %v2893_v26, %v2892_v13 }
 0x715   :  { %6266 = vmatmul.msk.bf16.gmra.mxu0 %vm131_vm2, %v2897_v60 }
 0x717   :  { %v2939_v28 = vpop.f32.mrf.mxu0 }
 0x718   :  { %v2940_v0 = vadd.f32 %v6674_v1, %v2939_v28 }
 0x71a   :  { %v2959_v55 = vmax.f32 %v2940_v0, 0.0 }
 0x71f   :  { %v2941_v38 = vpop.f32.mrf.mxu0 }
 0x720   :  { %v2942_v35 = vadd.f32 %v6674_v1, %v2941_v38 }
 0x722   :  { %v2960_v50 = vmax.f32 %v2942_v35, 0.0 }
 0x724   :  { %v2967_v52 = vpack.c.bf16 %v2960_v50, %v2959_v55 }
 0x726   :  { %6283 = vmatmul.msk.bf16.vlgmr.msrb.gmra.mxu1 %vm3007_vm3, %v2967_v52 }
 0x742   :  { %v2944_v37 = vpop.f32.mrf.mxu0 }
 0x743   :  { %v2945_v58 = vadd.f32 %v6674_v1, %v2944_v37 }
 0x745   :  { %v2961_v3 = vmax.f32 %v2945_v58, 0.0 }
 0x74a   :  { %v2946_v62 = vpop.f32.mrf.mxu0 }
 0x74b   :  { %v2947_v31 = vadd.f32 %v6674_v1, %v2946_v62 }
 0x74d   :  { %v2962_v27 = vmax.f32 %v2947_v31, 0.0 }
 0x74f   :  { %v2968_v45 = vpack.c.bf16 %v2962_v27, %v2961_v3 }
 0x751   :  { %6284 = vmatmul.msk.bf16.gmra.mxu1 %vm3007_vm3, %v2968_v45 }
 0x756   :  { %v2949_v54 = vpop.f32.mrf.mxu0 }
 0x757   :  { %v2950_v61 = vadd.f32 %v6674_v1, %v2949_v54 }
 0x759   :  { %v2963_v2 = vmax.f32 %v2950_v61, 0.0 }
 0x75e   :  { %v2951_v12 = vpop.f32.mrf.mxu0 }
 0x75f   :  { %v2952_v7 = vadd.f32 %v6674_v1, %v2951_v12 }
 0x761   :  { %v2964_v44 = vmax.f32 %v2952_v7, 0.0 }
 0x763   :  { %v2969_v40 = vpack.c.bf16 %v2964_v44, %v2963_v2 }
 0x765   :  { %6285 = vmatmul.msk.bf16.gmra.mxu1 %vm3007_vm3, %v2969_v40 }
 0x792   :  { %v2954_v24 = vpop.f32.mrf.mxu0 }
 0x793   :  { %v2955_v51 = vadd.f32 %v6674_v1, %v2954_v24 }
 0x795   :  { %v2965_v63 = vmax.f32 %v2955_v51, 0.0 }
 0x79a   :  { %v2956_v36 = vpop.f32.mrf.mxu0 }
 0x79b   :  { %v2957_v8 = vadd.f32 %v6674_v1, %v2956_v36 }
 0x79d   :  { %v2966_v42 = vmax.f32 %v2957_v8, 0.0 }
 0x79f   :  { %v2970_v18 = vpack.c.bf16 %v2966_v42, %v2965_v63  ;;  %v6633_v42 = vld [vmem:[%s9488_s5 + $0x48] sm:$0xff] }
 0x7a0   :  { %3326 = vmatpush.bf16.msrb.mxu2 %v6633_v42 }
 0x7a1   :  { %6286 = vmatmul.msk.bf16.gmra.mxu1 %vm3007_vm3, %v2970_v18  ;;  %v6635_v18 = vld [vmem:[%s9488_s5 + $0x58] sm:$0xff] }
 0x7a2   :  { %3367 = vmatpush.bf16.msra.mxu3 %v6635_v18 }
 0x7a3   :  { %v3029_v14 = vpop.f32.mrf.mxu1 }
 0x7a4   :  { %v3030_v29 = vadd.f32 %v6675_v10, %v3029_v14 }
 0x7a6   :  { %v3053_v34 = vsel %vm131_vm2, %v3030_v29, 0.0 }
 0x7a7   :  { %3054 = vadd.xlane.f32.xlu0 %v3053_v34 }
 0x7ab   :  { %v3031_v4 = vpop.f32.mrf.mxu1 }
 0x7ac   :  { %v3032_v49 = vadd.f32 %v6675_v10, %v3031_v4 }
 0x7ae   :  { %v3056_v15 = vsel %vm131_vm2, %v3032_v49, 0.0 }
 0x7af   :  { %3057 = vadd.xlane.f32.xlu1 %v3056_v15  ;;  %v6632_v15 = vld [vmem:[%s9488_s5 + $0x40] sm:$0xff] }
 0x7b0   :  { %3327 = vmatpush.bf16.msrb.mxu2 %v6632_v15 }
 0x7ce   :  { %v3034_v47 = vpop.f32.mrf.mxu1 }
 0x7cf   :  { %v3035_v53 = vadd.f32 %v6675_v10, %v3034_v47  ;;  %v6634_v47 = vld [vmem:[%s9488_s5 + $0x50] sm:$0xff] }
 0x7d0   :  { %3368 = vmatpush.bf16.msra.mxu3 %v6634_v47 }
 0x7d1   :  { %v3059_v43 = vsel %vm131_vm2, %v3035_v53, 0.0 }
 0x7d2   :  { %3060 = vadd.xlane.f32.xlu2 %v3059_v43 }
 0x7d6   :  { %v3036_v32 = vpop.f32.mrf.mxu1 }
 0x7d7   :  { %v3037_v33 = vadd.f32 %v6675_v10, %v3036_v32 }
 0x7d9   :  { %v3062_v41 = vsel %vm131_vm2, %v3037_v33, 0.0 }
 0x7da   :  { %3063 = vadd.xlane.f32.xlu0 %v3062_v41 }
 0x7e2   :  { %v3039_v22 = vpop.f32.mrf.mxu1 }
 0x7e3   :  { %v3040_v23 = vadd.f32 %v6675_v10, %v3039_v22 }
 0x7e5   :  { %v3065_v59 = vsel %vm131_vm2, %v3040_v23, 0.0 }
 0x7e6   :  { %3066 = vadd.xlane.f32.xlu1 %v3065_v59 }
 0x7ea   :  { %v3041_v25 = vpop.f32.mrf.mxu1 }
 0x7eb   :  { %v3042_v20 = vadd.f32 %v6675_v10, %v3041_v25 }
 0x7ed   :  { %v3068_v19 = vsel %vm131_vm2, %v3042_v20, 0.0 }
 0x7ee   :  { %3069 = vadd.xlane.f32.xlu2 %v3068_v19 }
 0x81a   :  { %v3055_v9 = vpop.xlane.xlu0 %3054 }
 0x81b   :  { %v3077_v11 = vmul.f32 %v3055_v9, %v7148_v46 }
 0x81d   :  { %v8281_v17 = vsub.f32 %v3030_v29, %v3077_v11  ;;  %v6639_v29 = vld [vmem:[%s9488_s5 + $0x78] sm:$0xff] }
 0x81e   :  { %v3044_v56 = vpop.f32.mrf.mxu1  ;;  %3449 = vmatpush.bf16.msra.mxu1 %v6639_v29 }
 0x81f   :  { %v3045_v30 = vadd.f32 %v6675_v10, %v3044_v56  ;;  %v3093_v57 = vmul.f32 %v8281_v17, %v8281_v17 }
 0x821   :  { %v3101_v16 = vsel %vm131_vm2, %v3093_v57, 0.0  ;;  %v3071_v6 = vsel %vm131_vm2, %v3045_v30, 0.0 }
 0x822   :  { %3102 = vadd.xlane.f32.xlu0 %v3101_v16  ;;  %v3058_v21 = vpop.xlane.xlu1 %3057  ;;  %3072 = vadd.xlane.f32.xlu2 %v3071_v6 }
 0x823   :  { %v3078_v48 = vmul.f32 %v3058_v21, %v7148_v46  ;;  %v8359_v21 = vld [vmem:[%s9486_s3 + $0x1] ss:$0 sm:$0xff] }
 0x825   :  { %v8288_v39 = vsub.f32 %v3032_v49, %v3078_v48 }
 0x826   :  { %v3046_v5 = vpop.f32.mrf.mxu1 }
 0x827   :  { %v3047_v13 = vadd.f32 %v6675_v10, %v3046_v5  ;;  %v3094_v26 = vmul.f32 %v8288_v39, %v8288_v39  ;;  %v6637_v10 = vld [vmem:[%s9488_s5 + $0x68] sm:$0xff] }
 0x828   :  { %3408 = vmatpush.bf16.msra.mxu0 %v6637_v10 }
 0x829   :  { %v3104_v60 = vsel %vm131_vm2, %v3094_v26, 0.0  ;;  %v3074_v28 = vsel %vm131_vm2, %v3047_v13, 0.0  ;;  %v8365_v26 = vld [vmem:[%s9487_s4 + $0x1] ss:$0 sm:$0xff] }
 0x82a   :  { %3105 = vadd.xlane.f32.xlu1 %v3104_v60  ;;  %3075 = vadd.xlane.f32.xlu0 %v3074_v28 }
 0x845   :  { %v3061_v1 = vpop.xlane.xlu2 %3060 }
 0x846   :  { %v3079_v0 = vmul.f32 %v3061_v1, %v7148_v46 }
 0x848   :  { %v8295_v38 = vsub.f32 %v3035_v53, %v3079_v0  ;;  %v6636_v53 = vld [vmem:[%s9488_s5 + $0x60] sm:$0xff] }
 0x849   :  { %3409 = vmatpush.bf16.msra.mxu0 %v6636_v53 }
 0x84a   :  { %v3095_v35 = vmul.f32 %v8295_v38, %v8295_v38 }
 0x84c   :  { %v3107_v55 = vsel %vm131_vm2, %v3095_v35, 0.0 }
 0x84d   :  { %v3064_v50 = vpop.xlane.xlu0 %3063  ;;  %3108 = vadd.xlane.f32.xlu1 %v3107_v55 }
 0x84e   :  { %v3080_v52 = vmul.f32 %v3064_v50, %v7148_v46 }
 0x850   :  { %v8301_v37 = vsub.f32 %v3037_v33, %v3080_v52  ;;  %v6638_v33 = vld [vmem:[%s9488_s5 + $0x70] sm:$0xff] }
 0x851   :  { %3450 = vmatpush.bf16.msra.mxu1 %v6638_v33 }
 0x852   :  { %v3096_v58 = vmul.f32 %v8301_v37, %v8301_v37 }
 0x854   :  { %v3110_v62 = vsel %vm131_vm2, %v3096_v58, 0.0 }
 0x855   :  { %3111 = vadd.xlane.f32.xlu2 %v3110_v62 }
 0x859   :  { %v3067_v31 = vpop.xlane.xlu1 %3066 }
 0x85a   :  { %v3081_v3 = vmul.f32 %v3067_v31, %v7148_v46 }
 0x85c   :  { %v8307_v27 = vsub.f32 %v3040_v23, %v3081_v3 }
 0x85e   :  { %v3097_v45 = vmul.f32 %v8307_v27, %v8307_v27 }
 0x860   :  { %v3113_v54 = vsel %vm131_vm2, %v3097_v45, 0.0 }
 0x861   :  { %3114 = vadd.xlane.f32.xlu0 %v3113_v54  ;;  %v3070_v61 = vpop.xlane.xlu2 %3069 }
 0x862   :  { %v3082_v12 = vmul.f32 %v3070_v61, %v7148_v46 }
 0x864   :  { %v8313_v7 = vsub.f32 %v3042_v20, %v3082_v12 }
 0x866   :  { %v3098_v2 = vmul.f32 %v8313_v7, %v8313_v7 }
 0x868   :  { %v3116_v44 = vsel %vm131_vm2, %v3098_v2, 0.0 }
 0x869   :  { %3117 = vadd.xlane.f32.xlu1 %v3116_v44 }
 0x895   :  { %v3103_v40 = vpop.xlane.xlu0 %3102  ;;  %v3073_v24 = vpop.xlane.xlu2 %3072 }
 0x896   :  { %v3125_v51 = vmul.f32 %v3103_v40, %v7148_v46  ;;  %v3083_v36 = vmul.f32 %v3073_v24, %v7148_v46 }
 0x898   :  { %v3133_v8 = vadd.f32 1e-05, %v3125_v51  ;;  %v8320_v63 = vsub.f32 %v3045_v30, %v3083_v36 }
 0x89a   :  { %6846 = vrsqrt.f32 %v3133_v8  ;;  %v3099_v14 = vmul.f32 %v8320_v63, %v8320_v63  ;;  %vm3147_vm5 = vweird.f32 %v3133_v8 }
 0x89c   :  { %v3119_v34 = vsel %vm131_vm2, %v3099_v14, 0.0 }
 0x89d   :  { %v3106_v4 = vpop.xlane.xlu1 %3105  ;;  %v3076_v49 = vpop.xlane.xlu0 %3075  ;;  %3120 = vadd.xlane.f32.xlu2 %v3119_v34 }
 0x89e   :  { %v3126_v43 = vmul.f32 %v3106_v4, %v7148_v46  ;;  %v3084_v32 = vmul.f32 %v3076_v49, %v7148_v46 }
 0x8a0   :  { %v6847_v41 = vpop.eup %6846  ;;  %v3134_v22 = vadd.f32 1e-05, %v3126_v43  ;;  %v8351_v23 = vsub.f32 %v3047_v13, %v3084_v32 }
 0x8a1   :  { %v3142_v59 = vmul.f32 %v6847_v41, %v3133_v8  ;;  %vm3148_vm4 = vweird.f32 %v6847_v41 }
 0x8a2   :  { %6848 = vrsqrt.f32 %v3134_v22  ;;  %v3100_v25 = vmul.f32 %v8351_v23, %v8351_v23  ;;  %vm3149_vm6 = vmor %vm3147_vm5, %vm3148_vm4  ;;  %vm3157_vm8 = vweird.f32 %v3134_v22 }
 0x8a3   :  { %v3143_v20 = vmul.f32 %v6847_v41, %v3142_v59 }
 0x8a4   :  { %v3122_v19 = vsel %vm131_vm2, %v3100_v25, 0.0 }
 0x8a5   :  { %v3144_v9 = vmul.f32 0.5, %v3143_v20  ;;  %3123 = vadd.xlane.f32.xlu0 %v3122_v19 }
 0x8a7   :  { %v3145_v11 = vsub.f32 1.5, %v3144_v9 }
 0x8a8   :  { %v6849_v56 = vpop.eup %6848 }
 0x8a9   :  { %v3146_v30 = vmul.f32 %v6847_v41, %v3145_v11  ;;  %v3152_v57 = vmul.f32 %v6849_v56, %v3134_v22  ;;  %vm3158_vm7 = vweird.f32 %v6849_v56 }
 0x8aa   :  { %vm3159_vm9 = vmor %vm3157_vm8, %vm3158_vm7 }
 0x8ab   :  { %v3150_v16 = vsel %vm3149_vm6, %v6847_v41, %v3146_v30  ;;  %v3153_v6 = vmul.f32 %v6849_v56, %v3152_v57 }
 0x8ac   :  { %v3221_v48 = vmul.f32 %v3150_v16, %v8281_v17 }
 0x8ad   :  { %v3154_v5 = vmul.f32 0.5, %v3153_v6 }
 0x8ae   :  { %v3232_v60 = vmul.f32 %v8359_v21, %v3221_v48 }
 0x8af   :  { %v3155_v13 = vsub.f32 1.5, %v3154_v5 }
 0x8b0   :  { %v8369_v0 = vadd.f32 %v8365_v26, %v3232_v60 }
 0x8b1   :  { %v3156_v28 = vmul.f32 %v6849_v56, %v3155_v13 }
 0x8b2   :  { %9521 = vst [vmem:[#allocation3_spill] sm:$0xff] %v8369_v0  ;;  %v3251_v55 = vpack.c.bf16 %v8369_v0, %v8369_v0 }
 0x8b3   :  { %v3160_v1 = vsel %vm3159_vm9, %v6849_v56, %v3156_v28 }
 0x8b4   :  { %v3222_v35 = vmul.f32 %v3160_v1, %v8288_v39  ;;  %v3284_v58 = vunpack.c.l.b16 %v3251_v55 }
 0x8b6   :  { %v3233_v17 = vmul.f32 %v8359_v21, %v3222_v35 }
 0x8b8   :  { %v8376_v50 = vadd.f32 %v8365_v26, %v3233_v17 }
 0x8ba   :  { %9522 = vst [vmem:[#allocation4_spill] sm:$0xff] %v8376_v50  ;;  %v3252_v52 = vpack.c.bf16 %v8376_v50, %v8376_v50 }
 0x8bc   :  { %v3285_v62 = vunpack.c.l.b16 %v3252_v52 }
 0x8be   :  { %v8380_v31 = vpack.c.b16 %v3285_v62, %v3284_v58 }
 0x8c0   :  { %v3109_v3 = vpop.xlane.xlu1 %3108  ;;  %6313 = vmatmul.msk.bf16.vlgmr.msrb.gmra.mxu2 %vm131_vm2, %v8380_v31  ;;  %6325 = vmatmul.msk.bf16.vlgmr.msra.gmra.mxu3 %vm131_vm2, %v8380_v31 }
 0x8c1   :  { %v3127_v45 = vmul.f32 %v3109_v3, %v7148_v46  ;;  %6337 = vmatmul.msk.bf16.vlgmr.msra.gmra.mxu0 %vm131_vm2, %v8380_v31  ;;  %6349 = vmatmul.msk.bf16.vlgmr.msra.gmra.mxu1 %vm131_vm2, %v8380_v31 }
 0x8c3   :  { %v3135_v39 = vadd.f32 1e-05, %v3127_v45 }
 0x8c5   :  { %6850 = vrsqrt.f32 %v3135_v39  ;;  %vm3167_vm11 = vweird.f32 %v3135_v39 }
 0x8c8   :  { %v3112_v54 = vpop.xlane.xlu2 %3111 }
 0x8c9   :  { %v3128_v61 = vmul.f32 %v3112_v54, %v7148_v46 }
 0x8cb   :  { %v6851_v12 = vpop.eup %6850  ;;  %v3136_v2 = vadd.f32 1e-05, %v3128_v61 }
 0x8cc   :  { %v3162_v44 = vmul.f32 %v6851_v12, %v3135_v39  ;;  %vm3168_vm10 = vweird.f32 %v6851_v12 }
 0x8cd   :  { %6852 = vrsqrt.f32 %v3136_v2  ;;  %vm3169_vm12 = vmor %vm3167_vm11, %vm3168_vm10  ;;  %vm3177_vm14 = vweird.f32 %v3136_v2 }
 0x8ce   :  { %v3163_v40 = vmul.f32 %v6851_v12, %v3162_v44 }
 0x8d0   :  { %v3164_v24 = vmul.f32 0.5, %v3163_v40 }
 0x8d2   :  { %v3165_v51 = vsub.f32 1.5, %v3164_v24 }
 0x8d3   :  { %v6853_v36 = vpop.eup %6852 }
 0x8d4   :  { %v3166_v8 = vmul.f32 %v6851_v12, %v3165_v51  ;;  %v3172_v42 = vmul.f32 %v6853_v36, %v3136_v2  ;;  %v3115_v18 = vpop.xlane.xlu0 %3114  ;;  %vm3178_vm13 = vweird.f32 %v6853_v36 }
 0x8d5   :  { %v3129_v10 = vmul.f32 %v3115_v18, %v7148_v46  ;;  %vm3179_vm4 = vmor %vm3177_vm14, %vm3178_vm13 }
 0x8d6   :  { %v3170_v14 = vsel %vm3169_vm12, %v6851_v12, %v3166_v8  ;;  %v3173_v29 = vmul.f32 %v6853_v36, %v3172_v42 }
 0x8d7   :  { %v3223_v34 = vmul.f32 %v3170_v14, %v8295_v38  ;;  %v3137_v4 = vadd.f32 1e-05, %v3129_v10 }
 0x8d8   :  { %v3174_v49 = vmul.f32 0.5, %v3173_v29 }
 0x8d9   :  { %6854 = vrsqrt.f32 %v3137_v4  ;;  %v3234_v47 = vmul.f32 %v8359_v21, %v3223_v34  ;;  %vm3187_vm6 = vweird.f32 %v3137_v4 }
 0x8da   :  { %v3175_v15 = vsub.f32 1.5, %v3174_v49  ;;  %v6641_v49 = vld [vmem:[%s9489_s6 + $0x48] sm:$0xff] }
 0x8db   :  { %v8397_v22 = vadd.f32 %v8365_v26, %v3234_v47  ;;  %v6645_v47 = vld [vmem:[%s9489_s6 + $0x68] sm:$0xff]  ;;  %3507 = vmatpush.bf16.msra.mxu2 %v6641_v49 }
 0x8dc   :  { %v3176_v53 = vmul.f32 %v6853_v36, %v3175_v15  ;;  %v3118_v43 = vpop.xlane.xlu1 %3117  ;;  %v6643_v15 = vld [vmem:[%s9489_s6 + $0x58] sm:$0xff]  ;;  %3589 = vmatpush.bf16.msrb.mxu0 %v6645_v47 }
 0x8dd   :  { %v3130_v32 = vmul.f32 %v3118_v43, %v7148_v46  ;;  %9523 = vst [vmem:[#allocation5_spill] sm:$0xff] %v8397_v22  ;;  %v3253_v9 = vpack.c.bf16 %v8397_v22, %v8397_v22  ;;  %3548 = vmatpush.bf16.msrb.mxu3 %v6643_v15 }
 0x8de   :  { %v3180_v33 = vsel %vm3179_vm4, %v6853_v36, %v3176_v53  ;;  %v6647_v53 = vld [vmem:[%s9489_s6 + $0x78] sm:$0xff] }
 0x8df   :  { %v6855_v41 = vpop.eup %6854  ;;  %v3224_v38 = vmul.f32 %v3180_v33, %v8301_v37  ;;  %v3138_v59 = vadd.f32 1e-05, %v3130_v32  ;;  %v3286_v37 = vunpack.c.l.b16 %v3253_v9  ;;  %3630 = vmatpush.bf16.msrb.mxu1 %v6647_v53 }
 0x8e0   :  { %v3182_v25 = vmul.f32 %v6855_v41, %v3137_v4  ;;  %vm3188_vm5 = vweird.f32 %v6855_v41 }
 0x8e1   :  { %v3235_v20 = vmul.f32 %v8359_v21, %v3224_v38  ;;  %6856 = vrsqrt.f32 %v3138_v59  ;;  %vm3189_vm7 = vmor %vm3187_vm6, %vm3188_vm5  ;;  %vm3197_vm9 = vweird.f32 %v3138_v59  ;;  %v6640_v38 = vld [vmem:[%s9489_s6 + $0x40] sm:$0xff] }
 0x8e2   :  { %v3183_v19 = vmul.f32 %v6855_v41, %v3182_v25  ;;  %v6644_v25 = vld [vmem:[%s9489_s6 + $0x60] sm:$0xff]  ;;  %3508 = vmatpush.bf16.msra.mxu2 %v6640_v38 }
 0x8e3   :  { %v8404_v11 = vadd.f32 %v8365_v26, %v3235_v20  ;;  %v6646_v20 = vld [vmem:[%s9489_s6 + $0x70] sm:$0xff]  ;;  %3590 = vmatpush.bf16.msrb.mxu0 %v6644_v25 }
 0x8e4   :  { %v3184_v56 = vmul.f32 0.5, %v3183_v19  ;;  %3631 = vmatpush.bf16.msrb.mxu1 %v6646_v20 }
 0x8e5   :  { %9524 = vst [vmem:[#allocation6_spill] sm:$0xff] %v8404_v11  ;;  %v3254_v30 = vpack.c.bf16 %v8404_v11, %v8404_v11 }
 0x8e6   :  { %v3185_v57 = vsub.f32 1.5, %v3184_v56 }
 0x8e7   :  { %v6857_v16 = vpop.eup %6856  ;;  %v3287_v6 = vunpack.c.l.b16 %v3254_v30 }
 0x8e8   :  { %v3186_v48 = vmul.f32 %v6855_v41, %v3185_v57  ;;  %v3192_v5 = vmul.f32 %v6857_v16, %v3138_v59  ;;  %vm3198_vm8 = vweird.f32 %v6857_v16  ;;  %v6642_v59 = vld [vmem:[%s9489_s6 + $0x50] sm:$0xff] }
 0x8e9   :  { %v8408_v13 = vpack.c.b16 %v3287_v6, %v3286_v37  ;;  %vm3199_vm10 = vmor %vm3197_vm9, %vm3198_vm8  ;;  %3549 = vmatpush.bf16.msrb.mxu3 %v6642_v59 }
 0x8ea   :  { %v3190_v60 = vsel %vm3189_vm7, %v6855_v41, %v3186_v48  ;;  %v3193_v28 = vmul.f32 %v6857_v16, %v3192_v5 }
 0x8eb   :  { %v3225_v1 = vmul.f32 %v3190_v60, %v8307_v27  ;;  %6314 = vmatmul.msk.bf16.gmra.mxu2 %vm131_vm2, %v8408_v13  ;;  %6326 = vmatmul.msk.bf16.gmra.mxu3 %vm131_vm2, %v8408_v13 }
 0x8ec   :  { %v3194_v35 = vmul.f32 0.5, %v3193_v28  ;;  %6338 = vmatmul.msk.bf16.gmra.mxu0 %vm131_vm2, %v8408_v13  ;;  %6350 = vmatmul.msk.bf16.gmra.mxu1 %vm131_vm2, %v8408_v13 }
 0x8ed   :  { %v3236_v55 = vmul.f32 %v8359_v21, %v3225_v1  ;;  %v6655_v1 = vld [vmem:[%s9490_s7 + $0x78] sm:$0xff] }
 0x8ee   :  { %v3195_v17 = vsub.f32 1.5, %v3194_v35  ;;  %3811 = vmatpush.bf16.msra.mxu1 %v6655_v1  ;;  %v6648_v35 = vld [vmem:[%s9490_s7 + $0x40] sm:$0xff] }
 0x8ef   :  { %v8421_v58 = vadd.f32 %v8365_v26, %v3236_v55  ;;  %v6652_v55 = vld [vmem:[%s9490_s7 + $0x60] sm:$0xff] }
 0x8f0   :  { %v3196_v52 = vmul.f32 %v6857_v16, %v3195_v17  ;;  %v6650_v17 = vld [vmem:[%s9490_s7 + $0x50] sm:$0xff] }
 0x8f1   :  { %9525 = vst [vmem:[#allocation7_spill] sm:$0xff] %v8421_v58  ;;  %v3255_v45 = vpack.c.bf16 %v8421_v58, %v8421_v58 }
 0x8f2   :  { %v3200_v27 = vsel %vm3199_vm10, %v6857_v16, %v3196_v52  ;;  %v6654_v52 = vld [vmem:[%s9490_s7 + $0x70] sm:$0xff] }
 0x8f3   :  { %v3226_v62 = vmul.f32 %v3200_v27, %v8313_v7  ;;  %v3288_v61 = vunpack.c.l.b16 %v3255_v45  ;;  %3812 = vmatpush.bf16.msra.mxu1 %v6654_v52 }
 0x8f5   :  { %v3237_v3 = vmul.f32 %v8359_v21, %v3226_v62 }
 0x8f7   :  { %v8428_v39 = vadd.f32 %v8365_v26, %v3237_v3 }
 0x8f9   :  { %9526 = vst [vmem:[#allocation8_spill] sm:$0xff] %v8428_v39  ;;  %v3256_v54 = vpack.c.bf16 %v8428_v39, %v8428_v39 }
 0x8fb   :  { %v3289_v12 = vunpack.c.l.b16 %v3256_v54 }
 0x8fd   :  { %v8432_v2 = vpack.c.b16 %v3289_v12, %v3288_v61 }
 0x8ff   :  { %6315 = vmatmul.msk.bf16.gmra.mxu2 %vm131_vm2, %v8432_v2  ;;  %6327 = vmatmul.msk.bf16.gmra.mxu3 %vm131_vm2, %v8432_v2 }
 0x900   :  { %6339 = vmatmul.msk.bf16.gmra.mxu0 %vm131_vm2, %v8432_v2  ;;  %6351 = vmatmul.msk.bf16.gmra.mxu1 %vm131_vm2, %v8432_v2 }
 0x910   :  { %v3121_v7 = vpop.xlane.xlu2 %3120 }
 0x911   :  { %v3131_v44 = vmul.f32 %v3121_v7, %v7148_v46 }
 0x913   :  { %v3139_v40 = vadd.f32 1e-05, %v3131_v44 }
 0x915   :  { %6858 = vrsqrt.f32 %v3139_v40  ;;  %vm3207_vm12 = vweird.f32 %v3139_v40 }
 0x918   :  { %v3124_v24 = vpop.xlane.xlu0 %3123 }
 0x919   :  { %v3132_v51 = vmul.f32 %v3124_v24, %v7148_v46 }
 0x91b   :  { %v6859_v36 = vpop.eup %6858  ;;  %v3140_v8 = vadd.f32 1e-05, %v3132_v51 }
 0x91c   :  { %v3202_v42 = vmul.f32 %v6859_v36, %v3139_v40  ;;  %vm3208_vm11 = vweird.f32 %v6859_v36 }
 0x91d   :  { %6860 = vrsqrt.f32 %v3140_v8  ;;  %vm3209_vm13 = vmor %vm3207_vm12, %vm3208_vm11  ;;  %vm3217_vm4 = vweird.f32 %v3140_v8 }
 0x91e   :  { %v3203_v18 = vmul.f32 %v6859_v36, %v3202_v42 }
 0x920   :  { %v3204_v10 = vmul.f32 0.5, %v3203_v18 }
 0x922   :  { %v3205_v14 = vsub.f32 1.5, %v3204_v10 }
 0x923   :  { %v6861_v29 = vpop.eup %6860 }
 0x924   :  { %v3206_v34 = vmul.f32 %v6859_v36, %v3205_v14  ;;  %v3212_v4 = vmul.f32 %v6861_v29, %v3140_v8  ;;  %vm3218_vm14 = vweird.f32 %v6861_v29 }
 0x925   :  { %vm3219_vm5 = vmor %vm3217_vm4, %vm3218_vm14 }
 0x926   :  { %v3210_v43 = vsel %vm3209_vm13, %v6859_v36, %v3206_v34  ;;  %v3213_v32 = vmul.f32 %v6861_v29, %v3212_v4 }
 0x927   :  { %v3227_v33 = vmul.f32 %v3210_v43, %v8320_v63 }
 0x928   :  { %v3214_v41 = vmul.f32 0.5, %v3213_v32 }
 0x929   :  { %v3238_v19 = vmul.f32 %v8359_v21, %v3227_v33 }
 0x92a   :  { %v3215_v63 = vsub.f32 1.5, %v3214_v41 }
 0x92b   :  { %v8471_v30 = vadd.f32 %v8365_v26, %v3238_v19 }
 0x92c   :  { %v3216_v9 = vmul.f32 %v6861_v29, %v3215_v63 }
 0x92d   :  { %9527 = vst [vmem:[#allocation9_spill] sm:$0xff] %v8471_v30  ;;  %v3257_v37 = vpack.c.bf16 %v8471_v30, %v8471_v30 }
 0x92e   :  { %v3220_v56 = vsel %vm3219_vm5, %v6861_v29, %v3216_v9 }
 0x92f   :  { %v3228_v57 = vmul.f32 %v3220_v56, %v8351_v23  ;;  %v3290_v5 = vunpack.c.l.b16 %v3257_v37  ;;  %v6649_v23 = vld [vmem:[%s9490_s7 + $0x48] sm:$0xff] }
 0x930   :  { %3688 = vmatpush.bf16.msrb.mxu2 %v6649_v23 }
 0x931   :  { %v3239_v16 = vmul.f32 %v8359_v21, %v3228_v57  ;;  %v6651_v21 = vld [vmem:[%s9490_s7 + $0x58] sm:$0xff] }
 0x932   :  { %3729 = vmatpush.bf16.msra.mxu3 %v6651_v21 }
 0x933   :  { %v8478_v6 = vadd.f32 %v8365_v26, %v3239_v16  ;;  %v6653_v26 = vld [vmem:[%s9490_s7 + $0x68] sm:$0xff] }
 0x934   :  { %3770 = vmatpush.bf16.msra.mxu0 %v6653_v26  ;;  %3689 = vmatpush.bf16.msrb.mxu2 %v6648_v35 }
 0x935   :  { %9528 = vst [vmem:[#allocation10_spill] sm:$0xff] %v8478_v6  ;;  %v3258_v48 = vpack.c.bf16 %v8478_v6, %v8478_v6 }
 0x936   :  { %3730 = vmatpush.bf16.msra.mxu3 %v6650_v17 }
 0x937   :  { %v3291_v60 = vunpack.c.l.b16 %v3258_v48 }
 0x938   :  { %3771 = vmatpush.bf16.msra.mxu0 %v6652_v55 }
 0x939   :  { %v3295_v28 = vpack.c.b16 %v3291_v60, %v3290_v5 }
 0x93b   :  { %6316 = vmatmul.msk.bf16.gmra.mxu2 %vm131_vm2, %v3295_v28  ;;  %6328 = vmatmul.msk.bf16.gmra.mxu3 %vm131_vm2, %v3295_v28 }
 0x93c   :  { %6340 = vmatmul.msk.bf16.gmra.mxu0 %vm131_vm2, %v3295_v28  ;;  %6352 = vmatmul.msk.bf16.gmra.mxu1 %vm131_vm2, %v3295_v28 }
 0x93e   :  { %v8538_v27 = vpop.f32.mrf.mxu0  ;;  %v8540_v62 = vpop.f32.mrf.mxu1 }
 0x93f   :  { %v3850_v55 = vpack.c.bf16 %v8538_v27, %v8538_v27 }
 0x943   :  { %v8542_v3 = vpop.f32.mrf.mxu2  ;;  %v8544_v45 = vpop.f32.mrf.mxu3 }
 0x946   :  { %v8554_v54 = vpop.f32.mrf.mxu0  ;;  %v8556_v61 = vpop.f32.mrf.mxu1 }
 0x947   :  { %v3851_v23 = vpack.c.bf16 %v8554_v54, %v8554_v54 }
 0x94b   :  { %6377 = vmatmul.msk.bf16.vlgmr.msra.gmra.mxu2 %vm131_vm2, %v8380_v31  ;;  %6389 = vmatmul.msk.bf16.vlgmr.msrb.gmra.mxu3 %vm131_vm2, %v8380_v31  ;;  %v8558_v12 = vpop.f32.mrf.mxu2  ;;  %v8560_v7 = vpop.f32.mrf.mxu3 }
 0x94c   :  { %6401 = vmatmul.msk.bf16.vlgmr.msrb.gmra.mxu0 %vm131_vm2, %v8380_v31  ;;  %6413 = vmatmul.msk.bf16.vlgmr.msrb.gmra.mxu1 %vm131_vm2, %v8380_v31  ;;  %v3835_v54 = vpack.c.bf16 %v8558_v12, %v8558_v12 }
 0x95b   :  { %6378 = vmatmul.msk.bf16.gmra.mxu2 %vm131_vm2, %v8408_v13  ;;  %6390 = vmatmul.msk.bf16.gmra.mxu3 %vm131_vm2, %v8408_v13 }
 0x95c   :  { %6402 = vmatmul.msk.bf16.gmra.mxu0 %vm131_vm2, %v8408_v13  ;;  %6414 = vmatmul.msk.bf16.gmra.mxu1 %vm131_vm2, %v8408_v13 }
 0x969   :  { %v8562_v44 = vpop.f32.mrf.mxu0  ;;  %v8564_v40 = vpop.f32.mrf.mxu1 }
 0x96b   :  { %6379 = vmatmul.msk.bf16.gmra.mxu2 %vm131_vm2, %v8432_v2  ;;  %6391 = vmatmul.msk.bf16.gmra.mxu3 %vm131_vm2, %v8432_v2 }
 0x96c   :  { %6403 = vmatmul.msk.bf16.gmra.mxu0 %vm131_vm2, %v8432_v2  ;;  %6415 = vmatmul.msk.bf16.gmra.mxu1 %vm131_vm2, %v8432_v2 }
 0x96e   :  { %v8566_v24 = vpop.f32.mrf.mxu2  ;;  %v8568_v51 = vpop.f32.mrf.mxu3 }
 0x971   :  { %v8576_v36 = vpop.f32.mrf.mxu1 }
 0x976   :  { %v8578_v8 = vpop.f32.mrf.mxu2  ;;  %v8580_v42 = vpop.f32.mrf.mxu3 }
 0x97b   :  { %6380 = vmatmul.msk.bf16.gmra.mxu2 %vm131_vm2, %v3295_v28  ;;  %6392 = vmatmul.msk.bf16.gmra.mxu3 %vm131_vm2, %v3295_v28 }
 0x97c   :  { %6404 = vmatmul.msk.bf16.gmra.mxu0 %vm131_vm2, %v3295_v28  ;;  %6416 = vmatmul.msk.bf16.gmra.mxu1 %vm131_vm2, %v3295_v28 }
 0x97d   :  { %v8584_v10 = vpop.f32.mrf.mxu1 }
 0x982   :  { %v8590_v14 = vpop.f32.mrf.mxu2  ;;  %v8592_v29 = vpop.f32.mrf.mxu3 }
 0x985   :  { %v8600_v4 = vpop.f32.mrf.mxu1 }
 0x98a   :  { %v8602_v49 = vpop.f32.mrf.mxu2  ;;  %v8604_v15 = vpop.f32.mrf.mxu3 }
 0x98b   :  { %6441 = vmatmul.msk.bf16.vlgmr.msrb.gmra.mxu2 %vm131_vm2, %v8432_v2  ;;  %6453 = vmatmul.msk.bf16.vlgmr.msra.gmra.mxu3 %vm131_vm2, %v8432_v2 }
 0x98c   :  { %6465 = vmatmul.msk.bf16.vlgmr.msra.gmra.mxu0 %vm131_vm2, %v8432_v2  ;;  %6477 = vmatmul.msk.bf16.vlgmr.msra.gmra.mxu1 %vm131_vm2, %v8432_v2  ;;  %v8574_v2 = vpop.f32.mrf.mxu0 }
 0x994   :  { %v8582_v18 = vpop.f32.mrf.mxu0 }
 0x99b   :  { %6442 = vmatmul.msk.bf16.gmra.mxu2 %vm131_vm2, %v3295_v28  ;;  %6454 = vmatmul.msk.bf16.gmra.mxu3 %vm131_vm2, %v3295_v28 }
 0x99c   :  { %6466 = vmatmul.msk.bf16.gmra.mxu0 %vm131_vm2, %v3295_v28  ;;  %6478 = vmatmul.msk.bf16.gmra.mxu1 %vm131_vm2, %v3295_v28  ;;  %v8598_v34 = vpop.f32.mrf.mxu0 }
 0x9ab   :  { %6443 = vmatmul.msk.bf16.gmra.mxu2 %vm131_vm2, %v8380_v31  ;;  %6455 = vmatmul.msk.bf16.gmra.mxu3 %vm131_vm2, %v8380_v31 }
 0x9ac   :  { %6467 = vmatmul.msk.bf16.gmra.mxu0 %vm131_vm2, %v8380_v31  ;;  %6479 = vmatmul.msk.bf16.gmra.mxu1 %vm131_vm2, %v8380_v31 }
 0x9b9   :  { %v8606_v47 = vpop.f32.mrf.mxu0  ;;  %v8608_v53 = vpop.f32.mrf.mxu1 }
 0x9bb   :  { %6444 = vmatmul.msk.bf16.gmra.mxu2 %vm131_vm2, %v8408_v13  ;;  %6456 = vmatmul.msk.bf16.gmra.mxu3 %vm131_vm2, %v8408_v13 }
 0x9bc   :  { %6468 = vmatmul.msk.bf16.gmra.mxu0 %vm131_vm2, %v8408_v13  ;;  %6480 = vmatmul.msk.bf16.gmra.mxu1 %vm131_vm2, %v8408_v13 }
 0x9be   :  { %v8618_v31 = vpop.f32.mrf.mxu2  ;;  %v8620_v43 = vpop.f32.mrf.mxu3 }
 0x9c1   :  { %v8622_v32 = vpop.f32.mrf.mxu0  ;;  %v8624_v33 = vpop.f32.mrf.mxu1 }
 0x9c6   :  { %v8626_v41 = vpop.f32.mrf.mxu2  ;;  %v8628_v38 = vpop.f32.mrf.mxu3 }
 0x9c9   :  { %v3592_v59 = vpop.f32.mrf.mxu0  ;;  %v3633_v25 = vpop.f32.mrf.mxu1 }
 0x9ca   :  { %v3882_v19 = vpack.c.bf16 %v3592_v59, %v3592_v59  ;;  %v3890_v9 = vpack.c.bf16 %v3633_v25, %v3633_v25 }
 0x9cc   :  { %v4177_v37 = vunpack.c.l.b16 %v3882_v19  ;;  %v4297_v48 = vunpack.c.l.b16 %v3890_v9 }
 0x9ce   :  { %v3510_v20 = vpop.f32.mrf.mxu2  ;;  %v8630_v63 = vpop.f32.mrf.mxu3 }
 0x9cf   :  { %v3866_v28 = vpack.c.bf16 %v3510_v20, %v3510_v20 }
 0x9d1   :  { %v3594_v13 = vpop.f32.mrf.mxu0  ;;  %v3635_v56 = vpop.f32.mrf.mxu1  ;;  %v3937_v25 = vunpack.c.l.b16 %v3866_v28 }
 0x9d2   :  { %v3883_v57 = vpack.c.bf16 %v3594_v13, %v3594_v13  ;;  %v3891_v16 = vpack.c.bf16 %v3635_v56, %v3635_v56  ;;  %v4173_v13 = vunpack.c.l.b16 %v3851_v23 }
 0x9d4   :  { %v4178_v5 = vunpack.c.l.b16 %v3883_v57  ;;  %v4298_v60 = vunpack.c.l.b16 %v3891_v16  ;;  %v4172_v57 = vunpack.c.l.b16 %v3850_v55  ;;  %v3834_v16 = vpack.c.bf16 %v8542_v3, %v8542_v3 }
 0x9d6   :  { %v4179_v21 = vpack.c.b16 %v4178_v5, %v4177_v37  ;;  %v4299_v26 = vpack.c.b16 %v4298_v60, %v4297_v48  ;;  %v3512_v1 = vpop.f32.mrf.mxu2  ;;  %v8634_v35 = vpop.f32.mrf.mxu3  ;;  %v4174_v37 = vpack.c.b16 %v4173_v13, %v4172_v57  ;;  %v3933_v60 = vunpack.c.l.b16 %v3835_v54 }
 0x9d7   :  { %v3867_v17 = vpack.c.bf16 %v3512_v1, %v3512_v1  ;;  %v3932_v23 = vunpack.c.l.b16 %v3834_v16  ;;  %v3859_v13 = vpack.c.bf16 %v8556_v61, %v8556_v61 }
 0x9d8   :  { %v4184_v52 = vsel %vm73_vm1, %v4179_v21, 0  ;;  %v4304_v59 = vsel %vm73_vm1, %v4299_v26, 0 }
 0x9d9   :  { %v3938_v19 = vunpack.c.l.b16 %v3867_v17  ;;  %v3597_v9 = vpop.f32.mrf.mxu0  ;;  %v3638_v20 = vpop.f32.mrf.mxu1  ;;  %4193 = vmatpush.bf16.xpose.msrb.mxu0 %v4184_v52  ;;  %v3934_v55 = vpack.c.b16 %v3933_v60, %v3932_v23 }
 0x9da   :  { %v3884_v28 = vpack.c.bf16 %v3597_v9, %v3597_v9  ;;  %v3892_v21 = vpack.c.bf16 %v3638_v20, %v3638_v20  ;;  %v3853_v9 = vpack.c.bf16 %v8574_v2, %v8574_v2  ;;  %v4293_v2 = vunpack.c.l.b16 %v3859_v13 }
 0x9db   :  { %v3939_v56 = vpack.c.b16 %v3938_v19, %v3937_v25  ;;  %v3875_v13 = vpack.c.bf16 %v8634_v35, %v8634_v35 }
 0x9dc   :  { %v4207_v52 = vunpack.c.l.b16 %v3884_v28  ;;  %v4327_v3 = vunpack.c.l.b16 %v3892_v21  ;;  %v4203_v23 = vunpack.c.l.b16 %v3853_v9 }
 0x9dd   :  { %v3944_v27 = vsel %vm73_vm1, %v3939_v56, 0 }
 0x9de   :  { %v3515_v48 = vpop.f32.mrf.mxu2  ;;  %v8645_v5 = vpop.f32.mrf.mxu3  ;;  %3953 = vmatpush.bf16.xpose.msra.mxu2 %v3944_v27  ;;  %v3858_v27 = vpack.c.bf16 %v8540_v62, %v8540_v62 }
 0x9df   :  { %v3868_v19 = vpack.c.bf16 %v3515_v48, %v3515_v48 }
 0x9e0   :  { %6489 = vmatmul.msk.bf16.vlgmr.msrb.gmra.mxu0 %vm73_vm1, %v4174_v37  ;;  %v3852_v37 = vpack.c.bf16 %v8562_v44, %v8562_v44  ;;  %v4292_v62 = vunpack.c.l.b16 %v3858_v27  ;;  %v3836_v44 = vpack.c.bf16 %v8566_v24, %v8566_v24  ;;  %v3874_v24 = vpack.c.bf16 %v8630_v63, %v8630_v63 }
 0x9e1   :  { %4313 = vmatpush.bf16.xpose.msra.mxu0 %v4304_v59  ;;  %v3599_v26 = vpop.f32.mrf.mxu0  ;;  %v3640_v12 = vpop.f32.mrf.mxu1  ;;  %v3967_v61 = vunpack.c.l.b16 %v3868_v19 }
 0x9e2   :  { %v3885_v1 = vpack.c.bf16 %v3599_v26, %v3599_v26  ;;  %v3893_v17 = vpack.c.bf16 %v3640_v12, %v3640_v12  ;;  %v3837_v26 = vpack.c.bf16 %v8578_v8, %v8578_v8  ;;  %v3962_v19 = vunpack.c.l.b16 %v3836_v44 }
 0x9e3   :  { %v4057_v35 = vunpack.c.l.b16 %v3874_v24  ;;  %v3838_v44 = vpack.c.bf16 %v8590_v14, %v8590_v14 }
 0x9e4   :  { %v4208_v59 = vunpack.c.l.b16 %v3885_v1  ;;  %v4328_v25 = vunpack.c.l.b16 %v3893_v17  ;;  %v4202_v1 = vunpack.c.l.b16 %v3852_v37 }
 0x9e5   :  { %6481 = vmatmul.msk.bf16.vlgmr.msra.gmra.mxu2 %vm73_vm1, %v3934_v55  ;;  %v4294_v55 = vpack.c.b16 %v4293_v2, %v4292_v62 }
 0x9e6   :  { %v4209_v20 = vpack.c.b16 %v4208_v59, %v4207_v52  ;;  %v4329_v54 = vpack.c.b16 %v4328_v25, %v4327_v3  ;;  %v3517_v56 = vpop.f32.mrf.mxu2  ;;  %v8653_v57 = vpop.f32.mrf.mxu3  ;;  %v4204_v52 = vpack.c.b16 %v4203_v23, %v4202_v1  ;;  %v3963_v25 = vunpack.c.l.b16 %v3837_v26 }
 0x9e7   :  { %v3869_v16 = vpack.c.bf16 %v3517_v56, %v3517_v56  ;;  %v4058_v56 = vunpack.c.l.b16 %v3875_v13  ;;  %v3839_v26 = vpack.c.bf16 %v8602_v49, %v8602_v49  ;;  %v3992_v49 = vunpack.c.l.b16 %v3838_v44 }
 0x9e8   :  { %v4214_v48 = vsel %vm73_vm1, %v4209_v20, 0  ;;  %v4334_v60 = vsel %vm73_vm1, %v4329_v54, 0  ;;  %v3964_v9 = vpack.c.b16 %v3963_v25, %v3962_v19  ;;  %v3861_v54 = vpack.c.bf16 %v8576_v36, %v8576_v36 }
 0x9e9   :  { %v3968_v28 = vunpack.c.l.b16 %v3869_v16  ;;  %v8661_v21 = vpop.f32.mrf.mxu0  ;;  %4223 = vmatpush.bf16.xpose.msrb.mxu1 %v4214_v48  ;;  %v8679_v37 = vpop.f32.mrf.mxu1  ;;  %v4059_v23 = vpack.c.b16 %v4058_v56, %v4057_v35  ;;  %v3993_v19 = vunpack.c.l.b16 %v3839_v26  ;;  %v3877_v14 = vpack.c.bf16 %v8653_v57, %v8653_v57 }
 0x9ea   :  { %v4323_v63 = vunpack.c.l.b16 %v3861_v54  ;;  %v3841_v26 = vpack.c.bf16 %v8626_v41, %v8626_v41 }
 0x9eb   :  { %v3969_v12 = vpack.c.b16 %v3968_v28, %v3967_v61  ;;  %v4064_v25 = vsel %vm73_vm1, %v4059_v23, 0  ;;  %v3994_v24 = vpack.c.b16 %v3993_v19, %v3992_v49 }
 0x9ec   :  { %v4023_v19 = vunpack.c.l.b16 %v3841_v26 }
 0x9ed   :  { %v3974_v17 = vsel %vm73_vm1, %v3969_v12, 0 }
 0x9ee   :  { %v3520_v3 = vpop.f32.mrf.mxu2  ;;  %v3561_v59 = vpop.f32.mrf.mxu3  ;;  %3983 = vmatpush.bf16.xpose.msrb.mxu3 %v3974_v17 }
 0x9ef   :  { %v3870_v20 = vpack.c.bf16 %v3520_v3, %v3520_v3  ;;  %v3878_v12 = vpack.c.bf16 %v3561_v59, %v3561_v59 }
 0x9f0   :  { %6490 = vmatmul.msk.bf16.vlgmr.msrb.gmra.mxu1 %vm73_vm1, %v4204_v52  ;;  %6493 = vmatmul.msk.bf16.vlgmr.msra.gmra.mxu0 %vm73_vm1, %v4294_v55 }
 0x9f1   :  { %4343 = vmatpush.bf16.xpose.msra.mxu1 %v4334_v60  ;;  %v8670_v8 = vpop.f32.mrf.mxu0  ;;  %v3860_v60 = vpack.c.bf16 %v8564_v40, %v8564_v40  ;;  %v3997_v61 = vunpack.c.l.b16 %v3870_v20  ;;  %v4117_v13 = vunpack.c.l.b16 %v3878_v12  ;;  %v8692_v59 = vpop.f32.mrf.mxu1  ;;  %v3876_v20 = vpack.c.bf16 %v8645_v5, %v8645_v5 }
 0x9f2   :  { %v3887_v57 = vpack.c.bf16 %v8670_v8, %v8670_v8  ;;  %v3843_v5 = vpack.c.bf16 %v8560_v7, %v8560_v7  ;;  %v3886_v12 = vpack.c.bf16 %v8661_v21, %v8661_v21  ;;  %v3842_v8 = vpack.c.bf16 %v8544_v45, %v8544_v45 }
 0x9f3   :  { %v4322_v1 = vunpack.c.l.b16 %v3860_v60 }
 0x9f4   :  { %v4053_v21 = vunpack.c.l.b16 %v3843_v5  ;;  %v4052_v45 = vunpack.c.l.b16 %v3842_v8  ;;  %v3847_v8 = vpack.c.bf16 %v8604_v15, %v8604_v15 }
 0x9f5   :  { %6482 = vmatmul.msk.bf16.vlgmr.msrb.gmra.mxu3 %vm73_vm1, %v3964_v9  ;;  %v4324_v55 = vpack.c.b16 %v4323_v63, %v4322_v1 }
 0x9f6   :  { %v3522_v16 = vpop.f32.mrf.mxu2  ;;  %v3563_v27 = vpop.f32.mrf.mxu3 }
 0x9f7   :  { %v3871_v48 = vpack.c.bf16 %v3522_v16, %v3522_v16  ;;  %v3879_v2 = vpack.c.bf16 %v3563_v27, %v3563_v27  ;;  %v4088_v27 = vunpack.c.l.b16 %v3877_v14 }
 0x9f9   :  { %v3998_v28 = vunpack.c.l.b16 %v3871_v48  ;;  %v8685_v62 = vpop.f32.mrf.mxu0  ;;  %v4118_v17 = vunpack.c.l.b16 %v3879_v2 }
 0x9fb   :  { %v3999_v36 = vpack.c.b16 %v3998_v28, %v3997_v61  ;;  %v4119_v9 = vpack.c.b16 %v4118_v17, %v4117_v13  ;;  %v4087_v61 = vunpack.c.l.b16 %v3876_v20  ;;  %v3840_v17 = vpack.c.bf16 %v8618_v31, %v8618_v31 }
 0x9fc   :  { %v4237_v13 = vunpack.c.l.b16 %v3886_v12 }
 0x9fd   :  { %v4004_v40 = vsel %vm73_vm1, %v3999_v36, 0  ;;  %v4124_v16 = vsel %vm73_vm1, %v4119_v9, 0  ;;  %v4089_v23 = vpack.c.b16 %v4088_v27, %v4087_v61  ;;  %v8710_v36 = vpop.f32.mrf.mxu1  ;;  %v4022_v9 = vunpack.c.l.b16 %v3840_v17 }
 0x9fe   :  { %v3525_v52 = vpop.f32.mrf.mxu2  ;;  %v3566_v3 = vpop.f32.mrf.mxu3  ;;  %4013 = vmatpush.bf16.xpose.msrb.mxu2 %v4004_v40  ;;  %v4238_v40 = vunpack.c.l.b16 %v3887_v57  ;;  %v3894_v17 = vpack.c.bf16 %v8679_v37, %v8679_v37 }
 0x9ff   :  { %v3872_v54 = vpack.c.bf16 %v3525_v52, %v3525_v52  ;;  %v3880_v1 = vpack.c.bf16 %v3566_v3, %v3566_v3  ;;  %v4094_v41 = vsel %vm73_vm1, %v4089_v23, 0  ;;  %v4024_v20 = vpack.c.b16 %v4023_v19, %v4022_v9 }
 0xa00   :  { %6494 = vmatmul.msk.bf16.vlgmr.msra.gmra.mxu1 %vm73_vm1, %v4324_v55  ;;  %v4239_v14 = vpack.c.b16 %v4238_v40, %v4237_v13  ;;  %v4357_v37 = vunpack.c.l.b16 %v3894_v17  ;;  %v3848_v17 = vpack.c.bf16 %v8620_v43, %v8620_v43 }
 0xa01   :  { %v8698_v56 = vpop.f32.mrf.mxu0  ;;  %v4027_v28 = vunpack.c.l.b16 %v3872_v54  ;;  %v4147_v3 = vunpack.c.l.b16 %v3880_v1 }
 0xa05   :  { %6483 = vmatmul.msk.bf16.vlgmr.msrb.gmra.mxu2 %vm73_vm1, %v3994_v24  ;;  %v4054_v24 = vpack.c.b16 %v4053_v21, %v4052_v45  ;;  %v8720_v54 = vpop.f32.mrf.mxu1  ;;  %v4113_v21 = vunpack.c.l.b16 %v3847_v8 }
 0xa06   :  { %4073 = vmatpush.bf16.xpose.msra.mxu2 %v4064_v25  ;;  %v3527_v48 = vpop.f32.mrf.mxu2  ;;  %v3568_v60 = vpop.f32.mrf.mxu3 }
 0xa07   :  { %v3873_v35 = vpack.c.bf16 %v3527_v48, %v3527_v48  ;;  %v3881_v63 = vpack.c.bf16 %v3568_v60, %v3568_v60  ;;  %v4244_v48 = vsel %vm73_vm1, %v4239_v14, 0 }
 0xa09   :  { %v4028_v2 = vunpack.c.l.b16 %v3873_v35  ;;  %v4148_v55 = vunpack.c.l.b16 %v3881_v63  ;;  %v8718_v49 = vpop.f32.mrf.mxu0  ;;  %v3889_v63 = vpack.c.bf16 %v8698_v56, %v8698_v56 }
 0xa0b   :  { %v4029_v44 = vpack.c.b16 %v4028_v2, %v4027_v28  ;;  %v4149_v31 = vpack.c.b16 %v4148_v55, %v4147_v3  ;;  %v3895_v2 = vpack.c.bf16 %v8692_v59, %v8692_v59  ;;  %v3888_v59 = vpack.c.bf16 %v8685_v62, %v8685_v62 }
 0xa0c   :  { %v3844_v55 = vpack.c.bf16 %v8568_v51, %v8568_v51 }
 0xa0d   :  { %v4034_v7 = vsel %vm73_vm1, %v4029_v44, 0  ;;  %v4154_v60 = vsel %vm73_vm1, %v4149_v31, 0  ;;  %v3845_v44 = vpack.c.bf16 %v8580_v42, %v8580_v42  ;;  %v4267_v19 = vunpack.c.l.b16 %v3888_v59  ;;  %v8744_v13 = vpop.f32.mrf.mxu1 }
 0xa0e   :  { %4133 = vmatpush.bf16.xpose.msrb.mxu2 %v4124_v16  ;;  %v3691_v52 = vpop.f32.mrf.mxu2  ;;  %v3732_v25 = vpop.f32.mrf.mxu3  ;;  %4043 = vmatpush.bf16.xpose.msra.mxu3 %v4034_v7  ;;  %v3846_v7 = vpack.c.bf16 %v8592_v29, %v8592_v29  ;;  %v4082_v62 = vunpack.c.l.b16 %v3844_v55 }
 0xa0f   :  { %v3898_v16 = vpack.c.bf16 %v3691_v52, %v3691_v52  ;;  %v3906_v27 = vpack.c.bf16 %v3732_v25, %v3732_v25  ;;  %v4358_v52 = vunpack.c.l.b16 %v3895_v2  ;;  %v4268_v25 = vunpack.c.l.b16 %v3889_v63 }
 0xa10   :  { %v4083_v15 = vunpack.c.l.b16 %v3845_v44  ;;  %v4112_v3 = vunpack.c.l.b16 %v3846_v7 }
 0xa11   :  { %v4801_v5 = vunpack.c.l.b16 %v3898_v16  ;;  %v4913_v23 = vunpack.c.l.b16 %v3906_v27  ;;  %v8730_v26 = vpop.f32.mrf.mxu0  ;;  %v4359_v45 = vpack.c.b16 %v4358_v52, %v4357_v37  ;;  %v4269_v9 = vpack.c.b16 %v4268_v25, %v4267_v19 }
 0xa12   :  { %v4084_v51 = vpack.c.b16 %v4083_v15, %v4082_v62  ;;  %v4114_v14 = vpack.c.b16 %v4113_v21, %v4112_v3 }
 0xa13   :  { %v4364_v16 = vsel %vm73_vm1, %v4359_v45, 0 }
 0xa15   :  { %6484 = vmatmul.msk.bf16.vlgmr.msra.gmra.mxu3 %vm73_vm1, %v4024_v20  ;;  %6485 = vmatmul.msk.bf16.vlgmr.msra.gmra.mxu2 %vm73_vm1, %v4054_v24  ;;  %v4274_v20 = vsel %vm73_vm1, %v4269_v9, 0  ;;  %v3863_v9 = vpack.c.bf16 %v8600_v4, %v8600_v4 }
 0xa16   :  { %4103 = vmatpush.bf16.xpose.msrb.mxu3 %v4094_v41  ;;  %4253 = vmatpush.bf16.xpose.msra.mxu2 %v4244_v48  ;;  %v3693_v35 = vpop.f32.mrf.mxu2  ;;  %v3734_v61 = vpop.f32.mrf.mxu3 }
 0xa17   :  { %v3899_v57 = vpack.c.bf16 %v3693_v35, %v3693_v35  ;;  %v3907_v28 = vpack.c.bf16 %v3734_v61, %v3734_v61  ;;  %v3897_v61 = vpack.c.bf16 %v8720_v54, %v8720_v54  ;;  %v3854_v54 = vpack.c.bf16 %v8582_v18, %v8582_v18 }
 0xa19   :  { %v4802_v12 = vunpack.c.l.b16 %v3899_v57  ;;  %v4914_v1 = vunpack.c.l.b16 %v3907_v28  ;;  %v8746_v31 = vpop.f32.mrf.mxu0  ;;  %v8754_v57 = vpop.f32.mrf.mxu1  ;;  %v4388_v59 = vunpack.c.l.b16 %v3897_v61  ;;  %v4232_v52 = vunpack.c.l.b16 %v3854_v54 }
 0xa1b   :  { %v4803_v40 = vpack.c.b16 %v4802_v12, %v4801_v5  ;;  %v4915_v56 = vpack.c.b16 %v4914_v1, %v4913_v23  ;;  %v3855_v23 = vpack.c.bf16 %v8598_v34, %v8598_v34  ;;  %v3849_v12 = vpack.c.bf16 %v8628_v38, %v8628_v38 }
 0xa1c   :  { %v3896_v1 = vpack.c.bf16 %v8710_v36, %v8710_v36  ;;  %v4142_v36 = vunpack.c.l.b16 %v3848_v17 }
 0xa1d   :  { %4815 = vmatpush.bf16.msrb.mxu0 %v4803_v40  ;;  %v4233_v55 = vunpack.c.l.b16 %v3855_v23  ;;  %v4143_v38 = vunpack.c.l.b16 %v3849_v12 }
 0xa1e   :  { %4163 = vmatpush.bf16.xpose.msra.mxu3 %v4154_v60  ;;  %v3696_v42 = vpop.f32.mrf.mxu2  ;;  %v3737_v41 = vpop.f32.mrf.mxu3  ;;  %v4387_v7 = vunpack.c.l.b16 %v3896_v1 }
 0xa1f   :  { %v3900_v29 = vpack.c.bf16 %v3696_v42, %v3696_v42  ;;  %v3908_v24 = vpack.c.bf16 %v3737_v41, %v3737_v41  ;;  %v4234_v42 = vpack.c.b16 %v4233_v55, %v4232_v52  ;;  %v4144_v41 = vpack.c.b16 %v4143_v38, %v4142_v36 }
 0xa20   :  { %v4389_v25 = vpack.c.b16 %v4388_v59, %v4387_v7  ;;  %v3865_v59 = vpack.c.bf16 %v8624_v33, %v8624_v33  ;;  %v3864_v38 = vpack.c.bf16 %v8608_v53, %v8608_v53 }
 0xa21   :  { %4927 = vmatpush.bf16.msra.mxu0 %v4915_v56  ;;  %v4829_v28 = vunpack.c.l.b16 %v3900_v29  ;;  %v4941_v2 = vunpack.c.l.b16 %v3908_v24  ;;  %v8766_v40 = vpop.f32.mrf.mxu0  ;;  %v8768_v15 = vpop.f32.mrf.mxu1  ;;  %v3862_v24 = vpack.c.bf16 %v8584_v10, %v8584_v10 }
 0xa22   :  { %v4394_v43 = vsel %vm73_vm1, %v4389_v25, 0  ;;  %v4383_v52 = vunpack.c.l.b16 %v3865_v59  ;;  %v4382_v25 = vunpack.c.l.b16 %v3864_v38 }
 0xa25   :  { %6486 = vmatmul.msk.bf16.vlgmr.msrb.gmra.mxu3 %vm73_vm1, %v4084_v51  ;;  %6487 = vmatmul.msk.bf16.vlgmr.msrb.gmra.mxu2 %vm73_vm1, %v4114_v14  ;;  %v3857_v51 = vpack.c.bf16 %v8622_v32, %v8622_v32 }
 0xa26   :  { %4283 = vmatpush.bf16.xpose.msrb.mxu3 %v4274_v20  ;;  %4373 = vmatpush.bf16.xpose.msrb.mxu2 %v4364_v16  ;;  %v3698_v27 = vpop.f32.mrf.mxu2  ;;  %v3739_v48 = vpop.f32.mrf.mxu3  ;;  %v3856_v20 = vpack.c.bf16 %v8606_v47, %v8606_v47 }
 0xa27   :  { %v3901_v60 = vpack.c.bf16 %v3698_v27, %v3698_v27  ;;  %v3909_v35 = vpack.c.bf16 %v3739_v48, %v3739_v48 }
 0xa29   :  { %v4830_v63 = vunpack.c.l.b16 %v3901_v60  ;;  %v4942_v5 = vunpack.c.l.b16 %v3909_v35  ;;  %v8773_v19 = vpop.f32.mrf.mxu0  ;;  %v8783_v16 = vpop.f32.mrf.mxu1  ;;  %v4353_v60 = vunpack.c.l.b16 %v3863_v9  ;;  %v4263_v35 = vunpack.c.l.b16 %v3857_v51 }
 0xa2b   :  { %v4831_v44 = vpack.c.b16 %v4830_v63, %v4829_v28  ;;  %v4943_v8 = vpack.c.b16 %v4942_v5, %v4941_v2  ;;  %v4352_v28 = vunpack.c.l.b16 %v3862_v24  ;;  %v4262_v2 = vunpack.c.l.b16 %v3856_v20 }
 0xa2d   :  { %4843 = vmatpush.bf16.msrb.mxu1 %v4831_v44  ;;  %v4354_v5 = vpack.c.b16 %v4353_v60, %v4352_v28  ;;  %v4264_v23 = vpack.c.b16 %v4263_v35, %v4262_v2 }
 0xa2e   :  { %v3701_v56 = vpop.f32.mrf.mxu2  ;;  %v3742_v34 = vpop.f32.mrf.mxu3 }
 0xa2f   :  { %v3902_v18 = vpack.c.bf16 %v3701_v56, %v3701_v56  ;;  %v3910_v27 = vpack.c.bf16 %v3742_v34, %v3742_v34 }
 0xa31   :  { %4955 = vmatpush.bf16.msra.mxu1 %v4943_v8  ;;  %v4857_v3 = vunpack.c.l.b16 %v3902_v18  ;;  %v8785_v32 = vpop.f32.mrf.mxu0  ;;  %v4969_v63 = vunpack.c.l.b16 %v3910_v27  ;;  %v8789_v1 = vpop.f32.mrf.mxu1  ;;  %v4384_v18 = vpack.c.b16 %v4383_v52, %v4382_v25 }
 0xa35   :  { %6488 = vmatmul.msk.bf16.vlgmr.msra.gmra.mxu3 %vm73_vm1, %v4144_v41  ;;  %6491 = vmatmul.msk.bf16.vlgmr.msra.gmra.mxu2 %vm73_vm1, %v4234_v42 }
 0xa36   :  { %4403 = vmatpush.bf16.xpose.msra.mxu3 %v4394_v43  ;;  %v3703_v21 = vpop.f32.mrf.mxu2  ;;  %v3744_v37 = vpop.f32.mrf.mxu3 }
 0xa37   :  { %v3903_v62 = vpack.c.bf16 %v3703_v21, %v3703_v21  ;;  %v3911_v29 = vpack.c.bf16 %v3744_v37, %v3744_v37 }
 0xa39   :  { %v4858_v45 = vunpack.c.l.b16 %v3903_v62  ;;  %v4970_v4 = vunpack.c.l.b16 %v3911_v29  ;;  %v8793_v56 = vpop.f32.mrf.mxu0  ;;  %v8797_v42 = vpop.f32.mrf.mxu1 }
 0xa3b   :  { %v4859_v14 = vpack.c.b16 %v4858_v45, %v4857_v3  ;;  %v4971_v10 = vpack.c.b16 %v4970_v4, %v4969_v63 }
 0xa3d   :  { %4871 = vmatpush.bf16.msra.mxu2 %v4859_v14 }
 0xa3e   :  { %v3706_v48 = vpop.f32.mrf.mxu2  ;;  %v3747_v61 = vpop.f32.mrf.mxu3 }
 0xa3f   :  { %v3904_v12 = vpack.c.bf16 %v3706_v48, %v3706_v48  ;;  %v3912_v7 = vpack.c.bf16 %v3747_v61, %v3747_v61 }
 0xa41   :  { %v4885_v8 = vunpack.c.l.b16 %v3904_v12  ;;  %v4997_v41 = vunpack.c.l.b16 %v3912_v7  ;;  %v8799_v21 = vpop.f32.mrf.mxu0  ;;  %v8802_v33 = vpop.f32.mrf.mxu1 }
 0xa42   :  { %9529 = vst [vmem:[#allocation11_spill] sm:$0xff] %v8802_v33 }
 0xa45   :  { %6492 = vmatmul.msk.bf16.vlgmr.msrb.gmra.mxu3 %vm73_vm1, %v4264_v23  ;;  %6495 = vmatmul.msk.bf16.vlgmr.msrb.gmra.mxu2 %vm73_vm1, %v4354_v5 }
 0xa46   :  { %4983 = vmatpush.bf16.msrb.mxu2 %v4971_v10  ;;  %v3708_v47 = vpop.f32.mrf.mxu2  ;;  %v3749_v17 = vpop.f32.mrf.mxu3 }
 0xa47   :  { %v3905_v44 = vpack.c.bf16 %v3708_v47, %v3708_v47  ;;  %v3913_v55 = vpack.c.bf16 %v3749_v17, %v3749_v17 }
 0xa49   :  { %v4886_v54 = vunpack.c.l.b16 %v3905_v44  ;;  %v4998_v36 = vunpack.c.l.b16 %v3913_v55  ;;  %v8808_v62 = vpop.f32.mrf.mxu1 }
 0xa4b   :  { %v4887_v34 = vpack.c.b16 %v4886_v54, %v4885_v8  ;;  %v4999_v43 = vpack.c.b16 %v4998_v36, %v4997_v41 }
 0xa4d   :  { %4899 = vmatpush.bf16.msrb.mxu3 %v4887_v34 }
 0xa55   :  { %6496 = vmatmul.msk.bf16.vlgmr.msra.gmra.mxu3 %vm73_vm1, %v4384_v18 }
 0xa56   :  { %5011 = vmatpush.bf16.msra.mxu3 %v4999_v43 }
 0xa5d   :  { %v8804_v37 = vpop.f32.mrf.mxu0 }
 0xa5e   :  { %v4458_v53 = vsel %vm1493_vm15, %v8804_v37, -inf }
 0xa5f   :  { %4459 = vmax.xlane.f32.xlu2 %v4458_v53 }
 0xa65   :  { %v8810_v3 = vpop.f32.mrf.mxu0 }
 0xa66   :  { %v4461_v45 = vsel %vm1493_vm15, %v8810_v3, -inf }
 0xa67   :  { %4462 = vmax.xlane.f32.xlu0 %v4461_v45 }
 0xa68   :  { %v8814_v9 = vpop.f32.mrf.mxu2 }
 0xa69   :  { %v4410_v51 = vsel %vm1493_vm15, %v8814_v9, -inf }
 0xa6a   :  { %4411 = vmax.xlane.f32.xlu1 %v4410_v51 }
 0xa6d   :  { %v8818_v14 = vpop.f32.mrf.mxu1  ;;  %v8820_v29 = vpop.f32.mrf.mxu0 }
 0xa6e   :  { %v4464_v24 = vsel %vm1493_vm15, %v8818_v14, -inf  ;;  %v4482_v20 = vsel %vm1493_vm15, %v8820_v29, -inf }
 0xa6f   :  { %4465 = vmax.xlane.f32.xlu2 %v4464_v24 }
 0xa70   :  { %v8826_v27 = vpop.f32.mrf.mxu2 }
 0xa71   :  { %v4413_v35 = vsel %vm1493_vm15, %v8826_v27, -inf }
 0xa72   :  { %4483 = vmax.xlane.f32.xlu1 %v4482_v20 }
 0xa75   :  { %v8828_v48 = vpop.f32.mrf.mxu1  ;;  %v8836_v4 = vpop.f32.mrf.mxu0 }
 0xa76   :  { %v4467_v60 = vsel %vm1493_vm15, %v8828_v48, -inf  ;;  %v4485_v63 = vsel %vm1493_vm15, %v8836_v4, -inf }
 0xa77   :  { %4468 = vmax.xlane.f32.xlu0 %v4467_v60  ;;  %4414 = vmax.xlane.f32.xlu2 %v4413_v35 }
 0xa78   :  { %v8834_v61 = vpop.f32.mrf.mxu3 }
 0xa79   :  { %v4416_v2 = vsel %vm1493_vm15, %v8834_v61, -inf }
 0xa7d   :  { %v8838_v28 = vpop.f32.mrf.mxu1 }
 0xa7e   :  { %v4488_v12 = vsel %vm1493_vm15, %v8838_v28, -inf }
 0xa7f   :  { %4417 = vmax.xlane.f32.xlu0 %v4416_v2  ;;  %4486 = vmax.xlane.f32.xlu2 %v4485_v63 }
 0xa80   :  { %v8844_v5 = vpop.f32.mrf.mxu3 }
 0xa81   :  { %v4419_v23 = vsel %vm1493_vm15, %v8844_v5, -inf }
 0xa82   :  { %4420 = vmax.xlane.f32.xlu1 %v4419_v23 }
 0xa85   :  { %v8848_v10 = vpop.f32.mrf.mxu1 }
 0xa86   :  { %v4491_v44 = vsel %vm1493_vm15, %v8848_v10, -inf }
 0xa87   :  { %4489 = vmax.xlane.f32.xlu0 %v4488_v12 }
 0xa88   :  { %v8852_v47 = vpop.f32.mrf.mxu2 }
 0xa89   :  { %v4422_v54 = vsel %vm1493_vm15, %v8852_v47, -inf }
 0xa8a   :  { %4492 = vmax.xlane.f32.xlu1 %v4491_v44 }
 0xa90   :  { %v8856_v8 = vpop.f32.mrf.mxu2 }
 0xa91   :  { %v4425_v17 = vsel %vm1493_vm15, %v8856_v8, -inf }
 0xa92   :  { %4423 = vmax.xlane.f32.xlu1 %v4422_v54  ;;  %4426 = vmax.xlane.f32.xlu2 %v4425_v17 }
 0xa98   :  { %v8862_v59 = vpop.f32.mrf.mxu3  ;;  %v8864_v34 = vpop.f32.mrf.mxu2 }
 0xa99   :  { %v4428_v55 = vsel %vm1493_vm15, %v8862_v59, -inf  ;;  %v4434_v38 = vsel %vm1493_vm15, %v8864_v34, -inf }
 0xa9a   :  { %4429 = vmax.xlane.f32.xlu1 %v4428_v55  ;;  %4435 = vmax.xlane.f32.xlu2 %v4434_v38 }
 0xaa0   :  { %v8870_v7 = vpop.f32.mrf.mxu3  ;;  %v8872_v52 = vpop.f32.mrf.mxu2 }
 0xaa1   :  { %v4431_v36 = vsel %vm1493_vm15, %v8870_v7, -inf  ;;  %v4437_v25 = vsel %vm1493_vm15, %v8872_v52, -inf }
 0xaa2   :  { %4432 = vmax.xlane.f32.xlu2 %v4431_v36  ;;  %4438 = vmax.xlane.f32.xlu0 %v4437_v25 }
 0xaa8   :  { %v8878_v41 = vpop.f32.mrf.mxu3  ;;  %v8880_v18 = vpop.f32.mrf.mxu2 }
 0xaa9   :  { %v4440_v43 = vsel %vm1493_vm15, %v8878_v41, -inf  ;;  %v4446_v24 = vsel %vm1493_vm15, %v8880_v18, -inf }
 0xaaa   :  { %4441 = vmax.xlane.f32.xlu0 %v4440_v43 }
 0xab0   :  { %v8884_v53 = vpop.f32.mrf.mxu3  ;;  %v8886_v45 = vpop.f32.mrf.mxu2 }
 0xab1   :  { %v4443_v51 = vsel %vm1493_vm15, %v8884_v53, -inf  ;;  %v4449_v2 = vsel %vm1493_vm15, %v8886_v45, -inf }
 0xab2   :  { %4444 = vmax.xlane.f32.xlu1 %v4443_v51  ;;  %4447 = vmax.xlane.f32.xlu0 %v4446_v24 }
 0xab8   :  { %v8892_v20 = vpop.f32.mrf.mxu3  ;;  %v8894_v60 = vpop.f32.mrf.mxu2 }
 0xab9   :  { %v4452_v35 = vsel %vm1493_vm15, %v8892_v20, -inf  ;;  %v4470_v44 = vsel %vm1493_vm15, %v8894_v60, -inf }
 0xaba   :  { %4453 = vmax.xlane.f32.xlu2 %v4452_v35  ;;  %4450 = vmax.xlane.f32.xlu1 %v4449_v2 }
 0xac0   :  { %v8900_v63 = vpop.f32.mrf.mxu3  ;;  %v8902_v23 = vpop.f32.mrf.mxu2 }
 0xac1   :  { %v4455_v12 = vsel %vm1493_vm15, %v8900_v63, -inf  ;;  %v4473_v54 = vsel %vm1493_vm15, %v8902_v23, -inf }
 0xac2   :  { %4456 = vmax.xlane.f32.xlu0 %v4455_v12  ;;  %4471 = vmax.xlane.f32.xlu1 %v4470_v44 }
 0xac3   :  { %4474 = vmax.xlane.f32.xlu2 %v4473_v54 }
 0xac8   :  { %v8910_v17 = vpop.f32.mrf.mxu3  ;;  %v8912_v55 = vpop.f32.mrf.mxu2 }
 0xac9   :  { %v4476_v38 = vsel %vm1493_vm15, %v8910_v17, -inf  ;;  %v4494_v36 = vsel %vm1493_vm15, %v8912_v55, -inf }
 0xaca   :  { %4477 = vmax.xlane.f32.xlu0 %v4476_v38 }
 0xacb   :  { %4495 = vmax.xlane.f32.xlu2 %v4494_v36 }
 0xad0   :  { %v8918_v25 = vpop.f32.mrf.mxu3  ;;  %v8920_v43 = vpop.f32.mrf.mxu2 }
 0xad1   :  { %v4479_v51 = vsel %vm1493_vm15, %v8918_v25, -inf  ;;  %v4497_v24 = vsel %vm1493_vm15, %v8920_v43, -inf }
 0xad2   :  { %4480 = vmax.xlane.f32.xlu1 %v4479_v51  ;;  %4498 = vmax.xlane.f32.xlu0 %v4497_v24  ;;  %v8926_v35 = vpop.xlane.xlu2 %4459 }
 0xada   :  { %v4463_v54 = vpop.xlane.xlu0 %4462 }
 0xadd   :  { %v4412_v2 = vpop.xlane.xlu1 %4411 }
 0xade   :  { %v4506_v12 = vsub.f32 %v8814_v9, %v4412_v2 }
 0xae0   :  { %v4538_v44 = vmul.f32 1.442695, %v4506_v12 }
 0xae2   :  { %6862 = vpow2.f32 %v4538_v44  ;;  %v8929_v38 = vpop.xlane.xlu2 %4465 }
 0xae5   :  { %v8938_v24 = vpop.xlane.xlu1 %4483 }
 0xae8   :  { %v8931_v36 = vpop.eup %6862 }
 0xae9   :  { %v4602_v6 = vsel %vm1493_vm15, %v8931_v36, 0.0 }
 0xaea   :  { %v8935_v46 = vpop.xlane.xlu0 %4468  ;;  %v4415_v30 = vpop.xlane.xlu2 %4414  ;;  %4603 = vadd.xlane.f32.xlu0 %v4602_v6  ;;  %v4523_v6 = vsub.f32 %v8810_v3, %v4463_v54 }
 0xaeb   :  { %v4507_v51 = vsub.f32 %v8826_v27, %v4415_v30 }
 0xaec   :  { %v4572_v27 = vmul.f32 1.442695, %v4523_v6 }
 0xaed   :  { %v4540_v39 = vmul.f32 1.442695, %v4507_v51 }
 0xaef   :  { %6864 = vpow2.f32 %v4540_v39 }
 0xaf2   :  { %v4418_v9 = vpop.xlane.xlu0 %4417  ;;  %v8949_v51 = vpop.xlane.xlu2 %4486 }
 0xaf3   :  { %v4508_v2 = vsub.f32 %v8834_v61, %v4418_v9 }
 0xaf5   :  { %v4542_v12 = vmul.f32 1.442695, %v4508_v2  ;;  %v4421_v44 = vpop.xlane.xlu1 %4420  ;;  %v8941_v58 = vpop.eup %6864 }
 0xaf6   :  { %v4509_v11 = vsub.f32 %v8844_v5, %v4421_v44  ;;  %v4605_v22 = vsel %vm1493_vm15, %v8941_v58, 0.0 }
 0xaf7   :  { %6866 = vpow2.f32 %v4542_v12  ;;  %4606 = vadd.xlane.f32.xlu1 %v4605_v22 }
 0xaf8   :  { %v4544_v30 = vmul.f32 1.442695, %v4509_v11 }
 0xafa   :  { %6868 = vpow2.f32 %v4544_v30 }
 0xafb   :  { %6870 = vpow2.f32 %v4572_v27  ;;  %v8965_v27 = vpop.xlane.xlu0 %4489 }
 0xafd   :  { %v8947_v39 = vpop.eup %6866  ;;  %v8951_v61 = vpop.xlane.xlu1 %4492 }
 0xafe   :  { %v4608_v9 = vsel %vm1493_vm15, %v8947_v39, 0.0 }
 0xaff   :  { %4609 = vadd.xlane.f32.xlu2 %v4608_v9 }
 0xb00   :  { %v8955_v5 = vpop.eup %6868 }
 0xb01   :  { %v4611_v3 = vsel %vm1493_vm15, %v8955_v5, 0.0  ;;  %v8959_v54 = vpop.eup %6870 }
 0xb02   :  { %4612 = vadd.xlane.f32.xlu0 %v4611_v3  ;;  %v4653_v30 = vsel %vm1493_vm15, %v8959_v54, 0.0 }
 0xb05   :  { %v4424_v22 = vpop.xlane.xlu1 %4423  ;;  %v4427_v11 = vpop.xlane.xlu2 %4426 }
 0xb06   :  { %v4510_v2 = vsub.f32 %v8852_v47, %v4424_v22  ;;  %v4511_v12 = vsub.f32 %v8856_v8, %v4427_v11 }
 0xb08   :  { %v4546_v44 = vmul.f32 1.442695, %v4510_v2  ;;  %v4548_v6 = vmul.f32 1.442695, %v4511_v12 }
 0xb0a   :  { %6872 = vpow2.f32 %v4546_v44  ;;  %4654 = vadd.xlane.f32.xlu0 %v4653_v30 }
 0xb0b   :  { %6874 = vpow2.f32 %v4548_v6 }
 0xb0d   :  { %v4430_v9 = vpop.xlane.xlu1 %4429  ;;  %v4436_v3 = vpop.xlane.xlu2 %4435 }
 0xb0e   :  { %v4512_v50 = vsub.f32 %v8862_v59, %v4430_v9  ;;  %v4514_v0 = vsub.f32 %v8864_v34, %v4436_v3 }
 0xb10   :  { %v8969_v33 = vpop.eup %6872  ;;  %v4550_v47 = vmul.f32 1.442695, %v4512_v50  ;;  %v4554_v8 = vmul.f32 1.442695, %v4514_v0  ;;  %v4522_v0 = vsub.f32 %v8804_v37, %v8926_v35  ;;  %v8990_v37 = vpop.f32.mrf.mxu3 }
 0xb11   :  { %v8971_v22 = vpop.eup %6874  ;;  %v4614_v11 = vsel %vm1493_vm15, %v8969_v33, 0.0 }
 0xb12   :  { %6876 = vpow2.f32 %v4550_v47  ;;  %4615 = vadd.xlane.f32.xlu1 %v4614_v11  ;;  %v4617_v2 = vsel %vm1493_vm15, %v8971_v22, 0.0 }
 0xb13   :  { %6878 = vpow2.f32 %v4554_v8  ;;  %4618 = vadd.xlane.f32.xlu2 %v4617_v2 }
 0xb15   :  { %v4439_v12 = vpop.xlane.xlu0 %4438  ;;  %v4433_v59 = vpop.xlane.xlu2 %4432 }
 0xb16   :  { %v4515_v34 = vsub.f32 %v8872_v52, %v4439_v12  ;;  %v4513_v30 = vsub.f32 %v8870_v7, %v4433_v59  ;;  %v4570_v52 = vmul.f32 1.442695, %v4522_v0  ;;  %v4500_v7 = vsel %vm1493_vm15, %v8990_v37, -inf }
 0xb18   :  { %v8978_v44 = vpop.eup %6876  ;;  %v4556_v50 = vmul.f32 1.442695, %v4515_v34  ;;  %v4552_v47 = vmul.f32 1.442695, %v4513_v30 }
 0xb19   :  { %v8982_v6 = vpop.eup %6878  ;;  %v4620_v9 = vsel %vm1493_vm15, %v8978_v44, 0.0 }
 0xb1a   :  { %v4626_v3 = vsel %vm1493_vm15, %v8982_v6, 0.0  ;;  %4621 = vadd.xlane.f32.xlu0 %v4620_v9  ;;  %6880 = vpow2.f32 %v4556_v50  ;;  %v4524_v9 = vsub.f32 %v8818_v14, %v8929_v38  ;;  %v9015_v38 = vpop.f32.mrf.mxu3 }
 0xb1b   :  { %4627 = vadd.xlane.f32.xlu1 %v4626_v3  ;;  %6882 = vpow2.f32 %v4570_v52 }
 0xb1c   :  { %6884 = vpow2.f32 %v4552_v47 }
 0xb1d   :  { %v4442_v8 = vpop.xlane.xlu0 %4441 }
 0xb1e   :  { %v4516_v11 = vsub.f32 %v8878_v41, %v4442_v8 }
 0xb20   :  { %v4558_v35 = vmul.f32 1.442695, %v4516_v11  ;;  %v8992_v2 = vpop.eup %6880  ;;  %v4574_v11 = vmul.f32 1.442695, %v4524_v9 }
 0xb21   :  { %v4629_v12 = vsel %vm1493_vm15, %v8992_v2, 0.0  ;;  %v8998_v34 = vpop.eup %6882 }
 0xb22   :  { %6886 = vpow2.f32 %v4558_v35  ;;  %4630 = vadd.xlane.f32.xlu2 %v4629_v12  ;;  %v9001_v50 = vpop.eup %6884 }
 0xb23   :  { %4501 = vmax.xlane.f32.xlu1 %v4500_v7  ;;  %v4623_v8 = vsel %vm1493_vm15, %v9001_v50, 0.0 }
 0xb25   :  { %v4445_v59 = vpop.xlane.xlu1 %4444  ;;  %v4448_v0 = vpop.xlane.xlu0 %4447 }
 0xb26   :  { %v4517_v41 = vsub.f32 %v8884_v53, %v4445_v59  ;;  %v4518_v52 = vsub.f32 %v8880_v18, %v4448_v0  ;;  %v4650_v53 = vsel %vm1493_vm15, %v8998_v34, 0.0  ;;  %v4530_v18 = vsub.f32 %v8820_v29, %v8938_v24 }
 0xb27   :  { %v4525_v59 = vsub.f32 %v8828_v48, %v8935_v46  ;;  %v4531_v0 = vsub.f32 %v8836_v4, %v8949_v51 }
 0xb28   :  { %v9003_v30 = vpop.eup %6886  ;;  %v4560_v3 = vmul.f32 1.442695, %v4517_v41  ;;  %v4562_v35 = vmul.f32 1.442695, %v4518_v52  ;;  %v4586_v52 = vmul.f32 1.442695, %v4530_v18 }
 0xb29   :  { %v4632_v47 = vsel %vm1493_vm15, %v9003_v30, 0.0  ;;  %v4576_v29 = vmul.f32 1.442695, %v4525_v59  ;;  %v4588_v24 = vmul.f32 1.442695, %v4531_v0 }
 0xb2a   :  { %6888 = vpow2.f32 %v4560_v3  ;;  %4633 = vadd.xlane.f32.xlu0 %v4632_v47  ;;  %4651 = vadd.xlane.f32.xlu2 %v4650_v53  ;;  %v4503_v3 = vsel %vm1493_vm15, %v9015_v38, -inf }
 0xb2b   :  { %4624 = vadd.xlane.f32.xlu1 %v4623_v8  ;;  %6890 = vpow2.f32 %v4574_v11 }
 0xb2c   :  { %6892 = vpow2.f32 %v4562_v35 }
 0xb2d   :  { %v4451_v7 = vpop.xlane.xlu1 %4450 }
 0xb2e   :  { %v4519_v14 = vsub.f32 %v8886_v45, %v4451_v7  ;;  %v4454_v45 = vpop.xlane.xlu2 %4453 }
 0xb2f   :  { %v4520_v51 = vsub.f32 %v8892_v20, %v4454_v45 }
 0xb30   :  { %v9019_v12 = vpop.eup %6888  ;;  %v4564_v41 = vmul.f32 1.442695, %v4519_v14 }
 0xb31   :  { %v4635_v9 = vsel %vm1493_vm15, %v9019_v12, 0.0  ;;  %v9029_v47 = vpop.eup %6890  ;;  %v4566_v18 = vmul.f32 1.442695, %v4520_v51 }
 0xb32   :  { %6894 = vpow2.f32 %v4564_v41  ;;  %4504 = vmax.xlane.f32.xlu2 %v4503_v3  ;;  %v9031_v48 = vpop.eup %6892  ;;  %v4656_v35 = vsel %vm1493_vm15, %v9029_v47, 0.0  ;;  %v4532_v3 = vsub.f32 %v8838_v28, %v8965_v27 }
 0xb33   :  { %4636 = vadd.xlane.f32.xlu1 %v4635_v9  ;;  %6896 = vpow2.f32 %v4586_v52  ;;  %v4638_v7 = vsel %vm1493_vm15, %v9031_v48, 0.0  ;;  %v4533_v9 = vsub.f32 %v8848_v10, %v8951_v61 }
 0xb34   :  { %6898 = vpow2.f32 %v4576_v29 }
 0xb35   :  { %v4472_v46 = vpop.xlane.xlu1 %4471  ;;  %v4457_v4 = vpop.xlane.xlu0 %4456  ;;  %6900 = vpow2.f32 %v4588_v24  ;;  %v4592_v10 = vmul.f32 1.442695, %v4533_v9 }
 0xb36   :  { %v4526_v53 = vsub.f32 %v8894_v60, %v4472_v46  ;;  %v4521_v11 = vsub.f32 %v8900_v63, %v4457_v4  ;;  %v4475_v20 = vpop.xlane.xlu2 %4474  ;;  %6902 = vpow2.f32 %v4566_v18  ;;  %v4590_v4 = vmul.f32 1.442695, %v4532_v3 }
 0xb37   :  { %v4527_v45 = vsub.f32 %v8902_v23, %v4475_v20 }
 0xb38   :  { %v9034_v8 = vpop.eup %6894  ;;  %v4578_v41 = vmul.f32 1.442695, %v4526_v53  ;;  %v4568_v63 = vmul.f32 1.442695, %v4521_v11 }
 0xb39   :  { %v4641_v14 = vsel %vm1493_vm15, %v9034_v8, 0.0  ;;  %v9044_v59 = vpop.eup %6896  ;;  %v4580_v46 = vmul.f32 1.442695, %v4527_v45 }
 0xb3a   :  { %4639 = vadd.xlane.f32.xlu2 %v4638_v7  ;;  %4642 = vadd.xlane.f32.xlu0 %v4641_v14  ;;  %v9046_v60 = vpop.eup %6898  ;;  %6904 = vpow2.f32 %v4578_v41  ;;  %v4674_v24 = vsel %vm1493_vm15, %v9044_v59, 0.0 }
 0xb3b   :  { %4657 = vadd.xlane.f32.xlu1 %v4656_v35  ;;  %v9048_v0 = vpop.eup %6900  ;;  %6906 = vpow2.f32 %v4568_v63  ;;  %v4659_v29 = vsel %vm1493_vm15, %v9046_v60, 0.0 }
 0xb3c   :  { %v4677_v52 = vsel %vm1493_vm15, %v9048_v0, 0.0  ;;  %v9061_v23 = vpop.eup %6902  ;;  %6908 = vpow2.f32 %v4592_v10 }
 0xb3d   :  { %v4478_v61 = vpop.xlane.xlu0 %4477  ;;  %6910 = vpow2.f32 %v4580_v46  ;;  %v4644_v18 = vsel %vm1493_vm15, %v9061_v23, 0.0 }
 0xb3e   :  { %v4496_v28 = vpop.xlane.xlu2 %4495  ;;  %v4528_v11 = vsub.f32 %v8910_v17, %v4478_v61  ;;  %6912 = vpow2.f32 %v4590_v4 }
 0xb3f   :  { %v4534_v35 = vsub.f32 %v8912_v55, %v4496_v28 }
 0xb40   :  { %v9063_v27 = vpop.eup %6904  ;;  %v4582_v41 = vmul.f32 1.442695, %v4528_v11 }
 0xb41   :  { %v9065_v53 = vpop.eup %6906  ;;  %v4662_v14 = vsel %vm1493_vm15, %v9063_v27, 0.0  ;;  %v4594_v17 = vmul.f32 1.442695, %v4534_v35 }
 0xb42   :  { %4660 = vadd.xlane.f32.xlu2 %v4659_v29  ;;  %4675 = vadd.xlane.f32.xlu0 %v4674_v24  ;;  %v4647_v20 = vsel %vm1493_vm15, %v9065_v53, 0.0  ;;  %v9076_v63 = vpop.eup %6908  ;;  %6914 = vpow2.f32 %v4582_v41 }
 0xb43   :  { %4678 = vadd.xlane.f32.xlu1 %v4677_v52  ;;  %v9078_v45 = vpop.eup %6910  ;;  %6916 = vpow2.f32 %v4594_v17  ;;  %v4683_v52 = vsel %vm1493_vm15, %v9076_v63, 0.0  ;;  %v3915_v17 = vpack.c.bf16 %v8730_v26, %v8730_v26 }
 0xb44   :  { %v4665_v29 = vsel %vm1493_vm15, %v9078_v45, 0.0 }
 0xb45   :  { %v4481_v51 = vpop.xlane.xlu1 %4480  ;;  %v4499_v9 = vpop.xlane.xlu0 %4498 }
 0xb46   :  { %v4529_v7 = vsub.f32 %v8918_v25, %v4481_v51  ;;  %v9080_v25 = vpop.eup %6912  ;;  %v4535_v3 = vsub.f32 %v8920_v43, %v4499_v9 }
 0xb47   :  { %v4680_v24 = vsel %vm1493_vm15, %v9080_v25, 0.0 }
 0xb48   :  { %v4584_v55 = vmul.f32 1.442695, %v4529_v7  ;;  %v4596_v10 = vmul.f32 1.442695, %v4535_v3  ;;  %v9089_v61 = vpop.eup %6914 }
 0xb49   :  { %v9091_v46 = vpop.eup %6916  ;;  %v4668_v43 = vsel %vm1493_vm15, %v9089_v61, 0.0 }
 0xb4a   :  { %4645 = vadd.xlane.f32.xlu2 %v4644_v18  ;;  %4648 = vadd.xlane.f32.xlu0 %v4647_v20  ;;  %6918 = vpow2.f32 %v4584_v55  ;;  %v4686_v28 = vsel %vm1493_vm15, %v9091_v46, 0.0 }
 0xb4b   :  { %4663 = vadd.xlane.f32.xlu1 %v4662_v14  ;;  %6920 = vpow2.f32 %v4596_v10  ;;  %v5026_v10 = vunpack.c.l.b16 %v3915_v17 }
 0xb50   :  { %v9093_v4 = vpop.eup %6918 }
 0xb51   :  { %v4671_v51 = vsel %vm1493_vm15, %v9093_v4, 0.0  ;;  %v9101_v11 = vpop.eup %6920 }
 0xb52   :  { %4666 = vadd.xlane.f32.xlu2 %v4665_v29  ;;  %4681 = vadd.xlane.f32.xlu0 %v4680_v24  ;;  %v4689_v35 = vsel %vm1493_vm15, %v9101_v11, 0.0 }
 0xb53   :  { %4684 = vadd.xlane.f32.xlu1 %v4683_v52  ;;  %v3914_v52 = vpack.c.bf16 %v8718_v49, %v8718_v49 }
 0xb5a   :  { %4669 = vadd.xlane.f32.xlu2 %v4668_v43  ;;  %4672 = vadd.xlane.f32.xlu0 %v4671_v51  ;;  %v5025_v51 = vunpack.c.l.b16 %v3914_v52 }
 0xb5b   :  { %4687 = vadd.xlane.f32.xlu1 %v4686_v28 }
 0xb5d   :  { %v4604_v7 = vpop.xlane.xlu0 %4603 }
 0xb5e   :  { %6922 = vrcp.f32 %v4604_v7  ;;  %v5027_v7 = vpack.c.b16 %v5026_v10, %v5025_v51 }
 0xb62   :  { %4690 = vadd.xlane.f32.xlu2 %v4689_v35 }
 0xb64   :  { %v6923_v18 = vpop.eup %6922 }
 0xb65   :  { %v4730_v20 = vmul.f32 %v6923_v18, %v8931_v36 }
 0xb67   :  { %v4762_v9 = vpack.c.bf16 %v4730_v20, %v4730_v20  ;;  %v3916_v20 = vpack.c.bf16 %v8746_v31, %v8746_v31 }
 0xb69   :  { %v4796_v43 = vunpack.c.l.b16 %v4762_v9 }
 0xb6a   :  { %v4607_v14 = vpop.xlane.xlu1 %4606 }
 0xb6b   :  { %6924 = vrcp.f32 %v4607_v14 }
 0xb71   :  { %v6925_v41 = vpop.eup %6924 }
 0xb72   :  { %v4610_v55 = vpop.xlane.xlu2 %4609  ;;  %v4731_v3 = vmul.f32 %v6925_v41, %v8941_v58  ;;  %v3917_v58 = vpack.c.bf16 %v8766_v40, %v8766_v40 }
 0xb73   :  { %6926 = vrcp.f32 %v4610_v55 }
 0xb74   :  { %v4763_v29 = vpack.c.bf16 %v4731_v3, %v4731_v3  ;;  %v5054_v17 = vunpack.c.l.b16 %v3917_v58  ;;  %v5053_v3 = vunpack.c.l.b16 %v3916_v20 }
 0xb75   :  { %v4613_v24 = vpop.xlane.xlu0 %4612 }
 0xb76   :  { %6928 = vrcp.f32 %v4613_v24  ;;  %v4797_v28 = vunpack.c.l.b16 %v4763_v29 }
 0xb78   :  { %v4798_v35 = vpack.c.b16 %v4797_v28, %v4796_v43 }
 0xb79   :  { %v6927_v36 = vpop.eup %6926 }
 0xb7a   :  { %v4732_v26 = vmul.f32 %v6927_v36, %v8947_v39  ;;  %6497 = vmatmul.msk.bf16.vlgmr.msrb.gmra.mxu0 %vm1493_vm15, %v4798_v35  ;;  %v5055_v39 = vpack.c.b16 %v5054_v17, %v5053_v3  ;;  %v3918_v36 = vpack.c.bf16 %v8773_v19, %v8773_v19  ;;  %v3923_v3 = vpack.c.bf16 %v8754_v57, %v8754_v57 }
 0xb7b   :  { %5039 = vmatpush.bf16.msrb.mxu0 %v5027_v7 }
 0xb7c   :  { %v6929_v14 = vpop.eup %6928  ;;  %v4764_v49 = vpack.c.bf16 %v4732_v26, %v4732_v26 }
 0xb7d   :  { %v4733_v18 = vmul.f32 %v6929_v14, %v8955_v5  ;;  %v3919_v5 = vpack.c.bf16 %v8785_v32, %v8785_v32  ;;  %v4655_v31 = vpop.xlane.xlu0 %4654 }
 0xb7e   :  { %v4824_v55 = vunpack.c.l.b16 %v4764_v49  ;;  %v5081_v49 = vunpack.c.l.b16 %v3918_v36 }
 0xb7f   :  { %v4765_v41 = vpack.c.bf16 %v4733_v18, %v4733_v18  ;;  %v5082_v26 = vunpack.c.l.b16 %v3919_v5 }
 0xb81   :  { %v4825_v9 = vunpack.c.l.b16 %v4765_v41  ;;  %v5083_v20 = vpack.c.b16 %v5082_v26, %v5081_v49  ;;  %v3921_v26 = vpack.c.bf16 %v8799_v21, %v8799_v21 }
 0xb83   :  { %v4826_v52 = vpack.c.b16 %v4825_v9, %v4824_v55  ;;  %v5110_v21 = vunpack.c.l.b16 %v3921_v26 }
 0xb85   :  { %v4616_v29 = vpop.xlane.xlu1 %4615  ;;  %6498 = vmatmul.msk.bf16.vlgmr.msrb.gmra.mxu1 %vm1493_vm15, %v4826_v52 }
 0xb86   :  { %6930 = vrcp.f32 %v4616_v29  ;;  %v4619_v24 = vpop.xlane.xlu2 %4618  ;;  %5067 = vmatpush.bf16.msrb.mxu1 %v5055_v39 }
 0xb87   :  { %6932 = vrcp.f32 %v4619_v24 }
 0xb8c   :  { %v6931_v40 = vpop.eup %6930 }
 0xb8d   :  { %v6933_v10 = vpop.eup %6932  ;;  %v4734_v43 = vmul.f32 %v6931_v40, %v8969_v33  ;;  %v4622_v41 = vpop.xlane.xlu0 %4621 }
 0xb8e   :  { %v4735_v28 = vmul.f32 %v6933_v10, %v8971_v22  ;;  %v4628_v51 = vpop.xlane.xlu1 %4627 }
 0xb8f   :  { %v4766_v35 = vpack.c.bf16 %v4734_v43, %v4734_v43  ;;  %6934 = vrcp.f32 %v4628_v51  ;;  %v5138_v43 = vunpack.c.l.b16 %v3923_v3 }
 0xb90   :  { %v4767_v7 = vpack.c.bf16 %v4735_v28, %v4735_v28 }
 0xb91   :  { %v4852_v14 = vunpack.c.l.b16 %v4766_v35 }
 0xb92   :  { %v4853_v58 = vunpack.c.l.b16 %v4767_v7 }
 0xb94   :  { %v4854_v18 = vpack.c.b16 %v4853_v58, %v4852_v14 }
 0xb95   :  { %v4631_v33 = vpop.xlane.xlu2 %4630  ;;  %v6935_v17 = vpop.eup %6934 }
 0xb96   :  { %v4502_v32 = vpop.xlane.xlu1 %4501  ;;  %6499 = vmatmul.msk.bf16.vlgmr.msra.gmra.mxu2 %vm1493_vm15, %v4854_v18  ;;  %6936 = vrcp.f32 %v4631_v33  ;;  %v4738_v55 = vmul.f32 %v6935_v17, %v8982_v6 }
 0xb97   :  { %v4536_v22 = vsub.f32 %v8990_v37, %v4502_v32  ;;  %5095 = vmatpush.bf16.msra.mxu2 %v5083_v20  ;;  %6938 = vrcp.f32 %v4622_v41  ;;  %v3922_v37 = vpack.c.bf16 %v8744_v13, %v8744_v13  ;;  %v3920_v41 = vpack.c.bf16 %v8793_v56, %v8793_v56 }
 0xb98   :  { %v4770_v39 = vpack.c.bf16 %v4738_v55, %v4738_v55 }
 0xb99   :  { %v4598_v19 = vmul.f32 1.442695, %v4536_v22  ;;  %v5137_v51 = vunpack.c.l.b16 %v3922_v37  ;;  %v5109_v3 = vunpack.c.l.b16 %v3920_v41  ;;  %v3926_v41 = vpack.c.bf16 %v8789_v1, %v8789_v1 }
 0xb9a   :  { %v4908_v28 = vunpack.c.l.b16 %v4770_v39 }
 0xb9b   :  { %6940 = vpow2.f32 %v4598_v19  ;;  %v5139_v13 = vpack.c.b16 %v5138_v43, %v5137_v51 }
 0xb9c   :  { %v6937_v9 = vpop.eup %6936  ;;  %6942 = vrcp.f32 %v4655_v31 }
 0xb9d   :  { %v4634_v52 = vpop.xlane.xlu0 %4633  ;;  %v4739_v29 = vmul.f32 %v6937_v9, %v8992_v2  ;;  %v4652_v40 = vpop.xlane.xlu2 %4651 }
 0xb9e   :  { %v4625_v24 = vpop.xlane.xlu1 %4624  ;;  %v6939_v10 = vpop.eup %6938 }
 0xb9f   :  { %6944 = vrcp.f32 %v4625_v24  ;;  %v4771_v5 = vpack.c.bf16 %v4739_v29, %v4739_v29  ;;  %v4736_v57 = vmul.f32 %v6939_v10, %v8978_v44  ;;  %v5111_v29 = vpack.c.b16 %v5110_v21, %v5109_v3 }
 0xba0   :  { %6946 = vrcp.f32 %v4652_v40 }
 0xba1   :  { %v9133_v6 = vpop.eup %6940  ;;  %6948 = vrcp.f32 %v4634_v52  ;;  %v4909_v31 = vunpack.c.l.b16 %v4771_v5  ;;  %v4768_v58 = vpack.c.bf16 %v4736_v57, %v4736_v57 }
 0xba2   :  { %v4692_v2 = vsel %vm1493_vm15, %v9133_v6, 0.0  ;;  %v6943_v36 = vpop.eup %6942 }
 0xba3   :  { %4693 = vadd.xlane.f32.xlu0 %v4692_v2  ;;  %v4910_v35 = vpack.c.b16 %v4909_v31, %v4908_v28  ;;  %v4747_v22 = vmul.f32 %v6943_v36, %v8959_v54 }
 0xba5   :  { %v6945_v7 = vpop.eup %6944  ;;  %v4505_v20 = vpop.xlane.xlu2 %4504  ;;  %6501 = vmatmul.msk.bf16.vlgmr.msra.gmra.mxu0 %vm1493_vm15, %v4910_v35  ;;  %v4779_v24 = vpack.c.bf16 %v4747_v22, %v4747_v22 }
 0xba6   :  { %v6947_v14 = vpop.eup %6946  ;;  %v4737_v49 = vmul.f32 %v6945_v7, %v9001_v50  ;;  %v4637_v18 = vpop.xlane.xlu1 %4636  ;;  %v4537_v32 = vsub.f32 %v9015_v38, %v4505_v20  ;;  %5151 = vmatpush.bf16.msra.mxu0 %v5139_v13  ;;  %v4880_v50 = vunpack.c.l.b16 %v4768_v58  ;;  %v3925_v38 = vpack.c.bf16 %v8783_v16, %v8783_v16 }
 0xba7   :  { %v6949_v44 = vpop.eup %6948  ;;  %6950 = vrcp.f32 %v4637_v18  ;;  %v4746_v17 = vmul.f32 %v6947_v14, %v8998_v34  ;;  %v5021_v57 = vunpack.c.l.b16 %v4779_v24  ;;  %v3927_v58 = vpack.c.bf16 %v8797_v42, %v8797_v42 }
 0xba8   :  { %v4769_v33 = vpack.c.bf16 %v4737_v49, %v4737_v49  ;;  %v4600_v19 = vmul.f32 1.442695, %v4537_v32  ;;  %v4740_v9 = vmul.f32 %v6949_v44, %v9003_v30  ;;  %v3924_v30 = vpack.c.bf16 %v8768_v15, %v8768_v15 }
 0xba9   :  { %v4778_v39 = vpack.c.bf16 %v4746_v17, %v4746_v17  ;;  %v5166_v16 = vunpack.c.l.b16 %v3925_v38  ;;  %v5194_v17 = vunpack.c.l.b16 %v3927_v58 }
 0xbaa   :  { %v4881_v55 = vunpack.c.l.b16 %v4769_v33  ;;  %6952 = vpow2.f32 %v4600_v19  ;;  %v4772_v40 = vpack.c.bf16 %v4740_v9, %v4740_v9  ;;  %v5165_v51 = vunpack.c.l.b16 %v3924_v30 }
 0xbab   :  { %v5020_v5 = vunpack.c.l.b16 %v4778_v39 }
 0xbac   :  { %v4882_v52 = vpack.c.b16 %v4881_v55, %v4880_v50  ;;  %v4936_v31 = vunpack.c.l.b16 %v4772_v40  ;;  %v5167_v35 = vpack.c.b16 %v5166_v16, %v5165_v51  ;;  %v9530_v51 = vld [vmem:[#allocation11_spill] sm:$0xff] }
 0xbad   :  { %v6951_v56 = vpop.eup %6950  ;;  %v4640_v54 = vpop.xlane.xlu2 %4639  ;;  %v5022_v36 = vpack.c.b16 %v5021_v57, %v5020_v5 }
 0xbae   :  { %v4741_v34 = vmul.f32 %v6951_v56, %v9019_v12  ;;  %v4658_v10 = vpop.xlane.xlu1 %4657  ;;  %6500 = vmatmul.msk.bf16.vlgmr.msrb.gmra.mxu3 %vm1493_vm15, %v4882_v52  ;;  %v4643_v37 = vpop.xlane.xlu0 %4642  ;;  %6954 = vrcp.f32 %v4640_v54 }
 0xbaf   :  { %5123 = vmatpush.bf16.msrb.mxu3 %v5111_v29  ;;  %6956 = vrcp.f32 %v4643_v37 }
 0xbb0   :  { %v4773_v43 = vpack.c.bf16 %v4741_v34, %v4741_v34  ;;  %v9154_v28 = vpop.eup %6952  ;;  %6958 = vrcp.f32 %v4658_v10 }
 0xbb1   :  { %v4695_v12 = vsel %vm1493_vm15, %v9154_v28, 0.0 }
 0xbb2   :  { %v4937_v2 = vunpack.c.l.b16 %v4773_v43  ;;  %4696 = vadd.xlane.f32.xlu1 %v4695_v12 }
 0xbb4   :  { %v4938_v15 = vpack.c.b16 %v4937_v2, %v4936_v31  ;;  %v6955_v7 = vpop.eup %6954 }
 0xbb5   :  { %v4661_v26 = vpop.xlane.xlu2 %4660  ;;  %6505 = vmatmul.msk.bf16.vlgmr.msrb.gmra.mxu0 %vm1493_vm15, %v5022_v36  ;;  %v6957_v14 = vpop.eup %6956  ;;  %v4742_v49 = vmul.f32 %v6955_v7, %v9031_v48  ;;  %v5193_v48 = vunpack.c.l.b16 %v3926_v41  ;;  %v3928_v36 = vpack.c.bf16 %v9530_v51, %v9530_v51  ;;  %v6514_v51 = vld [vmem:[%s9491_s8 + $0x14] sm:$0xf] }
 0xbb6   :  { %v4679_v13 = vpop.xlane.xlu1 %4678  ;;  %6502 = vmatmul.msk.bf16.vlgmr.msra.gmra.mxu1 %vm1493_vm15, %v4938_v15  ;;  %v4676_v18 = vpop.xlane.xlu0 %4675  ;;  %v4743_v44 = vmul.f32 %v6957_v14, %v9034_v8 }
 0xbb7   :  { %6960 = vrcp.f32 %v4679_v13  ;;  %5179 = vmatpush.bf16.msra.mxu1 %v5167_v35  ;;  %v6959_v20 = vpop.eup %6958  ;;  %v4774_v32 = vpack.c.bf16 %v4742_v49, %v4742_v49  ;;  %v5195_v39 = vpack.c.b16 %v5194_v17, %v5193_v48  ;;  %v5221_v14 = vunpack.c.l.b16 %v3928_v36 }
 0xbb8   :  { %6962 = vrcp.f32 %v4661_v26  ;;  %v4775_v33 = vpack.c.bf16 %v4743_v44, %v4743_v44  ;;  %v4748_v21 = vmul.f32 %v6959_v20, %v9029_v47 }
 0xbb9   :  { %6964 = vrcp.f32 %v4676_v18  ;;  %v4964_v22 = vunpack.c.l.b16 %v4774_v32 }
 0xbba   :  { %v4965_v42 = vunpack.c.l.b16 %v4775_v33  ;;  %v4780_v56 = vpack.c.bf16 %v4748_v21, %v4748_v21 }
 0xbbc   :  { %v4966_v55 = vpack.c.b16 %v4965_v42, %v4964_v22 }
 0xbbd   :  { %v6961_v19 = vpop.eup %6960  ;;  %v4646_v8 = vpop.xlane.xlu2 %4645 }
 0xbbe   :  { %v6963_v50 = vpop.eup %6962  ;;  %v4755_v9 = vmul.f32 %v6961_v19, %v9048_v0  ;;  %v4664_v3 = vpop.xlane.xlu1 %4663  ;;  %6966 = vrcp.f32 %v4646_v8  ;;  %6503 = vmatmul.msk.bf16.vlgmr.msrb.gmra.mxu2 %vm1493_vm15, %v4966_v55  ;;  %v5048_v0 = vunpack.c.l.b16 %v4780_v56 }
 0xbbf   :  { %v6965_v52 = vpop.eup %6964  ;;  %v4749_v1 = vmul.f32 %v6963_v50, %v9046_v60  ;;  %v4649_v38 = vpop.xlane.xlu0 %4648  ;;  %5207 = vmatpush.bf16.msrb.mxu2 %v5195_v39 }
 0xbc0   :  { %v4787_v29 = vpack.c.bf16 %v4755_v9, %v4755_v9  ;;  %v4754_v24 = vmul.f32 %v6965_v52, %v9044_v59  ;;  %6968 = vrcp.f32 %v4649_v38  ;;  %v3929_v59 = vpack.c.bf16 %v8808_v62, %v8808_v62 }
 0xbc1   :  { %v4781_v47 = vpack.c.bf16 %v4749_v1, %v4749_v1  ;;  %6970 = vrcp.f32 %v4664_v3 }
 0xbc2   :  { %v5133_v40 = vunpack.c.l.b16 %v4787_v29  ;;  %v4786_v34 = vpack.c.bf16 %v4754_v24, %v4754_v24  ;;  %v5222_v7 = vunpack.c.l.b16 %v3929_v59 }
 0xbc3   :  { %v5049_v10 = vunpack.c.l.b16 %v4781_v47 }
 0xbc4   :  { %v5132_v54 = vunpack.c.l.b16 %v4786_v34  ;;  %v6967_v37 = vpop.eup %6966  ;;  %v5223_v41 = vpack.c.b16 %v5222_v7, %v5221_v14 }
 0xbc5   :  { %v5050_v30 = vpack.c.b16 %v5049_v10, %v5048_v0  ;;  %v4667_v43 = vpop.xlane.xlu2 %4666  ;;  %v4744_v57 = vmul.f32 %v6967_v37, %v9061_v23 }
 0xbc6   :  { %v5134_v5 = vpack.c.b16 %v5133_v40, %v5132_v54  ;;  %v4685_v60 = vpop.xlane.xlu1 %4684  ;;  %v6969_v16 = vpop.eup %6968 }
 0xbc7   :  { %6972 = vrcp.f32 %v4685_v60  ;;  %6506 = vmatmul.msk.bf16.vlgmr.msrb.gmra.mxu1 %vm1493_vm15, %v5050_v30  ;;  %v4682_v31 = vpop.xlane.xlu0 %4681  ;;  %v6971_v2 = vpop.eup %6970  ;;  %v4745_v12 = vmul.f32 %v6969_v16, %v9065_v53  ;;  %v4776_v15 = vpack.c.bf16 %v4744_v57, %v4744_v57 }
 0xbc8   :  { %6974 = vrcp.f32 %v4667_v43  ;;  %6509 = vmatmul.msk.bf16.vlgmr.msra.gmra.mxu0 %vm1493_vm15, %v5134_v5  ;;  %v4750_v62 = vmul.f32 %v6971_v2, %v9063_v27 }
 0xbc9   :  { %6976 = vrcp.f32 %v4682_v31  ;;  %v4777_v35 = vpack.c.bf16 %v4745_v12, %v4745_v12  ;;  %v4992_v23 = vunpack.c.l.b16 %v4776_v15  ;;  %v5376_v15 = vsel %vm86_vm0, %v6514_v51, 0 }
 0xbca   :  { %v4782_v32 = vpack.c.bf16 %v4750_v62, %v4750_v62  ;;  %5385 = vmatpush.bf16.msrb.mxu1 %v5376_v15 }
 0xbcb   :  { %v4993_v13 = vunpack.c.l.b16 %v4777_v35 }
 0xbcc   :  { %v5076_v19 = vunpack.c.l.b16 %v4782_v32 }
 0xbcd   :  { %v6973_v26 = vpop.eup %6972  ;;  %v4994_v49 = vpack.c.b16 %v4993_v13, %v4992_v23  ;;  %v4670_v20 = vpop.xlane.xlu2 %4669 }
 0xbce   :  { %v6975_v58 = vpop.eup %6974  ;;  %v4757_v53 = vmul.f32 %v6973_v26, %v9076_v63  ;;  %v4688_v18 = vpop.xlane.xlu1 %4687  ;;  %v6515_v26 = vld [vmem:[%s9491_s8 + $0x18] sm:$0xf] }
 0xbcf   :  { %v6977_v44 = vpop.eup %6976  ;;  %v4751_v33 = vmul.f32 %v6975_v58, %v9078_v45  ;;  %6978 = vrcp.f32 %v4688_v18  ;;  %v4673_v17 = vpop.xlane.xlu0 %4672  ;;  %6504 = vmatmul.msk.bf16.vlgmr.msra.gmra.mxu3 %vm1493_vm15, %v4994_v49  ;;  %v5440_v58 = vsel %vm86_vm0, %v6515_v26, 0 }
 0xbd0   :  { %v4789_v21 = vpack.c.bf16 %v4757_v53, %v4757_v53  ;;  %v4756_v27 = vmul.f32 %v6977_v44, %v9080_v25  ;;  %6980 = vrcp.f32 %v4670_v20  ;;  %5235 = vmatpush.bf16.msra.mxu3 %v5223_v41 }
 0xbd1   :  { %v4783_v22 = vpack.c.bf16 %v4751_v33, %v4751_v33  ;;  %6982 = vrcp.f32 %v4673_v17 }
 0xbd2   :  { %v5161_v42 = vunpack.c.l.b16 %v4789_v21  ;;  %v4788_v63 = vpack.c.bf16 %v4756_v27, %v4756_v27 }
 0xbd3   :  { %v5077_v48 = vunpack.c.l.b16 %v4783_v22 }
 0xbd4   :  { %v5160_v50 = vunpack.c.l.b16 %v4788_v63 }
 0xbd5   :  { %v6979_v55 = vpop.eup %6978  ;;  %v5078_v9 = vpack.c.b16 %v5077_v48, %v5076_v19  ;;  %v4691_v8 = vpop.xlane.xlu2 %4690 }
 0xbd6   :  { %v6981_v3 = vpop.eup %6980  ;;  %v5162_v45 = vpack.c.b16 %v5161_v42, %v5160_v50  ;;  %6984 = vrcp.f32 %v4691_v8  ;;  %v4758_v1 = vmul.f32 %v6979_v55, %v9091_v46 }
 0xbd7   :  { %v6983_v52 = vpop.eup %6982  ;;  %v4752_v39 = vmul.f32 %v6981_v3, %v9089_v61  ;;  %6507 = vmatmul.msk.bf16.vlgmr.msra.gmra.mxu2 %vm1493_vm15, %v5078_v9  ;;  %v6516_v9 = vld [vmem:[%s9491_s8 + $0x1c] sm:$0xf] }
 0xbd8   :  { %v4753_v25 = vmul.f32 %v6983_v52, %v9093_v4  ;;  %6510 = vmatmul.msk.bf16.vlgmr.msra.gmra.mxu1 %vm1493_vm15, %v5162_v45  ;;  %v4790_v40 = vpack.c.bf16 %v4758_v1, %v4758_v1  ;;  %v6513_v4 = vld [vmem:[%s9491_s8 + $0x10] sm:$0xf]  ;;  %5449 = vmatpush.bf16.msra.mxu2 %v5440_v58  ;;  %v5504_v45 = vsel %vm86_vm0, %v6516_v9, 0 }
 0xbd9   :  { %v4784_v56 = vpack.c.bf16 %v4752_v39, %v4752_v39  ;;  %v5312_v46 = vsel %vm86_vm0, %v6513_v4, 0 }
 0xbda   :  { %v4785_v38 = vpack.c.bf16 %v4753_v25, %v4753_v25  ;;  %v5188_v61 = vunpack.c.l.b16 %v4790_v40  ;;  %5321 = vmatpush.bf16.msrb.mxu0 %v5312_v46 }
 0xbdb   :  { %v5104_v29 = vunpack.c.l.b16 %v4784_v56 }
 0xbdc   :  { %v5105_v24 = vunpack.c.l.b16 %v4785_v38  ;;  %v6985_v47 = vpop.eup %6984 }
 0xbdd   :  { %v4759_v0 = vmul.f32 %v6985_v47, %v9101_v11 }
 0xbde   :  { %v5106_v34 = vpack.c.b16 %v5105_v24, %v5104_v29 }
 0xbdf   :  { %v4791_v10 = vpack.c.bf16 %v4759_v0, %v4759_v0 }
 0xbe0   :  { %6508 = vmatmul.msk.bf16.vlgmr.msrb.gmra.mxu3 %vm1493_vm15, %v5106_v34 }
 0xbe1   :  { %v5189_v54 = vunpack.c.l.b16 %v4791_v10  ;;  %5513 = vmatpush.bf16.msrb.mxu3 %v5504_v45 }
 0xbe3   :  { %v5190_v30 = vpack.c.b16 %v5189_v54, %v5188_v61 }
 0xbe7   :  { %6511 = vmatmul.msk.bf16.vlgmr.msrb.gmra.mxu2 %vm1493_vm15, %v5190_v30 }
 0xbf7   :  { %v4817_v37 = vpop.f32.mrf.mxu0 }
 0xbf8   :  { %v5242_v5 = vpack.c.bf16 %v4817_v37, %v4817_v37 }
 0xbfa   :  { %v5287_v16 = vunpack.c.l.b16 %v5242_v5 }
 0xbff   :  { %v4819_v60 = vpop.f32.mrf.mxu0 }
 0xc00   :  { %v5243_v43 = vpack.c.bf16 %v4819_v60, %v4819_v60 }
 0xc02   :  { %v4845_v11 = vpop.f32.mrf.mxu1  ;;  %v5288_v59 = vunpack.c.l.b16 %v5243_v43 }
 0xc03   :  { %v5244_v12 = vpack.c.bf16 %v4845_v11, %v4845_v11 }
 0xc04   :  { %v5295_v57 = vpack.c.b16 %v5288_v59, %v5287_v16 }
 0xc05   :  { %v5289_v35 = vunpack.c.l.b16 %v5244_v12 }
 0xc06   :  { %6517 = vmatmul.msk.bf16.vlgmr.msrb.gmra.mxu0 %vm73_vm1, %v5295_v57 }
 0xc0a   :  { %v4847_v31 = vpop.f32.mrf.mxu1 }
 0xc0b   :  { %v5245_v2 = vpack.c.bf16 %v4847_v31, %v4847_v31 }
 0xc0d   :  { %v5290_v36 = vunpack.c.l.b16 %v5245_v2 }
 0xc0f   :  { %v5296_v7 = vpack.c.b16 %v5290_v36, %v5289_v35 }
 0xc16   :  { %6518 = vmatmul.msk.bf16.gmra.mxu0 %vm73_vm1, %v5296_v7  ;;  %v4694_v23 = vpop.xlane.xlu0 %4693 }
 0xc17   :  { %6986 = vrcp.f32 %v4694_v23 }
 0xc19   :  { %v4873_v62 = vpop.f32.mrf.mxu2 }
 0xc1a   :  { %v5246_v13 = vpack.c.bf16 %v4873_v62, %v4873_v62 }
 0xc1c   :  { %v5291_v18 = vunpack.c.l.b16 %v5246_v13 }
 0xc1d   :  { %v6987_v32 = vpop.eup %6986 }
 0xc1e   :  { %v4760_v33 = vmul.f32 %v6987_v32, %v9133_v6 }
 0xc20   :  { %v4792_v42 = vpack.c.bf16 %v4760_v33, %v4760_v33 }
 0xc21   :  { %v4875_v14 = vpop.f32.mrf.mxu2 }
 0xc22   :  { %v5247_v49 = vpack.c.bf16 %v4875_v14, %v4875_v14  ;;  %v4929_v53 = vpop.f32.mrf.mxu0  ;;  %v5216_v8 = vunpack.c.l.b16 %v4792_v42 }
 0xc23   :  { %v5250_v17 = vpack.c.bf16 %v4929_v53, %v4929_v53 }
 0xc24   :  { %v5292_v20 = vunpack.c.l.b16 %v5247_v49 }
 0xc25   :  { %v4697_v41 = vpop.xlane.xlu1 %4696  ;;  %v5351_v63 = vunpack.c.l.b16 %v5250_v17 }
 0xc26   :  { %v5297_v44 = vpack.c.b16 %v5292_v20, %v5291_v18  ;;  %6988 = vrcp.f32 %v4697_v41 }
 0xc28   :  { %6519 = vmatmul.msk.bf16.gmra.mxu0 %vm73_vm1, %v5297_v44 }
 0xc2a   :  { %v4931_v21 = vpop.f32.mrf.mxu0 }
 0xc2b   :  { %v5251_v27 = vpack.c.bf16 %v4931_v21, %v4931_v21 }
 0xc2c   :  { %v6989_v22 = vpop.eup %6988 }
 0xc2d   :  { %v4761_v19 = vmul.f32 %v6989_v22, %v9154_v28  ;;  %v5352_v48 = vunpack.c.l.b16 %v5251_v27 }
 0xc2f   :  { %v4793_v50 = vpack.c.bf16 %v4761_v19, %v4761_v19  ;;  %v5359_v55 = vpack.c.b16 %v5352_v48, %v5351_v63 }
 0xc31   :  { %v4901_v3 = vpop.f32.mrf.mxu3  ;;  %v5217_v6 = vunpack.c.l.b16 %v4793_v50  ;;  %6521 = vmatmul.msk.bf16.vlgmr.msrb.gmra.mxu1 %vm73_vm1, %v5359_v55 }
 0xc32   :  { %v5041_v39 = vpop.f32.mrf.mxu0  ;;  %v5248_v28 = vpack.c.bf16 %v4901_v3, %v4901_v3 }
 0xc33   :  { %v4957_v52 = vpop.f32.mrf.mxu1  ;;  %v5218_v25 = vpack.c.b16 %v5217_v6, %v5216_v8  ;;  %v5258_v38 = vpack.c.bf16 %v5041_v39, %v5041_v39 }
 0xc34   :  { %v5252_v56 = vpack.c.bf16 %v4957_v52, %v4957_v52  ;;  %v5293_v40 = vunpack.c.l.b16 %v5248_v28 }
 0xc35   :  { %6512 = vmatmul.msk.bf16.vlgmr.msra.gmra.mxu3 %vm1493_vm15, %v5218_v25  ;;  %v5415_v54 = vunpack.c.l.b16 %v5258_v38 }
 0xc36   :  { %v5353_v61 = vunpack.c.l.b16 %v5252_v56 }
 0xc39   :  { %v4903_v1 = vpop.f32.mrf.mxu3 }
 0xc3a   :  { %v5249_v29 = vpack.c.bf16 %v4903_v1, %v4903_v1  ;;  %v5043_v47 = vpop.f32.mrf.mxu0 }
 0xc3b   :  { %v4959_v24 = vpop.f32.mrf.mxu1  ;;  %v5259_v10 = vpack.c.bf16 %v5043_v47, %v5043_v47 }
 0xc3c   :  { %v5294_v34 = vunpack.c.l.b16 %v5249_v29  ;;  %v5253_v0 = vpack.c.bf16 %v4959_v24, %v4959_v24 }
 0xc3d   :  { %v5416_v46 = vunpack.c.l.b16 %v5259_v10 }
 0xc3e   :  { %v5298_v30 = vpack.c.b16 %v5294_v34, %v5293_v40  ;;  %v5354_v4 = vunpack.c.l.b16 %v5253_v0 }
 0xc3f   :  { %v5423_v5 = vpack.c.b16 %v5416_v46, %v5415_v54 }
 0xc40   :  { %v5360_v37 = vpack.c.b16 %v5354_v4, %v5353_v61  ;;  %6520 = vmatmul.msk.bf16.gmra.mxu0 %vm73_vm1, %v5298_v30 }
 0xc41   :  { %6525 = vmatmul.msk.bf16.vlgmr.msra.gmra.mxu2 %vm73_vm1, %v5423_v5  ;;  %v4985_v60 = vpop.f32.mrf.mxu2 }
 0xc42   :  { %6522 = vmatmul.msk.bf16.gmra.mxu1 %vm73_vm1, %v5360_v37  ;;  %v5254_v16 = vpack.c.bf16 %v4985_v60, %v4985_v60 }
 0xc44   :  { %v5069_v43 = vpop.f32.mrf.mxu1  ;;  %v5355_v15 = vunpack.c.l.b16 %v5254_v16 }
 0xc45   :  { %v5153_v11 = vpop.f32.mrf.mxu0  ;;  %v5260_v59 = vpack.c.bf16 %v5069_v43, %v5069_v43 }
 0xc46   :  { %v5266_v31 = vpack.c.bf16 %v5153_v11, %v5153_v11 }
 0xc47   :  { %v5417_v62 = vunpack.c.l.b16 %v5260_v59 }
 0xc48   :  { %v5479_v13 = vunpack.c.l.b16 %v5266_v31 }
 0xc49   :  { %v4987_v57 = vpop.f32.mrf.mxu2 }
 0xc4a   :  { %v5255_v2 = vpack.c.bf16 %v4987_v57, %v4987_v57 }
 0xc4c   :  { %v5071_v12 = vpop.f32.mrf.mxu1  ;;  %v5356_v35 = vunpack.c.l.b16 %v5255_v2 }
 0xc4d   :  { %v5261_v51 = vpack.c.bf16 %v5071_v12, %v5071_v12  ;;  %v5155_v36 = vpop.f32.mrf.mxu0 }
 0xc4e   :  { %v5267_v7 = vpack.c.bf16 %v5155_v36, %v5155_v36  ;;  %v5361_v26 = vpack.c.b16 %v5356_v35, %v5355_v15  ;;  %v9233_v15 = vld [vmem:[%s9492_s9 + $0x1] ss:$0 sm:$0xff] }
 0xc4f   :  { %v5418_v23 = vunpack.c.l.b16 %v5261_v51 }
 0xc50   :  { %v5480_v14 = vunpack.c.l.b16 %v5267_v7 }
 0xc51   :  { %v5424_v58 = vpack.c.b16 %v5418_v23, %v5417_v62 }
 0xc52   :  { %v5487_v49 = vpack.c.b16 %v5480_v14, %v5479_v13  ;;  %6523 = vmatmul.msk.bf16.gmra.mxu1 %vm73_vm1, %v5361_v26  ;;  %v5013_v53 = vpop.f32.mrf.mxu3 }
 0xc53   :  { %6526 = vmatmul.msk.bf16.gmra.mxu2 %vm73_vm1, %v5424_v58  ;;  %v5256_v20 = vpack.c.bf16 %v5013_v53, %v5013_v53 }
 0xc54   :  { %6529 = vmatmul.msk.bf16.vlgmr.msrb.gmra.mxu3 %vm73_vm1, %v5487_v49  ;;  %v9531_v49 = vld [vmem:[#allocation3_spill] sm:$0xff] }
 0xc55   :  { %v5181_v18 = vpop.f32.mrf.mxu1  ;;  %v5357_v21 = vunpack.c.l.b16 %v5256_v20 }
 0xc56   :  { %v5268_v32 = vpack.c.bf16 %v5181_v18, %v5181_v18 }
 0xc58   :  { %v5481_v42 = vunpack.c.l.b16 %v5268_v32 }
 0xc5a   :  { %v5097_v44 = vpop.f32.mrf.mxu2  ;;  %v5015_v41 = vpop.f32.mrf.mxu3 }
 0xc5b   :  { %v5257_v33 = vpack.c.bf16 %v5015_v41, %v5015_v41  ;;  %v5262_v48 = vpack.c.bf16 %v5097_v44, %v5097_v44 }
 0xc5d   :  { %v5183_v17 = vpop.f32.mrf.mxu1  ;;  %v5358_v27 = vunpack.c.l.b16 %v5257_v33  ;;  %v5419_v45 = vunpack.c.l.b16 %v5262_v48 }
 0xc5e   :  { %v5269_v22 = vpack.c.bf16 %v5183_v17, %v5183_v17 }
 0xc5f   :  { %v5362_v63 = vpack.c.b16 %v5358_v27, %v5357_v21 }
 0xc60   :  { %v5482_v19 = vunpack.c.l.b16 %v5269_v22 }
 0xc62   :  { %v5488_v50 = vpack.c.b16 %v5482_v19, %v5481_v42  ;;  %v5099_v55 = vpop.f32.mrf.mxu2  ;;  %6524 = vmatmul.msk.bf16.gmra.mxu1 %vm73_vm1, %v5362_v63  ;;  %v9532_v19 = vld [vmem:[#allocation4_spill] sm:$0xff] }
 0xc63   :  { %v5263_v9 = vpack.c.bf16 %v5099_v55, %v5099_v55  ;;  %v5125_v3 = vpop.f32.mrf.mxu3 }
 0xc64   :  { %6530 = vmatmul.msk.bf16.gmra.mxu3 %vm73_vm1, %v5488_v50  ;;  %v5264_v28 = vpack.c.bf16 %v5125_v3, %v5125_v3 }
 0xc65   :  { %v5420_v8 = vunpack.c.l.b16 %v5263_v9 }
 0xc66   :  { %v5421_v24 = vunpack.c.l.b16 %v5264_v28 }
 0xc67   :  { %v5425_v6 = vpack.c.b16 %v5420_v8, %v5419_v45 }
 0xc69   :  { %6527 = vmatmul.msk.bf16.gmra.mxu2 %vm73_vm1, %v5425_v6 }
 0xc6a   :  { %v5209_v52 = vpop.f32.mrf.mxu2 }
 0xc6b   :  { %v5127_v39 = vpop.f32.mrf.mxu3  ;;  %v5270_v56 = vpack.c.bf16 %v5209_v52, %v5209_v52 }
 0xc6c   :  { %v5265_v25 = vpack.c.bf16 %v5127_v39, %v5127_v39 }
 0xc6d   :  { %v5483_v47 = vunpack.c.l.b16 %v5270_v56 }
 0xc6e   :  { %v5422_v38 = vunpack.c.l.b16 %v5265_v25 }
 0xc70   :  { %v5426_v34 = vpack.c.b16 %v5422_v38, %v5421_v24  ;;  %v9533_v38 = vld [vmem:[#allocation5_spill] sm:$0xff] }
 0xc72   :  { %v5211_v1 = vpop.f32.mrf.mxu2 }
 0xc73   :  { %v5271_v29 = vpack.c.bf16 %v5211_v1, %v5211_v1 }
 0xc75   :  { %v5484_v40 = vunpack.c.l.b16 %v5271_v29 }
 0xc77   :  { %v5489_v0 = vpack.c.b16 %v5484_v40, %v5483_v47 }
 0xc79   :  { %6528 = vmatmul.msk.bf16.gmra.mxu2 %vm73_vm1, %v5426_v34  ;;  %6531 = vmatmul.msk.bf16.gmra.mxu3 %vm73_vm1, %v5489_v0 }
 0xc83   :  { %v5323_v60 = vpop.f32.mrf.mxu0 }
 0xc84   :  { %v5535_v59 = vsel %vm131_vm2, %v5323_v60, 0.0 }
 0xc8b   :  { %v5325_v57 = vpop.f32.mrf.mxu0 }
 0xc8c   :  { %v5542_v13 = vsel %vm131_vm2, %v5325_v57, 0.0 }
 0xc93   :  { %v5328_v18 = vpop.f32.mrf.mxu0 }
 0xc94   :  { %v5549_v22 = vsel %vm131_vm2, %v5328_v18, 0.0 }
 0xc9b   :  { %v5330_v8 = vpop.f32.mrf.mxu0 }
 0xc9c   :  { %v5556_v28 = vsel %vm131_vm2, %v5330_v8, 0.0 }
 0xcae   :  { %v5387_v5 = vpop.f32.mrf.mxu1 }
 0xcaf   :  { %v5536_v11 = vsel %vm131_vm2, %v5387_v5, 0.0 }
 0xcb0   :  { %v5537_v2 = vadd.f32 %v5536_v11, %v5535_v59 }
 0xcb6   :  { %v5389_v16 = vpop.f32.mrf.mxu1 }
 0xcb7   :  { %v5543_v62 = vsel %vm131_vm2, %v5389_v16, 0.0 }
 0xcb8   :  { %v5237_v10 = vpop.f32.mrf.mxu3  ;;  %v5544_v14 = vadd.f32 %v5543_v62, %v5542_v13  ;;  %v9535_v13 = vld [vmem:[#allocation7_spill] sm:$0xff] }
 0xcb9   :  { %v5272_v61 = vpack.c.bf16 %v5237_v10, %v5237_v10 }
 0xcbb   :  { %v5485_v4 = vunpack.c.l.b16 %v5272_v61 }
 0xcbf   :  { %v5392_v58 = vpop.f32.mrf.mxu1 }
 0xcc0   :  { %v5239_v54 = vpop.f32.mrf.mxu3  ;;  %v5550_v21 = vsel %vm131_vm2, %v5392_v58, 0.0 }
 0xcc1   :  { %v5273_v30 = vpack.c.bf16 %v5239_v54, %v5239_v54  ;;  %v5551_v63 = vadd.f32 %v5550_v21, %v5549_v22  ;;  %v5333_v54 = vpop.f32.mrf.mxu0 }
 0xcc2   :  { %v5563_v60 = vsel %vm131_vm2, %v5333_v54, 0.0 }
 0xcc3   :  { %v5486_v46 = vunpack.c.l.b16 %v5273_v30 }
 0xcc4   :  { %v5451_v43 = vpop.f32.mrf.mxu2 }
 0xcc5   :  { %v5490_v37 = vpack.c.b16 %v5486_v46, %v5485_v4  ;;  %v5538_v31 = vsel %vm131_vm2, %v5451_v43, 0.0  ;;  %v9534_v4 = vld [vmem:[#allocation6_spill] sm:$0xff] }
 0xcc6   :  { %v5539_v51 = vadd.f32 %v5538_v31, %v5537_v2 }
 0xcc7   :  { %6532 = vmatmul.msk.bf16.gmra.mxu3 %vm73_vm1, %v5490_v37  ;;  %v5394_v50 = vpop.f32.mrf.mxu1 }
 0xcc8   :  { %v5557_v39 = vsel %vm131_vm2, %v5394_v50, 0.0 }
 0xcc9   :  { %v5558_v1 = vadd.f32 %v5557_v39, %v5556_v28  ;;  %v5335_v2 = vpop.f32.mrf.mxu0 }
 0xccc   :  { %v5453_v12 = vpop.f32.mrf.mxu2 }
 0xccd   :  { %v5545_v26 = vsel %vm131_vm2, %v5453_v12, 0.0 }
 0xcce   :  { %v5546_v20 = vadd.f32 %v5545_v26, %v5544_v14 }
 0xccf   :  { %v5397_v10 = vpop.f32.mrf.mxu1 }
 0xcd0   :  { %v5564_v37 = vsel %vm131_vm2, %v5397_v10, 0.0 }
 0xcd1   :  { %v5565_v11 = vadd.f32 %v5564_v37, %v5563_v60  ;;  %v5338_v21 = vpop.f32.mrf.mxu0 }
 0xcd6   :  { %v5456_v44 = vpop.f32.mrf.mxu2 }
 0xcd7   :  { %v5515_v36 = vpop.f32.mrf.mxu3  ;;  %v5552_v42 = vsel %vm131_vm2, %v5456_v44, 0.0  ;;  %v5399_v16 = vpop.f32.mrf.mxu1 }
 0xcd8   :  { %v5540_v35 = vsel %vm131_vm2, %v5515_v36, 0.0  ;;  %v5553_v55 = vadd.f32 %v5552_v42, %v5551_v63  ;;  %v5571_v36 = vsel %vm131_vm2, %v5399_v16, 0.0  ;;  %v5577_v42 = vsel %vm131_vm2, %v5338_v21, 0.0  ;;  %v9539_v16 = vld [vmem:[#allocation10_spill] sm:$0xff] }
 0xcd9   :  { %v5541_v7 = vadd.f32 %v5540_v35, %v5539_v51  ;;  %v5340_v8 = vpop.f32.mrf.mxu0 }
 0xcdb   :  { %v5596_v23 = vadd.f32 %v9233_v15, %v5541_v7  ;;  %v5570_v7 = vsel %vm131_vm2, %v5335_v2, 0.0 }
 0xcdd   :  { %v9241_v53 = vadd.f32 %v5596_v23, %v9531_v49  ;;  %v5572_v23 = vadd.f32 %v5571_v36, %v5570_v7 }
 0xcde   :  { %v5458_v6 = vpop.f32.mrf.mxu2 }
 0xcdf   :  { %v5517_v41 = vpop.f32.mrf.mxu3  ;;  %v5616_v32 = vsel %vm131_vm2, %v9241_v53, 0.0  ;;  %v5559_v56 = vsel %vm131_vm2, %v5458_v6, 0.0 }
 0xce0   :  { %v5547_v33 = vsel %vm131_vm2, %v5517_v41, 0.0  ;;  %5617 = vadd.xlane.f32.xlu2 %v5616_v32  ;;  %v5560_v24 = vadd.f32 %v5559_v56, %v5558_v1  ;;  %v9536_v41 = vld [vmem:[#allocation8_spill] sm:$0xff]  ;;  %v9537_v56 = vld [vmem:[#allocation9_spill] sm:$0xff] }
 0xce1   :  { %v5548_v17 = vadd.f32 %v5547_v33, %v5546_v20 }
 0xce3   :  { %v5597_v27 = vadd.f32 %v9233_v15, %v5548_v17  ;;  %v5402_v17 = vpop.f32.mrf.mxu1 }
 0xce4   :  { %v5578_v22 = vsel %vm131_vm2, %v5402_v17, 0.0 }
 0xce5   :  { %v9251_v48 = vadd.f32 %v5597_v27, %v9532_v19  ;;  %v5579_v19 = vadd.f32 %v5578_v22, %v5577_v42 }
 0xce7   :  { %v5520_v9 = vpop.f32.mrf.mxu3  ;;  %v5619_v3 = vsel %vm131_vm2, %v9251_v48, 0.0 }
 0xce8   :  { %v5554_v45 = vsel %vm131_vm2, %v5520_v9, 0.0  ;;  %5620 = vadd.xlane.f32.xlu0 %v5619_v3 }
 0xce9   :  { %v5555_v52 = vadd.f32 %v5554_v45, %v5553_v55 }
 0xceb   :  { %v5598_v25 = vadd.f32 %v9233_v15, %v5555_v52  ;;  %v5404_v9 = vpop.f32.mrf.mxu1 }
 0xcec   :  { %v5461_v30 = vpop.f32.mrf.mxu2  ;;  %v5585_v52 = vsel %vm131_vm2, %v5404_v9, 0.0 }
 0xced   :  { %v9261_v29 = vadd.f32 %v5598_v25, %v9533_v38  ;;  %v5566_v43 = vsel %vm131_vm2, %v5461_v30, 0.0  ;;  %v5584_v25 = vsel %vm131_vm2, %v5340_v8, 0.0 }
 0xcee   :  { %v5567_v59 = vadd.f32 %v5566_v43, %v5565_v11  ;;  %v5586_v38 = vadd.f32 %v5585_v52, %v5584_v25 }
 0xcef   :  { %v5522_v47 = vpop.f32.mrf.mxu3  ;;  %v5622_v40 = vsel %vm131_vm2, %v9261_v29, 0.0 }
 0xcf0   :  { %v5561_v34 = vsel %vm131_vm2, %v5522_v47, 0.0  ;;  %5623 = vadd.xlane.f32.xlu1 %v5622_v40 }
 0xcf1   :  { %v5562_v0 = vadd.f32 %v5561_v34, %v5560_v24 }
 0xcf3   :  { %v5599_v61 = vadd.f32 %v9233_v15, %v5562_v0  ;;  %v9538_v0 = vld [vmem:[#allocation2_spill] sm:$0xff] }
 0xcf4   :  { %v5463_v12 = vpop.f32.mrf.mxu2 }
 0xcf5   :  { %v9268_v46 = vadd.f32 %v5599_v61, %v9534_v4  ;;  %v5573_v62 = vsel %vm131_vm2, %v5463_v12, 0.0 }
 0xcf6   :  { %v5574_v14 = vadd.f32 %v5573_v62, %v5572_v23 }
 0xcf7   :  { %v5625_v5 = vsel %vm131_vm2, %v9268_v46, 0.0 }
 0xcf8   :  { %5626 = vadd.xlane.f32.xlu2 %v5625_v5 }
 0xcfc   :  { %v5525_v57 = vpop.f32.mrf.mxu3  ;;  %v5466_v27 = vpop.f32.mrf.mxu2 }
 0xcfd   :  { %v5568_v31 = vsel %vm131_vm2, %v5525_v57, 0.0  ;;  %v5580_v63 = vsel %vm131_vm2, %v5466_v27, 0.0  ;;  %v6657_v27 = vld [vmem:[%s9495_s12 + $0x18] sm:$0xff] }
 0xcfe   :  { %v5569_v51 = vadd.f32 %v5568_v31, %v5567_v59  ;;  %v5581_v50 = vadd.f32 %v5580_v63, %v5579_v19  ;;  %5858 = vmatpush.bf16.msra.mxu0 %v6657_v27  ;;  %v6656_v19 = vld [vmem:[%s9495_s12 + $0x10] sm:$0xff] }
 0xd00   :  { %v5600_v35 = vadd.f32 %v9233_v15, %v5569_v51 }
 0xd02   :  { %v9281_v26 = vadd.f32 %v5600_v35, %v9535_v13  ;;  %5859 = vmatpush.bf16.msra.mxu0 %v6656_v19 }
 0xd04   :  { %v5527_v58 = vpop.f32.mrf.mxu3  ;;  %v5628_v49 = vsel %vm131_vm2, %v9281_v26, 0.0  ;;  %v5468_v6 = vpop.f32.mrf.mxu2 }
 0xd05   :  { %v5575_v18 = vsel %vm131_vm2, %v5527_v58, 0.0  ;;  %5629 = vadd.xlane.f32.xlu0 %v5628_v49  ;;  %v5587_v28 = vsel %vm131_vm2, %v5468_v6, 0.0 }
 0xd06   :  { %v5576_v20 = vadd.f32 %v5575_v18, %v5574_v14  ;;  %v5588_v34 = vadd.f32 %v5587_v28, %v5586_v38 }
 0xd08   :  { %v5601_v44 = vadd.f32 %v9233_v15, %v5576_v20 }
 0xd0a   :  { %v9288_v32 = vadd.f32 %v5601_v44, %v9536_v41 }
 0xd0c   :  { %v5631_v33 = vsel %vm131_vm2, %v9288_v32, 0.0 }
 0xd0d   :  { %5632 = vadd.xlane.f32.xlu1 %v5631_v33 }
 0xd4a   :  { %v5530_v55 = vpop.f32.mrf.mxu3 }
 0xd4b   :  { %v5582_v3 = vsel %vm131_vm2, %v5530_v55, 0.0 }
 0xd4c   :  { %v5583_v45 = vadd.f32 %v5582_v3, %v5581_v50 }
 0xd4e   :  { %v5602_v39 = vadd.f32 %v9233_v15, %v5583_v45 }
 0xd50   :  { %v5610_v1 = vadd.f32 %v5602_v39, %v9537_v56 }
 0xd52   :  { %v5532_v47 = vpop.f32.mrf.mxu3  ;;  %v5634_v40 = vsel %vm131_vm2, %v5610_v1, 0.0 }
 0xd53   :  { %v5618_v24 = vpop.xlane.xlu2 %5617  ;;  %v5589_v61 = vsel %vm131_vm2, %v5532_v47, 0.0  ;;  %5635 = vadd.xlane.f32.xlu1 %v5634_v40 }
 0xd54   :  { %v5640_v10 = vmul.f32 %v5618_v24, %v9538_v0  ;;  %v5590_v30 = vadd.f32 %v5589_v61, %v5588_v34 }
 0xd56   :  { %v9305_v54 = vsub.f32 %v9241_v53, %v5640_v10  ;;  %v5603_v37 = vadd.f32 %v9233_v15, %v5590_v30 }
 0xd58   :  { %v5656_v4 = vmul.f32 %v9305_v54, %v9305_v54  ;;  %v5611_v59 = vadd.f32 %v5603_v37, %v9539_v16  ;;  %v9373_v16 = vld [vmem:[%s9493_s10 + $0x1] ss:$0 sm:$0xff] }
 0xd5a   :  { %v5664_v5 = vsel %vm131_vm2, %v5656_v4, 0.0  ;;  %v5637_v31 = vsel %vm131_vm2, %v5611_v59, 0.0 }
 0xd5b   :  { %v5621_v60 = vpop.xlane.xlu0 %5620  ;;  %5665 = vadd.xlane.f32.xlu2 %v5664_v5 }
 0xd5c   :  { %v5641_v43 = vmul.f32 %v5621_v60, %v9538_v0 }
 0xd5e   :  { %v9313_v11 = vsub.f32 %v9251_v48, %v5641_v43 }
 0xd60   :  { %v5657_v53 = vmul.f32 %v9313_v11, %v9313_v11 }
 0xd62   :  { %v5667_v57 = vsel %vm131_vm2, %v5657_v53, 0.0 }
 0xd63   :  { %v5624_v2 = vpop.xlane.xlu1 %5623  ;;  %5668 = vadd.xlane.f32.xlu0 %v5667_v57  ;;  %5638 = vadd.xlane.f32.xlu2 %v5637_v31 }
 0xd64   :  { %v5642_v15 = vmul.f32 %v5624_v2, %v9538_v0 }
 0xd66   :  { %v9322_v12 = vsub.f32 %v9261_v29, %v5642_v15 }
 0xd68   :  { %v5658_v48 = vmul.f32 %v9322_v12, %v9322_v12 }
 0xd6a   :  { %v5670_v51 = vsel %vm131_vm2, %v5658_v48, 0.0  ;;  %v9379_v48 = vld [vmem:[%s9494_s11 + $0x1] ss:$0 sm:$0xff] }
 0xd6b   :  { %v5627_v36 = vpop.xlane.xlu2 %5626  ;;  %5671 = vadd.xlane.f32.xlu0 %v5670_v51 }
 0xd6c   :  { %v5643_v35 = vmul.f32 %v5627_v36, %v9538_v0 }
 0xd6e   :  { %v9329_v7 = vsub.f32 %v9268_v46, %v5643_v35 }
 0xd70   :  { %v5659_v62 = vmul.f32 %v9329_v7, %v9329_v7 }
 0xd72   :  { %v5673_v23 = vsel %vm131_vm2, %v5659_v62, 0.0 }
 0xd73   :  { %5674 = vadd.xlane.f32.xlu1 %v5673_v23 }
 0xd78   :  { %v5630_v29 = vpop.xlane.xlu0 %5629 }
 0xd79   :  { %v5644_v13 = vmul.f32 %v5630_v29, %v9538_v0 }
 0xd7b   :  { %v9336_v14 = vsub.f32 %v9281_v26, %v5644_v13 }
 0xd7d   :  { %v5660_v58 = vmul.f32 %v9336_v14, %v9336_v14 }
 0xd7f   :  { %v5676_v49 = vsel %vm131_vm2, %v5660_v58, 0.0 }
 0xd80   :  { %v5633_v18 = vpop.xlane.xlu1 %5632  ;;  %5677 = vadd.xlane.f32.xlu2 %v5676_v49 }
 0xd81   :  { %v5645_v46 = vmul.f32 %v5633_v18, %v9538_v0 }
 0xd83   :  { %v9343_v20 = vsub.f32 %v9288_v32, %v5645_v46 }
 0xd85   :  { %v5661_v44 = vmul.f32 %v9343_v20, %v9343_v20 }
 0xd87   :  { %v5679_v41 = vsel %vm131_vm2, %v5661_v44, 0.0 }
 0xd88   :  { %5680 = vadd.xlane.f32.xlu0 %v5679_v41 }
 0xdc6   :  { %v5636_v26 = vpop.xlane.xlu1 %5635 }
 0xdc7   :  { %v5646_v33 = vmul.f32 %v5636_v26, %v9538_v0 }
 0xdc9   :  { %v9349_v17 = vsub.f32 %v5610_v1, %v5646_v33 }
 0xdcb   :  { %v5662_v21 = vmul.f32 %v9349_v17, %v9349_v17 }
 0xdcd   :  { %v5682_v22 = vsel %vm131_vm2, %v5662_v21, 0.0 }
 0xdce   :  { %v5666_v32 = vpop.xlane.xlu2 %5665  ;;  %5683 = vadd.xlane.f32.xlu1 %v5682_v22 }
 0xdcf   :  { %v5688_v42 = vmul.f32 %v5666_v32, %v9538_v0 }
 0xdd1   :  { %v5696_v63 = vadd.f32 1e-05, %v5688_v42 }
 0xdd3   :  { %6990 = vrsqrt.f32 %v5696_v63  ;;  %vm5710_vm1 = vweird.f32 %v5696_v63 }
 0xdd6   :  { %v5669_v50 = vpop.xlane.xlu0 %5668  ;;  %v5639_v55 = vpop.xlane.xlu2 %5638 }
 0xdd7   :  { %v5689_v9 = vmul.f32 %v5669_v50, %v9538_v0  ;;  %v5647_v3 = vmul.f32 %v5639_v55, %v9538_v0 }
 0xdd9   :  { %v6991_v45 = vpop.eup %6990  ;;  %v5697_v8 = vadd.f32 1e-05, %v5689_v9  ;;  %v9363_v6 = vsub.f32 %v5611_v59, %v5647_v3 }
 0xdda   :  { %v5705_v52 = vmul.f32 %v6991_v45, %v5696_v63  ;;  %vm5711_vm0 = vweird.f32 %v6991_v45 }
 0xddb   :  { %6992 = vrsqrt.f32 %v5697_v8  ;;  %v5663_v39 = vmul.f32 %v9363_v6, %v9363_v6  ;;  %vm5712_vm15 = vmor %vm5710_vm1, %vm5711_vm0  ;;  %vm5720_vm7 = vweird.f32 %v5697_v8 }
 0xddc   :  { %v5706_v25 = vmul.f32 %v6991_v45, %v5705_v52 }
 0xddd   :  { %v5685_v28 = vsel %vm131_vm2, %v5663_v39, 0.0 }
 0xdde   :  { %v5707_v56 = vmul.f32 0.5, %v5706_v25  ;;  %v5672_v1 = vpop.xlane.xlu0 %5671  ;;  %5686 = vadd.xlane.f32.xlu2 %v5685_v28 }
 0xddf   :  { %v5690_v38 = vmul.f32 %v5672_v1, %v9538_v0 }
 0xde0   :  { %v5708_v24 = vsub.f32 1.5, %v5707_v56 }
 0xde1   :  { %v6993_v47 = vpop.eup %6992  ;;  %v5698_v40 = vadd.f32 1e-05, %v5690_v38 }
 0xde2   :  { %v5709_v34 = vmul.f32 %v6991_v45, %v5708_v24  ;;  %v5715_v10 = vmul.f32 %v6993_v47, %v5697_v8  ;;  %vm5721_vm6 = vweird.f32 %v6993_v47 }
 0xde3   :  { %6994 = vrsqrt.f32 %v5698_v40  ;;  %vm5722_vm8 = vmor %vm5720_vm7, %vm5721_vm6  ;;  %vm5730_vm10 = vweird.f32 %v5698_v40 }
 0xde4   :  { %v5716_v61 = vmul.f32 %v6993_v47, %v5715_v10  ;;  %v5713_v30 = vsel %vm5712_vm15, %v6991_v45, %v5709_v34 }
 0xde5   :  { %v5784_v59 = vmul.f32 %v5713_v30, %v9305_v54 }
 0xde6   :  { %v5717_v4 = vmul.f32 0.5, %v5716_v61  ;;  %v5675_v37 = vpop.xlane.xlu1 %5674 }
 0xde7   :  { %v5691_v5 = vmul.f32 %v5675_v37, %v9538_v0  ;;  %v5795_v51 = vmul.f32 %v9373_v16, %v5784_v59 }
 0xde8   :  { %v5718_v60 = vsub.f32 1.5, %v5717_v4 }
 0xde9   :  { %v6995_v43 = vpop.eup %6994  ;;  %v5699_v53 = vadd.f32 1e-05, %v5691_v5  ;;  %v5806_v29 = vadd.f32 %v9379_v48, %v5795_v51 }
 0xdea   :  { %v5719_v57 = vmul.f32 %v6993_v47, %v5718_v60  ;;  %v5725_v31 = vmul.f32 %v6995_v43, %v5698_v40  ;;  %vm5731_vm9 = vweird.f32 %v6995_v43 }
 0xdeb   :  { %6996 = vrsqrt.f32 %v5699_v53  ;;  %vm5732_vm11 = vmor %vm5730_vm10, %vm5731_vm9  ;;  %vm5740_vm13 = vweird.f32 %v5699_v53 }
 0xdec   :  { %v5723_v2 = vsel %vm5722_vm8, %v6993_v47, %v5719_v57  ;;  %v5726_v15 = vmul.f32 %v6995_v43, %v5725_v31 }
 0xded   :  { %v5785_v36 = vmul.f32 %v5723_v2, %v9313_v11 }
 0xdee   :  { %v5727_v35 = vmul.f32 0.5, %v5726_v15  ;;  %v6661_v15 = vld [vmem:[%s9497_s14 + $0x38] sm:$0xff] }
 0xdef   :  { %v5796_v54 = vmul.f32 %v9373_v16, %v5785_v36  ;;  %5947 = vmatpush.bf16.msra.mxu1 %v6661_v15 }
 0xdf0   :  { %v5728_v62 = vsub.f32 1.5, %v5727_v35 }
 0xdf1   :  { %v6997_v23 = vpop.eup %6996  ;;  %v5807_v13 = vadd.f32 %v9379_v48, %v5796_v54  ;;  %v6660_v54 = vld [vmem:[%s9497_s14 + $0x30] sm:$0xff] }
 0xdf2   :  { %v5729_v58 = vmul.f32 %v6995_v43, %v5728_v62  ;;  %v5735_v49 = vmul.f32 %v6997_v23, %v5699_v53  ;;  %vm5741_vm12 = vweird.f32 %v6997_v23 }
 0xdf3   :  { %v5814_v18 = vpack.c.bf16 %v5807_v13, %v5806_v29  ;;  %v5678_v46 = vpop.xlane.xlu2 %5677  ;;  %vm5742_vm14 = vmor %vm5740_vm13, %vm5741_vm12  ;;  %5948 = vmatpush.bf16.msra.mxu1 %v6660_v54 }
 0xdf4   :  { %v5736_v44 = vmul.f32 %v6997_v23, %v5735_v49  ;;  %v5692_v41 = vmul.f32 %v5678_v46, %v9538_v0  ;;  %v5733_v11 = vsel %vm5732_vm11, %v6995_v43, %v5729_v58 }
 0xdf5   :  { %6549 = vmatmul.msk.bf16.vlgmr.msra.gmra.mxu0 %vm131_vm2, %v5814_v18  ;;  %v5786_v27 = vmul.f32 %v5733_v11, %v9322_v12 }
 0xdf6   :  { %v5737_v26 = vmul.f32 0.5, %v5736_v44  ;;  %v5700_v33 = vadd.f32 1e-05, %v5692_v41 }
 0xdf7   :  { %v5797_v50 = vmul.f32 %v9373_v16, %v5786_v27 }
 0xdf8   :  { %v5738_v21 = vsub.f32 1.5, %v5737_v26  ;;  %6998 = vrsqrt.f32 %v5700_v33  ;;  %vm5750_vm5 = vweird.f32 %v5700_v33 }
 0xdf9   :  { %v5808_v12 = vadd.f32 %v9379_v48, %v5797_v50 }
 0xdfa   :  { %v5739_v32 = vmul.f32 %v6997_v23, %v5738_v21 }
 0xdfb   :  { %v5681_v22 = vpop.xlane.xlu0 %5680 }
 0xdfc   :  { %v5743_v42 = vsel %vm5742_vm14, %v6997_v23, %v5739_v32  ;;  %v5693_v63 = vmul.f32 %v5681_v22, %v9538_v0  ;;  %v6659_v23 = vld [vmem:[%s9497_s14 + $0x28] sm:$0xff] }
 0xdfd   :  { %v5787_v19 = vmul.f32 %v5743_v42, %v9329_v7  ;;  %5949 = vmatpush.bf16.msra.mxu1 %v6659_v23 }
 0xdfe   :  { %v6999_v55 = vpop.eup %6998  ;;  %v5701_v9 = vadd.f32 1e-05, %v5693_v63 }
 0xdff   :  { %v5745_v3 = vmul.f32 %v6999_v55, %v5700_v33  ;;  %v5798_v45 = vmul.f32 %v9373_v16, %v5787_v19  ;;  %vm5751_vm4 = vweird.f32 %v6999_v55 }
 0xe00   :  { %7000 = vrsqrt.f32 %v5701_v9  ;;  %vm5752_vm0 = vmor %vm5750_vm5, %vm5751_vm4  ;;  %vm5760_vm15 = vweird.f32 %v5701_v9 }
 0xe01   :  { %v5746_v8 = vmul.f32 %v6999_v55, %v5745_v3  ;;  %v5809_v52 = vadd.f32 %v9379_v48, %v5798_v45 }
 0xe03   :  { %v5747_v39 = vmul.f32 0.5, %v5746_v8  ;;  %v5815_v25 = vpack.c.bf16 %v5809_v52, %v5808_v12 }
 0xe05   :  { %v5748_v28 = vsub.f32 1.5, %v5747_v39  ;;  %6550 = vmatmul.msk.bf16.gmra.mxu0 %vm131_vm2, %v5815_v25 }
 0xe06   :  { %v7001_v56 = vpop.eup %7000 }
 0xe07   :  { %v5749_v7 = vmul.f32 %v6999_v55, %v5748_v28  ;;  %v5755_v1 = vmul.f32 %v7001_v56, %v5701_v9  ;;  %vm5761_vm1 = vweird.f32 %v7001_v56 }
 0xe08   :  { %vm5762_vm6 = vmor %vm5760_vm15, %vm5761_vm1 }
 0xe09   :  { %v5756_v38 = vmul.f32 %v7001_v56, %v5755_v1  ;;  %v5753_v24 = vsel %vm5752_vm0, %v6999_v55, %v5749_v7 }
 0xe0a   :  { %v5788_v34 = vmul.f32 %v5753_v24, %v9336_v14 }
 0xe0b   :  { %v5757_v47 = vmul.f32 0.5, %v5756_v38 }
 0xe0c   :  { %v5799_v4 = vmul.f32 %v9373_v16, %v5788_v34 }
 0xe0d   :  { %v5758_v40 = vsub.f32 1.5, %v5757_v47  ;;  %v6663_v47 = vld [vmem:[%s9499_s16 + $0x8] sm:$0xff] }
 0xe0e   :  { %v5810_v5 = vadd.f32 %v9379_v48, %v5799_v4  ;;  %6014 = vmatpush.bf16.msrb.mxu2 %v6663_v47 }
 0xe0f   :  { %v5759_v10 = vmul.f32 %v7001_v56, %v5758_v40  ;;  %v6662_v40 = vld [vmem:[%s9499_s16] sm:$0xff] }
 0xe11   :  { %v5763_v61 = vsel %vm5762_vm6, %v7001_v56, %v5759_v10 }
 0xe12   :  { %v5789_v30 = vmul.f32 %v5763_v61, %v9343_v20  ;;  %6015 = vmatpush.bf16.msrb.mxu2 %v6662_v40 }
 0xe14   :  { %v5800_v37 = vmul.f32 %v9373_v16, %v5789_v30 }
 0xe16   :  { %v5811_v60 = vadd.f32 %v9379_v48, %v5800_v37 }
 0xe18   :  { %v5816_v43 = vpack.c.bf16 %v5811_v60, %v5810_v5 }
 0xe1a   :  { %6551 = vmatmul.msk.bf16.gmra.mxu0 %vm131_vm2, %v5816_v43  ;;  %v6682_v43 = vld [vmem:[%s9498_s15 + $0x1] ss:$0 sm:$0xff] }
 0xe41   :  { %v5684_v59 = vpop.xlane.xlu1 %5683 }
 0xe42   :  { %v5694_v14 = vmul.f32 %v5684_v59, %v9538_v0 }
 0xe44   :  { %v5702_v53 = vadd.f32 1e-05, %v5694_v14 }
 0xe46   :  { %7002 = vrsqrt.f32 %v5702_v53  ;;  %vm5770_vm8 = vweird.f32 %v5702_v53 }
 0xe4c   :  { %v7003_v57 = vpop.eup %7002 }
 0xe4d   :  { %v5765_v31 = vmul.f32 %v7003_v57, %v5702_v53  ;;  %vm5771_vm7 = vweird.f32 %v7003_v57 }
 0xe4e   :  { %vm5772_vm9 = vmor %vm5770_vm8, %vm5771_vm7 }
 0xe4f   :  { %v5766_v2 = vmul.f32 %v7003_v57, %v5765_v31 }
 0xe51   :  { %v5687_v20 = vpop.xlane.xlu2 %5686  ;;  %v5767_v35 = vmul.f32 0.5, %v5766_v2 }
 0xe52   :  { %v5695_v51 = vmul.f32 %v5687_v20, %v9538_v0  ;;  %v6658_v0 = vld [vmem:[%s9497_s14 + $0x20] sm:$0xff] }
 0xe53   :  { %v5768_v62 = vsub.f32 1.5, %v5767_v35  ;;  %5950 = vmatpush.bf16.msra.mxu1 %v6658_v0 }
 0xe54   :  { %v5703_v36 = vadd.f32 1e-05, %v5695_v51 }
 0xe55   :  { %v5769_v13 = vmul.f32 %v7003_v57, %v5768_v62 }
 0xe56   :  { %7004 = vrsqrt.f32 %v5703_v36  ;;  %vm5780_vm11 = vweird.f32 %v5703_v36 }
 0xe57   :  { %v5773_v18 = vsel %vm5772_vm9, %v7003_v57, %v5769_v13 }
 0xe58   :  { %v5790_v41 = vmul.f32 %v5773_v18, %v9349_v17  ;;  %v6681_v17 = vld [vmem:[%s9496_s13 + $0x1] ss:$0 sm:$0xff]  ;;  %v6683_v18 = vld [vmem:[%s9500_s17] ss:$0 sm:$0xff] }
 0xe5a   :  { %v5801_v21 = vmul.f32 %v9373_v16, %v5790_v41 }
 0xe5c   :  { %v7005_v29 = vpop.eup %7004  ;;  %v5812_v32 = vadd.f32 %v9379_v48, %v5801_v21 }
 0xe5d   :  { %v5775_v58 = vmul.f32 %v7005_v29, %v5703_v36  ;;  %vm5781_vm10 = vweird.f32 %v7005_v29 }
 0xe5e   :  { %vm5782_vm12 = vmor %vm5780_vm11, %vm5781_vm10 }
 0xe5f   :  { %v5776_v49 = vmul.f32 %v7005_v29, %v5775_v58 }
 0xe61   :  { %v5777_v46 = vmul.f32 0.5, %v5776_v49 }
 0xe63   :  { %v5778_v44 = vsub.f32 1.5, %v5777_v46 }
 0xe65   :  { %v5779_v11 = vmul.f32 %v7005_v29, %v5778_v44 }
 0xe67   :  { %v5783_v26 = vsel %vm5782_vm12, %v7005_v29, %v5779_v11 }
 0xe68   :  { %v5791_v33 = vmul.f32 %v5783_v26, %v9363_v6 }
 0xe6a   :  { %v5802_v27 = vmul.f32 %v9373_v16, %v5791_v33 }
 0xe6c   :  { %v5813_v22 = vadd.f32 %v9379_v48, %v5802_v27 }
 0xe6e   :  { %v5817_v42 = vpack.c.bf16 %v5813_v22, %v5812_v32 }
 0xe70   :  { %6552 = vmatmul.msk.bf16.gmra.mxu0 %vm131_vm2, %v5817_v42 }
 0xe72   :  { %v5861_v63 = vpop.f32.mrf.mxu0 }
 0xe73   :  { %v5862_v19 = vadd.f32 %v6681_v17, %v5861_v63 }
 0xe75   :  { %v5881_v6 = vmax.f32 %v5862_v19, 0.0 }
 0xe7a   :  { %v5863_v50 = vpop.f32.mrf.mxu0 }
 0xe7b   :  { %v5864_v55 = vadd.f32 %v6681_v17, %v5863_v50 }
 0xe7d   :  { %v5882_v9 = vmax.f32 %v5864_v55, 0.0 }
 0xe7f   :  { %v5889_v3 = vpack.c.bf16 %v5882_v9, %v5881_v6 }
 0xe81   :  { %6578 = vmatmul.msk.bf16.vlgmr.msra.gmra.mxu1 %vm3007_vm3, %v5889_v3 }
 0xe82   :  { %v5866_v16 = vpop.f32.mrf.mxu0 }
 0xe83   :  { %v5867_v45 = vadd.f32 %v6681_v17, %v5866_v16 }
 0xe85   :  { %v5883_v12 = vmax.f32 %v5867_v45, 0.0 }
 0xe8a   :  { %v5868_v8 = vpop.f32.mrf.mxu0 }
 0xe8b   :  { %v5869_v48 = vadd.f32 %v6681_v17, %v5868_v8 }
 0xe8d   :  { %v5884_v52 = vmax.f32 %v5869_v48, 0.0 }
 0xe8f   :  { %v5890_v39 = vpack.c.bf16 %v5884_v52, %v5883_v12 }
 0xe91   :  { %6579 = vmatmul.msk.bf16.gmra.mxu1 %vm3007_vm3, %v5890_v39 }
 0xe97   :  { %v5871_v25 = vpop.f32.mrf.mxu0 }
 0xe98   :  { %v5872_v28 = vadd.f32 %v6681_v17, %v5871_v25 }
 0xe9a   :  { %v5885_v1 = vmax.f32 %v5872_v28, 0.0 }
 0xe9f   :  { %v5873_v56 = vpop.f32.mrf.mxu0 }
 0xea0   :  { %v5874_v7 = vadd.f32 %v6681_v17, %v5873_v56 }
 0xea2   :  { %v5886_v38 = vmax.f32 %v5874_v7, 0.0 }
 0xea4   :  { %v5891_v24 = vpack.c.bf16 %v5886_v38, %v5885_v1 }
 0xea6   :  { %6580 = vmatmul.msk.bf16.gmra.mxu1 %vm3007_vm3, %v5891_v24 }
 0xeed   :  { %v5876_v34 = vpop.f32.mrf.mxu0 }
 0xeee   :  { %v5877_v10 = vadd.f32 %v6681_v17, %v5876_v34 }
 0xef0   :  { %v5887_v4 = vmax.f32 %v5877_v10, 0.0 }
 0xef5   :  { %v5878_v61 = vpop.f32.mrf.mxu0 }
 0xef6   :  { %v5879_v30 = vadd.f32 %v6681_v17, %v5878_v61 }
 0xef8   :  { %v5888_v37 = vmax.f32 %v5879_v30, 0.0 }
 0xefa   :  { %v5892_v5 = vpack.c.bf16 %v5888_v37, %v5887_v4 }
 0xefc   :  { %6581 = vmatmul.msk.bf16.gmra.mxu1 %vm3007_vm3, %v5892_v5 }
 0xefe   :  { %v5952_v60 = vpop.f32.mrf.mxu1 }
 0xeff   :  { %v5953_v14 = vadd.f32 %v6682_v43, %v5952_v60 }
 0xf06   :  { %v5954_v59 = vpop.f32.mrf.mxu1 }
 0xf07   :  { %v5955_v53 = vadd.f32 %v6682_v43, %v5954_v59 }
 0xf09   :  { %v5972_v57 = vpack.c.bf16 %v5955_v53, %v5953_v14 }
 0xf0b   :  { %6590 = vmatmul.msk.bf16.vlgmr.msrb.gmra.mxu2 %vm131_vm2, %v5972_v57 }
 0xf0e   :  { %v5957_v31 = vpop.f32.mrf.mxu1 }
 0xf0f   :  { %v5958_v20 = vadd.f32 %v6682_v43, %v5957_v31 }
 0xf16   :  { %v5959_v2 = vpop.f32.mrf.mxu1 }
 0xf17   :  { %v5960_v15 = vadd.f32 %v6682_v43, %v5959_v2 }
 0xf19   :  { %v5973_v51 = vpack.c.bf16 %v5960_v15, %v5958_v20 }
 0xf1b   :  { %6591 = vmatmul.msk.bf16.gmra.mxu2 %vm131_vm2, %v5973_v51 }
 0xf23   :  { %v5962_v36 = vpop.f32.mrf.mxu1 }
 0xf24   :  { %v5963_v54 = vadd.f32 %v6682_v43, %v5962_v36 }
 0xf2b   :  { %v5964_v35 = vpop.f32.mrf.mxu1 }
 0xf2c   :  { %v5965_v62 = vadd.f32 %v6682_v43, %v5964_v35 }
 0xf2e   :  { %v5974_v23 = vpack.c.bf16 %v5965_v62, %v5963_v54 }
 0xf30   :  { %6592 = vmatmul.msk.bf16.gmra.mxu2 %vm131_vm2, %v5974_v23 }
 0xf79   :  { %v5967_v29 = vpop.f32.mrf.mxu1 }
 0xf7a   :  { %v5968_v58 = vadd.f32 %v6682_v43, %v5967_v29 }
 0xf81   :  { %v5969_v13 = vpop.f32.mrf.mxu1 }
 0xf82   :  { %v5970_v0 = vadd.f32 %v6682_v43, %v5969_v13 }
 0xf84   :  { %v5975_v49 = vpack.c.bf16 %v5970_v0, %v5968_v58 }
 0xf86   :  { %6593 = vmatmul.msk.bf16.gmra.mxu2 %vm131_vm2, %v5975_v49 }
 0xf8e   :  { %v6017_v46 = vpop.f32.mrf.mxu2 }
 0xf8f   :  { %v6018_v44 = vadd.f32 %v6683_v18, %v6017_v46 }
 0xf91   :  { %6037 = vst [vmem:[%s9501_s18] sm:$0xff] %v6018_v44 }
 0xf96   :  { %v6019_v41 = vpop.f32.mrf.mxu2 }
 0xf97   :  { %v6020_v11 = vadd.f32 %v6683_v18, %v6019_v41 }
 0xf99   :  { %6038 = vst [vmem:[%s9501_s18 + $0x8] sm:$0xff] %v6020_v11 }
 0xf9e   :  { %v6022_v26 = vpop.f32.mrf.mxu2 }
 0xf9f   :  { %v6023_v33 = vadd.f32 %v6683_v18, %v6022_v26 }
 0xfa1   :  { %6039 = vst [vmem:[%s9501_s18 + $0x10] sm:$0xff] %v6023_v33 }
 0xfa6   :  { %v6024_v21 = vpop.f32.mrf.mxu2 }
 0xfa7   :  { %v6025_v27 = vadd.f32 %v6683_v18, %v6024_v21 }
 0xfa9   :  { %6040 = vst [vmem:[%s9501_s18 + $0x18] sm:$0xff] %v6025_v27 }
 0xfb3   :  { %v6027_v32 = vpop.f32.mrf.mxu2 }
 0xfb4   :  { %v6028_v22 = vadd.f32 %v6683_v18, %v6027_v32 }
 0xfb6   :  { %6594 = vst [vmem:[%s9501_s18 + $0x20] sm:$0xff] %v6028_v22  ;;  %v6046_v42 = vadd.f32 %v6028_v22, %v6018_v44 }
 0xfb8   :  { %6598 = vst [vmem:[%s9501_s18 + $0x40] sm:$0xff] %v6046_v42 }
 0xfbb   :  { %v6029_v63 = vpop.f32.mrf.mxu2 }
 0xfbc   :  { %v6030_v17 = vadd.f32 %v6683_v18, %v6029_v63 }
 0xfbe   :  { %6595 = vst [vmem:[%s9501_s18 + $0x28] sm:$0xff] %v6030_v17  ;;  %v6047_v19 = vadd.f32 %v6030_v17, %v6020_v11 }
 0xfc0   :  { %6599 = vst [vmem:[%s9501_s18 + $0x48] sm:$0xff] %v6047_v19 }
0x1009   :  { %v6032_v50 = vpop.f32.mrf.mxu2 }
0x100a   :  { %v6033_v55 = vadd.f32 %v6683_v18, %v6032_v50 }
0x100c   :  { %6596 = vst [vmem:[%s9501_s18 + $0x30] sm:$0xff] %v6033_v55  ;;  %v6048_v6 = vadd.f32 %v6033_v55, %v6023_v33 }
0x100e   :  { %6600 = vst [vmem:[%s9501_s18 + $0x50] sm:$0xff] %v6048_v6 }
0x1011   :  { %v6034_v9 = vpop.f32.mrf.mxu2 }
0x1012   :  { %v6035_v3 = vadd.f32 %v6683_v18, %v6034_v9 }
0x1014   :  { %6597 = vst [vmem:[%s9501_s18 + $0x38] sm:$0xff] %v6035_v3  ;;  %v6049_v16 = vadd.f32 %v6035_v3, %v6025_v27 }
0x1016   :  { %6601 = vst [vmem:[%s9501_s18 + $0x58] sm:$0xff] %v6049_v16 }

</bundles_post_ra>
